<compile_context>
chip_gen: v7x
topology: tpu7x:2x2x1
jax: 0.10.0
libtpu: 0.0.40
codegen_flags: <defaults>
</compile_context>

<pallas_src>
import functools

import jax
import jax.numpy as jnp
import numpy as np
from jax.experimental import pallas as pl
from jax.experimental.pallas import tpu as pltpu


# Conv-trunk hyper-parameters fixed by the PyTorch module.
_K1, _S1, _C1 = 8, 4, 32
_K2, _S2, _C2 = 4, 2, 64
_K3, _S3, _C3 = 3, 1, 64
_HID = 512
_NPAD = 128          # lane padding of the merged (value | advantage) head output
_G0 = _S1 * _S2      # row-grouping modulus of the input layout (= 8)


def _conv_sizes(input_shape):
    C0, H0, W0 = input_shape
    H1, W1 = (H0 - _K1) // _S1 + 1, (W0 - _K1) // _S1 + 1
    H2, W2 = (H1 - _K2) // _S2 + 1, (W1 - _K2) // _S2 + 1
    H3, W3 = (H2 - _K3) // _S3 + 1, (W2 - _K3) // _S3 + 1
    return (C0, H0, W0), (H1, W1), (H2, W2), (H3, W3)


# ----------------------------------------------------------------------------
# The fused Pallas kernel
# ----------------------------------------------------------------------------
def _fused_kernel(x_ref, u1_ref, b1_ref, b2_ref, b3_ref, b1c_ref, b2c_ref,
                  u2_hbm, u3_hbm, w1_hbm, w2_hbm,
                  q_ref,
                  a1_ref, a2_ref, u2_buf, u3_buf, w1_buf, w2_buf, sem,
                  *, B, Hm, H1, H2, n_actions):
    # Activation layouts (all 2-D, lane-dense, batch is the innermost row index):
    #   x_ref  : (8*Hm*B, W0*C0)  rows = (h mod 8, h // 8, b), lanes = (w, c)
    #   a1_ref : (H1*B,  W1*32)   rows = (oh1 mod 2, oh1 // 2, b), lanes = (w, c)
    #   a2_ref : (B, H2*W2*64)    one flattened (h, w, c) row per example
    wdt = u1_ref.dtype
    cls0 = (H1 + 1) // 2          # a1 rows (per batch) in residue class 0

    # ---- start streaming the later-layer weights while conv1/conv2 compute ---
    cp_u2 = pltpu.make_async_copy(u2_hbm, u2_buf, sem.at[0]); cp_u2.start()
    cp_u3 = pltpu.make_async_copy(u3_hbm, u3_buf, sem.at[1]); cp_u3.start()
    cp_w1 = pltpu.make_async_copy(w1_hbm, w1_buf, sem.at[2]); cp_w1.start()
    cp_w2 = pltpu.make_async_copy(w2_hbm, w2_buf, sem.at[3]); cp_w2.start()

    # ---- conv1: 8x8 / stride 4; 16 batched tap matmuls, register accumulation
    for r2 in range(2):                          # residue of oh1 mod 2
        n_oh = (H1 - r2 + 1) // 2
        if n_oh == 0:
            continue
        acc = None
        for kh in range(_K1):
            c = _S1 * r2 + kh                    # input h == c (mod 8)
            src = (c % _G0) * (Hm * B) + (c // _G0) * B
            lhs = x_ref[src:src + n_oh * B, :].astype(wdt)
            t = jnp.dot(lhs, u1_ref[kh], preferred_element_type=jnp.float32)
            acc = t if acc is None else acc + t
        dst = r2 * (cls0 * B)
        a1_ref[dst:dst + n_oh * B, :] = jnp.maximum(acc + b1_ref[...], 0.0)

    # ---- conv2: 4x4 / stride 2; 4 batched tap matmuls ------------------------
    cp_u2.wait()
    acc2 = None
    for kh in range(_K2):
        src = (kh % 2) * (cls0 * B) + (kh // 2) * B
        lhs = a1_ref[src:src + H2 * B, :].astype(wdt)
        t = jnp.dot(lhs, u2_buf[kh], preferred_element_type=jnp.float32)
        acc2 = t if acc2 is None else acc2 + t
    a2_val = jnp.maximum(acc2 + b2_ref[...], 0.0)        # (H2*B, W2*64), rows (oh2, b)
    # scatter rows into the per-example flattened (h2, w2, c2) lane layout
    FW2 = a2_val.shape[1]
    for oh in range(H2):
        for b in range(B):
            a2_ref[b:b + 1, oh * FW2:(oh + 1) * FW2] = (
                a2_val[oh * B + b:oh * B + b + 1, :])

    # ---- conv3 (height+width unfolded, single matmul) + dueling head ---------
    cp_u3.wait()
    feat = jnp.maximum(
        jnp.dot(a2_ref[...].astype(wdt), u3_buf[...],
                preferred_element_type=jnp.float32) + b3_ref[...], 0.0)   # (B, 256)

    cp_w1.wait()
    h = jnp.maximum(
        jnp.dot(feat.astype(wdt), w1_buf[...],
                preferred_element_type=jnp.float32) + b1c_ref[...], 0.0)  # (B, 1024)

    cp_w2.wait()
    out = (jnp.dot(h.astype(wdt), w2_buf[...],
                   preferred_element_type=jnp.float32) + b2c_ref[...])    # (B, 128)
    val = out[:, 0:1]
    adv = out[:, 1:1 + n_actions]
    q_ref[...] = val + adv - jnp.mean(adv, axis=1, keepdims=True)


# ----------------------------------------------------------------------------
# Forward wrapper (single pallas_call)
# ----------------------------------------------------------------------------
def dueling_ddqn_forward(kp, x, *, n_actions):
    B, C0, H0, W0 = x.shape
    (_, _, _), (H1, W1), (H2, W2), (_, _) = _conv_sizes((C0, H0, W0))

    H0p = ((H0 + _G0 - 1) // _G0) * _G0
    Hm = H0p // _G0
    cls0 = (H1 + 1) // 2

    # Residue-class layout validity (Pallas does no bounds checking on VMEM refs).
    for r2 in range(2):
        n_oh = (H1 - r2 + 1) // 2
        for kh in range(_K1):
            c = _S1 * r2 + kh
            assert c // _G0 + n_oh <= Hm, "conv1 residue-class slab would overrun"
    for kh in range(_K2):
        n_cls = (H1 - (kh % 2) + 1) // 2
        assert kh // 2 + H2 <= n_cls, "conv2 residue-class slab would overrun"

    # NCHW -> channels-last rows -> (h mod 8, h // 8, batch) row ordering.
    x_rows = jnp.transpose(x, (0, 2, 3, 1)).reshape(B, H0, W0 * C0)
    x_rows = jnp.pad(x_rows, ((0, 0), (0, H0p - H0), (0, 0)))
    x_g = (x_rows.reshape(B, Hm, _G0, W0 * C0)
           .transpose(2, 1, 0, 3)                    # (residue, quotient, b, lanes)
           .reshape(_G0 * Hm * B, W0 * C0))

    kernel = functools.partial(_fused_kernel, B=B, Hm=Hm, H1=H1, H2=H2,
                               n_actions=n_actions)
    wdt = kp["u1"].dtype
    vmem = pl.BlockSpec(memory_space=pltpu.MemorySpace.VMEM)
    hbm = pl.BlockSpec(memory_space=pl.ANY)

    return pl.pallas_call(
        kernel,
        out_shape=jax.ShapeDtypeStruct((B, n_actions), jnp.float32),
        in_specs=[vmem] * 7 + [hbm] * 4,
        out_specs=vmem,
        scratch_shapes=[
            pltpu.VMEM((B * H1, W1 * _C1), jnp.float32),   # conv1 activations
            pltpu.VMEM((B, H2 * W2 * _C2), jnp.float32),   # conv2 activations (flat)
            pltpu.VMEM(kp["u2"].shape, wdt),               # streamed conv2 weights
            pltpu.VMEM(kp["u3"].shape, wdt),               # streamed conv3 weights
            pltpu.VMEM(kp["w1cat"].shape, wdt),            # streamed fc1 (merged)
            pltpu.VMEM(kp["w2cat"].shape, wdt),            # streamed fc2 (merged)
            pltpu.SemaphoreType.DMA((4,)),
        ],
    )(x_g, kp["u1"], kp["b1row"], kp["b2row"], kp["b3row"],
      kp["b1cat"], kp["b2cat"],
      kp["u2"], kp["u3"], kp["w1cat"], kp["w2cat"])


# ----------------------------------------------------------------------------
# Parameters: torch-layout init + one-time host-side kernel-layout preparation
# ----------------------------------------------------------------------------
def _uniform(key, shape, fan_in):
    bound = 1.0 / float(np.sqrt(fan_in))
    return jax.random.uniform(key, shape, jnp.float32, -bound, bound)


def init_params(key, input_shape, n_actions):
    C, _, _ = input_shape
    (_, _, _), (_, _), (_, _), (H3, W3) = _conv_sizes(input_shape)
    conv_out = _C3 * H3 * W3
    ks = jax.random.split(key, 14)
    p = {
        "conv1_w": _uniform(ks[0], (_C1, C, _K1, _K1), C * _K1 * _K1),
        "conv1_b": _uniform(ks[1], (_C1,), C * _K1 * _K1),
        "conv2_w": _uniform(ks[2], (_C2, _C1, _K2, _K2), _C1 * _K2 * _K2),
        "conv2_b": _uniform(ks[3], (_C2,), _C1 * _K2 * _K2),
        "conv3_w": _uniform(ks[4], (_C3, _C2, _K3, _K3), _C2 * _K3 * _K3),
        "conv3_b": _uniform(ks[5], (_C3,), _C2 * _K3 * _K3),
        # Linear weights stored as (in, out) = torch_weight.T, torch flatten order
        "fc_v1_w": _uniform(ks[6], (conv_out, _HID), conv_out),
        "fc_v1_b": _uniform(ks[7], (1, _HID), conv_out),
        "fc_v2_w": _uniform(ks[8], (_HID, 1), _HID),
        "fc_v2_b": _uniform(ks[9], (1, 1), _HID),
        "fc_a1_w": _uniform(ks[10], (conv_out, _HID), conv_out),
        "fc_a1_b": _uniform(ks[11], (1, _HID), conv_out),
        "fc_a2_w": _uniform(ks[12], (_HID, n_actions), _HID),
        "fc_a2_b": _uniform(ks[13], (1, n_actions), _HID),
    }
    return p, conv_out


def _unfold_conv_weight(w_oihw, w_in, w_out, stride):
    """(Cout,Cin,KH,KW) torch weight -> (KH, W_in*Cin, W_out*Cout) unfolded slices."""
    Cout, Cin, KH, KW = w_oihw.shape
    w = np.transpose(np.asarray(w_oihw, np.float32), (2, 3, 1, 0))   # (KH,KW,Cin,Cout)
    U = np.zeros((KH, w_in * Cin, w_out * Cout), np.float32)
    for kh in range(KH):
        for ow in range(w_out):
            for kw in range(KW):
                col = stride * ow + kw
                U[kh, col * Cin:(col + 1) * Cin, ow * Cout:(ow + 1) * Cout] = w[kh, kw]
    return U


def _unfold_conv3_full(w_oihw, H2, W2, H3, W3):
    """Height+width unfolded conv3: (H2*W2*Cin, H3*W3*Cout), zero outside the taps."""
    Cout, Cin, KH, KW = w_oihw.shape
    w = np.transpose(np.asarray(w_oihw, np.float32), (2, 3, 1, 0))   # (KH,KW,Cin,Cout)
    U = np.zeros((H2 * W2 * Cin, H3 * W3 * Cout), np.float32)
    for oh in range(H3):
        for ow in range(W3):
            c0 = (oh * W3 + ow) * Cout
            for kh in range(KH):
                for kw in range(KW):
                    r0 = ((oh + kh) * W2 + (ow + kw)) * Cin
                    U[r0:r0 + Cin, c0:c0 + Cout] = w[kh, kw]
    return U


def prepare_kernel_params(params, input_shape, weight_dtype=jnp.bfloat16):
    """One-time (per weight update) host-side repack into kernel layout."""
    (_, _, W0), (_, W1), (H2, W2), (H3, W3) = _conv_sizes(input_shape)
    n_actions = np.asarray(params["fc_a2_w"]).shape[1]
    assert n_actions + 1 <= _NPAD

    u1 = _unfold_conv_weight(params["conv1_w"], W0, W1, _S1)
    u2 = _unfold_conv_weight(params["conv2_w"], W1, W2, _S2)
    u3 = _unfold_conv3_full(params["conv3_w"], H2, W2, H3, W3)
    b1row = np.tile(np.asarray(params["conv1_b"], np.float32), W1)[None, :]
    b2row = np.tile(np.asarray(params["conv2_b"], np.float32), W2)[None, :]
    b3row = np.tile(np.asarray(params["conv3_b"], np.float32), H3 * W3)[None, :]

    # fc1: permute rows from torch (c,h,w) flatten order to the kernel's (h,w,c)
    # lane order and merge the value / advantage branches into one matrix.
    perm = np.empty(_C3 * H3 * W3, np.int64)
    j = 0
    for h in range(H3):
        for w in range(W3):
            for c in range(_C3):
                perm[j] = c * H3 * W3 + h * W3 + w
                j += 1
    w1cat = np.concatenate([np.asarray(params["fc_v1_w"], np.float32)[perm],
                            np.asarray(params["fc_a1_w"], np.float32)[perm]], axis=1)
    b1cat = np.concatenate([np.asarray(params["fc_v1_b"], np.float32),
                            np.asarray(params["fc_a1_b"], np.float32)], axis=1)

    # fc2: merged, block-structured, lane-padded.  col 0 = value, 1.. = advantage.
    w2cat = np.zeros((2 * _HID, _NPAD), np.float32)
    w2cat[:_HID, 0] = np.asarray(params["fc_v2_w"], np.float32)[:, 0]
    w2cat[_HID:, 1:1 + n_actions] = np.asarray(params["fc_a2_w"], np.float32)
    b2cat = np.zeros((1, _NPAD), np.float32)
    b2cat[0, 0] = np.asarray(params["fc_v2_b"], np.float32)[0, 0]
    b2cat[0, 1:1 + n_actions] = np.asarray(params["fc_a2_b"], np.float32)[0]

    kp = {
        # MXU operands (narrowed); accumulation stays f32 in-kernel.
        "u1": jnp.asarray(u1, weight_dtype),
        "u2": jnp.asarray(u2, weight_dtype),
        "u3": jnp.asarray(u3, weight_dtype),
        "w1cat": jnp.asarray(w1cat, weight_dtype),
        "w2cat": jnp.asarray(w2cat, weight_dtype),
        # VPU operands stay f32 (v5e has no bf16 VPU).
        "b1row": jnp.asarray(b1row), "b2row": jnp.asarray(b2row),
        "b3row": jnp.asarray(b3row),
        "b1cat": jnp.asarray(b1cat), "b2cat": jnp.asarray(b2cat),
    }
    return kp


# ----------------------------------------------------------------------------
# Pure-JAX reference (torch-layout params) for correctness checks
# ----------------------------------------------------------------------------
def reference_forward(params, x):
    prec = jax.lax.Precision.HIGHEST

    def conv(x, w, b, s):
        y = jax.lax.conv_general_dilated(
            x, w, (s, s), "VALID", dimension_numbers=("NCHW", "OIHW", "NCHW"),
            precision=prec)
        return jnp.maximum(y + b[None, :, None, None], 0.0)

    y = conv(x, params["conv1_w"], params["conv1_b"], _S1)
    y = conv(y, params["conv2_w"], params["conv2_b"], _S2)
    y = conv(y, params["conv3_w"], params["conv3_b"], _S3)
    f = y.reshape(x.shape[0], -1)
    hv = jnp.maximum(jnp.dot(f, params["fc_v1_w"], precision=prec)
                     + params["fc_v1_b"], 0.0)
    val = jnp.dot(hv, params["fc_v2_w"], precision=prec) + params["fc_v2_b"]
    ha = jnp.maximum(jnp.dot(f, params["fc_a1_w"], precision=prec)
                     + params["fc_a1_b"], 0.0)
    adv = jnp.dot(ha, params["fc_a2_w"], precision=prec) + params["fc_a2_b"]
    return val + adv - adv.mean(axis=1, keepdims=True)


if __name__ == "__main__":
    # 44x44 -> 10x10 -> 4x4 -> 2x2 ; conv_out = 64*2*2 = 256
    B, C, H, W = 2, 4, 44, 44
    n_actions = 6

    key = jax.random.PRNGKey(0)
    pkey, xkey = jax.random.split(key)
    params, conv_out_size = init_params(pkey, (C, H, W), n_actions)
    x = jax.random.normal(xkey, (B, C, H, W), dtype=jnp.float32)

    fwd = jax.jit(dueling_ddqn_forward, static_argnames=("n_actions",))
    q_ref = jax.block_until_ready(reference_forward(params, x))

    # 1) Correctness gate: float32 weights, tight tolerance (any indexing /
    #    unfolding / permutation bug produces O(0.1-1) errors, numerical noise
    #    of the all-f32 path is orders of magnitude below 1e-3).
    kp_f32 = prepare_kernel_params(params, (C, H, W), weight_dtype=jnp.float32)
    q_f32 = jax.block_until_ready(fwd(kp_f32, x, n_actions=n_actions))
    assert q_f32.shape == (B, n_actions)
    np.testing.assert_allclose(np.asarray(q_f32), np.asarray(q_ref),
                               rtol=1e-3, atol=1e-3)

    # 2) Production path: bf16 MXU operands (half the weight DMA, 2x MXU rate on
    #    v6e/v7x); tolerance sized for bf16 rounding, not to mask layout bugs.
    kp_bf16 = prepare_kernel_params(params, (C, H, W), weight_dtype=jnp.bfloat16)
    q_bf16 = jax.block_until_ready(fwd(kp_bf16, x, n_actions=n_actions))
    assert q_bf16.shape == (B, n_actions)
    np.testing.assert_allclose(np.asarray(q_bf16), np.asarray(q_ref),
                               rtol=3e-2, atol=3e-2)

    print("KERNEL_OK")
</pallas_src>

<mosaic_0001>
module attributes {stable_mosaic.version = 11 : i64} {
  func.func @_fused_kernel(%arg0: memref<96x176xf32, #tpu.memory_space<vmem>>, %arg1: memref<8x176x320xf32, #tpu.memory_space<vmem>>, %arg2: memref<1x320xf32, #tpu.memory_space<vmem>>, %arg3: memref<1x256xf32, #tpu.memory_space<vmem>>, %arg4: memref<1x256xf32, #tpu.memory_space<vmem>>, %arg5: memref<1x1024xf32, #tpu.memory_space<vmem>>, %arg6: memref<1x128xf32, #tpu.memory_space<vmem>>, %arg7: memref<4x320x256xf32, #tpu.memory_space<any>>, %arg8: memref<1024x256xf32, #tpu.memory_space<any>>, %arg9: memref<256x1024xf32, #tpu.memory_space<any>>, %arg10: memref<1024x128xf32, #tpu.memory_space<any>>, %arg11: memref<2x6xf32, #tpu.memory_space<vmem>>, %arg12: memref<20x320xf32, #tpu.memory_space<vmem>>, %arg13: memref<2x1024xf32, #tpu.memory_space<vmem>>, %arg14: memref<4x320x256xf32, #tpu.memory_space<vmem>>, %arg15: memref<1024x256xf32, #tpu.memory_space<vmem>>, %arg16: memref<256x1024xf32, #tpu.memory_space<vmem>>, %arg17: memref<1024x128xf32, #tpu.memory_space<vmem>>, %arg18: memref<4x!tpu.dma_semaphore, #tpu.memory_space<semaphore_mem>>) attributes {dimension_semantics = [], scalar_prefetch = 0 : i64, scratch_operands = 7 : i64, tpu.core_type = #tpu.core_type<tc>} {
    %c0_i32 = arith.constant 0 : i32
    %0 = tpu.memref_slice %arg18[%c0_i32] : memref<4x!tpu.dma_semaphore, #tpu.memory_space<semaphore_mem>> -> memref<1x!tpu.dma_semaphore, #tpu.memory_space<semaphore_mem>>
    %1 = tpu.memref_squeeze %0 : memref<1x!tpu.dma_semaphore, #tpu.memory_space<semaphore_mem>> -> memref<!tpu.dma_semaphore, #tpu.memory_space<semaphore_mem>>
    tpu.enqueue_dma source(%arg7 : memref<4x320x256xf32, #tpu.memory_space<any>>) target(%arg14 : memref<4x320x256xf32, #tpu.memory_space<vmem>>) target_semaphore(%1 : memref<!tpu.dma_semaphore, #tpu.memory_space<semaphore_mem>>)
    %c1_i32 = arith.constant 1 : i32
    %2 = tpu.memref_slice %arg18[%c1_i32] : memref<4x!tpu.dma_semaphore, #tpu.memory_space<semaphore_mem>> -> memref<1x!tpu.dma_semaphore, #tpu.memory_space<semaphore_mem>>
    %3 = tpu.memref_squeeze %2 : memref<1x!tpu.dma_semaphore, #tpu.memory_space<semaphore_mem>> -> memref<!tpu.dma_semaphore, #tpu.memory_space<semaphore_mem>>
    tpu.enqueue_dma source(%arg8 : memref<1024x256xf32, #tpu.memory_space<any>>) target(%arg15 : memref<1024x256xf32, #tpu.memory_space<vmem>>) target_semaphore(%3 : memref<!tpu.dma_semaphore, #tpu.memory_space<semaphore_mem>>)
    %c2_i32 = arith.constant 2 : i32
    %4 = tpu.memref_slice %arg18[%c2_i32] : memref<4x!tpu.dma_semaphore, #tpu.memory_space<semaphore_mem>> -> memref<1x!tpu.dma_semaphore, #tpu.memory_space<semaphore_mem>>
    %5 = tpu.memref_squeeze %4 : memref<1x!tpu.dma_semaphore, #tpu.memory_space<semaphore_mem>> -> memref<!tpu.dma_semaphore, #tpu.memory_space<semaphore_mem>>
    tpu.enqueue_dma source(%arg9 : memref<256x1024xf32, #tpu.memory_space<any>>) target(%arg16 : memref<256x1024xf32, #tpu.memory_space<vmem>>) target_semaphore(%5 : memref<!tpu.dma_semaphore, #tpu.memory_space<semaphore_mem>>)
    %c3_i32 = arith.constant 3 : i32
    %6 = tpu.memref_slice %arg18[%c3_i32] : memref<4x!tpu.dma_semaphore, #tpu.memory_space<semaphore_mem>> -> memref<1x!tpu.dma_semaphore, #tpu.memory_space<semaphore_mem>>
    %7 = tpu.memref_squeeze %6 : memref<1x!tpu.dma_semaphore, #tpu.memory_space<semaphore_mem>> -> memref<!tpu.dma_semaphore, #tpu.memory_space<semaphore_mem>>
    tpu.enqueue_dma source(%arg10 : memref<1024x128xf32, #tpu.memory_space<any>>) target(%arg17 : memref<1024x128xf32, #tpu.memory_space<vmem>>) target_semaphore(%7 : memref<!tpu.dma_semaphore, #tpu.memory_space<semaphore_mem>>)
    %c0 = arith.constant 0 : index
    %c0_0 = arith.constant 0 : index
    %8 = vector.load %arg0[%c0, %c0_0] : memref<96x176xf32, #tpu.memory_space<vmem>>, vector<10x176xf32>
    %c0_1 = arith.constant 0 : index
    %c0_2 = arith.constant 0 : index
    %c0_3 = arith.constant 0 : index
    %9 = vector.load %arg1[%c0_1, %c0_2, %c0_3] : memref<8x176x320xf32, #tpu.memory_space<vmem>>, vector<1x176x320xf32>
    %10 = vector.shape_cast %9 : vector<1x176x320xf32> to vector<176x320xf32>
    %cst = arith.constant dense<0.000000e+00> : vector<10x320xf32>
    %11 = tpu.matmul %8, %10, %cst {dimension_numbers = #tpu.dot_dimension_numbers<[1], [0], [0], [1], [0, 0, 1, 1], [], []>} : vector<10x176xf32>, vector<176x320xf32>, vector<10x320xf32> -> vector<10x320xf32>
    %c12 = arith.constant 12 : index
    %c0_4 = arith.constant 0 : index
    %12 = vector.load %arg0[%c12, %c0_4] : memref<96x176xf32, #tpu.memory_space<vmem>>, vector<10x176xf32>
    %c1 = arith.constant 1 : index
    %c0_5 = arith.constant 0 : index
    %c0_6 = arith.constant 0 : index
    %13 = vector.load %arg1[%c1, %c0_5, %c0_6] : memref<8x176x320xf32, #tpu.memory_space<vmem>>, vector<1x176x320xf32>
    %14 = vector.shape_cast %13 : vector<1x176x320xf32> to vector<176x320xf32>
    %cst_7 = arith.constant dense<0.000000e+00> : vector<10x320xf32>
    %15 = tpu.matmul %12, %14, %cst_7 {dimension_numbers = #tpu.dot_dimension_numbers<[1], [0], [0], [1], [0, 0, 1, 1], [], []>} : vector<10x176xf32>, vector<176x320xf32>, vector<10x320xf32> -> vector<10x320xf32>
    %16 = arith.addf %11, %15 : vector<10x320xf32>
    %c24 = arith.constant 24 : index
    %c0_8 = arith.constant 0 : index
    %17 = vector.load %arg0[%c24, %c0_8] : memref<96x176xf32, #tpu.memory_space<vmem>>, vector<10x176xf32>
    %c2 = arith.constant 2 : index
    %c0_9 = arith.constant 0 : index
    %c0_10 = arith.constant 0 : index
    %18 = vector.load %arg1[%c2, %c0_9, %c0_10] : memref<8x176x320xf32, #tpu.memory_space<vmem>>, vector<1x176x320xf32>
    %19 = vector.shape_cast %18 : vector<1x176x320xf32> to vector<176x320xf32>
    %cst_11 = arith.constant dense<0.000000e+00> : vector<10x320xf32>
    %20 = tpu.matmul %17, %19, %cst_11 {dimension_numbers = #tpu.dot_dimension_numbers<[1], [0], [0], [1], [0, 0, 1, 1], [], []>} : vector<10x176xf32>, vector<176x320xf32>, vector<10x320xf32> -> vector<10x320xf32>
    %21 = arith.addf %16, %20 : vector<10x320xf32>
    %c36 = arith.constant 36 : index
    %c0_12 = arith.constant 0 : index
    %22 = vector.load %arg0[%c36, %c0_12] : memref<96x176xf32, #tpu.memory_space<vmem>>, vector<10x176xf32>
    %c3 = arith.constant 3 : index
    %c0_13 = arith.constant 0 : index
    %c0_14 = arith.constant 0 : index
    %23 = vector.load %arg1[%c3, %c0_13, %c0_14] : memref<8x176x320xf32, #tpu.memory_space<vmem>>, vector<1x176x320xf32>
    %24 = vector.shape_cast %23 : vector<1x176x320xf32> to vector<176x320xf32>
    %cst_15 = arith.constant dense<0.000000e+00> : vector<10x320xf32>
    %25 = tpu.matmul %22, %24, %cst_15 {dimension_numbers = #tpu.dot_dimension_numbers<[1], [0], [0], [1], [0, 0, 1, 1], [], []>} : vector<10x176xf32>, vector<176x320xf32>, vector<10x320xf32> -> vector<10x320xf32>
    %26 = arith.addf %21, %25 : vector<10x320xf32>
    %c48 = arith.constant 48 : index
    %c0_16 = arith.constant 0 : index
    %27 = vector.load %arg0[%c48, %c0_16] : memref<96x176xf32, #tpu.memory_space<vmem>>, vector<10x176xf32>
    %c4 = arith.constant 4 : index
    %c0_17 = arith.constant 0 : index
    %c0_18 = arith.constant 0 : index
    %28 = vector.load %arg1[%c4, %c0_17, %c0_18] : memref<8x176x320xf32, #tpu.memory_space<vmem>>, vector<1x176x320xf32>
    %29 = vector.shape_cast %28 : vector<1x176x320xf32> to vector<176x320xf32>
    %cst_19 = arith.constant dense<0.000000e+00> : vector<10x320xf32>
    %30 = tpu.matmul %27, %29, %cst_19 {dimension_numbers = #tpu.dot_dimension_numbers<[1], [0], [0], [1], [0, 0, 1, 1], [], []>} : vector<10x176xf32>, vector<176x320xf32>, vector<10x320xf32> -> vector<10x320xf32>
    %31 = arith.addf %26, %30 : vector<10x320xf32>
    %c60 = arith.constant 60 : index
    %c0_20 = arith.constant 0 : index
    %32 = vector.load %arg0[%c60, %c0_20] : memref<96x176xf32, #tpu.memory_space<vmem>>, vector<10x176xf32>
    %c5 = arith.constant 5 : index
    %c0_21 = arith.constant 0 : index
    %c0_22 = arith.constant 0 : index
    %33 = vector.load %arg1[%c5, %c0_21, %c0_22] : memref<8x176x320xf32, #tpu.memory_space<vmem>>, vector<1x176x320xf32>
    %34 = vector.shape_cast %33 : vector<1x176x320xf32> to vector<176x320xf32>
    %cst_23 = arith.constant dense<0.000000e+00> : vector<10x320xf32>
    %35 = tpu.matmul %32, %34, %cst_23 {dimension_numbers = #tpu.dot_dimension_numbers<[1], [0], [0], [1], [0, 0, 1, 1], [], []>} : vector<10x176xf32>, vector<176x320xf32>, vector<10x320xf32> -> vector<10x320xf32>
    %36 = arith.addf %31, %35 : vector<10x320xf32>
    %c72 = arith.constant 72 : index
    %c0_24 = arith.constant 0 : index
    %37 = vector.load %arg0[%c72, %c0_24] : memref<96x176xf32, #tpu.memory_space<vmem>>, vector<10x176xf32>
    %c6 = arith.constant 6 : index
    %c0_25 = arith.constant 0 : index
    %c0_26 = arith.constant 0 : index
    %38 = vector.load %arg1[%c6, %c0_25, %c0_26] : memref<8x176x320xf32, #tpu.memory_space<vmem>>, vector<1x176x320xf32>
    %39 = vector.shape_cast %38 : vector<1x176x320xf32> to vector<176x320xf32>
    %cst_27 = arith.constant dense<0.000000e+00> : vector<10x320xf32>
    %40 = tpu.matmul %37, %39, %cst_27 {dimension_numbers = #tpu.dot_dimension_numbers<[1], [0], [0], [1], [0, 0, 1, 1], [], []>} : vector<10x176xf32>, vector<176x320xf32>, vector<10x320xf32> -> vector<10x320xf32>
    %41 = arith.addf %36, %40 : vector<10x320xf32>
    %c84 = arith.constant 84 : index
    %c0_28 = arith.constant 0 : index
    %42 = vector.load %arg0[%c84, %c0_28] : memref<96x176xf32, #tpu.memory_space<vmem>>, vector<10x176xf32>
    %c7 = arith.constant 7 : index
    %c0_29 = arith.constant 0 : index
    %c0_30 = arith.constant 0 : index
    %43 = vector.load %arg1[%c7, %c0_29, %c0_30] : memref<8x176x320xf32, #tpu.memory_space<vmem>>, vector<1x176x320xf32>
    %44 = vector.shape_cast %43 : vector<1x176x320xf32> to vector<176x320xf32>
    %cst_31 = arith.constant dense<0.000000e+00> : vector<10x320xf32>
    %45 = tpu.matmul %42, %44, %cst_31 {dimension_numbers = #tpu.dot_dimension_numbers<[1], [0], [0], [1], [0, 0, 1, 1], [], []>} : vector<10x176xf32>, vector<176x320xf32>, vector<10x320xf32> -> vector<10x320xf32>
    %46 = arith.addf %41, %45 : vector<10x320xf32>
    %c0_32 = arith.constant 0 : index
    %c0_33 = arith.constant 0 : index
    %47 = vector.load %arg2[%c0_32, %c0_33] : memref<1x320xf32, #tpu.memory_space<vmem>>, vector<1x320xf32>
    %48 = vector.broadcast %47 : vector<1x320xf32> to vector<10x320xf32>
    %49 = arith.addf %46, %48 : vector<10x320xf32>
    %cst_34 = arith.constant 0.000000e+00 : f32
    %50 = vector.broadcast %cst_34 : f32 to vector<10x320xf32>
    %51 = arith.maximumf %49, %50 : vector<10x320xf32>
    %c0_35 = arith.constant 0 : index
    %c0_36 = arith.constant 0 : index
    %52 = vector.load %arg12[%c0_35, %c0_36] : memref<20x320xf32, #tpu.memory_space<vmem>>, vector<10x320xf32>
    tpu.vector_store %arg12[%c0_35, %c0_36], %51 {strides = array<i32>} : memref<20x320xf32, #tpu.memory_space<vmem>>, vector<10x320xf32>,
    %c48_37 = arith.constant 48 : index
    %c0_38 = arith.constant 0 : index
    %53 = vector.load %arg0[%c48_37, %c0_38] : memref<96x176xf32, #tpu.memory_space<vmem>>, vector<10x176xf32>
    %c0_39 = arith.constant 0 : index
    %c0_40 = arith.constant 0 : index
    %c0_41 = arith.constant 0 : index
    %54 = vector.load %arg1[%c0_39, %c0_40, %c0_41] : memref<8x176x320xf32, #tpu.memory_space<vmem>>, vector<1x176x320xf32>
    %55 = vector.shape_cast %54 : vector<1x176x320xf32> to vector<176x320xf32>
    %cst_42 = arith.constant dense<0.000000e+00> : vector<10x320xf32>
    %56 = tpu.matmul %53, %55, %cst_42 {dimension_numbers = #tpu.dot_dimension_numbers<[1], [0], [0], [1], [0, 0, 1, 1], [], []>} : vector<10x176xf32>, vector<176x320xf32>, vector<10x320xf32> -> vector<10x320xf32>
    %c60_43 = arith.constant 60 : index
    %c0_44 = arith.constant 0 : index
    %57 = vector.load %arg0[%c60_43, %c0_44] : memref<96x176xf32, #tpu.memory_space<vmem>>, vector<10x176xf32>
    %c1_45 = arith.constant 1 : index
    %c0_46 = arith.constant 0 : index
    %c0_47 = arith.constant 0 : index
    %58 = vector.load %arg1[%c1_45, %c0_46, %c0_47] : memref<8x176x320xf32, #tpu.memory_space<vmem>>, vector<1x176x320xf32>
    %59 = vector.shape_cast %58 : vector<1x176x320xf32> to vector<176x320xf32>
    %cst_48 = arith.constant dense<0.000000e+00> : vector<10x320xf32>
    %60 = tpu.matmul %57, %59, %cst_48 {dimension_numbers = #tpu.dot_dimension_numbers<[1], [0], [0], [1], [0, 0, 1, 1], [], []>} : vector<10x176xf32>, vector<176x320xf32>, vector<10x320xf32> -> vector<10x320xf32>
    %61 = arith.addf %56, %60 : vector<10x320xf32>
    %c72_49 = arith.constant 72 : index
    %c0_50 = arith.constant 0 : index
    %62 = vector.load %arg0[%c72_49, %c0_50] : memref<96x176xf32, #tpu.memory_space<vmem>>, vector<10x176xf32>
    %c2_51 = arith.constant 2 : index
    %c0_52 = arith.constant 0 : index
    %c0_53 = arith.constant 0 : index
    %63 = vector.load %arg1[%c2_51, %c0_52, %c0_53] : memref<8x176x320xf32, #tpu.memory_space<vmem>>, vector<1x176x320xf32>
    %64 = vector.shape_cast %63 : vector<1x176x320xf32> to vector<176x320xf32>
    %cst_54 = arith.constant dense<0.000000e+00> : vector<10x320xf32>
    %65 = tpu.matmul %62, %64, %cst_54 {dimension_numbers = #tpu.dot_dimension_numbers<[1], [0], [0], [1], [0, 0, 1, 1], [], []>} : vector<10x176xf32>, vector<176x320xf32>, vector<10x320xf32> -> vector<10x320xf32>
    %66 = arith.addf %61, %65 : vector<10x320xf32>
    %c84_55 = arith.constant 84 : index
    %c0_56 = arith.constant 0 : index
    %67 = vector.load %arg0[%c84_55, %c0_56] : memref<96x176xf32, #tpu.memory_space<vmem>>, vector<10x176xf32>
    %c3_57 = arith.constant 3 : index
    %c0_58 = arith.constant 0 : index
    %c0_59 = arith.constant 0 : index
    %68 = vector.load %arg1[%c3_57, %c0_58, %c0_59] : memref<8x176x320xf32, #tpu.memory_space<vmem>>, vector<1x176x320xf32>
    %69 = vector.shape_cast %68 : vector<1x176x320xf32> to vector<176x320xf32>
    %cst_60 = arith.constant dense<0.000000e+00> : vector<10x320xf32>
    %70 = tpu.matmul %67, %69, %cst_60 {dimension_numbers = #tpu.dot_dimension_numbers<[1], [0], [0], [1], [0, 0, 1, 1], [], []>} : vector<10x176xf32>, vector<176x320xf32>, vector<10x320xf32> -> vector<10x320xf32>
    %71 = arith.addf %66, %70 : vector<10x320xf32>
    %c2_61 = arith.constant 2 : index
    %c0_62 = arith.constant 0 : index
    %72 = vector.load %arg0[%c2_61, %c0_62] : memref<96x176xf32, #tpu.memory_space<vmem>>, vector<10x176xf32>
    %c4_63 = arith.constant 4 : index
    %c0_64 = arith.constant 0 : index
    %c0_65 = arith.constant 0 : index
    %73 = vector.load %arg1[%c4_63, %c0_64, %c0_65] : memref<8x176x320xf32, #tpu.memory_space<vmem>>, vector<1x176x320xf32>
    %74 = vector.shape_cast %73 : vector<1x176x320xf32> to vector<176x320xf32>
    %cst_66 = arith.constant dense<0.000000e+00> : vector<10x320xf32>
    %75 = tpu.matmul %72, %74, %cst_66 {dimension_numbers = #tpu.dot_dimension_numbers<[1], [0], [0], [1], [0, 0, 1, 1], [], []>} : vector<10x176xf32>, vector<176x320xf32>, vector<10x320xf32> -> vector<10x320xf32>
    %76 = arith.addf %71, %75 : vector<10x320xf32>
    %c14 = arith.constant 14 : index
    %c0_67 = arith.constant 0 : index
    %77 = vector.load %arg0[%c14, %c0_67] : memref<96x176xf32, #tpu.memory_space<vmem>>, vector<10x176xf32>
    %c5_68 = arith.constant 5 : index
    %c0_69 = arith.constant 0 : index
    %c0_70 = arith.constant 0 : index
    %78 = vector.load %arg1[%c5_68, %c0_69, %c0_70] : memref<8x176x320xf32, #tpu.memory_space<vmem>>, vector<1x176x320xf32>
    %79 = vector.shape_cast %78 : vector<1x176x320xf32> to vector<176x320xf32>
    %cst_71 = arith.constant dense<0.000000e+00> : vector<10x320xf32>
    %80 = tpu.matmul %77, %79, %cst_71 {dimension_numbers = #tpu.dot_dimension_numbers<[1], [0], [0], [1], [0, 0, 1, 1], [], []>} : vector<10x176xf32>, vector<176x320xf32>, vector<10x320xf32> -> vector<10x320xf32>
    %81 = arith.addf %76, %80 : vector<10x320xf32>
    %c26 = arith.constant 26 : index
    %c0_72 = arith.constant 0 : index
    %82 = vector.load %arg0[%c26, %c0_72] : memref<96x176xf32, #tpu.memory_space<vmem>>, vector<10x176xf32>
    %c6_73 = arith.constant 6 : index
    %c0_74 = arith.constant 0 : index
    %c0_75 = arith.constant 0 : index
    %83 = vector.load %arg1[%c6_73, %c0_74, %c0_75] : memref<8x176x320xf32, #tpu.memory_space<vmem>>, vector<1x176x320xf32>
    %84 = vector.shape_cast %83 : vector<1x176x320xf32> to vector<176x320xf32>
    %cst_76 = arith.constant dense<0.000000e+00> : vector<10x320xf32>
    %85 = tpu.matmul %82, %84, %cst_76 {dimension_numbers = #tpu.dot_dimension_numbers<[1], [0], [0], [1], [0, 0, 1, 1], [], []>} : vector<10x176xf32>, vector<176x320xf32>, vector<10x320xf32> -> vector<10x320xf32>
    %86 = arith.addf %81, %85 : vector<10x320xf32>
    %c38 = arith.constant 38 : index
    %c0_77 = arith.constant 0 : index
    %87 = vector.load %arg0[%c38, %c0_77] : memref<96x176xf32, #tpu.memory_space<vmem>>, vector<10x176xf32>
    %c7_78 = arith.constant 7 : index
    %c0_79 = arith.constant 0 : index
    %c0_80 = arith.constant 0 : index
    %88 = vector.load %arg1[%c7_78, %c0_79, %c0_80] : memref<8x176x320xf32, #tpu.memory_space<vmem>>, vector<1x176x320xf32>
    %89 = vector.shape_cast %88 : vector<1x176x320xf32> to vector<176x320xf32>
    %cst_81 = arith.constant dense<0.000000e+00> : vector<10x320xf32>
    %90 = tpu.matmul %87, %89, %cst_81 {dimension_numbers = #tpu.dot_dimension_numbers<[1], [0], [0], [1], [0, 0, 1, 1], [], []>} : vector<10x176xf32>, vector<176x320xf32>, vector<10x320xf32> -> vector<10x320xf32>
    %91 = arith.addf %86, %90 : vector<10x320xf32>
    %c0_82 = arith.constant 0 : index
    %c0_83 = arith.constant 0 : index
    %92 = vector.load %arg2[%c0_82, %c0_83] : memref<1x320xf32, #tpu.memory_space<vmem>>, vector<1x320xf32>
    %93 = vector.broadcast %92 : vector<1x320xf32> to vector<10x320xf32>
    %94 = arith.addf %91, %93 : vector<10x320xf32>
    %cst_84 = arith.constant 0.000000e+00 : f32
    %95 = vector.broadcast %cst_84 : f32 to vector<10x320xf32>
    %96 = arith.maximumf %94, %95 : vector<10x320xf32>
    %c10 = arith.constant 10 : index
    %c0_85 = arith.constant 0 : index
    %97 = vector.load %arg12[%c10, %c0_85] : memref<20x320xf32, #tpu.memory_space<vmem>>, vector<10x320xf32>
    tpu.vector_store %arg12[%c10, %c0_85], %96 {strides = array<i32>} : memref<20x320xf32, #tpu.memory_space<vmem>>, vector<10x320xf32>,
    %c0_i32_86 = arith.constant 0 : i32
    %98 = tpu.memref_slice %arg18[%c0_i32_86] : memref<4x!tpu.dma_semaphore, #tpu.memory_space<semaphore_mem>> -> memref<1x!tpu.dma_semaphore, #tpu.memory_space<semaphore_mem>>
    %99 = tpu.memref_squeeze %98 : memref<1x!tpu.dma_semaphore, #tpu.memory_space<semaphore_mem>> -> memref<!tpu.dma_semaphore, #tpu.memory_space<semaphore_mem>>
    tpu.wait_dma2 semaphore(%99 : memref<!tpu.dma_semaphore, #tpu.memory_space<semaphore_mem>>) src(%arg7 : memref<4x320x256xf32, #tpu.memory_space<any>>) dst(%arg14 : memref<4x320x256xf32, #tpu.memory_space<vmem>>)
    %c0_87 = arith.constant 0 : index
    %c0_88 = arith.constant 0 : index
    %100 = vector.load %arg12[%c0_87, %c0_88] : memref<20x320xf32, #tpu.memory_space<vmem>>, vector<8x320xf32>
    %c0_89 = arith.constant 0 : index
    %c0_90 = arith.constant 0 : index
    %c0_91 = arith.constant 0 : index
    %101 = vector.load %arg14[%c0_89, %c0_90, %c0_91] : memref<4x320x256xf32, #tpu.memory_space<vmem>>, vector<1x320x256xf32>
    %102 = vector.shape_cast %101 : vector<1x320x256xf32> to vector<320x256xf32>
    %cst_92 = arith.constant dense<0.000000e+00> : vector<8x256xf32>
    %103 = tpu.matmul %100, %102, %cst_92 {dimension_numbers = #tpu.dot_dimension_numbers<[1], [0], [0], [1], [0, 0, 1, 1], [], []>} : vector<8x320xf32>, vector<320x256xf32>, vector<8x256xf32> -> vector<8x256xf32>
    %c10_93 = arith.constant 10 : index
    %c0_94 = arith.constant 0 : index
    %104 = vector.load %arg12[%c10_93, %c0_94] : memref<20x320xf32, #tpu.memory_space<vmem>>, vector<8x320xf32>
    %c1_95 = arith.constant 1 : index
    %c0_96 = arith.constant 0 : index
    %c0_97 = arith.constant 0 : index
    %105 = vector.load %arg14[%c1_95, %c0_96, %c0_97] : memref<4x320x256xf32, #tpu.memory_space<vmem>>, vector<1x320x256xf32>
    %106 = vector.shape_cast %105 : vector<1x320x256xf32> to vector<320x256xf32>
    %cst_98 = arith.constant dense<0.000000e+00> : vector<8x256xf32>
    %107 = tpu.matmul %104, %106, %cst_98 {dimension_numbers = #tpu.dot_dimension_numbers<[1], [0], [0], [1], [0, 0, 1, 1], [], []>} : vector<8x320xf32>, vector<320x256xf32>, vector<8x256xf32> -> vector<8x256xf32>
    %108 = arith.addf %103, %107 : vector<8x256xf32>
    %c2_99 = arith.constant 2 : index
    %c0_100 = arith.constant 0 : index
    %109 = vector.load %arg12[%c2_99, %c0_100] : memref<20x320xf32, #tpu.memory_space<vmem>>, vector<8x320xf32>
    %c2_101 = arith.constant 2 : index
    %c0_102 = arith.constant 0 : index
    %c0_103 = arith.constant 0 : index
    %110 = vector.load %arg14[%c2_101, %c0_102, %c0_103] : memref<4x320x256xf32, #tpu.memory_space<vmem>>, vector<1x320x256xf32>
    %111 = vector.shape_cast %110 : vector<1x320x256xf32> to vector<320x256xf32>
    %cst_104 = arith.constant dense<0.000000e+00> : vector<8x256xf32>
    %112 = tpu.matmul %109, %111, %cst_104 {dimension_numbers = #tpu.dot_dimension_numbers<[1], [0], [0], [1], [0, 0, 1, 1], [], []>} : vector<8x320xf32>, vector<320x256xf32>, vector<8x256xf32> -> vector<8x256xf32>
    %113 = arith.addf %108, %112 : vector<8x256xf32>
    %c12_105 = arith.constant 12 : index
    %c0_106 = arith.constant 0 : index
    %114 = vector.load %arg12[%c12_105, %c0_106] : memref<20x320xf32, #tpu.memory_space<vmem>>, vector<8x320xf32>
    %c3_107 = arith.constant 3 : index
    %c0_108 = arith.constant 0 : index
    %c0_109 = arith.constant 0 : index
    %115 = vector.load %arg14[%c3_107, %c0_108, %c0_109] : memref<4x320x256xf32, #tpu.memory_space<vmem>>, vector<1x320x256xf32>
    %116 = vector.shape_cast %115 : vector<1x320x256xf32> to vector<320x256xf32>
    %cst_110 = arith.constant dense<0.000000e+00> : vector<8x256xf32>
    %117 = tpu.matmul %114, %116, %cst_110 {dimension_numbers = #tpu.dot_dimension_numbers<[1], [0], [0], [1], [0, 0, 1, 1], [], []>} : vector<8x320xf32>, vector<320x256xf32>, vector<8x256xf32> -> vector<8x256xf32>
    %118 = arith.addf %113, %117 : vector<8x256xf32>
    %c0_111 = arith.constant 0 : index
    %c0_112 = arith.constant 0 : index
    %119 = vector.load %arg3[%c0_111, %c0_112] : memref<1x256xf32, #tpu.memory_space<vmem>>, vector<1x256xf32>
    %120 = vector.broadcast %119 : vector<1x256xf32> to vector<8x256xf32>
    %121 = arith.addf %118, %120 : vector<8x256xf32>
    %cst_113 = arith.constant 0.000000e+00 : f32
    %122 = vector.broadcast %cst_113 : f32 to vector<8x256xf32>
    %123 = arith.maximumf %121, %122 : vector<8x256xf32>
    %124 = vector.extract_strided_slice %123 {offsets = [0, 0], sizes = [1, 256], strides = [1, 1]} : vector<8x256xf32> to vector<1x256xf32>
    %c0_114 = arith.constant 0 : index
    %c0_115 = arith.constant 0 : index
    %125 = vector.load %arg13[%c0_114, %c0_115] : memref<2x1024xf32, #tpu.memory_space<vmem>>, vector<1x256xf32>
    tpu.vector_store %arg13[%c0_114, %c0_115], %124 {strides = array<i32>} : memref<2x1024xf32, #tpu.memory_space<vmem>>, vector<1x256xf32>,
    %126 = vector.extract_strided_slice %123 {offsets = [1, 0], sizes = [1, 256], strides = [1, 1]} : vector<8x256xf32> to vector<1x256xf32>
    %c1_116 = arith.constant 1 : index
    %c0_117 = arith.constant 0 : index
    %127 = vector.load %arg13[%c1_116, %c0_117] : memref<2x1024xf32, #tpu.memory_space<vmem>>, vector<1x256xf32>
    tpu.vector_store %arg13[%c1_116, %c0_117], %126 {strides = array<i32>} : memref<2x1024xf32, #tpu.memory_space<vmem>>, vector<1x256xf32>,
    %128 = vector.extract_strided_slice %123 {offsets = [2, 0], sizes = [1, 256], strides = [1, 1]} : vector<8x256xf32> to vector<1x256xf32>
    %c0_118 = arith.constant 0 : index
    %c256 = arith.constant 256 : index
    %129 = vector.load %arg13[%c0_118, %c256] : memref<2x1024xf32, #tpu.memory_space<vmem>>, vector<1x256xf32>
    tpu.vector_store %arg13[%c0_118, %c256], %128 {strides = array<i32>} : memref<2x1024xf32, #tpu.memory_space<vmem>>, vector<1x256xf32>,
    %130 = vector.extract_strided_slice %123 {offsets = [3, 0], sizes = [1, 256], strides = [1, 1]} : vector<8x256xf32> to vector<1x256xf32>
    %c1_119 = arith.constant 1 : index
    %c256_120 = arith.constant 256 : index
    %131 = vector.load %arg13[%c1_119, %c256_120] : memref<2x1024xf32, #tpu.memory_space<vmem>>, vector<1x256xf32>
    tpu.vector_store %arg13[%c1_119, %c256_120], %130 {strides = array<i32>} : memref<2x1024xf32, #tpu.memory_space<vmem>>, vector<1x256xf32>,
    %132 = vector.extract_strided_slice %123 {offsets = [4, 0], sizes = [1, 256], strides = [1, 1]} : vector<8x256xf32> to vector<1x256xf32>
    %c0_121 = arith.constant 0 : index
    %c512 = arith.constant 512 : index
    %133 = vector.load %arg13[%c0_121, %c512] : memref<2x1024xf32, #tpu.memory_space<vmem>>, vector<1x256xf32>
    tpu.vector_store %arg13[%c0_121, %c512], %132 {strides = array<i32>} : memref<2x1024xf32, #tpu.memory_space<vmem>>, vector<1x256xf32>,
    %134 = vector.extract_strided_slice %123 {offsets = [5, 0], sizes = [1, 256], strides = [1, 1]} : vector<8x256xf32> to vector<1x256xf32>
    %c1_122 = arith.constant 1 : index
    %c512_123 = arith.constant 512 : index
    %135 = vector.load %arg13[%c1_122, %c512_123] : memref<2x1024xf32, #tpu.memory_space<vmem>>, vector<1x256xf32>
    tpu.vector_store %arg13[%c1_122, %c512_123], %134 {strides = array<i32>} : memref<2x1024xf32, #tpu.memory_space<vmem>>, vector<1x256xf32>,
    %136 = vector.extract_strided_slice %123 {offsets = [6, 0], sizes = [1, 256], strides = [1, 1]} : vector<8x256xf32> to vector<1x256xf32>
    %c0_124 = arith.constant 0 : index
    %c768 = arith.constant 768 : index
    %137 = vector.load %arg13[%c0_124, %c768] : memref<2x1024xf32, #tpu.memory_space<vmem>>, vector<1x256xf32>
    tpu.vector_store %arg13[%c0_124, %c768], %136 {strides = array<i32>} : memref<2x1024xf32, #tpu.memory_space<vmem>>, vector<1x256xf32>,
    %138 = vector.extract_strided_slice %123 {offsets = [7, 0], sizes = [1, 256], strides = [1, 1]} : vector<8x256xf32> to vector<1x256xf32>
    %c1_125 = arith.constant 1 : index
    %c768_126 = arith.constant 768 : index
    %139 = vector.load %arg13[%c1_125, %c768_126] : memref<2x1024xf32, #tpu.memory_space<vmem>>, vector<1x256xf32>
    tpu.vector_store %arg13[%c1_125, %c768_126], %138 {strides = array<i32>} : memref<2x1024xf32, #tpu.memory_space<vmem>>, vector<1x256xf32>,
    %c1_i32_127 = arith.constant 1 : i32
    %140 = tpu.memref_slice %arg18[%c1_i32_127] : memref<4x!tpu.dma_semaphore, #tpu.memory_space<semaphore_mem>> -> memref<1x!tpu.dma_semaphore, #tpu.memory_space<semaphore_mem>>
    %141 = tpu.memref_squeeze %140 : memref<1x!tpu.dma_semaphore, #tpu.memory_space<semaphore_mem>> -> memref<!tpu.dma_semaphore, #tpu.memory_space<semaphore_mem>>
    tpu.wait_dma2 semaphore(%141 : memref<!tpu.dma_semaphore, #tpu.memory_space<semaphore_mem>>) src(%arg8 : memref<1024x256xf32, #tpu.memory_space<any>>) dst(%arg15 : memref<1024x256xf32, #tpu.memory_space<vmem>>)
    %c0_128 = arith.constant 0 : index
    %c0_129 = arith.constant 0 : index
    %142 = vector.load %arg13[%c0_128, %c0_129] : memref<2x1024xf32, #tpu.memory_space<vmem>>, vector<2x1024xf32>
    %c0_130 = arith.constant 0 : index
    %c0_131 = arith.constant 0 : index
    %143 = vector.load %arg15[%c0_130, %c0_131] : memref<1024x256xf32, #tpu.memory_space<vmem>>, vector<1024x256xf32>
    %cst_132 = arith.constant dense<0.000000e+00> : vector<2x256xf32>
    %144 = tpu.matmul %142, %143, %cst_132 {dimension_numbers = #tpu.dot_dimension_numbers<[1], [0], [0], [1], [0, 0, 1, 1], [], []>} : vector<2x1024xf32>, vector<1024x256xf32>, vector<2x256xf32> -> vector<2x256xf32>
    %c0_133 = arith.constant 0 : index
    %c0_134 = arith.constant 0 : index
    %145 = vector.load %arg4[%c0_133, %c0_134] : memref<1x256xf32, #tpu.memory_space<vmem>>, vector<1x256xf32>
    %146 = vector.broadcast %145 : vector<1x256xf32> to vector<2x256xf32>
    %147 = arith.addf %144, %146 : vector<2x256xf32>
    %cst_135 = arith.constant 0.000000e+00 : f32
    %148 = vector.broadcast %cst_135 : f32 to vector<2x256xf32>
    %149 = arith.maximumf %147, %148 : vector<2x256xf32>
    %c2_i32_136 = arith.constant 2 : i32
    %150 = tpu.memref_slice %arg18[%c2_i32_136] : memref<4x!tpu.dma_semaphore, #tpu.memory_space<semaphore_mem>> -> memref<1x!tpu.dma_semaphore, #tpu.memory_space<semaphore_mem>>
    %151 = tpu.memref_squeeze %150 : memref<1x!tpu.dma_semaphore, #tpu.memory_space<semaphore_mem>> -> memref<!tpu.dma_semaphore, #tpu.memory_space<semaphore_mem>>
    tpu.wait_dma2 semaphore(%151 : memref<!tpu.dma_semaphore, #tpu.memory_space<semaphore_mem>>) src(%arg9 : memref<256x1024xf32, #tpu.memory_space<any>>) dst(%arg16 : memref<256x1024xf32, #tpu.memory_space<vmem>>)
    %c0_137 = arith.constant 0 : index
    %c0_138 = arith.constant 0 : index
    %152 = vector.load %arg16[%c0_137, %c0_138] : memref<256x1024xf32, #tpu.memory_space<vmem>>, vector<256x1024xf32>
    %cst_139 = arith.constant dense<0.000000e+00> : vector<2x1024xf32>
    %153 = tpu.matmul %149, %152, %cst_139 {dimension_numbers = #tpu.dot_dimension_numbers<[1], [0], [0], [1], [0, 0, 1, 1], [], []>} : vector<2x256xf32>, vector<256x1024xf32>, vector<2x1024xf32> -> vector<2x1024xf32>
    %c0_140 = arith.constant 0 : index
    %c0_141 = arith.constant 0 : index
    %154 = vector.load %arg5[%c0_140, %c0_141] : memref<1x1024xf32, #tpu.memory_space<vmem>>, vector<1x1024xf32>
    %155 = vector.broadcast %154 : vector<1x1024xf32> to vector<2x1024xf32>
    %156 = arith.addf %153, %155 : vector<2x1024xf32>
    %cst_142 = arith.constant 0.000000e+00 : f32
    %157 = vector.broadcast %cst_142 : f32 to vector<2x1024xf32>
    %158 = arith.maximumf %156, %157 : vector<2x1024xf32>
    %c3_i32_143 = arith.constant 3 : i32
    %159 = tpu.memref_slice %arg18[%c3_i32_143] : memref<4x!tpu.dma_semaphore, #tpu.memory_space<semaphore_mem>> -> memref<1x!tpu.dma_semaphore, #tpu.memory_space<semaphore_mem>>
    %160 = tpu.memref_squeeze %159 : memref<1x!tpu.dma_semaphore, #tpu.memory_space<semaphore_mem>> -> memref<!tpu.dma_semaphore, #tpu.memory_space<semaphore_mem>>
    tpu.wait_dma2 semaphore(%160 : memref<!tpu.dma_semaphore, #tpu.memory_space<semaphore_mem>>) src(%arg10 : memref<1024x128xf32, #tpu.memory_space<any>>) dst(%arg17 : memref<1024x128xf32, #tpu.memory_space<vmem>>)
    %c0_144 = arith.constant 0 : index
    %c0_145 = arith.constant 0 : index
    %161 = vector.load %arg17[%c0_144, %c0_145] : memref<1024x128xf32, #tpu.memory_space<vmem>>, vector<1024x128xf32>
    %cst_146 = arith.constant dense<0.000000e+00> : vector<2x128xf32>
    %162 = tpu.matmul %158, %161, %cst_146 {dimension_numbers = #tpu.dot_dimension_numbers<[1], [0], [0], [1], [0, 0, 1, 1], [], []>} : vector<2x1024xf32>, vector<1024x128xf32>, vector<2x128xf32> -> vector<2x128xf32>
    %c0_147 = arith.constant 0 : index
    %c0_148 = arith.constant 0 : index
    %163 = vector.load %arg6[%c0_147, %c0_148] : memref<1x128xf32, #tpu.memory_space<vmem>>, vector<1x128xf32>
    %164 = vector.broadcast %163 : vector<1x128xf32> to vector<2x128xf32>
    %165 = arith.addf %162, %164 : vector<2x128xf32>
    %166 = vector.extract_strided_slice %165 {offsets = [0, 0], sizes = [2, 1], strides = [1, 1]} : vector<2x128xf32> to vector<2x1xf32>
    %167 = vector.extract_strided_slice %165 {offsets = [0, 1], sizes = [2, 6], strides = [1, 1]} : vector<2x128xf32> to vector<2x6xf32>
    %168 = vector.broadcast %166 : vector<2x1xf32> to vector<2x6xf32>
    %169 = arith.addf %168, %167 : vector<2x6xf32>
    %cst_149 = arith.constant dense<0.000000e+00> : vector<2xf32>
    %170 = vector.multi_reduction <add>, %167, %cst_149 [1] : vector<2x6xf32> to vector<2xf32>
    %171 = vector.shape_cast %170 : vector<2xf32> to vector<2x1xf32>
    %cst_150 = arith.constant 6.000000e+00 : f32
    %172 = vector.broadcast %cst_150 : f32 to vector<2x1xf32>
    %173 = arith.divf %171, %172 : vector<2x1xf32>
    %174 = vector.broadcast %173 : vector<2x1xf32> to vector<2x6xf32>
    %175 = arith.subf %169, %174 : vector<2x6xf32>
    %c0_151 = arith.constant 0 : index
    %c0_152 = arith.constant 0 : index
    %176 = vector.load %arg11[%c0_151, %c0_152] : memref<2x6xf32, #tpu.memory_space<vmem>>, vector<2x6xf32>
    tpu.vector_store %arg11[%c0_151, %c0_152], %175 {strides = array<i32>} : memref<2x6xf32, #tpu.memory_space<vmem>>, vector<2x6xf32>,
    return
  }
}

</mosaic_0001>

<bundles_post_ra>
// kernel: dueling_ddqn_forward.1
= control target key start
LH: loop header
LB: loop body
LE: loop exit
PB: predicated region body
PF: predicated region fallthrough
CT: control target
= control target key end

     0   :  { %16 = vsyncpa [#allocation10], 0  ;;  %s10531_s0 = inlined_call_operand.vmem [shape: f32[96,176], index: 0, kind: input, shape index: {}]   ;;  %s10532_s1 = inlined_call_operand.hbm [shape: f32[8,176,320], index: 1, kind: input, shape index: {}]   ;;  %s10533_s2 = inlined_call_operand.hbm [shape: f32[1,320], index: 2, kind: input, shape index: {}]   ;;  %s10534_s3 = inlined_call_operand.hbm [shape: f32[1,256], index: 3, kind: input, shape index: {}]   ;;  %s10535_s4 = inlined_call_operand.hbm [shape: f32[1,256], index: 4, kind: input, shape index: {}]   ;;  %s10536_s5 = inlined_call_operand.hbm [shape: f32[1,1024], index: 5, kind: input, shape index: {}]   ;;  %s10537_s6 = inlined_call_operand.hbm [shape: f32[1,128], index: 6, kind: input, shape index: {}]   ;;  %s10538_s7 = inlined_call_operand.hbm [shape: f32[4,320,256], index: 7, kind: input, shape index: {}]   ;;  %s10539_s8 = inlined_call_operand.hbm [shape: f32[1024,256], index: 8, kind: input, shape index: {}]   ;;  %s10540_s9 = inlined_call_operand.hbm [shape: f32[256,1024], index: 9, kind: input, shape index: {}]   ;;  %s10541_s10 = inlined_call_operand.hbm [shape: f32[1024,128], index: 10, kind: input, shape index: {}]   ;;  %s10542_s11 = inlined_call_operand.hbm [shape: f32[2,6], index: 11, kind: output, shape index: {}]  }
   0x1   :  { %17 = vsyncpa [#allocation13], 0 }
   0x2   :  { %18 = vsyncpa [#allocation16], 0 }
   0x3   :  { %19 = vsyncpa [#allocation19], 0 }
   0x4   :  { %20 = vsyncpa [#allocation11], 0  ;;  %s9600_s17 = smov [#allocation12]   ;;  %s9601_s19 = smov [#allocation15]  }
   0x5   :  { %s41_s18 = sshll.u32 %s9600_s17, 4  ;;  %s61_s20 = sshll.u32 %s9601_s19, 4  ;;  %s42_s18 = int_to_ptr.vmem [resolvable:$true] %s41_s18  ;;  %s62_s20 = int_to_ptr.vmem [resolvable:$true] %s61_s20 }
   0x6   :  { %s9340_s23 = scalar_lea.hbm %s10533_s2, 48 }
   0x7   :  { %p9341_p0 = scmp.ne.s32.totalorder %s10533_s2, %s9340_s23  ;;  %p9344_p1 = scmp.lt.u32.totalorder %s9340_s23, %s10533_s2 }
   0x9   :  { %p9346_p2 = pnand %p9344_p1, %p9341_p0 }
   0xb   :  { %9349 = shalt.err (!%p9346_p2)
}
   0xc   :  { %s9350_s28 = scalar_lea.vmem %s42_s18, 48  ;;  %s9354_s29 = scalar_lea.vmem %s42_s18, 64 }
   0xd   :  { %p9351_p3 = scmp.ne.s32.totalorder %s42_s18, %s9350_s28  ;;  %p9355_p4 = scmp.lt.s32.totalorder %s42_s18, %s42_s18 }
   0xe   :  { %p9356_p5 = scmp.lt.s32.totalorder %s9354_s29, %s9350_s28 }
  0x10   :  { %p9357_p6 = por %p9356_p5, %p9355_p4 }
  0x12   :  { %p9358_p7 = pnand %p9357_p6, %p9351_p3 }
  0x14   :  { %9361 = shalt.err (!%p9358_p7)
}
  0x15   :  { %44 = dma.hbm_to_vmem [thread:$0]  %s10533_s2, 48, %s42_s18, [#allocation13]  }
  0x16   :  { %s9362_s15 = scalar_lea.hbm %s10535_s4, 32 }
  0x17   :  { %p9363_p8 = scmp.ne.s32.totalorder %s10535_s4, %s9362_s15  ;;  %p9366_p9 = scmp.lt.u32.totalorder %s9362_s15, %s10535_s4 }
  0x19   :  { %p9368_p10 = pnand %p9366_p9, %p9363_p8 }
  0x1b   :  { %9371 = shalt.err (!%p9368_p10)
}
  0x1c   :  { %s9372_s22 = scalar_lea.vmem %s62_s20, 32  ;;  %p9377_p12 = scmp.lt.s32.totalorder %s62_s20, %s62_s20 }
  0x1d   :  { %p9373_p11 = scmp.ne.s32.totalorder %s62_s20, %s9372_s22  ;;  %p9378_p13 = scmp.lt.s32.totalorder %s9372_s22, %s9372_s22 }
  0x1f   :  { %p9379_p0 = por %p9378_p13, %p9377_p12 }
  0x21   :  { %p9380_p1 = pnand %p9379_p0, %p9373_p11 }
  0x23   :  { %9383 = shalt.err (!%p9380_p1)
}
  0x24   :  { %64 = dma.hbm_to_vmem [thread:$0]  %s10535_s4, 32, %s62_s20, [#allocation16]  }
  0x25   :  { %s9602_s23 = smov [#allocation9]   ;;  %s9384_s27 = scalar_lea.hbm %s10532_s1, 67584 }
  0x26   :  { %s28_s24 = sshll.u32 %s9602_s23, 4  ;;  %p9385_p2 = scmp.ne.s32.totalorder %s10532_s1, %s9384_s27  ;;  %s29_s24 = int_to_ptr.vmem [resolvable:$true] %s28_s24 }
  0x27   :  { %p9388_p3 = scmp.lt.u32.totalorder %s9384_s27, %s10532_s1 }
  0x29   :  { %p9390_p4 = pnand %p9388_p3, %p9385_p2 }
  0x2b   :  { %9393 = shalt.err (!%p9390_p4)
}
  0x2c   :  { %s9394_s13 = scalar_lea.vmem %s29_s24, 67584  ;;  %p9399_p6 = scmp.lt.s32.totalorder %s29_s24, %s29_s24 }
  0x2d   :  { %p9395_p5 = scmp.ne.s32.totalorder %s29_s24, %s9394_s13  ;;  %p9400_p7 = scmp.lt.s32.totalorder %s9394_s13, %s9394_s13 }
  0x2f   :  { %p9401_p8 = por %p9400_p7, %p9399_p6 }
  0x31   :  { %p9402_p9 = pnand %p9401_p8, %p9395_p5 }
  0x33   :  { %9405 = shalt.err (!%p9402_p9)
}
  0x34   :  { %s9603_s4 = smov 384   ;;  %s9604_s20 = smov 24  }
  0x35   :  { %34 = dma.hbm_to_vmem [thread:$0]  %s10532_s1, 67584, %s29_s24, [#allocation10], %s9603_s4, %s9603_s4, %s9604_s20  }
  0x36   :  { %s9605_s16 = smov [#allocation14]   ;;  %s9606_s19 = smov [#allocation17]  }
  0x37   :  { %s51_s17 = sshll.u32 %s9605_s16, 4  ;;  %s71_s21 = sshll.u32 %s9606_s19, 4  ;;  %s52_s17 = int_to_ptr.vmem [resolvable:$true] %s51_s17  ;;  %s72_s21 = int_to_ptr.vmem [resolvable:$true] %s71_s21 }
  0x38   :  { %s9406_s18 = scalar_lea.hbm %s10534_s3, 32 }
  0x39   :  { %p9407_p10 = scmp.ne.s32.totalorder %s10534_s3, %s9406_s18  ;;  %p9410_p11 = scmp.lt.u32.totalorder %s9406_s18, %s10534_s3 }
  0x3b   :  { %p9412_p12 = pnand %p9410_p11, %p9407_p10 }
  0x3d   :  { %9415 = shalt.err (!%p9412_p12)
}
  0x3e   :  { %s9416_s1 = scalar_lea.vmem %s52_s17, 32  ;;  %p9421_p0 = scmp.lt.s32.totalorder %s52_s17, %s52_s17 }
  0x3f   :  { %p9417_p13 = scmp.ne.s32.totalorder %s52_s17, %s9416_s1  ;;  %p9422_p1 = scmp.lt.s32.totalorder %s9416_s1, %s9416_s1 }
  0x41   :  { %p9423_p2 = por %p9422_p1, %p9421_p0 }
  0x43   :  { %p9424_p3 = pnand %p9423_p2, %p9417_p13 }
  0x45   :  { %9427 = shalt.err (!%p9424_p3)
}
  0x46   :  { %54 = dma.hbm_to_vmem [thread:$0]  %s10534_s3, 32, %s52_s17, [#allocation13]  }
  0x47   :  { %s9428_s12 = scalar_lea.hbm %s10536_s5, 128 }
  0x48   :  { %p9429_p4 = scmp.ne.s32.totalorder %s10536_s5, %s9428_s12  ;;  %p9432_p5 = scmp.lt.u32.totalorder %s9428_s12, %s10536_s5 }
  0x4a   :  { %p9434_p6 = pnand %p9432_p5, %p9429_p4 }
  0x4c   :  { %9437 = shalt.err (!%p9434_p6)
}
  0x4d   :  { %s9438_s15 = scalar_lea.vmem %s72_s21, 128  ;;  %p9443_p8 = scmp.lt.s32.totalorder %s72_s21, %s72_s21 }
  0x4e   :  { %p9439_p7 = scmp.ne.s32.totalorder %s72_s21, %s9438_s15  ;;  %p9444_p9 = scmp.lt.s32.totalorder %s9438_s15, %s9438_s15 }
  0x50   :  { %p9445_p10 = por %p9444_p9, %p9443_p8 }
  0x52   :  { %p9446_p11 = pnand %p9445_p10, %p9439_p7 }
  0x54   :  { %9449 = shalt.err (!%p9446_p11)
}
  0x55   :  { %74 = dma.hbm_to_vmem [thread:$0]  %s10536_s5, 128, %s72_s21, [#allocation16]  }
  0x56   :  { %s9607_s17 = smov [#allocation18]   ;;  %s9450_s18 = scalar_lea.hbm %s10537_s6, 16 }
  0x57   :  { %s81_s19 = sshll.u32 %s9607_s17, 4  ;;  %p9451_p12 = scmp.ne.s32.totalorder %s10537_s6, %s9450_s18  ;;  %s82_s19 = int_to_ptr.vmem [resolvable:$true] %s81_s19 }
  0x58   :  { %p9454_p13 = scmp.lt.u32.totalorder %s9450_s18, %s10537_s6 }
  0x5a   :  { %p9456_p0 = pnand %p9454_p13, %p9451_p12 }
  0x5c   :  { %9459 = shalt.err (!%p9456_p0)
}
  0x5d   :  { %s9460_s1 = scalar_lea.vmem %s82_s19, 16  ;;  %s9464_s5 = scalar_lea.vmem %s82_s19, 32 }
  0x5e   :  { %p9461_p1 = scmp.ne.s32.totalorder %s82_s19, %s9460_s1  ;;  %p9465_p2 = scmp.lt.s32.totalorder %s82_s19, %s82_s19 }
  0x5f   :  { %p9466_p3 = scmp.lt.s32.totalorder %s9464_s5, %s9460_s1 }
  0x61   :  { %p9467_p4 = por %p9466_p3, %p9465_p2 }
  0x63   :  { %p9468_p5 = pnand %p9467_p4, %p9461_p1 }
  0x65   :  { %9471 = shalt.err (!%p9468_p5)
}
  0x66   :  { %84 = dma.hbm_to_vmem [thread:$0]  %s10537_s6, 16, %s82_s19, [#allocation19]  }
  0x67   :  { %9582 = dma.done.wait [#allocation10], 67584  }
  0x68   :  { %9583 = vsyncadd [#allocation10], 4294899712 }
  0x69   :  { %9584 = dma.done.wait [#allocation13], 80  }
  0x6a   :  { %9585 = vsyncadd [#allocation13], 4294967216 }
  0x6b   :  { %9586 = dma.done.wait [#allocation16], 160  }
  0x6c   :  { %9587 = vsyncadd [#allocation16], 4294967136 }
  0x6d   :  { %9588 = dma.done.wait [#allocation19], 16  }
  0x6e   :  { %9589 = vsyncadd [#allocation19], 4294967280  ;;  %v9608_v0 = vmov 0.0|0.0   ;;  %v226_v1 = vld [vmem:[#allocation9 + $0x218] sm:$0xff]  ;;  %v229_v2 = vld [vmem:[#allocation9 + $0x230] sm:$0xff]  ;;  %vm295_vm0 = vcmask 1043456  }
  0x6f   :  { %7091 = vmatprep.subr.bf16.mxu1 %v9608_v0  ;;  %v227_v3 = vld [vmem:[#allocation9 + $0x220] sm:$0xff]  ;;  %v7047_v4 = vpack.c.bf16 %v229_v2, %v226_v1  ;;  %v230_v5 = vld [vmem:[#allocation9 + $0x238] sm:$0xff]  ;;  %v225_v6 = vld [vmem:[#allocation9 + $0x210] sm:$0xff]  ;;  %vm304_vm1 = vcmask 392192   ;;  %vm3114_vm2 = vcmask 1045504   ;;  %vm2090_vm3 = vcmask 523264  }
  0x70   :  { %v228_v7 = vld [vmem:[#allocation9 + $0x228] sm:$0xff]  ;;  %v7092_v8 = vpack.c.bf16 %v230_v5, %v227_v3  ;;  %v235_v11 = vld [vmem:[#allocation9 + $0x260] sm:$0xff]  ;;  %v233_v12 = vld [vmem:[#allocation9 + $0x250] sm:$0xff]  ;;  %vm2094_vm4 = vcmask 517120   ;;  %vm3359_vm5 = vcmask 1041408   ;;  %s9610_s12 = smov [#allocation5]  }
  0x71   :  { %v7049_v9 = vpack.c.bf16 %v228_v7, %v225_v6  ;;  %v232_v10 = vld [vmem:[#allocation9 + $0x248] sm:$0xff]  ;;  %7048 = vmatprep.subr.bf16.mxu0 %v7047_v4  ;;  %v231_v15 = vld [vmem:[#allocation9 + $0x240] sm:$0xff]  ;;  %v234_v16 = vld [vmem:[#allocation9 + $0x258] sm:$0xff]  ;;  %s122_s13 = sshll.u32 %s9610_s12, 4  ;;  %s9472_s14 = scalar_lea.hbm %s10538_s7, 40960  ;;  %s123_s13 = int_to_ptr.vmem [resolvable:$true] %s122_s13 }
  0x72   :  { %v7051_v13 = vpack.c.bf16 %v235_v11, %v232_v10  ;;  %v236_v14 = vld [vmem:[#allocation9 + $0x268] sm:$0xff]  ;;  %7093 = vmatpush1.bf16.msra.mxu1 %v7092_v8  ;;  %v7053_v18 = vpack.c.bf16 %v234_v16, %v231_v15  ;;  %v238_v19 = vld [vmem:[#allocation9 + $0x278] sm:$0xff]  ;;  %v241_v20 = vld [vmem:[#allocation9 + $0x290] sm:$0xff]  ;;  %p9473_p6 = scmp.ne.s32.totalorder %s10538_s7, %s9472_s14  ;;  %p9476_p7 = scmp.lt.u32.totalorder %s9472_s14, %s10538_s7 }
  0x73   :  { %7050 = vmatpush1.bf16.msra.mxu0 %v7049_v9  ;;  %v7095_v17 = vpack.c.bf16 %v236_v14, %v233_v12  ;;  %v239_v21 = vld [vmem:[#allocation9 + $0x280] sm:$0xff]  ;;  %7094 = vmatprep.subr.bf16.mxu1 %v9608_v0  ;;  %v7055_v22 = vpack.c.bf16 %v241_v20, %v238_v19  ;;  %v242_v23 = vld [vmem:[#allocation9 + $0x298] sm:$0xff]  ;;  %v237_v24 = vld [vmem:[#allocation9 + $0x270] sm:$0xff] }
  0x74   :  { %7052 = vmatprep.subr.bf16.mxu0 %v7051_v13  ;;  %v240_v25 = vld [vmem:[#allocation9 + $0x288] sm:$0xff]  ;;  %v247_v27 = vld [vmem:[#allocation9 + $0x2c0] sm:$0xff]  ;;  %v7098_v28 = vpack.c.bf16 %v242_v23, %v239_v21  ;;  %v245_v30 = vld [vmem:[#allocation9 + $0x2b0] sm:$0xff]  ;;  %p9478_p8 = pnand %p9476_p7, %p9473_p6 }
  0x75   :  { %v244_v26 = vld [vmem:[#allocation9 + $0x2a8] sm:$0xff]  ;;  %v7057_v29 = vpack.c.bf16 %v240_v25, %v237_v24  ;;  %v243_v33 = vld [vmem:[#allocation9 + $0x2a0] sm:$0xff]  ;;  %v246_v34 = vld [vmem:[#allocation9 + $0x2b8] sm:$0xff] }
  0x76   :  { %7096 = vmatpush1.bf16.msra.mxu1 %v7095_v17  ;;  %v7059_v31 = vpack.c.bf16 %v247_v27, %v244_v26  ;;  %v248_v32 = vld [vmem:[#allocation9 + $0x2c8] sm:$0xff]  ;;  %v250_v35 = vld [vmem:[#allocation9 + $0x2d8] sm:$0xff]  ;;  %v253_v36 = vld [vmem:[#allocation9 + $0x2f0] sm:$0xff]  ;;  %v7061_v38 = vpack.c.bf16 %v246_v34, %v243_v33 }
  0x77   :  { %7054 = vmatpush1.bf16.msra.mxu0 %v7053_v18  ;;  %7097 = vmatprep.subr.bf16.mxu1 %v9608_v0  ;;  %v7101_v37 = vpack.c.bf16 %v248_v32, %v245_v30  ;;  %v251_v39 = vld [vmem:[#allocation9 + $0x2e0] sm:$0xff]  ;;  %v7063_v40 = vpack.c.bf16 %v253_v36, %v250_v35  ;;  %v254_v41 = vld [vmem:[#allocation9 + $0x2f8] sm:$0xff]  ;;  %v249_v42 = vld [vmem:[#allocation9 + $0x2d0] sm:$0xff] }
  0x78   :  { %7056 = vmatprep.subr.bf16.mxu0 %v7055_v22  ;;  %v252_v43 = vld [vmem:[#allocation9 + $0x2e8] sm:$0xff]  ;;  %v259_v45 = vld [vmem:[#allocation9 + $0x320] sm:$0xff]  ;;  %v7104_v46 = vpack.c.bf16 %v254_v41, %v251_v39  ;;  %v257_v48 = vld [vmem:[#allocation9 + $0x310] sm:$0xff] }
  0x79   :  { %v256_v44 = vld [vmem:[#allocation9 + $0x308] sm:$0xff]  ;;  %v7065_v47 = vpack.c.bf16 %v252_v43, %v249_v42  ;;  %v255_v51 = vld [vmem:[#allocation9 + $0x300] sm:$0xff]  ;;  %v258_v52 = vld [vmem:[#allocation9 + $0x318] sm:$0xff] }
  0x7a   :  { %7099 = vmatpush1.bf16.msra.mxu1 %v7098_v28  ;;  %v7067_v49 = vpack.c.bf16 %v259_v45, %v256_v44  ;;  %v260_v50 = vld [vmem:[#allocation9 + $0x328] sm:$0xff]  ;;  %v262_v53 = vld [vmem:[#allocation9 + $0x338] sm:$0xff]  ;;  %v265_v54 = vld [vmem:[#allocation9 + $0x350] sm:$0xff]  ;;  %v7069_v56 = vpack.c.bf16 %v258_v52, %v255_v51 }
  0x7b   :  { %7058 = vmatpush1.bf16.msra.mxu0 %v7057_v29  ;;  %7100 = vmatprep.subr.bf16.mxu1 %v9608_v0  ;;  %v7107_v55 = vpack.c.bf16 %v260_v50, %v257_v48  ;;  %v263_v57 = vld [vmem:[#allocation9 + $0x340] sm:$0xff]  ;;  %v266_v58 = vld [vmem:[#allocation9 + $0x358] sm:$0xff]  ;;  %v7071_v59 = vpack.c.bf16 %v265_v54, %v262_v53  ;;  %v261_v60 = vld [vmem:[#allocation9 + $0x330] sm:$0xff] }
  0x7c   :  { %7060 = vmatprep.subr.bf16.mxu0 %v7059_v31  ;;  %v264_v61 = vld [vmem:[#allocation9 + $0x348] sm:$0xff]  ;;  %v271_v63 = vld [vmem:[#allocation9 + $0x380] sm:$0xff]  ;;  %v223_v2 = vld [vmem:[%s10531_s0 + $0x28] sm:$0x3f]  ;;  %v7110_v5 = vpack.c.bf16 %v266_v58, %v263_v57 }
  0x7d   :  { %v268_v62 = vld [vmem:[#allocation9 + $0x368] sm:$0xff]  ;;  %v221_v1 = vld [vmem:[%s10531_s0 + $0x18] sm:$0xf0]  ;;  %v9763_v4 = vrot.slane %v223_v2, 4  ;;  %v7073_v6 = vpack.c.bf16 %v264_v61, %v261_v60  ;;  %v269_v7 = vld [vmem:[#allocation9 + $0x370] sm:$0xff] }
  0x7e   :  { %7102 = vmatpush1.bf16.msra.mxu1 %v7101_v37  ;;  %v299_v3 = vrot.slane %v221_v1, 4  ;;  %v7075_v8 = vpack.c.bf16 %v271_v63, %v268_v62  ;;  %v272_v9 = vld [vmem:[#allocation9 + $0x388] sm:$0xff]  ;;  %v267_v10 = vld [vmem:[#allocation9 + $0x360] sm:$0xff]  ;;  %v270_v11 = vld [vmem:[#allocation9 + $0x378] sm:$0xff] }
  0x7f   :  { %7062 = vmatpush1.bf16.msra.mxu0 %v7061_v38  ;;  %7103 = vmatprep.subr.bf16.mxu1 %v9608_v0  ;;  %v274_v13 = vld [vmem:[#allocation9 + $0x398] sm:$0xff]  ;;  %v277_v14 = vld [vmem:[#allocation9 + $0x3b0] sm:$0xff]  ;;  %v7113_v15 = vpack.c.bf16 %v272_v9, %v269_v7  ;;  %v7077_v16 = vpack.c.bf16 %v270_v11, %v267_v10  ;;  %v275_v17 = vld [vmem:[#allocation9 + $0x3a0] sm:$0xff] }
  0x80   :  { %7064 = vmatprep.subr.bf16.mxu0 %v7063_v40  ;;  %v301_v12 = vsel %vm295_vm0, %v299_v3, %v9763_v4  ;;  %v7079_v18 = vpack.c.bf16 %v277_v14, %v274_v13  ;;  %v278_v19 = vld [vmem:[#allocation9 + $0x3b8] sm:$0xff]  ;;  %v273_v20 = vld [vmem:[#allocation9 + $0x390] sm:$0xff]  ;;  %v276_v21 = vld [vmem:[#allocation9 + $0x3a8] sm:$0xff] }
  0x81   :  { %6836 = vmatprep.mubr.msk.f32.mxu1 %vm304_vm1, %v301_v12  ;;  %6834 = vmatprep.mubr.msk.f32.mxu0 %vm304_vm1, %v301_v12  ;;  %v280_v22 = vld [vmem:[#allocation9 + $0x3c8] sm:$0xff]  ;;  %v283_v23 = vld [vmem:[#allocation9 + $0x3e0] sm:$0xff]  ;;  %v7116_v24 = vpack.c.bf16 %v278_v19, %v275_v17  ;;  %v7081_v25 = vpack.c.bf16 %v276_v21, %v273_v20  ;;  %v281_v26 = vld [vmem:[#allocation9 + $0x3d0] sm:$0xff] }
  0x82   :  { %7105 = vmatpush1.bf16.msra.mxu1 %v7104_v46  ;;  %v7083_v27 = vpack.c.bf16 %v283_v23, %v280_v22  ;;  %v284_v28 = vld [vmem:[#allocation9 + $0x3e8] sm:$0xff]  ;;  %v279_v29 = vld [vmem:[#allocation9 + $0x3c0] sm:$0xff]  ;;  %v282_v30 = vld [vmem:[#allocation9 + $0x3d8] sm:$0xff] }
  0x83   :  { %7066 = vmatpush1.bf16.msra.mxu0 %v7065_v47  ;;  %7106 = vmatprep.subr.bf16.mxu1 %v9608_v0  ;;  %v286_v31 = vld [vmem:[#allocation9 + $0x3f8] sm:$0xff]  ;;  %v289_v32 = vld [vmem:[#allocation9 + $0x410] sm:$0xff]  ;;  %v7119_v33 = vpack.c.bf16 %v284_v28, %v281_v26  ;;  %v7085_v34 = vpack.c.bf16 %v282_v30, %v279_v29  ;;  %v287_v35 = vld [vmem:[#allocation9 + $0x400] sm:$0xff] }
  0x84   :  { %7068 = vmatprep.subr.bf16.mxu0 %v7067_v49  ;;  %v290_v36 = vld [vmem:[#allocation9 + $0x418] sm:$0xff]  ;;  %v285_v37 = vld [vmem:[#allocation9 + $0x3f0] sm:$0xff]  ;;  %v7087_v38 = vpack.c.bf16 %v289_v32, %v286_v31  ;;  %v288_v39 = vld [vmem:[#allocation9 + $0x408] sm:$0xff] }
  0x85   :  { %v220_v40 = vld [vmem:[%s10531_s0 + $0x10] sm:$0xf0]  ;;  %v222_v41 = vld [vmem:[%s10531_s0 + $0x20] sm:$0x3f]  ;;  %v158_v43 = vld [vmem:[#allocation9 + $0x20] sm:$0xff]  ;;  %v7122_v44 = vpack.c.bf16 %v290_v36, %v287_v35  ;;  %v7089_v45 = vpack.c.bf16 %v288_v39, %v285_v37 }
  0x86   :  { %7108 = vmatpush1.bf16.msra.mxu1 %v7107_v55  ;;  %v155_v42 = vld [vmem:[#allocation9 + $0x8] sm:$0xff]  ;;  %v296_v46 = vrot.slane %v220_v40, 4  ;;  %v297_v47 = vrot.slane %v222_v41, 4  ;;  %v156_v48 = vld [vmem:[#allocation9 + $0x10] sm:$0xff]  ;;  %v154_v51 = vld [vmem:[#allocation9] sm:$0xff] }
  0x87   :  { %7070 = vmatpush1.bf16.msra.mxu0 %v7069_v56  ;;  %7109 = vmatprep.subr.bf16.mxu1 %v9608_v0  ;;  %v7124_v49 = vpack.c.bf16 %v158_v43, %v155_v42  ;;  %v159_v50 = vld [vmem:[#allocation9 + $0x28] sm:$0xff]  ;;  %v157_v52 = vld [vmem:[#allocation9 + $0x18] sm:$0xff]  ;;  %v164_v54 = vld [vmem:[#allocation9 + $0x50] sm:$0xff] }
  0x88   :  { %7072 = vmatprep.subr.bf16.mxu0 %v7071_v59  ;;  %v161_v53 = vld [vmem:[#allocation9 + $0x38] sm:$0xff]  ;;  %v298_v55 = vsel %vm295_vm0, %v296_v46, %v297_v47  ;;  %v7169_v56 = vpack.c.bf16 %v159_v50, %v156_v48  ;;  %v7126_v57 = vpack.c.bf16 %v157_v52, %v154_v51  ;;  %v162_v58 = vld [vmem:[#allocation9 + $0x40] sm:$0xff]  ;;  %v160_v61 = vld [vmem:[#allocation9 + $0x30] sm:$0xff] }
  0x89   :  { %v7128_v59 = vpack.c.bf16 %v164_v54, %v161_v53  ;;  %v165_v60 = vld [vmem:[#allocation9 + $0x58] sm:$0xff]  ;;  %v163_v62 = vld [vmem:[#allocation9 + $0x48] sm:$0xff]  ;;  %v170_v1 = vld [vmem:[#allocation9 + $0x80] sm:$0xff] }
  0x8a   :  { %7111 = vmatpush1.bf16.msra.mxu1 %v7110_v5  ;;  %v167_v63 = vld [vmem:[#allocation9 + $0x68] sm:$0xff]  ;;  %v7172_v2 = vpack.c.bf16 %v165_v60, %v162_v58  ;;  %v7130_v3 = vpack.c.bf16 %v163_v62, %v160_v61  ;;  %v168_v5 = vld [vmem:[#allocation9 + $0x70] sm:$0xff]  ;;  %v169_v9 = vld [vmem:[#allocation9 + $0x78] sm:$0xff] }
  0x8b   :  { %7074 = vmatpush1.bf16.msra.mxu0 %v7073_v6  ;;  %7112 = vmatprep.subr.bf16.mxu1 %v9608_v0  ;;  %v7132_v6 = vpack.c.bf16 %v170_v1, %v167_v63  ;;  %v171_v7 = vld [vmem:[#allocation9 + $0x88] sm:$0xff]  ;;  %v173_v10 = vld [vmem:[#allocation9 + $0x98] sm:$0xff]  ;;  %v176_v11 = vld [vmem:[#allocation9 + $0xb0] sm:$0xff] }
  0x8c   :  { %7076 = vmatprep.subr.bf16.mxu0 %v7075_v8  ;;  %v166_v8 = vld [vmem:[#allocation9 + $0x60] sm:$0xff]  ;;  %v151_v12 = vld [vmem:[%s10531_s0 + $0x8] sm:$0xff]  ;;  %v7175_v13 = vpack.c.bf16 %v171_v7, %v168_v5  ;;  %v177_v17 = vld [vmem:[#allocation9 + $0xb8] sm:$0xff] }
  0x8d   :  { %v7134_v14 = vpack.c.bf16 %v169_v9, %v166_v8  ;;  %v175_v19 = vld [vmem:[#allocation9 + $0xa8] sm:$0xff]  ;;  %v180_v23 = vld [vmem:[#allocation9 + $0xd0] sm:$0xff]  ;;  %v178_v26 = vld [vmem:[#allocation9 + $0xc0] sm:$0xff] }
  0x8e   :  { %7114 = vmatpush1.bf16.msra.mxu1 %v7113_v15  ;;  %v174_v15 = vld [vmem:[#allocation9 + $0xa0] sm:$0xff]  ;;  %v179_v20 = vld [vmem:[#allocation9 + $0xc8] sm:$0xff]  ;;  %v185_v28 = vld [vmem:[#allocation9 + $0xf8] sm:$0xff] }
  0x8f   :  { %7078 = vmatpush1.bf16.msra.mxu0 %v7077_v16  ;;  %7115 = vmatprep.subr.bf16.mxu1 %v9608_v0  ;;  %v7136_v16 = vpack.c.bf16 %v176_v11, %v173_v10  ;;  %v7178_v21 = vpack.c.bf16 %v177_v17, %v174_v15  ;;  %v188_v29 = vld [vmem:[#allocation9 + $0x110] sm:$0xff]  ;;  %v186_v32 = vld [vmem:[#allocation9 + $0x100] sm:$0xff]  ;;  %v187_v36 = vld [vmem:[#allocation9 + $0x108] sm:$0xff] }
  0x90   :  { %7080 = vmatprep.subr.bf16.mxu0 %v7079_v18  ;;  %v172_v18 = vld [vmem:[#allocation9 + $0x90] sm:$0xff]  ;;  %v191_v37 = vld [vmem:[#allocation9 + $0x128] sm:$0xff]  ;;  %v197_v46 = vld [vmem:[#allocation9 + $0x158] sm:$0xff] }
  0x91   :  { %v7138_v22 = vpack.c.bf16 %v175_v19, %v172_v18  ;;  %v184_v35 = vld [vmem:[#allocation9 + $0xf0] sm:$0xff]  ;;  %v195_v43 = vld [vmem:[#allocation9 + $0x148] sm:$0xff]  ;;  %v198_v50 = vld [vmem:[#allocation9 + $0x160] sm:$0xff] }
  0x92   :  { %7117 = vmatpush1.bf16.msra.mxu1 %v7116_v24  ;;  %v7146_v40 = vpack.c.bf16 %v187_v36, %v184_v35  ;;  %v192_v41 = vld [vmem:[#allocation9 + $0x130] sm:$0xff]  ;;  %v201_v52 = vld [vmem:[#allocation9 + $0x178] sm:$0xff]  ;;  %v199_v54 = vld [vmem:[#allocation9 + $0x168] sm:$0xff] }
  0x93   :  { %7082 = vmatpush1.bf16.msra.mxu0 %v7081_v25  ;;  %7118 = vmatprep.subr.bf16.mxu1 %v9608_v0  ;;  %v183_v25 = vld [vmem:[#allocation9 + $0xe8] sm:$0xff]  ;;  %v7187_v48 = vpack.c.bf16 %v195_v43, %v192_v41  ;;  %v196_v53 = vld [vmem:[#allocation9 + $0x150] sm:$0xff]  ;;  %v202_v62 = vld [vmem:[#allocation9 + $0x180] sm:$0xff] }
  0x94   :  { %7084 = vmatprep.subr.bf16.mxu0 %v7083_v27  ;;  %v181_v27 = vld [vmem:[#allocation9 + $0xd8] sm:$0xff]  ;;  %v7181_v30 = vpack.c.bf16 %v183_v25, %v180_v23  ;;  %v7154_v58 = vpack.c.bf16 %v199_v54, %v196_v53  ;;  %v207_v61 = vld [vmem:[#allocation9 + $0x1a8] sm:$0xff]  ;;  %v208_v9 = vld [vmem:[#allocation9 + $0x1b0] sm:$0xff] }
  0x95   :  { %v7142_v31 = vpack.c.bf16 %v181_v27, %v178_v26  ;;  %v205_v63 = vld [vmem:[#allocation9 + $0x198] sm:$0xff]  ;;  %v211_v10 = vld [vmem:[#allocation9 + $0x1c8] sm:$0xff]  ;;  %v216_v15 = vld [vmem:[#allocation9 + $0x1f0] sm:$0xff] }
  0x96   :  { %7120 = vmatpush1.bf16.msra.mxu1 %v7119_v33  ;;  %v7144_v33 = vpack.c.bf16 %v188_v29, %v185_v28  ;;  %v209_v1 = vld [vmem:[#allocation9 + $0x1b8] sm:$0xff]  ;;  %v7158_v5 = vpack.c.bf16 %v205_v63, %v202_v62  ;;  %v215_v11 = vld [vmem:[#allocation9 + $0x1e8] sm:$0xff]  ;;  %v214_v18 = vld [vmem:[#allocation9 + $0x1e0] sm:$0xff] }
  0x97   :  { %7086 = vmatpush1.bf16.msra.mxu0 %v7085_v34  ;;  %7121 = vmatprep.subr.bf16.mxu1 %v9608_v0  ;;  %v189_v34 = vld [vmem:[#allocation9 + $0x118] sm:$0xff]  ;;  %v219_v17 = vld [vmem:[#allocation9 + $0x208] sm:$0xff]  ;;  %v626_v23 = vld [vmem:[#allocation9 + $0x430] sm:$0xff] }
  0x98   :  { %7088 = vmatprep.subr.bf16.mxu0 %v7087_v38  ;;  %v194_v38 = vld [vmem:[#allocation9 + $0x140] sm:$0xff]  ;;  %v7184_v39 = vpack.c.bf16 %v189_v34, %v186_v32  ;;  %v213_v8 = vld [vmem:[#allocation9 + $0x1d8] sm:$0xff]  ;;  %v629_v25 = vld [vmem:[#allocation9 + $0x448] sm:$0xff] }
  0x99   :  { %v7148_v42 = vpack.c.bf16 %v194_v38, %v191_v37  ;;  %v217_v19 = vld [vmem:[#allocation9 + $0x1f8] sm:$0xff]  ;;  %v624_v26 = vld [vmem:[#allocation9 + $0x420] sm:$0xff]  ;;  %v634_v29 = vld [vmem:[#allocation9 + $0x470] sm:$0xff] }
  0x9a   :  { %7123 = vmatpush1.bf16.msra.mxu1 %v7122_v44  ;;  %v190_v44 = vld [vmem:[#allocation9 + $0x120] sm:$0xff]  ;;  %v627_v27 = vld [vmem:[#allocation9 + $0x438] sm:$0xff]  ;;  %v630_v35 = vld [vmem:[#allocation9 + $0x450] sm:$0xff] }
  0x9b   :  { %7090 = vmatpush1.bf16.msra.mxu0 %v7089_v45  ;;  %7168 = vmatprep.subr.bf16.mxu1 %v9608_v0  ;;  %v193_v45 = vld [vmem:[#allocation9 + $0x138] sm:$0xff]  ;;  %v7203_v32 = vpack.c.bf16 %v627_v27, %v624_v26  ;;  %v633_v36 = vld [vmem:[#allocation9 + $0x468] sm:$0xff]  ;;  %v153_v37 = vld [vmem:[%s10531_s0 + $0x18] sm:$0x3] }
  0x9c   :  { %7125 = vmatprep.subr.bf16.mxu0 %v7124_v49  ;;  %v7150_v49 = vpack.c.bf16 %v193_v45, %v190_v44  ;;  %v631_v28 = vld [vmem:[#allocation9 + $0x458] sm:$0xff]  ;;  %v7207_v43 = vpack.c.bf16 %v633_v36, %v630_v35  ;;  %v638_v44 = vld [vmem:[#allocation9 + $0x490] sm:$0xff]  ;;  %v644_v54 = vld [vmem:[#allocation9 + $0x4c0] sm:$0xff] }
  0x9d   :  { %451 = vmatmul.mubr.f32.vlgmr.msra.gmra.mrb[0].mxu1 %v298_v55  ;;  %v635_v34 = vld [vmem:[#allocation9 + $0x478] sm:$0xff]  ;;  %v7205_v38 = vpack.c.bf16 %v634_v29, %v631_v28  ;;  %v650_v63 = vld [vmem:[#allocation9 + $0x4f0] sm:$0xff]  ;;  %v668_v27 = vld [vmem:[#allocation9 + $0x580] sm:$0xff] }
  0x9e   :  { %374 = vmatmul.mubr.f32.vlgmr.msra.gmra.mrb[0].mxu0 %v298_v55  ;;  %7170 = vmatpush1.bf16.msra.mxu1 %v7169_v56  ;;  %v203_v55 = vld [vmem:[#allocation9 + $0x188] sm:$0xff]  ;;  %v206_v56 = vld [vmem:[#allocation9 + $0x1a0] sm:$0xff]  ;;  %v152_v41 = vld [vmem:[%s10531_s0 + $0x10] sm:$0x3] }
  0x9f   :  { %7127 = vmatpush1.bf16.msra.mxu0 %v7126_v57  ;;  %7171 = vmatprep.subr.bf16.mxu1 %v9608_v0  ;;  %v7190_v57 = vpack.c.bf16 %v201_v52, %v198_v50  ;;  %v7156_v60 = vpack.c.bf16 %v206_v56, %v203_v55  ;;  %v646_v50 = vld [vmem:[#allocation9 + $0x4d0] sm:$0xff]  ;;  %v647_v56 = vld [vmem:[#allocation9 + $0x4d8] sm:$0xff] }
  0xa0   :  { %7129 = vmatprep.subr.bf16.mxu0 %v7128_v59  ;;  %6837 = vmatprep.mubr.msk.f32.mxu1 %vm304_vm1, %v9763_v4  ;;  %v204_v59 = vld [vmem:[#allocation9 + $0x190] sm:$0xff]  ;;  %v671_v29 = vld [vmem:[#allocation9 + $0x598] sm:$0xff] }
  0xa1   :  { %6835 = vmatprep.mubr.msk.f32.mxu0 %vm304_vm1, %v9763_v4  ;;  %456 = vmatmul.mubr.f32.gmra.mrb[2].mxu1 %v297_v47  ;;  %v182_v4 = vld [vmem:[#allocation9 + $0xe0] sm:$0xff]  ;;  %v674_v36 = vld [vmem:[#allocation9 + $0x5b0] sm:$0xff] }
  0xa2   :  { %380 = vmatmul.mubr.f32.gmra.mrb[2].mxu0 %v297_v47  ;;  %7173 = vmatpush1.bf16.msra.mxu1 %v7172_v2  ;;  %v7140_v24 = vpack.c.bf16 %v182_v4, %v179_v20  ;;  %v200_v47 = vld [vmem:[#allocation9 + $0x170] sm:$0xff]  ;;  %v625_v20 = vld [vmem:[#allocation9 + $0x428] sm:$0xff]  ;;  %v628_v4 = vld [vmem:[#allocation9 + $0x440] sm:$0xff] }
  0xa3   :  { %7131 = vmatpush1.bf16.msra.mxu0 %v7130_v3  ;;  %7174 = vmatprep.subr.bf16.mxu1 %v9608_v0  ;;  %v7152_v51 = vpack.c.bf16 %v200_v47, %v197_v46  ;;  %v212_v2 = vld [vmem:[#allocation9 + $0x1d0] sm:$0xff]  ;;  %v7193_v3 = vpack.c.bf16 %v207_v61, %v204_v59  ;;  %v641_v46 = vld [vmem:[#allocation9 + $0x4a8] sm:$0xff]  ;;  %v636_v47 = vld [vmem:[#allocation9 + $0x480] sm:$0xff]  ;;  %v7255_v61 = vpack.c.bf16 %v647_v56, %v644_v54 }
  0xa4   :  { %7133 = vmatprep.subr.bf16.mxu0 %v7132_v6  ;;  %6840 = vmatprep.mubr.msk.f32.mxu1 %vm304_vm1, %v151_v12  ;;  %v210_v6 = vld [vmem:[#allocation9 + $0x1c0] sm:$0xff]  ;;  %v7160_v7 = vpack.c.bf16 %v212_v2, %v209_v1  ;;  %v7252_v52 = vpack.c.bf16 %v641_v46, %v638_v44  ;;  %v649_v59 = vld [vmem:[#allocation9 + $0x4e8] sm:$0xff]  ;;  %v686_v54 = vld [vmem:[#allocation9 + $0x610] sm:$0xff] }
  0xa5   :  { %6838 = vmatprep.mubr.msk.f32.mxu0 %vm304_vm1, %v151_v12  ;;  %v218_v12 = vld [vmem:[#allocation9 + $0x200] sm:$0xff]  ;;  %v653_v2 = vld [vmem:[#allocation9 + $0x508] sm:$0xff] }
  0xa6   :  { %7176 = vmatpush1.bf16.msra.mxu1 %v7175_v13  ;;  %v7196_v13 = vpack.c.bf16 %v213_v8, %v210_v6  ;;  %v655_v6 = vld [vmem:[#allocation9 + $0x518] sm:$0xff]  ;;  %v7258_v8 = vpack.c.bf16 %v653_v2, %v650_v63  ;;  %v689_v56 = vld [vmem:[#allocation9 + $0x628] sm:$0xff]  ;;  %v861_v63 = vld [vmem:[#allocation9 + $0x640] sm:$0xff] }
  0xa7   :  { %7135 = vmatpush1.bf16.msra.mxu0 %v7134_v14  ;;  %7177 = vmatprep.subr.bf16.mxu1 %v9608_v0  ;;  %v7162_v14 = vpack.c.bf16 %v211_v10, %v208_v9  ;;  %v656_v10 = vld [vmem:[#allocation9 + $0x520] sm:$0xff]  ;;  %v864_v2 = vld [vmem:[#allocation9 + $0x658] sm:$0xff] }
  0xa8   :  { %7137 = vmatprep.subr.bf16.mxu0 %v7136_v16  ;;  %v7164_v16 = vpack.c.bf16 %v218_v12, %v215_v11  ;;  %v659_v12 = vld [vmem:[#allocation9 + $0x538] sm:$0xff] }
  0xaa   :  { %7179 = vmatpush1.bf16.msra.mxu1 %v7178_v21  ;;  %v7199_v21 = vpack.c.bf16 %v219_v17, %v216_v15  ;;  %v661_v15 = vld [vmem:[#allocation9 + $0x548] sm:$0xff]  ;;  %v7261_v17 = vpack.c.bf16 %v659_v12, %v656_v10  ;;  %v855_v12 = vld [vmem:[%s10531_s0 + $0x48] sm:$0xf0] }
  0xab   :  { %7139 = vmatpush1.bf16.msra.mxu0 %v7138_v22  ;;  %7180 = vmatprep.subr.bf16.mxu1 %v9608_v0  ;;  %v7166_v22 = vpack.c.bf16 %v217_v19, %v214_v18  ;;  %v662_v19 = vld [vmem:[#allocation9 + $0x550] sm:$0xff] }
  0xac   :  { %7141 = vmatprep.subr.bf16.mxu0 %v7140_v24  ;;  %v7201_v24 = vpack.c.bf16 %v628_v4, %v625_v20  ;;  %v665_v4 = vld [vmem:[#allocation9 + $0x568] sm:$0xff] }
  0xae   :  { %7182 = vmatpush1.bf16.msra.mxu1 %v7181_v30  ;;  %v150_v30 = vld [vmem:[%s10531_s0] sm:$0xff] }
  0xaf   :  { %7143 = vmatpush1.bf16.msra.mxu0 %v7142_v31  ;;  %7183 = vmatprep.subr.bf16.mxu1 %v9608_v0  ;;  %v7246_v31 = vpack.c.bf16 %v629_v25, %v626_v23  ;;  %v667_v23 = vld [vmem:[#allocation9 + $0x578] sm:$0xff]  ;;  %v7264_v25 = vpack.c.bf16 %v665_v4, %v662_v19  ;;  %v932_v4 = vrot.slane %v855_v12, 4  ;;  %v901_v12 = vld [vmem:[#allocation9 + $0x780] sm:$0xff] }
  0xb0   :  { %7145 = vmatprep.subr.bf16.mxu0 %v7144_v33  ;;  %v632_v33 = vld [vmem:[#allocation9 + $0x460] sm:$0xff]  ;;  %v872_v19 = vld [vmem:[#allocation9 + $0x698] sm:$0xff] }
  0xb2   :  { %7185 = vmatpush1.bf16.msra.mxu1 %v7184_v39  ;;  %v637_v39 = vld [vmem:[#allocation9 + $0x488] sm:$0xff] }
  0xb3   :  { %7147 = vmatpush1.bf16.msra.mxu0 %v7146_v40  ;;  %7186 = vmatprep.subr.bf16.mxu1 %v9608_v0  ;;  %v640_v40 = vld [vmem:[#allocation9 + $0x4a0] sm:$0xff] }
  0xb4   :  { %7149 = vmatprep.subr.bf16.mxu0 %v7148_v42  ;;  %v7249_v42 = vpack.c.bf16 %v635_v34, %v632_v33  ;;  %v7209_v45 = vpack.c.bf16 %v640_v40, %v637_v39  ;;  %v676_v33 = vld [vmem:[#allocation9 + $0x5c0] sm:$0xff]  ;;  %v7267_v34 = vpack.c.bf16 %v671_v29, %v668_v27  ;;  %v675_v40 = vld [vmem:[#allocation9 + $0x5b8] sm:$0xff]  ;;  %v874_v29 = vld [vmem:[#allocation9 + $0x6a8] sm:$0xff] }
  0xb5   :  { %v672_v39 = vld [vmem:[#allocation9 + $0x5a0] sm:$0xff]  ;;  %v876_v27 = vld [vmem:[#allocation9 + $0x6b8] sm:$0xff] }
  0xb6   :  { %7188 = vmatpush1.bf16.msra.mxu1 %v7187_v48  ;;  %v639_v48 = vld [vmem:[#allocation9 + $0x498] sm:$0xff]  ;;  %v7235_v44 = vpack.c.bf16 %v675_v40, %v672_v39 }
  0xb7   :  { %7151 = vmatpush1.bf16.msra.mxu0 %v7150_v49  ;;  %7189 = vmatprep.subr.bf16.mxu1 %v9608_v0  ;;  %v643_v49 = vld [vmem:[#allocation9 + $0x4b8] sm:$0xff]  ;;  %v7211_v53 = vpack.c.bf16 %v639_v48, %v636_v47  ;;  %v678_v48 = vld [vmem:[#allocation9 + $0x5d0] sm:$0xff] }
  0xb8   :  { %7153 = vmatprep.subr.bf16.mxu0 %v7152_v51  ;;  %v620_v51 = vld [vmem:[%s10531_s0 + $0x38] sm:$0xff]  ;;  %v7213_v55 = vpack.c.bf16 %v646_v50, %v643_v49  ;;  %v683_v47 = vld [vmem:[#allocation9 + $0x5f8] sm:$0xff]  ;;  %v681_v49 = vld [vmem:[#allocation9 + $0x5e8] sm:$0xff] }
  0xb9   :  { %v685_v50 = vld [vmem:[#allocation9 + $0x608] sm:$0xff]  ;;  %v880_v39 = vld [vmem:[#allocation9 + $0x6d8] sm:$0xff] }
  0xba   :  { %7191 = vmatpush1.bf16.msra.mxu1 %v7190_v57  ;;  %v642_v57 = vld [vmem:[#allocation9 + $0x4b0] sm:$0xff]  ;;  %v884_v40 = vld [vmem:[#allocation9 + $0x6f8] sm:$0xff] }
  0xbb   :  { %7155 = vmatpush1.bf16.msra.mxu0 %v7154_v58  ;;  %7192 = vmatprep.subr.bf16.mxu1 %v9608_v0  ;;  %v645_v58 = vld [vmem:[#allocation9 + $0x4c8] sm:$0xff] }
  0xbc   :  { %7157 = vmatprep.subr.bf16.mxu0 %v7156_v60  ;;  %v652_v60 = vld [vmem:[#allocation9 + $0x500] sm:$0xff]  ;;  %v7215_v62 = vpack.c.bf16 %v645_v58, %v642_v57  ;;  %v687_v58 = vld [vmem:[#allocation9 + $0x618] sm:$0xff] }
  0xbd   :  { %v7217_v1 = vpack.c.bf16 %v652_v60, %v649_v59  ;;  %v684_v57 = vld [vmem:[#allocation9 + $0x600] sm:$0xff]  ;;  %v860_v59 = vld [vmem:[#allocation9 + $0x638] sm:$0xff]  ;;  %v863_v60 = vld [vmem:[#allocation9 + $0x650] sm:$0xff] }
  0xbe   :  { %7194 = vmatpush1.bf16.msra.mxu1 %v7193_v3  ;;  %v648_v3 = vld [vmem:[#allocation9 + $0x4e0] sm:$0xff] }
  0xbf   :  { %7159 = vmatpush1.bf16.msra.mxu0 %v7158_v5  ;;  %7195 = vmatprep.subr.bf16.mxu1 %v9608_v0  ;;  %v651_v5 = vld [vmem:[#allocation9 + $0x4f8] sm:$0xff] }
  0xc0   :  { %7161 = vmatprep.subr.bf16.mxu0 %v7160_v7  ;;  %v658_v7 = vld [vmem:[#allocation9 + $0x530] sm:$0xff]  ;;  %v7219_v9 = vpack.c.bf16 %v651_v5, %v648_v3  ;;  %v862_v5 = vld [vmem:[#allocation9 + $0x648] sm:$0xff] }
  0xc1   :  { %v7221_v11 = vpack.c.bf16 %v658_v7, %v655_v6  ;;  %v859_v3 = vld [vmem:[#allocation9 + $0x630] sm:$0xff]  ;;  %v619_v6 = vld [vmem:[%s10531_s0 + $0x30] sm:$0xff]  ;;  %v866_v7 = vld [vmem:[#allocation9 + $0x668] sm:$0xff] }
  0xc2   :  { %7197 = vmatpush1.bf16.msra.mxu1 %v7196_v13  ;;  %v654_v13 = vld [vmem:[#allocation9 + $0x510] sm:$0xff]  ;;  %v7280_v10 = vpack.c.bf16 %v862_v5, %v859_v3  ;;  %v898_v3 = vld [vmem:[#allocation9 + $0x768] sm:$0xff] }
  0xc3   :  { %7163 = vmatpush1.bf16.msra.mxu0 %v7162_v14  ;;  %7198 = vmatprep.subr.bf16.mxu1 %v9608_v0  ;;  %v657_v14 = vld [vmem:[#allocation9 + $0x528] sm:$0xff] }
  0xc4   :  { %7165 = vmatprep.subr.bf16.mxu0 %v7164_v16  ;;  %v664_v16 = vld [vmem:[#allocation9 + $0x560] sm:$0xff]  ;;  %v7223_v18 = vpack.c.bf16 %v657_v14, %v654_v13  ;;  %v870_v14 = vld [vmem:[#allocation9 + $0x688] sm:$0xff] }
  0xc5   :  { %v7225_v20 = vpack.c.bf16 %v664_v16, %v661_v15  ;;  %v857_v13 = vld [vmem:[%s10531_s0 + $0x58] sm:$0x3f]  ;;  %v868_v16 = vld [vmem:[#allocation9 + $0x678] sm:$0xff]  ;;  %v902_v5 = vld [vmem:[#allocation9 + $0x788] sm:$0xff] }
  0xc6   :  { %7200 = vmatpush1.bf16.msra.mxu1 %v7199_v21  ;;  %v660_v21 = vld [vmem:[#allocation9 + $0x540] sm:$0xff] }
  0xc7   :  { %7167 = vmatpush1.bf16.msra.mxu0 %v7166_v22  ;;  %7245 = vmatprep.subr.bf16.mxu1 %v9608_v0  ;;  %v663_v22 = vld [vmem:[#allocation9 + $0x558] sm:$0xff]  ;;  %v865_v15 = vld [vmem:[#allocation9 + $0x660] sm:$0xff] }
  0xc8   :  { %7202 = vmatprep.subr.bf16.mxu0 %v7201_v24  ;;  %v670_v24 = vld [vmem:[#allocation9 + $0x590] sm:$0xff]  ;;  %v7227_v26 = vpack.c.bf16 %v663_v22, %v660_v21  ;;  %v9841_v21 = vrot.slane %v857_v13, 4  ;;  %v621_v22 = vld [vmem:[%s10531_s0 + $0x40] sm:$0x3]  ;;  %v904_v13 = vld [vmem:[#allocation9 + $0x798] sm:$0xff] }
  0xc9   :  { %609 = vmatmul.mubr.f32.vlgmr.msra.gmra.mrb[4].mxu1 %v150_v30  ;;  %v7229_v28 = vpack.c.bf16 %v670_v24, %v667_v23  ;;  %v7284_v24 = vpack.c.bf16 %v868_v16, %v865_v15  ;;  %v911_v15 = vld [vmem:[#allocation9 + $0x7d0] sm:$0xff] }
  0xca   :  { %532 = vmatmul.mubr.f32.vlgmr.msra.gmra.mrb[0].mxu0 %v150_v30  ;;  %7247 = vmatpush1.bf16.msra.mxu1 %v7246_v31  ;;  %v666_v30 = vld [vmem:[#allocation9 + $0x570] sm:$0xff]  ;;  %v669_v31 = vld [vmem:[#allocation9 + $0x588] sm:$0xff] }
  0xcb   :  { %7204 = vmatpush1.bf16.msra.mxu0 %v7203_v32  ;;  %6841 = vmatprep.mubr.msk.f32.mxu1 %vm304_vm1, %v153_v37  ;;  %v673_v32 = vld [vmem:[#allocation9 + $0x5a8] sm:$0xff]  ;;  %v7231_v35 = vpack.c.bf16 %v669_v31, %v666_v30  ;;  %v881_v31 = vld [vmem:[#allocation9 + $0x6e0] sm:$0xff] }
  0xcc   :  { %7248 = vmatprep.subr.bf16.mxu1 %v9608_v0  ;;  %7206 = vmatprep.subr.bf16.mxu0 %v7205_v38  ;;  %v677_v38 = vld [vmem:[#allocation9 + $0x5c8] sm:$0xff] }
  0xcd   :  { %6839 = vmatprep.mubr.msk.f32.mxu0 %vm304_vm1, %v153_v37  ;;  %614 = vmatmul.mubr.f32.gmra.mrb[6].mxu1 %v152_v41  ;;  %v7233_v37 = vpack.c.bf16 %v676_v33, %v673_v32  ;;  %v878_v30 = vld [vmem:[#allocation9 + $0x6c8] sm:$0xff]  ;;  %v934_v32 = vsel %vm295_vm0, %v932_v4, %v9841_v21  ;;  %v907_v4 = vld [vmem:[#allocation9 + $0x7b0] sm:$0xff] }
  0xce   :  { %538 = vmatmul.mubr.f32.gmra.mrb[2].mxu0 %v152_v41  ;;  %7250 = vmatpush1.bf16.msra.mxu1 %v7249_v42  ;;  %v679_v41 = vld [vmem:[#allocation9 + $0x5d8] sm:$0xff]  ;;  %v682_v42 = vld [vmem:[#allocation9 + $0x5f0] sm:$0xff] }
  0xcf   :  { %7208 = vmatpush1.bf16.msra.mxu0 %v7207_v43  ;;  %7251 = vmatprep.subr.bf16.mxu1 %v9608_v0  ;;  %v7270_v43 = vpack.c.bf16 %v677_v38, %v674_v36  ;;  %v7237_v46 = vpack.c.bf16 %v682_v42, %v679_v41  ;;  %v7290_v36 = vpack.c.bf16 %v881_v31, %v878_v30  ;;  %v877_v38 = vld [vmem:[#allocation9 + $0x6c0] sm:$0xff]  ;;  %v887_v41 = vld [vmem:[#allocation9 + $0x710] sm:$0xff]  ;;  %v916_v31 = vld [vmem:[#allocation9 + $0x7f8] sm:$0xff] }
  0xd0   :  { %7210 = vmatprep.subr.bf16.mxu0 %v7209_v45  ;;  %6844 = vmatprep.mubr.msk.f32.mxu1 %vm304_vm1, %v620_v51  ;;  %v680_v45 = vld [vmem:[#allocation9 + $0x5e0] sm:$0xff] }
  0xd1   :  { %6842 = vmatprep.mubr.msk.f32.mxu0 %vm304_vm1, %v620_v51  ;;  %v688_v51 = vld [vmem:[#allocation9 + $0x620] sm:$0xff] }
  0xd2   :  { %7253 = vmatpush1.bf16.msra.mxu1 %v7252_v52  ;;  %v7273_v52 = vpack.c.bf16 %v683_v47, %v680_v45  ;;  %v7294_v45 = vpack.c.bf16 %v887_v41, %v884_v40  ;;  %v883_v47 = vld [vmem:[#allocation9 + $0x6f0] sm:$0xff]  ;;  %v913_v30 = vld [vmem:[#allocation9 + $0x7e0] sm:$0xff]  ;;  %v922_v40 = vld [vmem:[#allocation9 + $0x828] sm:$0xff] }
  0xd3   :  { %7212 = vmatpush1.bf16.msra.mxu0 %v7211_v53  ;;  %7254 = vmatprep.subr.bf16.mxu1 %v9608_v0  ;;  %v7239_v53 = vpack.c.bf16 %v681_v49, %v678_v48  ;;  %v886_v48 = vld [vmem:[#allocation9 + $0x708] sm:$0xff] }
  0xd4   :  { %7214 = vmatprep.subr.bf16.mxu0 %v7213_v55  ;;  %v7241_v55 = vpack.c.bf16 %v688_v51, %v685_v50  ;;  %v890_v49 = vld [vmem:[#allocation9 + $0x728] sm:$0xff]  ;;  %v893_v50 = vld [vmem:[#allocation9 + $0x740] sm:$0xff] }
  0xd5   :  { %v854_v41 = vld [vmem:[%s10531_s0 + $0x40] sm:$0xf0] }
  0xd6   :  { %7256 = vmatpush1.bf16.msra.mxu1 %v7255_v61  ;;  %v7276_v61 = vpack.c.bf16 %v689_v56, %v686_v54  ;;  %v7298_v54 = vpack.c.bf16 %v893_v50, %v890_v49  ;;  %v889_v56 = vld [vmem:[#allocation9 + $0x720] sm:$0xff]  ;;  %v1106_v49 = vld [vmem:[#allocation9 + $0x850] sm:$0xff] }
  0xd7   :  { %7216 = vmatpush1.bf16.msra.mxu0 %v7215_v62  ;;  %7257 = vmatprep.subr.bf16.mxu1 %v9608_v0  ;;  %v7243_v62 = vpack.c.bf16 %v687_v58, %v684_v57  ;;  %v892_v57 = vld [vmem:[#allocation9 + $0x738] sm:$0xff] }
  0xd8   :  { %7218 = vmatprep.subr.bf16.mxu0 %v7217_v1  ;;  %v7278_v1 = vpack.c.bf16 %v863_v60, %v860_v59  ;;  %v896_v58 = vld [vmem:[#allocation9 + $0x758] sm:$0xff]  ;;  %v899_v59 = vld [vmem:[#allocation9 + $0x770] sm:$0xff] }
  0xda   :  { %7259 = vmatpush1.bf16.msra.mxu1 %v7258_v8  ;;  %v869_v8 = vld [vmem:[#allocation9 + $0x680] sm:$0xff] }
  0xdb   :  { %7220 = vmatpush1.bf16.msra.mxu0 %v7219_v9  ;;  %7260 = vmatprep.subr.bf16.mxu1 %v9608_v0  ;;  %v7323_v9 = vpack.c.bf16 %v864_v2, %v861_v63  ;;  %v7302_v63 = vpack.c.bf16 %v899_v59, %v896_v58  ;;  %v895_v2 = vld [vmem:[#allocation9 + $0x750] sm:$0xff]  ;;  %v1112_v59 = vld [vmem:[#allocation9 + $0x880] sm:$0xff] }
  0xdc   :  { %7222 = vmatprep.subr.bf16.mxu0 %v7221_v11  ;;  %v867_v11 = vld [vmem:[#allocation9 + $0x670] sm:$0xff] }
  0xdd   :  { %v7326_v23 = vpack.c.bf16 %v870_v14, %v867_v11  ;;  %v906_v11 = vld [vmem:[#allocation9 + $0x7a8] sm:$0xff]  ;;  %v908_v14 = vld [vmem:[#allocation9 + $0x7b8] sm:$0xff] }
  0xde   :  { %7262 = vmatpush1.bf16.msra.mxu1 %v7261_v17  ;;  %v622_v17 = vld [vmem:[%s10531_s0 + $0x48] sm:$0x3] }
  0xdf   :  { %7224 = vmatpush1.bf16.msra.mxu0 %v7223_v18  ;;  %7263 = vmatprep.subr.bf16.mxu1 %v9608_v0  ;;  %v7282_v18 = vpack.c.bf16 %v869_v8, %v866_v7  ;;  %v7304_v8 = vpack.c.bf16 %v898_v3, %v895_v2  ;;  %v1120_v2 = vld [vmem:[#allocation9 + $0x8c0] sm:$0xff] }
  0xe0   :  { %7226 = vmatprep.subr.bf16.mxu0 %v7225_v20  ;;  %v875_v20 = vld [vmem:[#allocation9 + $0x6b0] sm:$0xff] }
  0xe2   :  { %7265 = vmatpush1.bf16.msra.mxu1 %v7264_v25  ;;  %v873_v25 = vld [vmem:[#allocation9 + $0x6a0] sm:$0xff] }
  0xe3   :  { %7228 = vmatpush1.bf16.msra.mxu0 %v7227_v26  ;;  %7266 = vmatprep.subr.bf16.mxu1 %v9608_v0  ;;  %v7286_v26 = vpack.c.bf16 %v875_v20, %v872_v19  ;;  %v7329_v33 = vpack.c.bf16 %v876_v27, %v873_v25  ;;  %v7310_v19 = vpack.c.bf16 %v911_v15, %v908_v14  ;;  %v912_v20 = vld [vmem:[#allocation9 + $0x7d8] sm:$0xff]  ;;  %v915_v27 = vld [vmem:[#allocation9 + $0x7f0] sm:$0xff] }
  0xe4   :  { %7230 = vmatprep.subr.bf16.mxu0 %v7229_v28  ;;  %v871_v28 = vld [vmem:[#allocation9 + $0x690] sm:$0xff] }
  0xe6   :  { %7268 = vmatpush1.bf16.msra.mxu1 %v7267_v34  ;;  %v7288_v34 = vpack.c.bf16 %v874_v29, %v871_v28  ;;  %v918_v29 = vld [vmem:[#allocation9 + $0x808] sm:$0xff] }
  0xe7   :  { %7232 = vmatpush1.bf16.msra.mxu0 %v7231_v35  ;;  %7269 = vmatprep.subr.bf16.mxu1 %v9608_v0  ;;  %v879_v35 = vld [vmem:[#allocation9 + $0x6d0] sm:$0xff] }
  0xe8   :  { %7234 = vmatprep.subr.bf16.mxu0 %v7233_v37  ;;  %v882_v37 = vld [vmem:[#allocation9 + $0x6e8] sm:$0xff] }
  0xe9   :  { %v7332_v42 = vpack.c.bf16 %v882_v37, %v879_v35  ;;  %v7316_v35 = vpack.c.bf16 %v916_v31, %v913_v30  ;;  %v924_v37 = vld [vmem:[#allocation9 + $0x838] sm:$0xff]  ;;  %v1138_v30 = vld [vmem:[#allocation9 + $0x950] sm:$0xff] }
  0xea   :  { %7271 = vmatpush1.bf16.msra.mxu1 %v7270_v43  ;;  %v7292_v43 = vpack.c.bf16 %v880_v39, %v877_v38  ;;  %v919_v38 = vld [vmem:[#allocation9 + $0x810] sm:$0xff] }
  0xeb   :  { %7236 = vmatpush1.bf16.msra.mxu0 %v7235_v44  ;;  %7272 = vmatprep.subr.bf16.mxu1 %v9608_v0  ;;  %v885_v44 = vld [vmem:[#allocation9 + $0x700] sm:$0xff] }
  0xec   :  { %7238 = vmatprep.subr.bf16.mxu0 %v7237_v46  ;;  %v888_v46 = vld [vmem:[#allocation9 + $0x718] sm:$0xff] }
  0xed   :  { %v7335_v51 = vpack.c.bf16 %v888_v46, %v885_v44  ;;  %v1108_v44 = vld [vmem:[#allocation9 + $0x860] sm:$0xff]  ;;  %v7320_v46 = vpack.c.bf16 %v922_v40, %v919_v38  ;;  %v1141_v38 = vld [vmem:[#allocation9 + $0x968] sm:$0xff] }
  0xee   :  { %7274 = vmatpush1.bf16.msra.mxu1 %v7273_v52  ;;  %v7296_v52 = vpack.c.bf16 %v886_v48, %v883_v47  ;;  %v929_v47 = vrot.slane %v854_v41, 4 }
  0xef   :  { %7240 = vmatpush1.bf16.msra.mxu0 %v7239_v53  ;;  %7275 = vmatprep.subr.bf16.mxu1 %v9608_v0  ;;  %v891_v53 = vld [vmem:[#allocation9 + $0x730] sm:$0xff] }
  0xf0   :  { %7242 = vmatprep.subr.bf16.mxu0 %v7241_v55  ;;  %v894_v55 = vld [vmem:[#allocation9 + $0x748] sm:$0xff] }
  0xf1   :  { %v7338_v60 = vpack.c.bf16 %v894_v55, %v891_v53  ;;  %v1107_v53 = vld [vmem:[#allocation9 + $0x858] sm:$0xff]  ;;  %v1114_v55 = vld [vmem:[#allocation9 + $0x890] sm:$0xff] }
  0xf2   :  { %7277 = vmatpush1.bf16.msra.mxu1 %v7276_v61  ;;  %v7300_v61 = vpack.c.bf16 %v892_v57, %v889_v56 }
  0xf3   :  { %7244 = vmatpush1.bf16.msra.mxu0 %v7243_v62  ;;  %7322 = vmatprep.subr.bf16.mxu1 %v9608_v0  ;;  %v897_v62 = vld [vmem:[#allocation9 + $0x760] sm:$0xff] }
  0xf4   :  { %7279 = vmatprep.subr.bf16.mxu0 %v7278_v1  ;;  %v900_v1 = vld [vmem:[#allocation9 + $0x778] sm:$0xff] }
  0xf5   :  { %838 = vmatmul.mubr.f32.vlgmr.msra.gmra.mrb[8].mxu1 %v619_v6  ;;  %v7341_v7 = vpack.c.bf16 %v900_v1, %v897_v62  ;;  %v1113_v62 = vld [vmem:[#allocation9 + $0x888] sm:$0xff] }
  0xf6   :  { %761 = vmatmul.mubr.f32.vlgmr.msra.gmra.mrb[0].mxu0 %v619_v6  ;;  %7324 = vmatpush1.bf16.msra.mxu1 %v7323_v9  ;;  %v905_v6 = vld [vmem:[#allocation9 + $0x7a0] sm:$0xff]  ;;  %v903_v9 = vld [vmem:[#allocation9 + $0x790] sm:$0xff]  ;;  %v1117_v1 = vld [vmem:[#allocation9 + $0x8a8] sm:$0xff] }
  0xf7   :  { %7281 = vmatpush1.bf16.msra.mxu0 %v7280_v10  ;;  %6845 = vmatprep.mubr.msk.f32.mxu1 %vm304_vm1, %v622_v17  ;;  %v7306_v10 = vpack.c.bf16 %v905_v6, %v902_v5  ;;  %v7344_v16 = vpack.c.bf16 %v906_v11, %v903_v9  ;;  %v1118_v6 = vld [vmem:[#allocation9 + $0x8b0] sm:$0xff]  ;;  %v1116_v9 = vld [vmem:[#allocation9 + $0x8a0] sm:$0xff]  ;;  %v1123_v11 = vld [vmem:[#allocation9 + $0x8d8] sm:$0xff] }
  0xf8   :  { %7325 = vmatprep.subr.bf16.mxu1 %v9608_v0  ;;  %7283 = vmatprep.subr.bf16.mxu0 %v7282_v18  ;;  %v909_v18 = vld [vmem:[#allocation9 + $0x7c0] sm:$0xff] }
  0xf9   :  { %6843 = vmatprep.mubr.msk.f32.mxu0 %vm304_vm1, %v622_v17  ;;  %843 = vmatmul.mubr.f32.gmra.mrb[10].mxu1 %v621_v22  ;;  %v7308_v17 = vpack.c.bf16 %v904_v13, %v901_v12  ;;  %v7347_v25 = vpack.c.bf16 %v912_v20, %v909_v18  ;;  %v1126_v12 = vld [vmem:[#allocation9 + $0x8f0] sm:$0xff]  ;;  %v1127_v18 = vld [vmem:[#allocation9 + $0x8f8] sm:$0xff]  ;;  %v1125_v20 = vld [vmem:[#allocation9 + $0x8e8] sm:$0xff] }
  0xfa   :  { %767 = vmatmul.mubr.f32.gmra.mrb[2].mxu0 %v621_v22  ;;  %7327 = vmatpush1.bf16.msra.mxu1 %v7326_v23  ;;  %v910_v22 = vld [vmem:[#allocation9 + $0x7c8] sm:$0xff]  ;;  %v1100_v13 = vld [vmem:[%s10531_s0 + $0x68] sm:$0xff] }
  0xfb   :  { %7285 = vmatpush1.bf16.msra.mxu0 %v7284_v24  ;;  %7328 = vmatprep.subr.bf16.mxu1 %v9608_v0  ;;  %v914_v23 = vld [vmem:[#allocation9 + $0x7e8] sm:$0xff]  ;;  %v917_v24 = vld [vmem:[#allocation9 + $0x800] sm:$0xff] }
  0xfc   :  { %7287 = vmatprep.subr.bf16.mxu0 %v7286_v26  ;;  %6848 = vmatprep.mubr.msk.f32.mxu1 %vm304_vm1, %v934_v32  ;;  %v7312_v26 = vpack.c.bf16 %v910_v22, %v907_v4  ;;  %v7314_v28 = vpack.c.bf16 %v917_v24, %v914_v23  ;;  %v1129_v4 = vld [vmem:[#allocation9 + $0x908] sm:$0xff]  ;;  %v1130_v24 = vld [vmem:[#allocation9 + $0x910] sm:$0xff] }
  0xfd   :  { %6846 = vmatprep.mubr.msk.f32.mxu0 %vm304_vm1, %v934_v32  ;;  %v920_v32 = vld [vmem:[#allocation9 + $0x818] sm:$0xff] }
  0xfe   :  { %7330 = vmatpush1.bf16.msra.mxu1 %v7329_v33  ;;  %v923_v33 = vld [vmem:[#allocation9 + $0x830] sm:$0xff] }
  0xff   :  { %7289 = vmatpush1.bf16.msra.mxu0 %v7288_v34  ;;  %7331 = vmatprep.subr.bf16.mxu1 %v9608_v0  ;;  %v7350_v34 = vpack.c.bf16 %v918_v29, %v915_v27  ;;  %v7318_v39 = vpack.c.bf16 %v923_v33, %v920_v32  ;;  %v1128_v27 = vld [vmem:[#allocation9 + $0x900] sm:$0xff]  ;;  %v1135_v29 = vld [vmem:[#allocation9 + $0x938] sm:$0xff] }
 0x100   :  { %7291 = vmatprep.subr.bf16.mxu0 %v7290_v36  ;;  %v921_v36 = vld [vmem:[#allocation9 + $0x820] sm:$0xff] }
 0x101   :  { %v1136_v33 = vld [vmem:[#allocation9 + $0x940] sm:$0xff] }
 0x102   :  { %7333 = vmatpush1.bf16.msra.mxu1 %v7332_v42  ;;  %v856_v42 = vld [vmem:[%s10531_s0 + $0x50] sm:$0x3f] }
 0x103   :  { %7293 = vmatpush1.bf16.msra.mxu0 %v7292_v43  ;;  %7334 = vmatprep.subr.bf16.mxu1 %v9608_v0  ;;  %v1105_v43 = vld [vmem:[#allocation9 + $0x848] sm:$0xff]  ;;  %v930_v48 = vrot.slane %v856_v42, 4  ;;  %v1142_v42 = vld [vmem:[#allocation9 + $0x970] sm:$0xff] }
 0x104   :  { %7295 = vmatprep.subr.bf16.mxu0 %v7294_v45  ;;  %v7353_v45 = vpack.c.bf16 %v924_v37, %v921_v36  ;;  %v7355_v50 = vpack.c.bf16 %v1108_v44, %v1105_v43  ;;  %v1134_v36 = vld [vmem:[#allocation9 + $0x930] sm:$0xff]  ;;  %v1137_v37 = vld [vmem:[#allocation9 + $0x948] sm:$0xff] }
 0x105   :  { %v931_v56 = vsel %vm295_vm0, %v929_v47, %v930_v48  ;;  %v7377_v41 = vpack.c.bf16 %v1137_v37, %v1134_v36  ;;  %v1145_v44 = vld [vmem:[#allocation9 + $0x988] sm:$0xff]  ;;  %v1147_v47 = vld [vmem:[#allocation9 + $0x998] sm:$0xff]  ;;  %v1337_v36 = vld [vmem:[%s10531_s0 + $0x88] sm:$0x3f] }
 0x106   :  { %7336 = vmatpush1.bf16.msra.mxu1 %v7335_v51  ;;  %v1109_v51 = vld [vmem:[#allocation9 + $0x868] sm:$0xff] }
 0x107   :  { %7297 = vmatpush1.bf16.msra.mxu0 %v7296_v52  ;;  %7337 = vmatprep.subr.bf16.mxu1 %v9608_v0  ;;  %v1104_v52 = vld [vmem:[#allocation9 + $0x840] sm:$0xff]  ;;  %v7400_v57 = vpack.c.bf16 %v1109_v51, %v1106_v49  ;;  %v7418_v49 = vpack.c.bf16 %v1145_v44, %v1142_v42  ;;  %v1350_v37 = vld [vmem:[#allocation9 + $0xaa8] sm:$0xff]  ;;  %v1352_v42 = vld [vmem:[#allocation9 + $0xab8] sm:$0xff] }
 0x108   :  { %7299 = vmatprep.subr.bf16.mxu0 %v7298_v54  ;;  %v1111_v54 = vld [vmem:[#allocation9 + $0x878] sm:$0xff]  ;;  %v7357_v58 = vpack.c.bf16 %v1107_v53, %v1104_v52  ;;  %v1148_v51 = vld [vmem:[#allocation9 + $0x9a0] sm:$0xff] }
 0x109   :  { %v1151_v53 = vld [vmem:[#allocation9 + $0x9b8] sm:$0xff] }
 0x10a   :  { %7339 = vmatpush1.bf16.msra.mxu1 %v7338_v60  ;;  %v1115_v60 = vld [vmem:[#allocation9 + $0x898] sm:$0xff] }
 0x10b   :  { %7301 = vmatpush1.bf16.msra.mxu0 %v7300_v61  ;;  %7340 = vmatprep.subr.bf16.mxu1 %v9608_v0  ;;  %v1110_v61 = vld [vmem:[#allocation9 + $0x870] sm:$0xff]  ;;  %v7403_v3 = vpack.c.bf16 %v1115_v60, %v1112_v59 }
 0x10c   :  { %7303 = vmatprep.subr.bf16.mxu0 %v7302_v63  ;;  %v7359_v63 = vpack.c.bf16 %v1114_v55, %v1111_v54  ;;  %v7361_v5 = vpack.c.bf16 %v1113_v62, %v1110_v61  ;;  %v1146_v54 = vld [vmem:[#allocation9 + $0x990] sm:$0xff]  ;;  %v1149_v55 = vld [vmem:[#allocation9 + $0x9a8] sm:$0xff] }
 0x10d   :  { %v7385_v59 = vpack.c.bf16 %v1149_v55, %v1146_v54  ;;  %v1154_v60 = vld [vmem:[#allocation9 + $0x9d0] sm:$0xff]  ;;  %v1157_v62 = vld [vmem:[#allocation9 + $0x9e8] sm:$0xff]  ;;  %v1361_v55 = vld [vmem:[#allocation9 + $0xb00] sm:$0xff] }
 0x10e   :  { %7342 = vmatpush1.bf16.msra.mxu1 %v7341_v7  ;;  %v7363_v7 = vpack.c.bf16 %v1120_v2, %v1117_v1  ;;  %v1155_v1 = vld [vmem:[#allocation9 + $0x9d8] sm:$0xff]  ;;  %v1358_v54 = vld [vmem:[#allocation9 + $0xae8] sm:$0xff] }
 0x10f   :  { %7305 = vmatpush1.bf16.msra.mxu0 %v7304_v8  ;;  %7343 = vmatprep.subr.bf16.mxu1 %v9608_v0  ;;  %v1121_v8 = vld [vmem:[#allocation9 + $0x8c8] sm:$0xff]  ;;  %v1159_v2 = vld [vmem:[#allocation9 + $0x9f8] sm:$0xff] }
 0x110   :  { %7307 = vmatprep.subr.bf16.mxu0 %v7306_v10  ;;  %v1119_v10 = vld [vmem:[#allocation9 + $0x8b8] sm:$0xff]  ;;  %v7406_v14 = vpack.c.bf16 %v1121_v8, %v1118_v6 }
 0x111   :  { %v7365_v15 = vpack.c.bf16 %v1119_v10, %v1116_v9  ;;  %v1163_v9 = vld [vmem:[#allocation9 + $0xa18] sm:$0xff]  ;;  %v1158_v10 = vld [vmem:[#allocation9 + $0x9f0] sm:$0xff] }
 0x112   :  { %7345 = vmatpush1.bf16.msra.mxu1 %v7344_v16  ;;  %v1124_v16 = vld [vmem:[#allocation9 + $0x8e0] sm:$0xff] }
 0x113   :  { %7309 = vmatpush1.bf16.msra.mxu0 %v7308_v17  ;;  %7346 = vmatprep.subr.bf16.mxu1 %v9608_v0  ;;  %v7367_v17 = vpack.c.bf16 %v1126_v12, %v1123_v11  ;;  %v7409_v22 = vpack.c.bf16 %v1127_v18, %v1124_v16  ;;  %v1161_v11 = vld [vmem:[#allocation9 + $0xa08] sm:$0xff]  ;;  %v1166_v16 = vld [vmem:[#allocation9 + $0xa30] sm:$0xff] }
 0x114   :  { %7311 = vmatprep.subr.bf16.mxu0 %v7310_v19  ;;  %v1122_v19 = vld [vmem:[#allocation9 + $0x8d0] sm:$0xff]  ;;  %v1165_v12 = vld [vmem:[#allocation9 + $0xa28] sm:$0xff] }
 0x115   :  { %v7369_v23 = vpack.c.bf16 %v1125_v20, %v1122_v19  ;;  %v1169_v18 = vld [vmem:[#allocation9 + $0xa48] sm:$0xff]  ;;  %v1164_v19 = vld [vmem:[#allocation9 + $0xa20] sm:$0xff]  ;;  %v1167_v20 = vld [vmem:[#allocation9 + $0xa38] sm:$0xff] }
 0x116   :  { %7348 = vmatpush1.bf16.msra.mxu1 %v7347_v25 }
 0x117   :  { %7313 = vmatpush1.bf16.msra.mxu0 %v7312_v26  ;;  %7349 = vmatprep.subr.bf16.mxu1 %v9608_v0  ;;  %v1133_v26 = vld [vmem:[#allocation9 + $0x928] sm:$0xff] }
 0x118   :  { %7315 = vmatprep.subr.bf16.mxu0 %v7314_v28  ;;  %v1131_v28 = vld [vmem:[#allocation9 + $0x918] sm:$0xff]  ;;  %v7412_v31 = vpack.c.bf16 %v1133_v26, %v1130_v24  ;;  %v1341_v24 = vld [vmem:[#allocation9 + $0xa60] sm:$0xff] }
 0x119   :  { %v7373_v32 = vpack.c.bf16 %v1131_v28, %v1128_v27  ;;  %v1344_v26 = vld [vmem:[#allocation9 + $0xa78] sm:$0xff]  ;;  %v1339_v27 = vld [vmem:[#allocation9 + $0xa50] sm:$0xff]  ;;  %v1342_v28 = vld [vmem:[#allocation9 + $0xa68] sm:$0xff] }
 0x11a   :  { %7351 = vmatpush1.bf16.msra.mxu1 %v7350_v34  ;;  %v7375_v34 = vpack.c.bf16 %v1138_v30, %v1135_v29  ;;  %v1099_v29 = vld [vmem:[%s10531_s0 + $0x60] sm:$0xff] }
 0x11b   :  { %7317 = vmatpush1.bf16.msra.mxu0 %v7316_v35  ;;  %7352 = vmatprep.subr.bf16.mxu1 %v9608_v0  ;;  %v1139_v35 = vld [vmem:[#allocation9 + $0x958] sm:$0xff]  ;;  %v1346_v30 = vld [vmem:[#allocation9 + $0xa88] sm:$0xff] }
 0x11c   :  { %7319 = vmatprep.subr.bf16.mxu0 %v7318_v39  ;;  %v1144_v39 = vld [vmem:[#allocation9 + $0x980] sm:$0xff]  ;;  %v7415_v40 = vpack.c.bf16 %v1139_v35, %v1136_v33  ;;  %v7434_v33 = vpack.c.bf16 %v1342_v28, %v1339_v27  ;;  %v1378_v27 = vld [vmem:[#allocation9 + $0xb88] sm:$0xff] }
 0x11d   :  { %v7379_v43 = vpack.c.bf16 %v1144_v39, %v1141_v38  ;;  %v1335_v35 = vld [vmem:[%s10531_s0 + $0x78] sm:$0xf0]  ;;  %v1348_v39 = vld [vmem:[#allocation9 + $0xa98] sm:$0xff]  ;;  %v1382_v28 = vld [vmem:[#allocation9 + $0xba8] sm:$0xff] }
 0x11e   :  { %7354 = vmatpush1.bf16.msra.mxu1 %v7353_v45  ;;  %v1140_v45 = vld [vmem:[#allocation9 + $0x960] sm:$0xff]  ;;  %v1412_v44 = vrot.slane %v1335_v35, 4 }
 0x11f   :  { %7321 = vmatpush1.bf16.msra.mxu0 %v7320_v46  ;;  %7399 = vmatprep.subr.bf16.mxu1 %v9608_v0  ;;  %v1143_v46 = vld [vmem:[#allocation9 + $0x978] sm:$0xff]  ;;  %v1345_v38 = vld [vmem:[#allocation9 + $0xa80] sm:$0xff] }
 0x120   :  { %7356 = vmatprep.subr.bf16.mxu0 %v7355_v50  ;;  %v7381_v50 = vpack.c.bf16 %v1143_v46, %v1140_v45  ;;  %v9902_v45 = vrot.slane %v1337_v36, 4  ;;  %v1101_v46 = vld [vmem:[%s10531_s0 + $0x70] sm:$0x3]  ;;  %v1381_v35 = vld [vmem:[#allocation9 + $0xba0] sm:$0xff] }
 0x121   :  { %1083 = vmatmul.mubr.f32.vlgmr.msra.gmra.mrb[12].mxu1 %v931_v56  ;;  %v1384_v36 = vld [vmem:[#allocation9 + $0xbb8] sm:$0xff] }
 0x122   :  { %1006 = vmatmul.mubr.f32.vlgmr.msra.gmra.mrb[0].mxu0 %v931_v56  ;;  %7401 = vmatpush1.bf16.msra.mxu1 %v7400_v57  ;;  %v1153_v56 = vld [vmem:[#allocation9 + $0x9c8] sm:$0xff]  ;;  %v1156_v57 = vld [vmem:[#allocation9 + $0x9e0] sm:$0xff] }
 0x123   :  { %7358 = vmatpush1.bf16.msra.mxu0 %v7357_v58  ;;  %6849 = vmatprep.mubr.msk.f32.mxu1 %vm304_vm1, %v9841_v21  ;;  %v7421_v58 = vpack.c.bf16 %v1151_v53, %v1148_v51  ;;  %v7387_v61 = vpack.c.bf16 %v1156_v57, %v1153_v56  ;;  %v1356_v51 = vld [vmem:[#allocation9 + $0xad8] sm:$0xff]  ;;  %v1354_v53 = vld [vmem:[#allocation9 + $0xac8] sm:$0xff]  ;;  %v1414_v56 = vsel %vm295_vm0, %v1412_v44, %v9902_v45  ;;  %v1387_v44 = vld [vmem:[#allocation9 + $0xbd0] sm:$0xff] }
 0x124   :  { %7402 = vmatprep.subr.bf16.mxu1 %v9608_v0  ;;  %7360 = vmatprep.subr.bf16.mxu0 %v7359_v63  ;;  %v1152_v63 = vld [vmem:[#allocation9 + $0x9c0] sm:$0xff] }
 0x125   :  { %6847 = vmatprep.mubr.msk.f32.mxu0 %vm304_vm1, %v9841_v21  ;;  %1088 = vmatmul.mubr.f32.gmra.mrb[14].mxu1 %v930_v48  ;;  %v1132_v21 = vld [vmem:[#allocation9 + $0x920] sm:$0xff]  ;;  %v7389_v6 = vpack.c.bf16 %v1155_v1, %v1152_v63  ;;  %v1360_v63 = vld [vmem:[#allocation9 + $0xaf8] sm:$0xff] }
 0x126   :  { %1012 = vmatmul.mubr.f32.gmra.mrb[2].mxu0 %v930_v48  ;;  %7404 = vmatpush1.bf16.msra.mxu1 %v7403_v3  ;;  %v7371_v25 = vpack.c.bf16 %v1132_v21, %v1129_v4  ;;  %v1150_v48 = vld [vmem:[#allocation9 + $0x9b0] sm:$0xff]  ;;  %v1340_v4 = vld [vmem:[#allocation9 + $0xa58] sm:$0xff] }
 0x127   :  { %7362 = vmatpush1.bf16.msra.mxu0 %v7361_v5  ;;  %7405 = vmatprep.subr.bf16.mxu1 %v9608_v0  ;;  %v7383_v52 = vpack.c.bf16 %v1150_v48, %v1147_v47  ;;  %v1162_v3 = vld [vmem:[#allocation9 + $0xa10] sm:$0xff]  ;;  %v7424_v5 = vpack.c.bf16 %v1157_v62, %v1154_v60  ;;  %v7438_v48 = vpack.c.bf16 %v1348_v39, %v1345_v38  ;;  %v1357_v62 = vld [vmem:[#allocation9 + $0xae0] sm:$0xff]  ;;  %v1364_v1 = vld [vmem:[#allocation9 + $0xb18] sm:$0xff] }
 0x128   :  { %7364 = vmatprep.subr.bf16.mxu0 %v7363_v7  ;;  %6852 = vmatprep.mubr.msk.f32.mxu1 %vm304_vm1, %v1100_v13  ;;  %v1160_v7 = vld [vmem:[#allocation9 + $0xa00] sm:$0xff]  ;;  %v7391_v8 = vpack.c.bf16 %v1162_v3, %v1159_v2  ;;  %v1343_v21 = vld [vmem:[#allocation9 + $0xa70] sm:$0xff]  ;;  %v7444_v60 = vpack.c.bf16 %v1361_v55, %v1358_v54  ;;  %v1396_v55 = vld [vmem:[#allocation9 + $0xc18] sm:$0xff] }
 0x129   :  { %6850 = vmatprep.mubr.msk.f32.mxu0 %vm304_vm1, %v1100_v13  ;;  %v1168_v13 = vld [vmem:[#allocation9 + $0xa40] sm:$0xff]  ;;  %v1367_v2 = vld [vmem:[#allocation9 + $0xb30] sm:$0xff] }
 0x12a   :  { %7407 = vmatpush1.bf16.msra.mxu1 %v7406_v14  ;;  %v7427_v14 = vpack.c.bf16 %v1163_v9, %v1160_v7  ;;  %v7448_v7 = vpack.c.bf16 %v1367_v2, %v1364_v1  ;;  %v1363_v9 = vld [vmem:[#allocation9 + $0xb10] sm:$0xff]  ;;  %v1393_v54 = vld [vmem:[#allocation9 + $0xc00] sm:$0xff]  ;;  %v1402_v1 = vld [vmem:[#allocation9 + $0xc48] sm:$0xff] }
 0x12b   :  { %7366 = vmatpush1.bf16.msra.mxu0 %v7365_v15  ;;  %7408 = vmatprep.subr.bf16.mxu1 %v9608_v0  ;;  %v7393_v15 = vpack.c.bf16 %v1161_v11, %v1158_v10  ;;  %v1366_v10 = vld [vmem:[#allocation9 + $0xb28] sm:$0xff]  ;;  %v1391_v38 = vld [vmem:[#allocation9 + $0xbf0] sm:$0xff]  ;;  %v1334_v2 = vld [vmem:[%s10531_s0 + $0x70] sm:$0xf0] }
 0x12c   :  { %7368 = vmatprep.subr.bf16.mxu0 %v7367_v17  ;;  %v7395_v17 = vpack.c.bf16 %v1168_v13, %v1165_v12  ;;  %v1370_v11 = vld [vmem:[#allocation9 + $0xb48] sm:$0xff]  ;;  %v1373_v12 = vld [vmem:[#allocation9 + $0xb60] sm:$0xff] }
 0x12e   :  { %7410 = vmatpush1.bf16.msra.mxu1 %v7409_v22  ;;  %v7430_v22 = vpack.c.bf16 %v1169_v18, %v1166_v16  ;;  %v7452_v16 = vpack.c.bf16 %v1373_v12, %v1370_v11  ;;  %v1369_v18 = vld [vmem:[#allocation9 + $0xb40] sm:$0xff]  ;;  %v1409_v11 = vrot.slane %v1334_v2, 4  ;;  %v1617_v2 = vld [vmem:[#allocation9 + $0xd68] sm:$0xff] }
 0x12f   :  { %7370 = vmatpush1.bf16.msra.mxu0 %v7369_v23  ;;  %7411 = vmatprep.subr.bf16.mxu1 %v9608_v0  ;;  %v7397_v23 = vpack.c.bf16 %v1167_v20, %v1164_v19  ;;  %v1372_v19 = vld [vmem:[#allocation9 + $0xb58] sm:$0xff] }
 0x130   :  { %7372 = vmatprep.subr.bf16.mxu0 %v7371_v25  ;;  %v7432_v25 = vpack.c.bf16 %v1343_v21, %v1340_v4  ;;  %v1376_v20 = vld [vmem:[#allocation9 + $0xb78] sm:$0xff]  ;;  %v1379_v4 = vld [vmem:[#allocation9 + $0xb90] sm:$0xff] }
 0x132   :  { %7413 = vmatpush1.bf16.msra.mxu1 %v7412_v31  ;;  %v1349_v31 = vld [vmem:[#allocation9 + $0xaa0] sm:$0xff] }
 0x133   :  { %7374 = vmatpush1.bf16.msra.mxu0 %v7373_v32  ;;  %7414 = vmatprep.subr.bf16.mxu1 %v9608_v0  ;;  %v7477_v32 = vpack.c.bf16 %v1344_v26, %v1341_v24  ;;  %v7456_v24 = vpack.c.bf16 %v1379_v4, %v1376_v20  ;;  %v1375_v26 = vld [vmem:[#allocation9 + $0xb70] sm:$0xff] }
 0x134   :  { %7376 = vmatprep.subr.bf16.mxu0 %v7375_v34  ;;  %v1347_v34 = vld [vmem:[#allocation9 + $0xa90] sm:$0xff] }
 0x135   :  { %v7480_v47 = vpack.c.bf16 %v1350_v37, %v1347_v34  ;;  %v1386_v34 = vld [vmem:[#allocation9 + $0xbc8] sm:$0xff]  ;;  %v1388_v37 = vld [vmem:[#allocation9 + $0xbd8] sm:$0xff]  ;;  %v1594_v20 = vld [vmem:[#allocation9 + $0xcb0] sm:$0xff] }
 0x136   :  { %7416 = vmatpush1.bf16.msra.mxu1 %v7415_v40  ;;  %v1102_v40 = vld [vmem:[%s10531_s0 + $0x78] sm:$0x3] }
 0x137   :  { %7378 = vmatpush1.bf16.msra.mxu0 %v7377_v41  ;;  %7417 = vmatprep.subr.bf16.mxu1 %v9608_v0  ;;  %v7436_v41 = vpack.c.bf16 %v1349_v31, %v1346_v30  ;;  %v7458_v31 = vpack.c.bf16 %v1378_v27, %v1375_v26  ;;  %v1590_v26 = vld [vmem:[#allocation9 + $0xc90] sm:$0xff]  ;;  %v1593_v27 = vld [vmem:[#allocation9 + $0xca8] sm:$0xff] }
 0x138   :  { %7380 = vmatprep.subr.bf16.mxu0 %v7379_v43  ;;  %v1355_v43 = vld [vmem:[#allocation9 + $0xad0] sm:$0xff] }
 0x13a   :  { %7419 = vmatpush1.bf16.msra.mxu1 %v7418_v49  ;;  %v1353_v49 = vld [vmem:[#allocation9 + $0xac0] sm:$0xff] }
 0x13b   :  { %7382 = vmatpush1.bf16.msra.mxu0 %v7381_v50  ;;  %7420 = vmatprep.subr.bf16.mxu1 %v9608_v0  ;;  %v7440_v50 = vpack.c.bf16 %v1355_v43, %v1352_v42  ;;  %v7483_v57 = vpack.c.bf16 %v1356_v51, %v1353_v49  ;;  %v7464_v42 = vpack.c.bf16 %v1391_v38, %v1388_v37  ;;  %v1392_v43 = vld [vmem:[#allocation9 + $0xbf8] sm:$0xff]  ;;  %v1395_v51 = vld [vmem:[#allocation9 + $0xc10] sm:$0xff] }
 0x13c   :  { %7384 = vmatprep.subr.bf16.mxu0 %v7383_v52  ;;  %v1351_v52 = vld [vmem:[#allocation9 + $0xab0] sm:$0xff]  ;;  %v1599_v37 = vld [vmem:[#allocation9 + $0xcd8] sm:$0xff] }
 0x13d   :  { %v1603_v38 = vld [vmem:[#allocation9 + $0xcf8] sm:$0xff] }
 0x13e   :  { %7422 = vmatpush1.bf16.msra.mxu1 %v7421_v58  ;;  %v7442_v58 = vpack.c.bf16 %v1354_v53, %v1351_v52  ;;  %v1398_v53 = vld [vmem:[#allocation9 + $0xc28] sm:$0xff] }
 0x13f   :  { %7386 = vmatpush1.bf16.msra.mxu0 %v7385_v59  ;;  %7423 = vmatprep.subr.bf16.mxu1 %v9608_v0  ;;  %v1359_v59 = vld [vmem:[#allocation9 + $0xaf0] sm:$0xff] }
 0x140   :  { %7388 = vmatprep.subr.bf16.mxu0 %v7387_v61  ;;  %v1362_v61 = vld [vmem:[#allocation9 + $0xb08] sm:$0xff] }
 0x141   :  { %v7486_v3 = vpack.c.bf16 %v1362_v61, %v1359_v59  ;;  %v7470_v59 = vpack.c.bf16 %v1396_v55, %v1393_v54  ;;  %v1404_v61 = vld [vmem:[#allocation9 + $0xc58] sm:$0xff]  ;;  %v1613_v54 = vld [vmem:[#allocation9 + $0xd48] sm:$0xff]  ;;  %v1608_v55 = vld [vmem:[#allocation9 + $0xd20] sm:$0xff] }
 0x142   :  { %7425 = vmatpush1.bf16.msra.mxu1 %v7424_v5  ;;  %v7446_v5 = vpack.c.bf16 %v1360_v63, %v1357_v62  ;;  %v1399_v62 = vld [vmem:[#allocation9 + $0xc30] sm:$0xff] }
 0x143   :  { %7390 = vmatpush1.bf16.msra.mxu0 %v7389_v6  ;;  %7426 = vmatprep.subr.bf16.mxu1 %v9608_v0  ;;  %v1365_v6 = vld [vmem:[#allocation9 + $0xb20] sm:$0xff] }
 0x144   :  { %7392 = vmatprep.subr.bf16.mxu0 %v7391_v8  ;;  %v1368_v8 = vld [vmem:[#allocation9 + $0xb38] sm:$0xff] }
 0x145   :  { %v7489_v13 = vpack.c.bf16 %v1368_v8, %v1365_v6  ;;  %v1585_v6 = vld [vmem:[#allocation9 + $0xc68] sm:$0xff] }
 0x146   :  { %7428 = vmatpush1.bf16.msra.mxu1 %v7427_v14  ;;  %v7450_v14 = vpack.c.bf16 %v1366_v10, %v1363_v9  ;;  %v7474_v10 = vpack.c.bf16 %v1402_v1, %v1399_v62  ;;  %v1614_v1 = vld [vmem:[#allocation9 + $0xd50] sm:$0xff] }
 0x147   :  { %7394 = vmatpush1.bf16.msra.mxu0 %v7393_v15  ;;  %7429 = vmatprep.subr.bf16.mxu1 %v9608_v0  ;;  %v1371_v15 = vld [vmem:[#allocation9 + $0xb50] sm:$0xff] }
 0x148   :  { %7396 = vmatprep.subr.bf16.mxu0 %v7395_v17  ;;  %v1374_v17 = vld [vmem:[#allocation9 + $0xb68] sm:$0xff] }
 0x149   :  { %v7492_v21 = vpack.c.bf16 %v1374_v17, %v1371_v15  ;;  %v1589_v15 = vld [vmem:[#allocation9 + $0xc88] sm:$0xff]  ;;  %v1587_v17 = vld [vmem:[#allocation9 + $0xc78] sm:$0xff] }
 0x14a   :  { %7431 = vmatpush1.bf16.msra.mxu1 %v7430_v22  ;;  %v7454_v22 = vpack.c.bf16 %v1372_v19, %v1369_v18  ;;  %v1591_v19 = vld [vmem:[#allocation9 + $0xc98] sm:$0xff] }
 0x14b   :  { %7398 = vmatpush1.bf16.msra.mxu0 %v7397_v23  ;;  %7476 = vmatprep.subr.bf16.mxu1 %v9608_v0  ;;  %v1377_v23 = vld [vmem:[#allocation9 + $0xb80] sm:$0xff] }
 0x14c   :  { %7433 = vmatprep.subr.bf16.mxu0 %v7432_v25  ;;  %v1380_v25 = vld [vmem:[#allocation9 + $0xb98] sm:$0xff] }
 0x14d   :  { %1318 = vmatmul.mubr.f32.vlgmr.msra.gmra.mrb[16].mxu1 %v1099_v29  ;;  %v7495_v30 = vpack.c.bf16 %v1380_v25, %v1377_v23  ;;  %v1595_v25 = vld [vmem:[#allocation9 + $0xcb8] sm:$0xff] }
 0x14e   :  { %1241 = vmatmul.mubr.f32.vlgmr.msra.gmra.mrb[0].mxu0 %v1099_v29  ;;  %7478 = vmatpush1.bf16.msra.mxu1 %v7477_v32  ;;  %v1385_v29 = vld [vmem:[#allocation9 + $0xbc0] sm:$0xff]  ;;  %v1383_v32 = vld [vmem:[#allocation9 + $0xbb0] sm:$0xff] }
 0x14f   :  { %7435 = vmatpush1.bf16.msra.mxu0 %v7434_v33  ;;  %6853 = vmatprep.mubr.msk.f32.mxu1 %vm304_vm1, %v1102_v40  ;;  %v7460_v33 = vpack.c.bf16 %v1385_v29, %v1382_v28  ;;  %v7498_v39 = vpack.c.bf16 %v1386_v34, %v1383_v32  ;;  %v7513_v28 = vpack.c.bf16 %v1594_v20, %v1591_v19  ;;  %v1597_v29 = vld [vmem:[#allocation9 + $0xcc8] sm:$0xff]  ;;  %v1628_v19 = vld [vmem:[#allocation9 + $0xdc0] sm:$0xff] }
 0x150   :  { %7479 = vmatprep.subr.bf16.mxu1 %v9608_v0  ;;  %7437 = vmatprep.subr.bf16.mxu0 %v7436_v41  ;;  %v1389_v41 = vld [vmem:[#allocation9 + $0xbe0] sm:$0xff]  ;;  %v7515_v32 = vpack.c.bf16 %v1593_v27, %v1590_v26  ;;  %v1634_v27 = vld [vmem:[#allocation9 + $0xdf0] sm:$0xff] }
 0x151   :  { %6851 = vmatprep.mubr.msk.f32.mxu0 %vm304_vm1, %v1102_v40  ;;  %1323 = vmatmul.mubr.f32.gmra.mrb[18].mxu1 %v1101_v46  ;;  %v7462_v40 = vpack.c.bf16 %v1384_v36, %v1381_v35  ;;  %v7501_v49 = vpack.c.bf16 %v1392_v43, %v1389_v41  ;;  %v1601_v35 = vld [vmem:[#allocation9 + $0xce8] sm:$0xff]  ;;  %v1596_v36 = vld [vmem:[#allocation9 + $0xcc0] sm:$0xff] }
 0x152   :  { %1247 = vmatmul.mubr.f32.gmra.mrb[2].mxu0 %v1101_v46  ;;  %7481 = vmatpush1.bf16.msra.mxu1 %v7480_v47  ;;  %v1390_v46 = vld [vmem:[#allocation9 + $0xbe8] sm:$0xff]  ;;  %v1604_v43 = vld [vmem:[#allocation9 + $0xd00] sm:$0xff] }
 0x153   :  { %7439 = vmatpush1.bf16.msra.mxu0 %v7438_v48  ;;  %7482 = vmatprep.subr.bf16.mxu1 %v9608_v0  ;;  %v1394_v47 = vld [vmem:[#allocation9 + $0xc08] sm:$0xff]  ;;  %v1397_v48 = vld [vmem:[#allocation9 + $0xc20] sm:$0xff] }
 0x154   :  { %7441 = vmatprep.subr.bf16.mxu0 %v7440_v50  ;;  %6856 = vmatprep.mubr.msk.f32.mxu1 %vm304_vm1, %v1414_v56  ;;  %v7466_v50 = vpack.c.bf16 %v1390_v46, %v1387_v44  ;;  %v7468_v52 = vpack.c.bf16 %v1397_v48, %v1394_v47  ;;  %v1607_v46 = vld [vmem:[#allocation9 + $0xd18] sm:$0xff]  ;;  %v1602_v47 = vld [vmem:[#allocation9 + $0xcf0] sm:$0xff]  ;;  %v1605_v48 = vld [vmem:[#allocation9 + $0xd08] sm:$0xff] }
 0x155   :  { %6854 = vmatprep.mubr.msk.f32.mxu0 %vm304_vm1, %v1414_v56  ;;  %v1400_v56 = vld [vmem:[#allocation9 + $0xc38] sm:$0xff] }
 0x156   :  { %7484 = vmatpush1.bf16.msra.mxu1 %v7483_v57  ;;  %v1403_v57 = vld [vmem:[#allocation9 + $0xc50] sm:$0xff] }
 0x157   :  { %7443 = vmatpush1.bf16.msra.mxu0 %v7442_v58  ;;  %7485 = vmatprep.subr.bf16.mxu1 %v9608_v0  ;;  %v7504_v58 = vpack.c.bf16 %v1398_v53, %v1395_v51  ;;  %v7472_v63 = vpack.c.bf16 %v1403_v57, %v1400_v56  ;;  %v7523_v51 = vpack.c.bf16 %v1605_v48, %v1602_v47  ;;  %v1611_v56 = vld [vmem:[#allocation9 + $0xd38] sm:$0xff]  ;;  %v1649_v48 = vld [vmem:[#allocation9 + $0xe68] sm:$0xff] }
 0x158   :  { %7445 = vmatprep.subr.bf16.mxu0 %v7444_v60  ;;  %v1401_v60 = vld [vmem:[#allocation9 + $0xc40] sm:$0xff]  ;;  %v1615_v57 = vld [vmem:[#allocation9 + $0xd58] sm:$0xff] }
 0x159   :  { %v7507_v9 = vpack.c.bf16 %v1404_v61, %v1401_v60  ;;  %v7527_v60 = vpack.c.bf16 %v1611_v56, %v1608_v55  ;;  %v1616_v61 = vld [vmem:[#allocation9 + $0xd60] sm:$0xff] }
 0x15a   :  { %7487 = vmatpush1.bf16.msra.mxu1 %v7486_v3  ;;  %v1336_v3 = vld [vmem:[%s10531_s0 + $0x80] sm:$0x3f] }
 0x15b   :  { %7447 = vmatpush1.bf16.msra.mxu0 %v7446_v5  ;;  %7488 = vmatprep.subr.bf16.mxu1 %v9608_v0  ;;  %v1410_v12 = vrot.slane %v1336_v3, 4  ;;  %v1621_v3 = vld [vmem:[#allocation9 + $0xd88] sm:$0xff] }
 0x15c   :  { %7449 = vmatprep.subr.bf16.mxu0 %v7448_v7  ;;  %v1588_v7 = vld [vmem:[#allocation9 + $0xc80] sm:$0xff] }
 0x15e   :  { %7490 = vmatpush1.bf16.msra.mxu1 %v7489_v13  ;;  %v1586_v13 = vld [vmem:[#allocation9 + $0xc70] sm:$0xff] }
 0x15f   :  { %7451 = vmatpush1.bf16.msra.mxu0 %v7450_v14  ;;  %7491 = vmatprep.subr.bf16.mxu1 %v9608_v0  ;;  %v7509_v14 = vpack.c.bf16 %v1588_v7, %v1585_v6  ;;  %v1624_v6 = vld [vmem:[#allocation9 + $0xda0] sm:$0xff] }
 0x160   :  { %7453 = vmatprep.subr.bf16.mxu0 %v7452_v16  ;;  %v1584_v16 = vld [vmem:[#allocation9 + $0xc60] sm:$0xff] }
 0x161   :  { %v7511_v23 = vpack.c.bf16 %v1587_v17, %v1584_v16 }
 0x162   :  { %7493 = vmatpush1.bf16.msra.mxu1 %v7492_v21  ;;  %v1411_v21 = vsel %vm295_vm0, %v1409_v11, %v1410_v12  ;;  %v1625_v11 = vld [vmem:[#allocation9 + $0xda8] sm:$0xff] }
 0x163   :  { %7455 = vmatpush1.bf16.msra.mxu0 %v7454_v22  ;;  %7494 = vmatprep.subr.bf16.mxu1 %v9608_v0  ;;  %v7554_v22 = vpack.c.bf16 %v1589_v15, %v1586_v13  ;;  %v1623_v13 = vld [vmem:[#allocation9 + $0xd98] sm:$0xff]  ;;  %v1630_v15 = vld [vmem:[#allocation9 + $0xdd0] sm:$0xff] }
 0x164   :  { %7457 = vmatprep.subr.bf16.mxu0 %v7456_v24  ;;  %v1592_v24 = vld [vmem:[#allocation9 + $0xca0] sm:$0xff] }
 0x166   :  { %7496 = vmatpush1.bf16.msra.mxu1 %v7495_v30  ;;  %v1600_v30 = vld [vmem:[#allocation9 + $0xce0] sm:$0xff] }
 0x167   :  { %7459 = vmatpush1.bf16.msra.mxu0 %v7458_v31  ;;  %7497 = vmatprep.subr.bf16.mxu1 %v9608_v0  ;;  %v7557_v31 = vpack.c.bf16 %v1595_v25, %v1592_v24  ;;  %v7517_v34 = vpack.c.bf16 %v1600_v30, %v1597_v29  ;;  %v1636_v24 = vld [vmem:[#allocation9 + $0xe00] sm:$0xff]  ;;  %v1637_v29 = vld [vmem:[#allocation9 + $0xe08] sm:$0xff] }
 0x168   :  { %7461 = vmatprep.subr.bf16.mxu0 %v7460_v33  ;;  %v1598_v33 = vld [vmem:[#allocation9 + $0xcd0] sm:$0xff]  ;;  %v1632_v30 = vld [vmem:[#allocation9 + $0xde0] sm:$0xff] }
 0x169   :  { %v7560_v41 = vpack.c.bf16 %v1601_v35, %v1598_v33  ;;  %v1642_v33 = vld [vmem:[#allocation9 + $0xe30] sm:$0xff] }
 0x16a   :  { %7499 = vmatpush1.bf16.msra.mxu1 %v7498_v39  ;;  %v1606_v39 = vld [vmem:[#allocation9 + $0xd10] sm:$0xff] }
 0x16b   :  { %7463 = vmatpush1.bf16.msra.mxu0 %v7462_v40  ;;  %7500 = vmatprep.subr.bf16.mxu1 %v9608_v0  ;;  %v1580_v40 = vld [vmem:[%s10531_s0 + $0x98] sm:$0xff]  ;;  %v7521_v44 = vpack.c.bf16 %v1606_v39, %v1603_v38  ;;  %v1643_v38 = vld [vmem:[#allocation9 + $0xe38] sm:$0xff]  ;;  %v1638_v39 = vld [vmem:[#allocation9 + $0xe10] sm:$0xff] }
 0x16c   :  { %7465 = vmatprep.subr.bf16.mxu0 %v7464_v42  ;;  %v7519_v42 = vpack.c.bf16 %v1599_v37, %v1596_v36  ;;  %v1640_v36 = vld [vmem:[#allocation9 + $0xe20] sm:$0xff] }
 0x16e   :  { %7502 = vmatpush1.bf16.msra.mxu1 %v7501_v49  ;;  %v1609_v49 = vld [vmem:[#allocation9 + $0xd28] sm:$0xff] }
 0x16f   :  { %7467 = vmatpush1.bf16.msra.mxu0 %v7466_v50  ;;  %7503 = vmatprep.subr.bf16.mxu1 %v9608_v0  ;;  %v7563_v50 = vpack.c.bf16 %v1607_v46, %v1604_v43  ;;  %v7581_v43 = vpack.c.bf16 %v1643_v38, %v1640_v36  ;;  %v1646_v46 = vld [vmem:[#allocation9 + $0xe50] sm:$0xff]  ;;  %v1840_v36 = vld [vmem:[#allocation9 + $0xf18] sm:$0xff] }
 0x170   :  { %7469 = vmatprep.subr.bf16.mxu0 %v7468_v52  ;;  %v9928_v5 = vpop.f32.mrb[0].mxu1  ;;  %v1610_v52 = vld [vmem:[#allocation9 + $0xd30] sm:$0xff]  ;;  %v7584_v55 = vpack.c.bf16 %v1649_v48, %v1646_v46  ;;  %v1846_v46 = vld [vmem:[#allocation9 + $0xf48] sm:$0xff]  ;;  %v1853_v48 = vld [vmem:[#allocation9 + $0xf80] sm:$0xff] }
 0x171   :  { %v454_v8 = vpop.f32.mrb[1].mxu1  ;;  %v1847_v38 = vld [vmem:[#allocation9 + $0xf50] sm:$0xff] }
 0x172   :  { %7505 = vmatpush1.bf16.msra.mxu1 %v7504_v58  ;;  %v1618_v58 = vld [vmem:[#allocation9 + $0xd70] sm:$0xff]  ;;  %v7531_v8 = vpack.c.bf16 %v1617_v2, %v1614_v1  ;;  %v1826_v1 = vld [vmem:[#allocation9 + $0xea8] sm:$0xff]  ;;  %v1829_v2 = vld [vmem:[#allocation9 + $0xec0] sm:$0xff] }
 0x173   :  { %7471 = vmatpush1.bf16.msra.mxu0 %v7470_v59  ;;  %7506 = vmatprep.subr.bf16.mxu1 %v9608_v0  ;;  %v7566_v59 = vpack.c.bf16 %v1613_v54, %v1610_v52  ;;  %v7529_v62 = vpack.c.bf16 %v1618_v58, %v1615_v57  ;;  %v1823_v52 = vld [vmem:[#allocation9 + $0xe90] sm:$0xff]  ;;  %v1821_v57 = vld [vmem:[#allocation9 + $0xe80] sm:$0xff] }
 0x174   :  { %7473 = vmatprep.subr.bf16.mxu0 %v7472_v63  ;;  %v9931_v18 = vpop.f32.mrb[2].mxu1  ;;  %v1619_v63 = vld [vmem:[#allocation9 + $0xd78] sm:$0xff] }
 0x175   :  { %v459_v4 = vpop.f32.mrb[3].mxu1  ;;  %v7569_v7 = vpack.c.bf16 %v1619_v63, %v1616_v61  ;;  %v1822_v61 = vld [vmem:[#allocation9 + $0xe88] sm:$0xff] }
 0x176   :  { %7508 = vmatpush1.bf16.msra.mxu1 %v7507_v9  ;;  %v1622_v9 = vld [vmem:[#allocation9 + $0xd90] sm:$0xff]  ;;  %v1631_v4 = vld [vmem:[#allocation9 + $0xdd8] sm:$0xff] }
 0x177   :  { %7475 = vmatpush1.bf16.msra.mxu0 %v7474_v10  ;;  %7553 = vmatprep.subr.bf16.mxu1 %v9608_v0  ;;  %v7533_v10 = vpack.c.bf16 %v1624_v6, %v1621_v3  ;;  %v7572_v16 = vpack.c.bf16 %v1625_v11, %v1622_v9  ;;  %v7575_v25 = vpack.c.bf16 %v1631_v4, %v1628_v19  ;;  %v1815_v9 = vld [vmem:[%s10531_s0 + $0xa8] sm:$0xf0]  ;;  %v1825_v11 = vld [vmem:[#allocation9 + $0xea0] sm:$0xff] }
 0x178   :  { %7510 = vmatprep.subr.bf16.mxu0 %v7509_v14  ;;  %v1627_v14 = vld [vmem:[#allocation9 + $0xdb8] sm:$0xff] }
 0x179   :  { %1563 = vmatmul.mubr.f32.vlgmr.msra.gmra.mrb[20].mxu1 %v1411_v21  ;;  %v7537_v20 = vpack.c.bf16 %v1630_v15, %v1627_v14  ;;  %v7590_v14 = vpack.c.bf16 %v1829_v2, %v1826_v1  ;;  %v1832_v15 = vld [vmem:[#allocation9 + $0xed8] sm:$0xff]  ;;  %v1858_v1 = vld [vmem:[#allocation9 + $0xfa8] sm:$0xff] }
 0x17a   :  { %1486 = vmatmul.mubr.f32.vlgmr.msra.gmra.mrb[0].mxu0 %v1411_v21  ;;  %7555 = vmatpush1.bf16.msra.mxu1 %v7554_v22  ;;  %v1626_v21 = vld [vmem:[#allocation9 + $0xdb0] sm:$0xff]  ;;  %v1629_v22 = vld [vmem:[#allocation9 + $0xdc8] sm:$0xff] }
 0x17b   :  { %7512 = vmatpush1.bf16.msra.mxu0 %v7511_v23  ;;  %6857 = vmatprep.mubr.msk.f32.mxu1 %vm304_vm1, %v9902_v45  ;;  %v1633_v23 = vld [vmem:[#allocation9 + $0xde8] sm:$0xff]  ;;  %v7539_v26 = vpack.c.bf16 %v1629_v22, %v1626_v21  ;;  %v1833_v22 = vld [vmem:[#allocation9 + $0xee0] sm:$0xff] }
 0x17c   :  { %7556 = vmatprep.subr.bf16.mxu1 %v9608_v0  ;;  %7514 = vmatprep.subr.bf16.mxu0 %v7513_v28  ;;  %v7541_v28 = vpack.c.bf16 %v1636_v24, %v1633_v23  ;;  %v1836_v24 = vld [vmem:[#allocation9 + $0xef8] sm:$0xff]  ;;  %v1862_v2 = vld [vmem:[#allocation9 + $0xfc8] sm:$0xff] }
 0x17d   :  { %6855 = vmatprep.mubr.msk.f32.mxu0 %vm304_vm1, %v9902_v45  ;;  %1568 = vmatmul.mubr.f32.gmra.mrb[22].mxu1 %v1410_v12  ;;  %v1612_v45 = vld [vmem:[#allocation9 + $0xd40] sm:$0xff] }
 0x17e   :  { %1492 = vmatmul.mubr.f32.gmra.mrb[2].mxu0 %v1410_v12  ;;  %7558 = vmatpush1.bf16.msra.mxu1 %v7557_v31  ;;  %v7525_v53 = vpack.c.bf16 %v1612_v45, %v1609_v49  ;;  %v1620_v12 = vld [vmem:[#allocation9 + $0xd80] sm:$0xff]  ;;  %v1635_v31 = vld [vmem:[#allocation9 + $0xdf8] sm:$0xff] }
 0x17f   :  { %7516 = vmatpush1.bf16.msra.mxu0 %v7515_v32  ;;  %7559 = vmatprep.subr.bf16.mxu1 %v9608_v0  ;;  %v7535_v17 = vpack.c.bf16 %v1623_v13, %v1620_v12  ;;  %v1639_v32 = vld [vmem:[#allocation9 + $0xe18] sm:$0xff]  ;;  %v7543_v35 = vpack.c.bf16 %v1635_v31, %v1632_v30  ;;  %v1644_v49 = vld [vmem:[#allocation9 + $0xe40] sm:$0xff]  ;;  %v1582_v13 = vld [vmem:[%s10531_s0 + $0xa8] sm:$0x3]  ;;  %v7637_v30 = vpack.c.bf16 %v1836_v24, %v1833_v22 }
 0x180   :  { %7518 = vmatprep.subr.bf16.mxu0 %v7517_v34  ;;  %6860 = vmatprep.mubr.msk.f32.mxu1 %vm304_vm1, %v1580_v40  ;;  %v7578_v34 = vpack.c.bf16 %v1637_v29, %v1634_v27  ;;  %v7545_v37 = vpack.c.bf16 %v1642_v33, %v1639_v32  ;;  %v1647_v45 = vld [vmem:[#allocation9 + $0xe58] sm:$0xff]  ;;  %v1838_v27 = vld [vmem:[#allocation9 + $0xf08] sm:$0xff]  ;;  %v1839_v32 = vld [vmem:[#allocation9 + $0xf10] sm:$0xff] }
 0x181   :  { %6858 = vmatprep.mubr.msk.f32.mxu0 %vm304_vm1, %v1580_v40  ;;  %v1641_v40 = vld [vmem:[#allocation9 + $0xe28] sm:$0xff]  ;;  %v7551_v56 = vpack.c.bf16 %v1647_v45, %v1644_v49  ;;  %v1828_v12 = vld [vmem:[#allocation9 + $0xeb8] sm:$0xff] }
 0x182   :  { %7561 = vmatpush1.bf16.msra.mxu1 %v7560_v41  ;;  %v1645_v41 = vld [vmem:[#allocation9 + $0xe48] sm:$0xff]  ;;  %v7592_v21 = vpack.c.bf16 %v1828_v12, %v1825_v11  ;;  %v1864_v11 = vld [vmem:[#allocation9 + $0xfd8] sm:$0xff] }
 0x183   :  { %7520 = vmatpush1.bf16.msra.mxu0 %v7519_v42  ;;  %7562 = vmatprep.subr.bf16.mxu1 %v9608_v0  ;;  %v1648_v42 = vld [vmem:[#allocation9 + $0xe60] sm:$0xff]  ;;  %v1868_v12 = vld [vmem:[#allocation9 + $0xff8] sm:$0xff]  ;;  %v1874_v22 = vld [vmem:[#allocation9 + $0x1028] sm:$0xff] }
 0x184   :  { %7522 = vmatprep.subr.bf16.mxu0 %v7521_v44  ;;  %v7547_v44 = vpack.c.bf16 %v1641_v40, %v1638_v39  ;;  %v7549_v47 = vpack.c.bf16 %v1648_v42, %v1645_v41  ;;  %v1845_v41 = vld [vmem:[#allocation9 + $0xf40] sm:$0xff] }
 0x186   :  { %7564 = vmatpush1.bf16.msra.mxu1 %v7563_v50 }
 0x187   :  { %7524 = vmatpush1.bf16.msra.mxu0 %v7523_v51  ;;  %7565 = vmatprep.subr.bf16.mxu1 %v9608_v0  ;;  %v1820_v51 = vld [vmem:[#allocation9 + $0xe78] sm:$0xff] }
 0x188   :  { %7526 = vmatprep.subr.bf16.mxu0 %v7525_v53  ;;  %v7586_v58 = vpack.c.bf16 %v1823_v52, %v1820_v51  ;;  %v1854_v52 = vld [vmem:[#allocation9 + $0xf88] sm:$0xff] }
 0x18a   :  { %7567 = vmatpush1.bf16.msra.mxu1 %v7566_v59  ;;  %v1824_v59 = vld [vmem:[#allocation9 + $0xe98] sm:$0xff] }
 0x18b   :  { %7528 = vmatpush1.bf16.msra.mxu0 %v7527_v60  ;;  %7568 = vmatprep.subr.bf16.mxu1 %v9608_v0  ;;  %v1819_v60 = vld [vmem:[#allocation9 + $0xe70] sm:$0xff]  ;;  %v7631_v6 = vpack.c.bf16 %v1824_v59, %v1821_v57 }
 0x18c   :  { %7530 = vmatprep.subr.bf16.mxu0 %v7529_v62  ;;  %v1859_v57 = vld [vmem:[#allocation9 + $0xfb0] sm:$0xff] }
 0x18e   :  { %7570 = vmatpush1.bf16.msra.mxu1 %v7569_v7  ;;  %v7588_v7 = vpack.c.bf16 %v1822_v61, %v1819_v60  ;;  %v1857_v60 = vld [vmem:[#allocation9 + $0xfa0] sm:$0xff] }
 0x18f   :  { %7532 = vmatpush1.bf16.msra.mxu0 %v7531_v8  ;;  %7571 = vmatprep.subr.bf16.mxu1 %v9608_v0  ;;  %v1827_v8 = vld [vmem:[#allocation9 + $0xeb0] sm:$0xff] }
 0x190   :  { %7534 = vmatprep.subr.bf16.mxu0 %v7533_v10  ;;  %v1830_v10 = vld [vmem:[#allocation9 + $0xec8] sm:$0xff] }
 0x191   :  { %v7634_v4 = vpack.c.bf16 %v1830_v10, %v1827_v8  ;;  %v1863_v8 = vld [vmem:[#allocation9 + $0xfd0] sm:$0xff]  ;;  %v1861_v10 = vld [vmem:[#allocation9 + $0xfc0] sm:$0xff] }
 0x192   :  { %7573 = vmatpush1.bf16.msra.mxu1 %v7572_v16  ;;  %v1835_v16 = vld [vmem:[#allocation9 + $0xef0] sm:$0xff] }
 0x193   :  { %7536 = vmatpush1.bf16.msra.mxu0 %v7535_v17  ;;  %7574 = vmatprep.subr.bf16.mxu1 %v9608_v0  ;;  %v1892_v17 = vrot.slane %v1815_v9, 4  ;;  %v7594_v23 = vpack.c.bf16 %v1835_v16, %v1832_v15  ;;  %v7616_v15 = vpack.c.bf16 %v1864_v11, %v1861_v10  ;;  %v1869_v16 = vld [vmem:[#allocation9 + $0x1000] sm:$0xff] }
 0x194   :  { %7538 = vmatprep.subr.bf16.mxu0 %v7537_v20  ;;  %v1581_v20 = vld [vmem:[%s10531_s0 + $0xa0] sm:$0x3] }
 0x196   :  { %7576 = vmatpush1.bf16.msra.mxu1 %v7575_v25  ;;  %v1831_v25 = vld [vmem:[#allocation9 + $0xed0] sm:$0xff] }
 0x197   :  { %7540 = vmatpush1.bf16.msra.mxu0 %v7539_v26  ;;  %7577 = vmatprep.subr.bf16.mxu1 %v9608_v0  ;;  %v1834_v26 = vld [vmem:[#allocation9 + $0xee8] sm:$0xff] }
 0x198   :  { %7542 = vmatprep.subr.bf16.mxu0 %v7541_v28  ;;  %v1841_v28 = vld [vmem:[#allocation9 + $0xf20] sm:$0xff]  ;;  %v7596_v31 = vpack.c.bf16 %v1834_v26, %v1831_v25  ;;  %v1875_v26 = vld [vmem:[#allocation9 + $0x1030] sm:$0xff] }
 0x199   :  { %v7598_v33 = vpack.c.bf16 %v1841_v28, %v1838_v27  ;;  %v1878_v28 = vld [vmem:[#allocation9 + $0x1048] sm:$0xff] }
 0x19a   :  { %7579 = vmatpush1.bf16.msra.mxu1 %v7578_v34  ;;  %v1842_v34 = vld [vmem:[#allocation9 + $0xf28] sm:$0xff] }
 0x19b   :  { %7544 = vmatpush1.bf16.msra.mxu0 %v7543_v35  ;;  %7580 = vmatprep.subr.bf16.mxu1 %v9608_v0  ;;  %v1837_v35 = vld [vmem:[#allocation9 + $0xf00] sm:$0xff]  ;;  %v7640_v39 = vpack.c.bf16 %v1842_v34, %v1839_v32  ;;  %v1883_v32 = vld [vmem:[#allocation9 + $0x1070] sm:$0xff] }
 0x19c   :  { %7546 = vmatprep.subr.bf16.mxu0 %v7545_v37  ;;  %v610_v50 = vpop.f32.mrb[4].mxu1  ;;  %v1844_v37 = vld [vmem:[#allocation9 + $0xf38] sm:$0xff]  ;;  %v7600_v40 = vpack.c.bf16 %v1840_v36, %v1837_v35  ;;  %v1881_v35 = vld [vmem:[#allocation9 + $0x1060] sm:$0xff] }
 0x19d   :  { %v9954_v53 = vadd.f32 %v610_v50, %v9928_v5  ;;  %v612_v54 = vpop.f32.mrb[5].mxu1  ;;  %v1579_v5 = vld [vmem:[%s10531_s0 + $0x90] sm:$0xff]  ;;  %v7602_v42 = vpack.c.bf16 %v1847_v38, %v1844_v37  ;;  %v1851_v50 = vld [vmem:[#allocation9 + $0xf70] sm:$0xff] }
 0x19e   :  { %7582 = vmatpush1.bf16.msra.mxu1 %v7581_v43  ;;  %v1848_v43 = vld [vmem:[#allocation9 + $0xf58] sm:$0xff]  ;;  %v1849_v54 = vld [vmem:[#allocation9 + $0xf60] sm:$0xff]  ;;  %v1879_v37 = vld [vmem:[#allocation9 + $0x1050] sm:$0xff] }
 0x19f   :  { %7548 = vmatpush1.bf16.msra.mxu0 %v7547_v44  ;;  %7583 = vmatprep.subr.bf16.mxu1 %v9608_v0  ;;  %v1843_v44 = vld [vmem:[#allocation9 + $0xf30] sm:$0xff]  ;;  %v7643_v49 = vpack.c.bf16 %v1848_v43, %v1845_v41  ;;  %v1884_v36 = vld [vmem:[#allocation9 + $0x1078] sm:$0xff] }
 0x1a0   :  { %7550 = vmatprep.subr.bf16.mxu0 %v7549_v47  ;;  %v615_v62 = vpop.f32.mrb[6].mxu1  ;;  %v1850_v47 = vld [vmem:[#allocation9 + $0xf68] sm:$0xff]  ;;  %v7604_v45 = vpack.c.bf16 %v1846_v46, %v1843_v44  ;;  %v1816_v41 = vld [vmem:[%s10531_s0 + $0xb0] sm:$0x3f]  ;;  %v2174_v44 = vld [vmem:[#allocation9 + $0x230] sm:$0xff] }
 0x1a1   :  { %v9958_v63 = vadd.f32 %v615_v62, %v9931_v18  ;;  %v617_v3 = vpop.f32.mrb[7].mxu1  ;;  %v1817_v18 = vld [vmem:[%s10531_s0 + $0xb8] sm:$0x3f]  ;;  %v7606_v51 = vpack.c.bf16 %v1853_v48, %v1850_v47  ;;  %v1860_v62 = vld [vmem:[#allocation9 + $0xfb8] sm:$0xff]  ;;  %v7661_v48 = vpack.c.bf16 %v1884_v36, %v1881_v35  ;;  %v2194_v36 = vld [vmem:[#allocation9 + $0x2d0] sm:$0xff] }
 0x1a2   :  { %7585 = vmatpush1.bf16.msra.mxu1 %v7584_v55  ;;  %v9973_v19 = vrot.slane %v1817_v18, 4  ;;  %v1852_v55 = vld [vmem:[#allocation9 + $0xf78] sm:$0xff]  ;;  %v1865_v3 = vld [vmem:[#allocation9 + $0xfe0] sm:$0xff]  ;;  %v1866_v18 = vld [vmem:[#allocation9 + $0xfe8] sm:$0xff] }
 0x1a3   :  { %7552 = vmatpush1.bf16.msra.mxu0 %v7551_v56  ;;  %7630 = vmatprep.subr.bf16.mxu1 %v9608_v0  ;;  %v1856_v56 = vld [vmem:[#allocation9 + $0xf98] sm:$0xff]  ;;  %v7608_v59 = vpack.c.bf16 %v1852_v55, %v1849_v54  ;;  %v7614_v9 = vpack.c.bf16 %v1865_v3, %v1862_v2  ;;  %v2170_v55 = vld [vmem:[#allocation9 + $0x210] sm:$0xff]  ;;  %v2167_v2 = vld [vmem:[%s10531_s0 + $0x78] sm:$0xf0] }
 0x1a4   :  { %7587 = vmatprep.subr.bf16.mxu0 %v7586_v58  ;;  %v1894_v29 = vsel %vm295_vm0, %v1892_v17, %v9973_v19  ;;  %v7646_v58 = vpack.c.bf16 %v1854_v52, %v1851_v50  ;;  %v7610_v61 = vpack.c.bf16 %v1859_v57, %v1856_v56  ;;  %v2171_v43 = vld [vmem:[#allocation9 + $0x218] sm:$0xff]  ;;  %v1890_v50 = vrot.slane %v1816_v41, 4  ;;  %v2173_v56 = vld [vmem:[#allocation9 + $0x228] sm:$0xff]  ;;  %v2169_v3 = vld [vmem:[%s10531_s0 + $0x88] sm:$0x3f] }
 0x1a5   :  { %1798 = vmatmul.mubr.f32.vlgmr.msra.gmra.mrb[24].mxu1 %v1579_v5  ;;  %v7663_v52 = vpack.c.bf16 %v2174_v44, %v2171_v43  ;;  %v2175_v54 = vld [vmem:[#allocation9 + $0x238] sm:$0xff]  ;;  %v2243_v10 = vrot.slane %v2167_v2, 4  ;;  %v10014_v11 = vrot.slane %v2169_v3, 4  ;;  %v2205_v44 = vld [vmem:[#allocation9 + $0x328] sm:$0xff]  ;;  %v2212_v2 = vld [vmem:[#allocation9 + $0x360] sm:$0xff] }
 0x1a6   :  { %1721 = vmatmul.mubr.f32.vlgmr.msra.gmra.mrb[0].mxu0 %v1579_v5  ;;  %7632 = vmatpush1.bf16.msra.mxu1 %v7631_v6  ;;  %v1855_v5 = vld [vmem:[#allocation9 + $0xf90] sm:$0xff]  ;;  %v7649_v6 = vpack.c.bf16 %v1860_v62, %v1857_v60  ;;  %v2199_v35 = vld [vmem:[#allocation9 + $0x2f8] sm:$0xff] }
 0x1a7   :  { %7589 = vmatpush1.bf16.msra.mxu0 %v7588_v7  ;;  %6861 = vmatprep.mubr.msk.f32.mxu1 %vm304_vm1, %v1582_v13  ;;  %v7612_v7 = vpack.c.bf16 %v1858_v1, %v1855_v5  ;;  %v7665_v5 = vpack.c.bf16 %v2173_v56, %v2170_v55  ;;  %v2178_v1 = vld [vmem:[#allocation9 + $0x250] sm:$0xff]  ;;  %v2211_v55 = vld [vmem:[#allocation9 + $0x358] sm:$0xff] }
 0x1a8   :  { %7633 = vmatprep.subr.bf16.mxu1 %v9608_v0  ;;  %7591 = vmatprep.subr.bf16.mxu0 %v7590_v14  ;;  %v7652_v14 = vpack.c.bf16 %v1866_v18, %v1863_v8  ;;  %v2186_v18 = vld [vmem:[#allocation9 + $0x290] sm:$0xff]  ;;  %v2215_v3 = vld [vmem:[#allocation9 + $0x378] sm:$0xff] }
 0x1a9   :  { %6859 = vmatprep.mubr.msk.f32.mxu0 %vm304_vm1, %v1582_v13  ;;  %1803 = vmatmul.mubr.f32.gmra.mrb[26].mxu1 %v1581_v20  ;;  %v1871_v13 = vld [vmem:[#allocation9 + $0x1010] sm:$0xff] }
 0x1aa   :  { %1727 = vmatmul.mubr.f32.gmra.mrb[2].mxu0 %v1581_v20  ;;  %7635 = vmatpush1.bf16.msra.mxu1 %v7634_v4  ;;  %v7618_v17 = vpack.c.bf16 %v1871_v13, %v1868_v12  ;;  %v1872_v20 = vld [vmem:[#allocation9 + $0x1018] sm:$0xff]  ;;  %v1867_v4 = vld [vmem:[#allocation9 + $0xff0] sm:$0xff] }
 0x1ab   :  { %7593 = vmatpush1.bf16.msra.mxu0 %v7592_v21  ;;  %7636 = vmatprep.subr.bf16.mxu1 %v9608_v0  ;;  %v1870_v21 = vld [vmem:[#allocation9 + $0x1008] sm:$0xff]  ;;  %v7655_v24 = vpack.c.bf16 %v1872_v20, %v1869_v16  ;;  %v2187_v16 = vld [vmem:[#allocation9 + $0x298] sm:$0xff]  ;;  %v2206_v56 = vld [vmem:[#allocation9 + $0x330] sm:$0xff] }
 0x1ac   :  { %7595 = vmatprep.subr.bf16.mxu0 %v7594_v23  ;;  %6864 = vmatprep.mubr.msk.f32.mxu1 %vm304_vm1, %v1894_v29  ;;  %v1877_v23 = vld [vmem:[#allocation9 + $0x1040] sm:$0xff]  ;;  %v7620_v25 = vpack.c.bf16 %v1870_v21, %v1867_v4  ;;  %v2185_v20 = vld [vmem:[#allocation9 + $0x288] sm:$0xff] }
 0x1ad   :  { %6862 = vmatprep.mubr.msk.f32.mxu0 %vm304_vm1, %v1894_v29  ;;  %v7622_v27 = vpack.c.bf16 %v1877_v23, %v1874_v22  ;;  %v1873_v29 = vld [vmem:[#allocation9 + $0x1020] sm:$0xff]  ;;  %v2189_v4 = vld [vmem:[#allocation9 + $0x2a8] sm:$0xff]  ;;  %v2245_v22 = vsel %vm295_vm0, %v2243_v10, %v10014_v11  ;;  %v2223_v10 = vld [vmem:[#allocation9 + $0x3b8] sm:$0xff] }
 0x1ae   :  { %7638 = vmatpush1.bf16.msra.mxu1 %v7637_v30  ;;  %v1876_v30 = vld [vmem:[#allocation9 + $0x1038] sm:$0xff]  ;;  %v2192_v21 = vld [vmem:[#allocation9 + $0x2c0] sm:$0xff] }
 0x1af   :  { %7597 = vmatpush1.bf16.msra.mxu0 %v7596_v31  ;;  %7639 = vmatprep.subr.bf16.mxu1 %v9608_v0  ;;  %v1880_v31 = vld [vmem:[#allocation9 + $0x1058] sm:$0xff]  ;;  %v7624_v34 = vpack.c.bf16 %v1876_v30, %v1873_v29  ;;  %v2198_v30 = vld [vmem:[#allocation9 + $0x2f0] sm:$0xff] }
 0x1b0   :  { %7599 = vmatprep.subr.bf16.mxu0 %v7598_v33  ;;  %v7658_v33 = vpack.c.bf16 %v1878_v28, %v1875_v26  ;;  %v7626_v38 = vpack.c.bf16 %v1883_v32, %v1880_v31  ;;  %v2193_v26 = vld [vmem:[#allocation9 + $0x2c8] sm:$0xff]  ;;  %v2191_v28 = vld [vmem:[#allocation9 + $0x2b8] sm:$0xff] }
 0x1b1   :  { %v2195_v29 = vld [vmem:[#allocation9 + $0x2d8] sm:$0xff] }
 0x1b2   :  { %7641 = vmatpush1.bf16.msra.mxu1 %v7640_v39  ;;  %v1882_v39 = vld [vmem:[#allocation9 + $0x1068] sm:$0xff] }
 0x1b3   :  { %7601 = vmatpush1.bf16.msra.mxu0 %v7600_v40  ;;  %7642 = vmatprep.subr.bf16.mxu1 %v9608_v0  ;;  %v1814_v40 = vld [vmem:[%s10531_s0 + $0xa0] sm:$0xf0] }
 0x1b4   :  { %7603 = vmatprep.subr.bf16.mxu0 %v7602_v42 }
 0x1b6   :  { %7644 = vmatpush1.bf16.msra.mxu1 %v7643_v49  ;;  %v7628_v49 = vpack.c.bf16 %v1882_v39, %v1879_v37  ;;  %v2197_v37 = vld [vmem:[#allocation9 + $0x2e8] sm:$0xff]  ;;  %v2204_v39 = vld [vmem:[#allocation9 + $0x320] sm:$0xff] }
 0x1b7   :  { %7605 = vmatpush1.bf16.msra.mxu0 %v7604_v45  ;;  %7645 = vmatprep.subr.bf16.mxu1 %v9608_v0  ;;  %v1889_v45 = vrot.slane %v1814_v40, 4  ;;  %v7681_v41 = vpack.c.bf16 %v2197_v37, %v2194_v36  ;;  %v2104_v36 = vld [vmem:[#allocation9 + $0x20] sm:$0xff] }
 0x1b8   :  { %7607 = vmatprep.subr.bf16.mxu0 %v7606_v51  ;;  %v2172_v51 = vld [vmem:[#allocation9 + $0x220] sm:$0xff] }
 0x1b9   :  { %v7708_v62 = vpack.c.bf16 %v2175_v54, %v2172_v51 }
 0x1ba   :  { %7647 = vmatpush1.bf16.msra.mxu1 %v7646_v58 }
 0x1bb   :  { %7609 = vmatpush1.bf16.msra.mxu0 %v7608_v59  ;;  %7648 = vmatprep.subr.bf16.mxu1 %v9608_v0  ;;  %v2180_v59 = vld [vmem:[#allocation9 + $0x260] sm:$0xff] }
 0x1bc   :  { %7611 = vmatprep.subr.bf16.mxu0 %v7610_v61  ;;  %v1891_v61 = vsel %vm295_vm0, %v1889_v45, %v1890_v50  ;;  %v2210_v45 = vld [vmem:[#allocation9 + $0x350] sm:$0xff] }
 0x1be   :  { %7650 = vmatpush1.bf16.msra.mxu1 %v7649_v6  ;;  %v2176_v6 = vld [vmem:[#allocation9 + $0x240] sm:$0xff] }
 0x1bf   :  { %7613 = vmatpush1.bf16.msra.mxu0 %v7612_v7  ;;  %7651 = vmatprep.subr.bf16.mxu1 %v9608_v0  ;;  %v2179_v7 = vld [vmem:[#allocation9 + $0x258] sm:$0xff] }
 0x1c0   :  { %7615 = vmatprep.subr.bf16.mxu0 %v7614_v9  ;;  %v2183_v9 = vld [vmem:[#allocation9 + $0x278] sm:$0xff]  ;;  %v7669_v13 = vpack.c.bf16 %v2179_v7, %v2176_v6  ;;  %v2222_v6 = vld [vmem:[#allocation9 + $0x3b0] sm:$0xff] }
 0x1c2   :  { %7653 = vmatpush1.bf16.msra.mxu1 %v7652_v14  ;;  %v2184_v14 = vld [vmem:[#allocation9 + $0x280] sm:$0xff] }
 0x1c3   :  { %7617 = vmatpush1.bf16.msra.mxu0 %v7616_v15  ;;  %7654 = vmatprep.subr.bf16.mxu1 %v9608_v0  ;;  %v7671_v15 = vpack.c.bf16 %v2186_v18, %v2183_v9  ;;  %v7714_v23 = vpack.c.bf16 %v2187_v16, %v2184_v14  ;;  %v2220_v9 = vld [vmem:[#allocation9 + $0x3a0] sm:$0xff]  ;;  %v2225_v14 = vld [vmem:[#allocation9 + $0x3c8] sm:$0xff] }
 0x1c4   :  { %7619 = vmatprep.subr.bf16.mxu0 %v7618_v17  ;;  %v2182_v17 = vld [vmem:[#allocation9 + $0x270] sm:$0xff]  ;;  %v7732_v16 = vpack.c.bf16 %v2223_v10, %v2220_v9 }
 0x1c5   :  { %v2122_v9 = vld [vmem:[#allocation9 + $0xb0] sm:$0xff] }
 0x1c6   :  { %7656 = vmatpush1.bf16.msra.mxu1 %v7655_v24  ;;  %v7673_v24 = vpack.c.bf16 %v2185_v20, %v2182_v17  ;;  %v2226_v20 = vld [vmem:[#allocation9 + $0x3d0] sm:$0xff] }
 0x1c7   :  { %7621 = vmatpush1.bf16.msra.mxu0 %v7620_v25  ;;  %7657 = vmatprep.subr.bf16.mxu1 %v9608_v0  ;;  %v2190_v25 = vld [vmem:[#allocation9 + $0x2b0] sm:$0xff] }
 0x1c8   :  { %7623 = vmatprep.subr.bf16.mxu0 %v7622_v27  ;;  %v839_v42 = vpop.f32.mrb[8].mxu1  ;;  %v2188_v27 = vld [vmem:[#allocation9 + $0x2a0] sm:$0xff]  ;;  %v7717_v31 = vpack.c.bf16 %v2193_v26, %v2190_v25  ;;  %v2234_v25 = vld [vmem:[#allocation9 + $0x410] sm:$0xff] }
 0x1c9   :  { %v10000_v46 = vadd.f32 %v839_v42, %v9954_v53  ;;  %v841_v47 = vpop.f32.mrb[9].mxu1  ;;  %v2177_v53 = vld [vmem:[#allocation9 + $0x248] sm:$0xff]  ;;  %v7677_v32 = vpack.c.bf16 %v2191_v28, %v2188_v27  ;;  %v2202_v42 = vld [vmem:[#allocation9 + $0x310] sm:$0xff]  ;;  %v2232_v27 = vld [vmem:[#allocation9 + $0x400] sm:$0xff] }
 0x1ca   :  { %7659 = vmatpush1.bf16.msra.mxu1 %v7658_v33  ;;  %v7667_v8 = vpack.c.bf16 %v2180_v59, %v2177_v53  ;;  %v2196_v33 = vld [vmem:[#allocation9 + $0x2e0] sm:$0xff]  ;;  %v2213_v53 = vld [vmem:[#allocation9 + $0x368] sm:$0xff]  ;;  %v2235_v28 = vld [vmem:[#allocation9 + $0x418] sm:$0xff] }
 0x1cb   :  { %7625 = vmatpush1.bf16.msra.mxu0 %v7624_v34  ;;  %7660 = vmatprep.subr.bf16.mxu1 %v9608_v0  ;;  %v7679_v34 = vpack.c.bf16 %v2198_v30, %v2195_v29  ;;  %v7720_v40 = vpack.c.bf16 %v2199_v35, %v2196_v33  ;;  %v2200_v47 = vld [vmem:[#allocation9 + $0x300] sm:$0xff]  ;;  %v2230_v29 = vld [vmem:[#allocation9 + $0x3f0] sm:$0xff]  ;;  %v2168_v33 = vld [vmem:[%s10531_s0 + $0x80] sm:$0x3f] }
 0x1cc   :  { %7627 = vmatprep.subr.bf16.mxu0 %v7626_v38  ;;  %v844_v57 = vpop.f32.mrb[10].mxu1  ;;  %v2201_v38 = vld [vmem:[#allocation9 + $0x308] sm:$0xff]  ;;  %v2216_v59 = vld [vmem:[#allocation9 + $0x380] sm:$0xff] }
 0x1cd   :  { %v10004_v58 = vadd.f32 %v844_v57, %v9958_v63  ;;  %v846_v60 = vpop.f32.mrb[11].mxu1  ;;  %v2181_v63 = vld [vmem:[#allocation9 + $0x268] sm:$0xff]  ;;  %v7683_v43 = vpack.c.bf16 %v2204_v39, %v2201_v38  ;;  %v7738_v39 = vpack.c.bf16 %v2235_v28, %v2232_v27  ;;  %v2134_v27 = vld [vmem:[#allocation9 + $0x110] sm:$0xff] }
 0x1ce   :  { %7662 = vmatpush1.bf16.msra.mxu1 %v7661_v48  ;;  %v7711_v12 = vpack.c.bf16 %v2181_v63, %v2178_v1  ;;  %v2203_v48 = vld [vmem:[#allocation9 + $0x318] sm:$0xff]  ;;  %v2209_v57 = vld [vmem:[#allocation9 + $0x348] sm:$0xff] }
 0x1cf   :  { %7629 = vmatpush1.bf16.msra.mxu0 %v7628_v49  ;;  %7707 = vmatprep.subr.bf16.mxu1 %v9608_v0  ;;  %v2207_v49 = vld [vmem:[#allocation9 + $0x338] sm:$0xff]  ;;  %v7685_v51 = vpack.c.bf16 %v2203_v48, %v2200_v47  ;;  %v2217_v1 = vld [vmem:[#allocation9 + $0x388] sm:$0xff]  ;;  %v2100_v48 = vld [vmem:[#allocation9] sm:$0xff] }
 0x1d0   :  { %7664 = vmatprep.subr.bf16.mxu0 %v7663_v52  ;;  %v2208_v52 = vld [vmem:[#allocation9 + $0x340] sm:$0xff]  ;;  %v7687_v54 = vpack.c.bf16 %v2210_v45, %v2207_v49  ;;  %v2219_v63 = vld [vmem:[#allocation9 + $0x398] sm:$0xff]  ;;  %v2101_v35 = vld [vmem:[#allocation9 + $0x8] sm:$0xff] }
 0x1d1   :  { %2043 = vmatmul.mubr.f32.vlgmr.msra.gmra.mrb[28].mxu1 %v1891_v61  ;;  %v7726_v60 = vpack.c.bf16 %v2211_v55, %v2208_v52  ;;  %v7695_v18 = vpack.c.bf16 %v2222_v6, %v2219_v63  ;;  %v2105_v47 = vld [vmem:[#allocation9 + $0x28] sm:$0xff]  ;;  %v2103_v49 = vld [vmem:[#allocation9 + $0x18] sm:$0xff]  ;;  %v2112_v6 = vld [vmem:[#allocation9 + $0x60] sm:$0xff] }
 0x1d2   :  { %1966 = vmatmul.mubr.f32.vlgmr.msra.gmra.mrb[0].mxu0 %v1891_v61  ;;  %7709 = vmatpush1.bf16.msra.mxu1 %v7708_v62  ;;  %v7689_v61 = vpack.c.bf16 %v2209_v57, %v2206_v56  ;;  %v2214_v62 = vld [vmem:[#allocation9 + $0x370] sm:$0xff]  ;;  %v7742_v56 = vpack.c.bf16 %v2103_v49, %v2100_v48  ;;  %v2108_v57 = vld [vmem:[#allocation9 + $0x40] sm:$0xff]  ;;  %v2117_v63 = vld [vmem:[#allocation9 + $0x88] sm:$0xff] }
 0x1d3   :  { %7666 = vmatpush1.bf16.msra.mxu0 %v7665_v5  ;;  %6865 = vmatprep.mubr.msk.f32.mxu1 %vm304_vm1, %v9973_v19  ;;  %v7691_v5 = vpack.c.bf16 %v2216_v59, %v2213_v53  ;;  %v7729_v7 = vpack.c.bf16 %v2217_v1, %v2214_v62  ;;  %v2111_v59 = vld [vmem:[#allocation9 + $0x58] sm:$0xff]  ;;  %v2113_v62 = vld [vmem:[#allocation9 + $0x68] sm:$0xff]  ;;  %v2146_v48 = vld [vmem:[#allocation9 + $0x170] sm:$0xff] }
 0x1d4   :  { %6863 = vmatprep.mubr.msk.f32.mxu0 %vm304_vm1, %v9973_v19  ;;  %7710 = vmatprep.subr.bf16.mxu1 %v9608_v0  ;;  %v7675_v19 = vpack.c.bf16 %v2192_v21, %v2189_v4  ;;  %v2229_v21 = vld [vmem:[#allocation9 + $0x3e8] sm:$0xff] }
 0x1d5   :  { %7668 = vmatprep.subr.bf16.mxu0 %v7667_v8  ;;  %2048 = vmatmul.mubr.f32.gmra.mrb[30].mxu1 %v1890_v50  ;;  %v7693_v8 = vpack.c.bf16 %v2215_v3, %v2212_v2  ;;  %v2114_v2 = vld [vmem:[#allocation9 + $0x70] sm:$0xff] }
 0x1d6   :  { %1972 = vmatmul.mubr.f32.gmra.mrb[2].mxu0 %v1890_v50  ;;  %7712 = vmatpush1.bf16.msra.mxu1 %v7711_v12  ;;  %v7723_v50 = vpack.c.bf16 %v2205_v44, %v2202_v42  ;;  %v2218_v12 = vld [vmem:[#allocation9 + $0x390] sm:$0xff]  ;;  %v2241_v42 = vrot.slane %v2168_v33, 4  ;;  %v7740_v44 = vpack.c.bf16 %v2104_v36, %v2101_v35  ;;  %v7791_v10 = vpack.c.bf16 %v2117_v63, %v2114_v2  ;;  %v2137_v35 = vld [vmem:[#allocation9 + $0x128] sm:$0xff]  ;;  %v2140_v36 = vld [vmem:[#allocation9 + $0x140] sm:$0xff] }
 0x1d7   :  { %7670 = vmatpush1.bf16.msra.mxu0 %v7669_v13  ;;  %7713 = vmatprep.subr.bf16.mxu1 %v9608_v0  ;;  %v2221_v13 = vld [vmem:[#allocation9 + $0x3a8] sm:$0xff]  ;;  %v2130_v33 = vld [vmem:[#allocation9 + $0xf0] sm:$0xff] }
 0x1d8   :  { %7672 = vmatprep.subr.bf16.mxu0 %v7671_v15  ;;  %6868 = vmatprep.mubr.msk.f32.mxu1 %vm304_vm1, %v2245_v22  ;;  %v2228_v15 = vld [vmem:[#allocation9 + $0x3e0] sm:$0xff]  ;;  %v7697_v17 = vpack.c.bf16 %v2221_v13, %v2218_v12  ;;  %v2158_v2 = vld [vmem:[#allocation9 + $0x1d0] sm:$0xff] }
 0x1d9   :  { %6866 = vmatprep.mubr.msk.f32.mxu0 %vm304_vm1, %v2245_v22  ;;  %v7699_v4 = vpack.c.bf16 %v2228_v15, %v2225_v14  ;;  %v2224_v22 = vld [vmem:[#allocation9 + $0x3c0] sm:$0xff]  ;;  %v2123_v15 = vld [vmem:[#allocation9 + $0xb8] sm:$0xff] }
 0x1da   :  { %7715 = vmatpush1.bf16.msra.mxu1 %v7714_v23  ;;  %v2227_v23 = vld [vmem:[#allocation9 + $0x3d8] sm:$0xff]  ;;  %v2120_v13 = vld [vmem:[#allocation9 + $0xa0] sm:$0xff] }
 0x1db   :  { %7674 = vmatpush1.bf16.msra.mxu0 %v7673_v24  ;;  %7716 = vmatprep.subr.bf16.mxu1 %v9608_v0  ;;  %v2231_v24 = vld [vmem:[#allocation9 + $0x3f8] sm:$0xff]  ;;  %v7701_v26 = vpack.c.bf16 %v2227_v23, %v2224_v22  ;;  %v2126_v22 = vld [vmem:[#allocation9 + $0xd0] sm:$0xff] }
 0x1dc   :  { %7676 = vmatprep.subr.bf16.mxu0 %v7675_v19  ;;  %v7735_v19 = vpack.c.bf16 %v2229_v21, %v2226_v20  ;;  %v7703_v30 = vpack.c.bf16 %v2234_v25, %v2231_v24  ;;  %v2125_v20 = vld [vmem:[#allocation9 + $0xc8] sm:$0xff]  ;;  %v2124_v25 = vld [vmem:[#allocation9 + $0xc0] sm:$0xff] }
 0x1dd   :  { %v2129_v24 = vld [vmem:[#allocation9 + $0xe8] sm:$0xff] }
 0x1de   :  { %7718 = vmatpush1.bf16.msra.mxu1 %v7717_v31  ;;  %v2233_v31 = vld [vmem:[#allocation9 + $0x408] sm:$0xff]  ;;  %v7797_v28 = vpack.c.bf16 %v2129_v24, %v2126_v22  ;;  %v2570_v22 = vld [vmem:[#allocation9 + $0x440] sm:$0xff] }
 0x1df   :  { %7678 = vmatpush1.bf16.msra.mxu0 %v7677_v32  ;;  %7719 = vmatprep.subr.bf16.mxu1 %v9608_v0  ;;  %v2166_v32 = vld [vmem:[%s10531_s0 + $0x70] sm:$0xf0] }
 0x1e0   :  { %7680 = vmatprep.subr.bf16.mxu0 %v7679_v34 }
 0x1e2   :  { %7721 = vmatpush1.bf16.msra.mxu1 %v7720_v40  ;;  %v7705_v40 = vpack.c.bf16 %v2233_v31, %v2230_v29 }
 0x1e3   :  { %7682 = vmatpush1.bf16.msra.mxu0 %v7681_v41  ;;  %7722 = vmatprep.subr.bf16.mxu1 %v9608_v0  ;;  %v2240_v41 = vrot.slane %v2166_v32, 4  ;;  %v2135_v32 = vld [vmem:[#allocation9 + $0x118] sm:$0xff] }
 0x1e4   :  { %7684 = vmatprep.subr.bf16.mxu0 %v7683_v43  ;;  %v2102_v43 = vld [vmem:[#allocation9 + $0x10] sm:$0xff] }
 0x1e5   :  { %v7785_v55 = vpack.c.bf16 %v2105_v47, %v2102_v43  ;;  %v2136_v43 = vld [vmem:[#allocation9 + $0x120] sm:$0xff]  ;;  %v2143_v47 = vld [vmem:[#allocation9 + $0x158] sm:$0xff] }
 0x1e6   :  { %7724 = vmatpush1.bf16.msra.mxu1 %v7723_v50  ;;  %v2107_v50 = vld [vmem:[#allocation9 + $0x38] sm:$0xff] }
 0x1e7   :  { %7686 = vmatpush1.bf16.msra.mxu0 %v7685_v51  ;;  %7725 = vmatprep.subr.bf16.mxu1 %v9608_v0  ;;  %v2110_v51 = vld [vmem:[#allocation9 + $0x50] sm:$0xff] }
 0x1e8   :  { %7688 = vmatprep.subr.bf16.mxu0 %v7687_v54  ;;  %v2242_v54 = vsel %vm295_vm0, %v2240_v41, %v2241_v42  ;;  %v7744_v53 = vpack.c.bf16 %v2110_v51, %v2107_v50  ;;  %v7764_v41 = vpack.c.bf16 %v2140_v36, %v2137_v35  ;;  %v2144_v50 = vld [vmem:[#allocation9 + $0x160] sm:$0xff]  ;;  %v7768_v51 = vpack.c.bf16 %v2146_v48, %v2143_v47  ;;  %v2096_v35 = vld [vmem:[%s10531_s0 + $0x60] sm:$0xff]  ;;  %v2098_v48 = vld [vmem:[%s10531_s0 + $0x70] sm:$0x3] }
 0x1e9   :  { %v2582_v47 = vld [vmem:[#allocation9 + $0x4a0] sm:$0xff] }
 0x1ea   :  { %7727 = vmatpush1.bf16.msra.mxu1 %v7726_v60  ;;  %v2106_v60 = vld [vmem:[#allocation9 + $0x30] sm:$0xff] }
 0x1eb   :  { %7690 = vmatpush1.bf16.msra.mxu0 %v7689_v61  ;;  %7728 = vmatprep.subr.bf16.mxu1 %v9608_v0  ;;  %v2109_v61 = vld [vmem:[#allocation9 + $0x48] sm:$0xff] }
 0x1ec   :  { %7692 = vmatprep.subr.bf16.mxu0 %v7691_v5  ;;  %v2116_v5 = vld [vmem:[#allocation9 + $0x80] sm:$0xff]  ;;  %v7746_v1 = vpack.c.bf16 %v2109_v61, %v2106_v60  ;;  %v2150_v60 = vld [vmem:[#allocation9 + $0x190] sm:$0xff] }
 0x1ed   :  { %v7748_v3 = vpack.c.bf16 %v2116_v5, %v2113_v62  ;;  %v2153_v62 = vld [vmem:[#allocation9 + $0x1a8] sm:$0xff]  ;;  %v2148_v5 = vld [vmem:[#allocation9 + $0x180] sm:$0xff] }
 0x1ee   :  { %7730 = vmatpush1.bf16.msra.mxu1 %v7729_v7  ;;  %v2115_v7 = vld [vmem:[#allocation9 + $0x78] sm:$0xff] }
 0x1ef   :  { %7694 = vmatpush1.bf16.msra.mxu0 %v7693_v8  ;;  %7731 = vmatprep.subr.bf16.mxu1 %v9608_v0  ;;  %v2119_v8 = vld [vmem:[#allocation9 + $0x98] sm:$0xff]  ;;  %v7750_v12 = vpack.c.bf16 %v2115_v7, %v2112_v6  ;;  %v2156_v6 = vld [vmem:[#allocation9 + $0x1c0] sm:$0xff] }
 0x1f0   :  { %7696 = vmatprep.subr.bf16.mxu0 %v7695_v18  ;;  %v2097_v18 = vld [vmem:[%s10531_s0 + $0x68] sm:$0xff]  ;;  %v7752_v14 = vpack.c.bf16 %v2122_v9, %v2119_v8  ;;  %v2159_v8 = vld [vmem:[#allocation9 + $0x1d8] sm:$0xff] }
 0x1f1   :  { %v2154_v9 = vld [vmem:[#allocation9 + $0x1b0] sm:$0xff] }
 0x1f2   :  { %7733 = vmatpush1.bf16.msra.mxu1 %v7732_v16  ;;  %v2118_v16 = vld [vmem:[#allocation9 + $0x90] sm:$0xff] }
 0x1f3   :  { %7698 = vmatpush1.bf16.msra.mxu0 %v7697_v17  ;;  %7734 = vmatprep.subr.bf16.mxu1 %v9608_v0  ;;  %v2121_v17 = vld [vmem:[#allocation9 + $0xa8] sm:$0xff] }
 0x1f4   :  { %7700 = vmatprep.subr.bf16.mxu0 %v7699_v4  ;;  %v1084_v34 = vpop.f32.mrb[12].mxu1  ;;  %v7794_v4 = vpack.c.bf16 %v2123_v15, %v2120_v13  ;;  %v7754_v21 = vpack.c.bf16 %v2121_v17, %v2118_v16  ;;  %v7812_v13 = vpack.c.bf16 %v2159_v8, %v2156_v6  ;;  %v2162_v15 = vld [vmem:[#allocation9 + $0x1f0] sm:$0xff]  ;;  %v2165_v17 = vld [vmem:[#allocation9 + $0x208] sm:$0xff] }
 0x1f5   :  { %v10040_v37 = vadd.f32 %v1084_v34, %v10000_v46  ;;  %v1086_v38 = vpop.f32.mrb[13].mxu1  ;;  %v2133_v34 = vld [vmem:[#allocation9 + $0x108] sm:$0xff] }
 0x1f6   :  { %7736 = vmatpush1.bf16.msra.mxu1 %v7735_v19  ;;  %v2127_v19 = vld [vmem:[#allocation9 + $0xd8] sm:$0xff] }
 0x1f7   :  { %7702 = vmatpush1.bf16.msra.mxu0 %v7701_v26  ;;  %7737 = vmatprep.subr.bf16.mxu1 %v9608_v0  ;;  %v2131_v26 = vld [vmem:[#allocation9 + $0xf8] sm:$0xff]  ;;  %v7758_v29 = vpack.c.bf16 %v2127_v19, %v2124_v25  ;;  %v7815_v25 = vpack.c.bf16 %v2165_v17, %v2162_v15 }
 0x1f8   :  { %7704 = vmatprep.subr.bf16.mxu0 %v7703_v30  ;;  %v1089_v45 = vpop.f32.mrb[14].mxu1  ;;  %v2132_v30 = vld [vmem:[#allocation9 + $0x100] sm:$0xff]  ;;  %v7760_v31 = vpack.c.bf16 %v2134_v27, %v2131_v26  ;;  %v2568_v26 = vld [vmem:[#allocation9 + $0x430] sm:$0xff] }
 0x1f9   :  { %v10044_v46 = vadd.f32 %v1089_v45, %v10004_v58  ;;  %v1091_v52 = vpop.f32.mrb[15].mxu1  ;;  %v7788_v58 = vpack.c.bf16 %v2111_v59, %v2108_v57  ;;  %v7800_v38 = vpack.c.bf16 %v2135_v32, %v2132_v30  ;;  %v2152_v57 = vld [vmem:[#allocation9 + $0x1a0] sm:$0xff]  ;;  %v2569_v30 = vld [vmem:[#allocation9 + $0x438] sm:$0xff] }
 0x1fa   :  { %7739 = vmatpush1.bf16.msra.mxu1 %v7738_v39  ;;  %v7762_v39 = vpack.c.bf16 %v2133_v34, %v2130_v33  ;;  %v2147_v52 = vld [vmem:[#allocation9 + $0x178] sm:$0xff] }
 0x1fb   :  { %7706 = vmatpush1.bf16.msra.mxu0 %v7705_v40  ;;  %7784 = vmatprep.subr.bf16.mxu1 %v9608_v0  ;;  %v2138_v40 = vld [vmem:[#allocation9 + $0x130] sm:$0xff]  ;;  %v2573_v33 = vld [vmem:[#allocation9 + $0x458] sm:$0xff] }
 0x1fc   :  { %7741 = vmatprep.subr.bf16.mxu0 %v7740_v44  ;;  %v2139_v44 = vld [vmem:[#allocation9 + $0x138] sm:$0xff] }
 0x1fd   :  { %2394 = vmatmul.mubr.f32.vlgmr.msra.gmra.mrb[32].mxu1 %v2242_v54  ;;  %v7766_v45 = vpack.c.bf16 %v2139_v44, %v2136_v43  ;;  %v2579_v44 = vld [vmem:[#allocation9 + $0x488] sm:$0xff] }
 0x1fe   :  { %2317 = vmatmul.mubr.f32.vlgmr.msra.gmra.mrb[4].mxu0 %v2242_v54  ;;  %7786 = vmatpush1.bf16.msra.mxu1 %v7785_v55  ;;  %v2142_v54 = vld [vmem:[#allocation9 + $0x150] sm:$0xff]  ;;  %v2145_v55 = vld [vmem:[#allocation9 + $0x168] sm:$0xff] }
 0x1ff   :  { %7743 = vmatpush1.bf16.msra.mxu0 %v7742_v56  ;;  %7787 = vmatprep.subr.bf16.mxu1 %v9608_v0  ;;  %v2149_v56 = vld [vmem:[#allocation9 + $0x188] sm:$0xff]  ;;  %v7770_v59 = vpack.c.bf16 %v2145_v55, %v2142_v54  ;;  %v2578_v54 = vld [vmem:[#allocation9 + $0x480] sm:$0xff]  ;;  %v2581_v55 = vld [vmem:[#allocation9 + $0x498] sm:$0xff] }
 0x200   :  { %7745 = vmatprep.subr.bf16.mxu0 %v7744_v53  ;;  %6869 = vmatprep.mubr.msk.f32.mxu1 %vm304_vm1, %v10014_v11  ;;  %v7806_v53 = vpack.c.bf16 %v2147_v52, %v2144_v50  ;;  %v7772_v61 = vpack.c.bf16 %v2152_v57, %v2149_v56  ;;  %v2580_v50 = vld [vmem:[#allocation9 + $0x490] sm:$0xff]  ;;  %v2583_v52 = vld [vmem:[#allocation9 + $0x4a8] sm:$0xff]  ;;  %v2585_v56 = vld [vmem:[#allocation9 + $0x4b8] sm:$0xff] }
 0x201   :  { %6867 = vmatprep.mubr.msk.f32.mxu0 %vm304_vm1, %v10014_v11  ;;  %2399 = vmatmul.mubr.f32.gmra.mrb[34].mxu1 %v2241_v42  ;;  %v2128_v11 = vld [vmem:[#allocation9 + $0xe0] sm:$0xff]  ;;  %v2588_v57 = vld [vmem:[#allocation9 + $0x4d0] sm:$0xff] }
 0x202   :  { %2323 = vmatmul.mubr.f32.gmra.mrb[6].mxu0 %v2241_v42  ;;  %7789 = vmatpush1.bf16.msra.mxu1 %v7788_v58  ;;  %v7756_v23 = vpack.c.bf16 %v2128_v11, %v2125_v20  ;;  %v2141_v42 = vld [vmem:[#allocation9 + $0x148] sm:$0xff]  ;;  %v2151_v58 = vld [vmem:[#allocation9 + $0x198] sm:$0xff]  ;;  %v2160_v20 = vld [vmem:[#allocation9 + $0x1e0] sm:$0xff] }
 0x203   :  { %7747 = vmatpush1.bf16.msra.mxu0 %v7746_v1  ;;  %7790 = vmatprep.subr.bf16.mxu1 %v9608_v0  ;;  %v7803_v49 = vpack.c.bf16 %v2141_v42, %v2138_v40  ;;  %v2155_v1 = vld [vmem:[#allocation9 + $0x1b8] sm:$0xff]  ;;  %v7774_v63 = vpack.c.bf16 %v2151_v58, %v2148_v5  ;;  %v2575_v42 = vld [vmem:[#allocation9 + $0x468] sm:$0xff]  ;;  %v2584_v58 = vld [vmem:[#allocation9 + $0x4b0] sm:$0xff] }
 0x204   :  { %7749 = vmatprep.subr.bf16.mxu0 %v7748_v3  ;;  %6872 = vmatprep.mubr.msk.f32.mxu1 %vm304_vm1, %v2097_v18  ;;  %v7809_v3 = vpack.c.bf16 %v2153_v62, %v2150_v60  ;;  %v7776_v7 = vpack.c.bf16 %v2158_v2, %v2155_v1  ;;  %v2163_v11 = vld [vmem:[#allocation9 + $0x1f8] sm:$0xff]  ;;  %v7827_v60 = vpack.c.bf16 %v2581_v55, %v2578_v54  ;;  %v2587_v1 = vld [vmem:[#allocation9 + $0x4c8] sm:$0xff]  ;;  %v2622_v54 = vld [vmem:[#allocation9 + $0x5e0] sm:$0xff] }
 0x205   :  { %6870 = vmatprep.mubr.msk.f32.mxu0 %vm304_vm1, %v2097_v18  ;;  %v2157_v18 = vld [vmem:[#allocation9 + $0x1c8] sm:$0xff]  ;;  %v7782_v19 = vpack.c.bf16 %v2163_v11, %v2160_v20  ;;  %v2577_v40 = vld [vmem:[#allocation9 + $0x478] sm:$0xff]  ;;  %v7829_v62 = vpack.c.bf16 %v2588_v57, %v2585_v56  ;;  %v7831_v6 = vpack.c.bf16 %v2587_v1, %v2584_v58  ;;  %v2596_v11 = vld [vmem:[#allocation9 + $0x510] sm:$0xff] }
 0x206   :  { %7792 = vmatpush1.bf16.msra.mxu1 %v7791_v10  ;;  %v2161_v10 = vld [vmem:[#allocation9 + $0x1e8] sm:$0xff]  ;;  %v2589_v5 = vld [vmem:[#allocation9 + $0x4d8] sm:$0xff]  ;;  %v2620_v57 = vld [vmem:[#allocation9 + $0x5d0] sm:$0xff] }
 0x207   :  { %7751 = vmatpush1.bf16.msra.mxu0 %v7750_v12  ;;  %7793 = vmatprep.subr.bf16.mxu1 %v9608_v0  ;;  %v2164_v12 = vld [vmem:[#allocation9 + $0x200] sm:$0xff]  ;;  %v2591_v2 = vld [vmem:[#allocation9 + $0x4e8] sm:$0xff]  ;;  %v2601_v20 = vld [vmem:[#allocation9 + $0x538] sm:$0xff] }
 0x208   :  { %7753 = vmatprep.subr.bf16.mxu0 %v7752_v14  ;;  %v7778_v14 = vpack.c.bf16 %v2157_v18, %v2154_v9  ;;  %v7780_v16 = vpack.c.bf16 %v2164_v12, %v2161_v10  ;;  %v2595_v9 = vld [vmem:[#allocation9 + $0x508] sm:$0xff]  ;;  %v2590_v18 = vld [vmem:[#allocation9 + $0x4e0] sm:$0xff]  ;;  %v2593_v10 = vld [vmem:[#allocation9 + $0x4f8] sm:$0xff] }
 0x209   :  { %v2597_v12 = vld [vmem:[#allocation9 + $0x518] sm:$0xff]  ;;  %v7835_v15 = vpack.c.bf16 %v2593_v10, %v2590_v18  ;;  %v2631_v1 = vld [vmem:[#allocation9 + $0x628] sm:$0xff] }
 0x20a   :  { %7795 = vmatpush1.bf16.msra.mxu1 %v7794_v4  ;;  %v2625_v56 = vld [vmem:[#allocation9 + $0x5f8] sm:$0xff] }
 0x20b   :  { %7755 = vmatpush1.bf16.msra.mxu0 %v7754_v21  ;;  %7796 = vmatprep.subr.bf16.mxu1 %v9608_v0  ;;  %v2567_v21 = vld [vmem:[#allocation9 + $0x428] sm:$0xff] }
 0x20c   :  { %7757 = vmatprep.subr.bf16.mxu0 %v7756_v23  ;;  %v7817_v27 = vpack.c.bf16 %v2570_v22, %v2567_v21  ;;  %v2603_v21 = vld [vmem:[#allocation9 + $0x548] sm:$0xff]  ;;  %v2606_v22 = vld [vmem:[#allocation9 + $0x560] sm:$0xff] }
 0x20e   :  { %7798 = vmatpush1.bf16.msra.mxu1 %v7797_v28  ;;  %v2571_v28 = vld [vmem:[#allocation9 + $0x448] sm:$0xff] }
 0x20f   :  { %7759 = vmatpush1.bf16.msra.mxu0 %v7758_v29  ;;  %7799 = vmatprep.subr.bf16.mxu1 %v9608_v0  ;;  %v2566_v29 = vld [vmem:[#allocation9 + $0x420] sm:$0xff]  ;;  %v7862_v36 = vpack.c.bf16 %v2571_v28, %v2568_v26  ;;  %v7841_v26 = vpack.c.bf16 %v2606_v22, %v2603_v21 }
 0x210   :  { %7761 = vmatprep.subr.bf16.mxu0 %v7760_v31  ;;  %v2602_v28 = vld [vmem:[#allocation9 + $0x540] sm:$0xff] }
 0x212   :  { %7801 = vmatpush1.bf16.msra.mxu1 %v7800_v38  ;;  %v7819_v38 = vpack.c.bf16 %v2569_v30, %v2566_v29  ;;  %v2605_v29 = vld [vmem:[#allocation9 + $0x558] sm:$0xff] }
 0x213   :  { %7763 = vmatpush1.bf16.msra.mxu0 %v7762_v39  ;;  %7802 = vmatprep.subr.bf16.mxu1 %v9608_v0  ;;  %v2574_v39 = vld [vmem:[#allocation9 + $0x460] sm:$0xff]  ;;  %v2609_v30 = vld [vmem:[#allocation9 + $0x578] sm:$0xff] }
 0x214   :  { %7765 = vmatprep.subr.bf16.mxu0 %v7764_v41  ;;  %v2572_v41 = vld [vmem:[#allocation9 + $0x450] sm:$0xff] }
 0x216   :  { %7804 = vmatpush1.bf16.msra.mxu1 %v7803_v49  ;;  %v7865_v49 = vpack.c.bf16 %v2577_v40, %v2574_v39  ;;  %v2611_v39 = vld [vmem:[#allocation9 + $0x588] sm:$0xff] }
 0x217   :  { %7767 = vmatpush1.bf16.msra.mxu0 %v7766_v45  ;;  %7805 = vmatprep.subr.bf16.mxu1 %v9608_v0  ;;  %v7823_v45 = vpack.c.bf16 %v2575_v42, %v2572_v41  ;;  %v2615_v40 = vld [vmem:[#allocation9 + $0x5a8] sm:$0xff]  ;;  %v2618_v41 = vld [vmem:[#allocation9 + $0x5c0] sm:$0xff] }
 0x218   :  { %7769 = vmatprep.subr.bf16.mxu0 %v7768_v51  ;;  %v7825_v51 = vpack.c.bf16 %v2582_v47, %v2579_v44  ;;  %v7849_v44 = vpack.c.bf16 %v2618_v41, %v2615_v40  ;;  %v2619_v47 = vld [vmem:[#allocation9 + $0x5c8] sm:$0xff]  ;;  %v2817_v41 = vld [vmem:[#allocation9 + $0x6b8] sm:$0xff] }
 0x21a   :  { %7807 = vmatpush1.bf16.msra.mxu1 %v7806_v53  ;;  %v2563_v53 = vld [vmem:[%s10531_s0 + $0x98] sm:$0xff] }
 0x21b   :  { %7771 = vmatpush1.bf16.msra.mxu0 %v7770_v59  ;;  %7808 = vmatprep.subr.bf16.mxu1 %v9608_v0  ;;  %v7868_v59 = vpack.c.bf16 %v2583_v52, %v2580_v50  ;;  %v2624_v50 = vld [vmem:[#allocation9 + $0x5f0] sm:$0xff] }
 0x21c   :  { %7773 = vmatprep.subr.bf16.mxu0 %v7772_v61  ;;  %v2586_v61 = vld [vmem:[#allocation9 + $0x4c0] sm:$0xff] }
 0x21e   :  { %7810 = vmatpush1.bf16.msra.mxu1 %v7809_v3  ;;  %v2594_v3 = vld [vmem:[#allocation9 + $0x500] sm:$0xff] }
 0x21f   :  { %7775 = vmatpush1.bf16.msra.mxu0 %v7774_v63  ;;  %7811 = vmatprep.subr.bf16.mxu1 %v9608_v0  ;;  %v7871_v63 = vpack.c.bf16 %v2589_v5, %v2586_v61  ;;  %v7833_v8 = vpack.c.bf16 %v2594_v3, %v2591_v2  ;;  %v7889_v61 = vpack.c.bf16 %v2625_v56, %v2622_v54  ;;  %v2628_v5 = vld [vmem:[#allocation9 + $0x610] sm:$0xff]  ;;  %v2626_v2 = vld [vmem:[#allocation9 + $0x600] sm:$0xff]  ;;  %v2629_v3 = vld [vmem:[#allocation9 + $0x618] sm:$0xff] }
 0x220   :  { %7777 = vmatprep.subr.bf16.mxu0 %v7776_v7  ;;  %v1319_v4 = vpop.f32.mrb[16].mxu1  ;;  %v2592_v7 = vld [vmem:[#allocation9 + $0x4f0] sm:$0xff]  ;;  %v7892_v18 = vpack.c.bf16 %v2631_v1, %v2628_v5  ;;  %v7859_v10 = vpack.c.bf16 %v2629_v3, %v2626_v2  ;;  %v2821_v54 = vld [vmem:[#allocation9 + $0x6d8] sm:$0xff]  ;;  %v2827_v5 = vld [vmem:[#allocation9 + $0x708] sm:$0xff] }
 0x221   :  { %v10067_v23 = vadd.f32 %v1319_v4, %v10040_v37  ;;  %v1321_v24 = vpop.f32.mrb[17].mxu1  ;;  %v2576_v37 = vld [vmem:[#allocation9 + $0x470] sm:$0xff]  ;;  %v2599_v4 = vld [vmem:[#allocation9 + $0x528] sm:$0xff]  ;;  %v2834_v1 = vld [vmem:[#allocation9 + $0x740] sm:$0xff] }
 0x222   :  { %7813 = vmatpush1.bf16.msra.mxu1 %v7812_v13  ;;  %v7821_v43 = vpack.c.bf16 %v2576_v37, %v2573_v33  ;;  %v2600_v13 = vld [vmem:[#allocation9 + $0x530] sm:$0xff]  ;;  %v7843_v37 = vpack.c.bf16 %v2605_v29, %v2602_v28  ;;  %v2809_v28 = vld [vmem:[#allocation9 + $0x678] sm:$0xff] }
 0x223   :  { %7779 = vmatpush1.bf16.msra.mxu0 %v7778_v14  ;;  %7814 = vmatprep.subr.bf16.mxu1 %v9608_v0  ;;  %v7874_v14 = vpack.c.bf16 %v2595_v9, %v2592_v7  ;;  %v7837_v17 = vpack.c.bf16 %v2600_v13, %v2597_v12  ;;  %v2804_v7 = vld [vmem:[#allocation9 + $0x650] sm:$0xff]  ;;  %v2802_v12 = vld [vmem:[#allocation9 + $0x640] sm:$0xff] }
 0x224   :  { %7781 = vmatprep.subr.bf16.mxu0 %v7780_v16  ;;  %v1324_v31 = vpop.f32.mrb[18].mxu1  ;;  %v2598_v16 = vld [vmem:[#allocation9 + $0x520] sm:$0xff]  ;;  %v2565_v29 = vld [vmem:[%s10531_s0 + $0xa8] sm:$0x3] }
 0x225   :  { %v10071_v32 = vadd.f32 %v1324_v31, %v10044_v46  ;;  %v1326_v34 = vpop.f32.mrb[19].mxu1  ;;  %v2099_v46 = vld [vmem:[%s10531_s0 + $0x78] sm:$0x3]  ;;  %v7877_v24 = vpack.c.bf16 %v2601_v20, %v2598_v16  ;;  %v2612_v31 = vld [vmem:[#allocation9 + $0x590] sm:$0xff]  ;;  %v2803_v16 = vld [vmem:[#allocation9 + $0x648] sm:$0xff] }
 0x226   :  { %7816 = vmatpush1.bf16.msra.mxu1 %v7815_v25  ;;  %v7839_v25 = vpack.c.bf16 %v2599_v4, %v2596_v11  ;;  %v2610_v34 = vld [vmem:[#allocation9 + $0x580] sm:$0xff]  ;;  %v2807_v11 = vld [vmem:[#allocation9 + $0x668] sm:$0xff]  ;;  %v2828_v56 = vld [vmem:[#allocation9 + $0x710] sm:$0xff] }
 0x227   :  { %7783 = vmatpush1.bf16.msra.mxu0 %v7782_v19  ;;  %7861 = vmatprep.subr.bf16.mxu1 %v9608_v0  ;;  %v2604_v19 = vld [vmem:[#allocation9 + $0x550] sm:$0xff]  ;;  %v2810_v4 = vld [vmem:[#allocation9 + $0x680] sm:$0xff] }
 0x228   :  { %7818 = vmatprep.subr.bf16.mxu0 %v7817_v27  ;;  %v2607_v27 = vld [vmem:[#allocation9 + $0x568] sm:$0xff] }
 0x229   :  { %2552 = vmatmul.mubr.f32.vlgmr.msra.gmra.mrb[36].mxu1 %v2096_v35  ;;  %v7880_v33 = vpack.c.bf16 %v2607_v27, %v2604_v19  ;;  %v2797_v19 = vld [vmem:[%s10531_s0 + $0xa8] sm:$0xf0]  ;;  %v2806_v27 = vld [vmem:[#allocation9 + $0x660] sm:$0xff] }
 0x22a   :  { %2475 = vmatmul.mubr.f32.vlgmr.msra.gmra.mrb[4].mxu0 %v2096_v35  ;;  %7863 = vmatpush1.bf16.msra.mxu1 %v7862_v36  ;;  %v7845_v35 = vpack.c.bf16 %v2612_v31, %v2609_v30  ;;  %v2613_v36 = vld [vmem:[#allocation9 + $0x598] sm:$0xff]  ;;  %v7898_v30 = vpack.c.bf16 %v2810_v4, %v2807_v11  ;;  %v2839_v11 = vld [vmem:[#allocation9 + $0x768] sm:$0xff] }
 0x22b   :  { %7820 = vmatpush1.bf16.msra.mxu0 %v7819_v38  ;;  %6873 = vmatprep.mubr.msk.f32.mxu1 %vm304_vm1, %v2099_v46  ;;  %v2608_v38 = vld [vmem:[#allocation9 + $0x570] sm:$0xff]  ;;  %v7883_v42 = vpack.c.bf16 %v2613_v36, %v2610_v34  ;;  %v2813_v31 = vld [vmem:[#allocation9 + $0x698] sm:$0xff]  ;;  %v2843_v4 = vld [vmem:[#allocation9 + $0x788] sm:$0xff] }
 0x22c   :  { %7864 = vmatprep.subr.bf16.mxu1 %v9608_v0  ;;  %7822 = vmatprep.subr.bf16.mxu0 %v7821_v43  ;;  %v2616_v43 = vld [vmem:[#allocation9 + $0x5b0] sm:$0xff] }
 0x22d   :  { %6871 = vmatprep.mubr.msk.f32.mxu0 %vm304_vm1, %v2099_v46  ;;  %2557 = vmatmul.mubr.f32.gmra.mrb[38].mxu1 %v2098_v48  ;;  %v7847_v46 = vpack.c.bf16 %v2611_v39, %v2608_v38  ;;  %v7900_v38 = vpack.c.bf16 %v2809_v28, %v2806_v27  ;;  %v2814_v39 = vld [vmem:[#allocation9 + $0x6a0] sm:$0xff]  ;;  %v2845_v27 = vld [vmem:[#allocation9 + $0x798] sm:$0xff] }
 0x22e   :  { %2481 = vmatmul.mubr.f32.gmra.mrb[6].mxu0 %v2098_v48  ;;  %7866 = vmatpush1.bf16.msra.mxu1 %v7865_v49  ;;  %v2614_v48 = vld [vmem:[#allocation9 + $0x5a0] sm:$0xff]  ;;  %v2617_v49 = vld [vmem:[#allocation9 + $0x5b8] sm:$0xff] }
 0x22f   :  { %7824 = vmatpush1.bf16.msra.mxu0 %v7823_v45  ;;  %7867 = vmatprep.subr.bf16.mxu1 %v9608_v0  ;;  %v2621_v45 = vld [vmem:[#allocation9 + $0x5d8] sm:$0xff]  ;;  %v7851_v52 = vpack.c.bf16 %v2617_v49, %v2614_v48  ;;  %v7945_v48 = vpack.c.bf16 %v2817_v41, %v2814_v39  ;;  %v2855_v39 = vld [vmem:[#allocation9 + $0x7e8] sm:$0xff] }
 0x230   :  { %7826 = vmatprep.subr.bf16.mxu0 %v7825_v51  ;;  %6876 = vmatprep.mubr.msk.f32.mxu1 %vm304_vm1, %v2563_v53  ;;  %v7886_v51 = vpack.c.bf16 %v2619_v47, %v2616_v43  ;;  %v7853_v55 = vpack.c.bf16 %v2624_v50, %v2621_v45  ;;  %v2819_v43 = vld [vmem:[#allocation9 + $0x6c8] sm:$0xff]  ;;  %v2820_v45 = vld [vmem:[#allocation9 + $0x6d0] sm:$0xff]  ;;  %v2849_v28 = vld [vmem:[#allocation9 + $0x7b8] sm:$0xff] }
 0x231   :  { %6874 = vmatprep.mubr.msk.f32.mxu0 %vm304_vm1, %v2563_v53  ;;  %v2623_v53 = vld [vmem:[#allocation9 + $0x5e8] sm:$0xff] }
 0x232   :  { %7869 = vmatpush1.bf16.msra.mxu1 %v7868_v59  ;;  %v2627_v59 = vld [vmem:[#allocation9 + $0x608] sm:$0xff] }
 0x233   :  { %7828 = vmatpush1.bf16.msra.mxu0 %v7827_v60  ;;  %7870 = vmatprep.subr.bf16.mxu1 %v9608_v0  ;;  %v2630_v60 = vld [vmem:[#allocation9 + $0x620] sm:$0xff] }
 0x234   :  { %7830 = vmatprep.subr.bf16.mxu0 %v7829_v62  ;;  %v7855_v62 = vpack.c.bf16 %v2623_v53, %v2620_v57  ;;  %v7857_v58 = vpack.c.bf16 %v2630_v60, %v2627_v59  ;;  %v2826_v59 = vld [vmem:[#allocation9 + $0x700] sm:$0xff] }
 0x236   :  { %7872 = vmatpush1.bf16.msra.mxu1 %v7871_v63 }
 0x237   :  { %7832 = vmatpush1.bf16.msra.mxu0 %v7831_v6  ;;  %7873 = vmatprep.subr.bf16.mxu1 %v9608_v0  ;;  %v2801_v6 = vld [vmem:[#allocation9 + $0x638] sm:$0xff] }
 0x238   :  { %7834 = vmatprep.subr.bf16.mxu0 %v7833_v8  ;;  %v7894_v13 = vpack.c.bf16 %v2804_v7, %v2801_v6  ;;  %v2835_v7 = vld [vmem:[#allocation9 + $0x748] sm:$0xff] }
 0x23a   :  { %7875 = vmatpush1.bf16.msra.mxu1 %v7874_v14  ;;  %v2805_v14 = vld [vmem:[#allocation9 + $0x658] sm:$0xff] }
 0x23b   :  { %7836 = vmatpush1.bf16.msra.mxu0 %v7835_v15  ;;  %7876 = vmatprep.subr.bf16.mxu1 %v9608_v0  ;;  %v2800_v15 = vld [vmem:[#allocation9 + $0x630] sm:$0xff]  ;;  %v7939_v22 = vpack.c.bf16 %v2805_v14, %v2802_v12 }
 0x23c   :  { %7838 = vmatprep.subr.bf16.mxu0 %v7837_v17  ;;  %v2840_v12 = vld [vmem:[#allocation9 + $0x770] sm:$0xff] }
 0x23e   :  { %7878 = vmatpush1.bf16.msra.mxu1 %v7877_v24  ;;  %v7896_v24 = vpack.c.bf16 %v2803_v16, %v2800_v15  ;;  %v2838_v15 = vld [vmem:[#allocation9 + $0x760] sm:$0xff] }
 0x23f   :  { %7840 = vmatpush1.bf16.msra.mxu0 %v7839_v25  ;;  %7879 = vmatprep.subr.bf16.mxu1 %v9608_v0  ;;  %v2808_v25 = vld [vmem:[#allocation9 + $0x670] sm:$0xff] }
 0x240   :  { %7842 = vmatprep.subr.bf16.mxu0 %v7841_v26  ;;  %v2811_v26 = vld [vmem:[#allocation9 + $0x688] sm:$0xff] }
 0x241   :  { %v7942_v36 = vpack.c.bf16 %v2811_v26, %v2808_v25  ;;  %v2844_v25 = vld [vmem:[#allocation9 + $0x790] sm:$0xff]  ;;  %v2842_v26 = vld [vmem:[#allocation9 + $0x780] sm:$0xff] }
 0x242   :  { %7881 = vmatpush1.bf16.msra.mxu1 %v7880_v33  ;;  %v2816_v33 = vld [vmem:[#allocation9 + $0x6b0] sm:$0xff] }
 0x243   :  { %7844 = vmatpush1.bf16.msra.mxu0 %v7843_v37  ;;  %7882 = vmatprep.subr.bf16.mxu1 %v9608_v0  ;;  %v2873_v37 = vrot.slane %v2797_v19, 4  ;;  %v7902_v40 = vpack.c.bf16 %v2816_v33, %v2813_v31  ;;  %v7924_v31 = vpack.c.bf16 %v2845_v27, %v2842_v26  ;;  %v2850_v33 = vld [vmem:[#allocation9 + $0x7c0] sm:$0xff] }
 0x244   :  { %7846 = vmatprep.subr.bf16.mxu0 %v7845_v35  ;;  %v2564_v35 = vld [vmem:[%s10531_s0 + $0xa0] sm:$0x3] }
 0x246   :  { %7884 = vmatpush1.bf16.msra.mxu1 %v7883_v42  ;;  %v2812_v42 = vld [vmem:[#allocation9 + $0x690] sm:$0xff] }
 0x247   :  { %7848 = vmatpush1.bf16.msra.mxu0 %v7847_v46  ;;  %7885 = vmatprep.subr.bf16.mxu1 %v9608_v0  ;;  %v2815_v46 = vld [vmem:[#allocation9 + $0x6a8] sm:$0xff] }
 0x248   :  { %7850 = vmatprep.subr.bf16.mxu0 %v7849_v44  ;;  %v2822_v44 = vld [vmem:[#allocation9 + $0x6e0] sm:$0xff]  ;;  %v7904_v49 = vpack.c.bf16 %v2815_v46, %v2812_v42  ;;  %v2856_v46 = vld [vmem:[#allocation9 + $0x7f0] sm:$0xff] }
 0x249   :  { %v7906_v50 = vpack.c.bf16 %v2822_v44, %v2819_v43  ;;  %v2859_v44 = vld [vmem:[#allocation9 + $0x808] sm:$0xff] }
 0x24a   :  { %7887 = vmatpush1.bf16.msra.mxu1 %v7886_v51  ;;  %v2823_v51 = vld [vmem:[#allocation9 + $0x6e8] sm:$0xff] }
 0x24b   :  { %7852 = vmatpush1.bf16.msra.mxu0 %v7851_v52  ;;  %7888 = vmatprep.subr.bf16.mxu1 %v9608_v0  ;;  %v2818_v52 = vld [vmem:[#allocation9 + $0x6c0] sm:$0xff]  ;;  %v7948_v57 = vpack.c.bf16 %v2823_v51, %v2820_v45  ;;  %v2864_v45 = vld [vmem:[#allocation9 + $0x830] sm:$0xff] }
 0x24c   :  { %7854 = vmatprep.subr.bf16.mxu0 %v7853_v55  ;;  %v1564_v63 = vpop.f32.mrb[20].mxu1  ;;  %v2825_v55 = vld [vmem:[#allocation9 + $0x6f8] sm:$0xff]  ;;  %v7908_v53 = vpack.c.bf16 %v2821_v54, %v2818_v52  ;;  %v2862_v52 = vld [vmem:[#allocation9 + $0x820] sm:$0xff] }
 0x24d   :  { %v10100_v8 = vadd.f32 %v1564_v63, %v10067_v23  ;;  %v1566_v9 = vpop.f32.mrb[21].mxu1  ;;  %v2562_v23 = vld [vmem:[%s10531_s0 + $0x90] sm:$0xff]  ;;  %v7910_v60 = vpack.c.bf16 %v2828_v56, %v2825_v55  ;;  %v2832_v63 = vld [vmem:[#allocation9 + $0x730] sm:$0xff] }
 0x24e   :  { %7890 = vmatpush1.bf16.msra.mxu1 %v7889_v61  ;;  %v2829_v61 = vld [vmem:[#allocation9 + $0x718] sm:$0xff]  ;;  %v2830_v9 = vld [vmem:[#allocation9 + $0x720] sm:$0xff]  ;;  %v2860_v55 = vld [vmem:[#allocation9 + $0x810] sm:$0xff] }
 0x24f   :  { %7856 = vmatpush1.bf16.msra.mxu0 %v7855_v62  ;;  %7891 = vmatprep.subr.bf16.mxu1 %v9608_v0  ;;  %v2824_v62 = vld [vmem:[#allocation9 + $0x6f0] sm:$0xff]  ;;  %v7951_v2 = vpack.c.bf16 %v2829_v61, %v2826_v59  ;;  %v2865_v54 = vld [vmem:[#allocation9 + $0x838] sm:$0xff]  ;;  %v3045_v61 = vld [vmem:[#allocation9 + $0x848] sm:$0xff] }
 0x250   :  { %7858 = vmatprep.subr.bf16.mxu0 %v7857_v58  ;;  %v1569_v17 = vpop.f32.mrb[22].mxu1  ;;  %v2831_v58 = vld [vmem:[#allocation9 + $0x728] sm:$0xff]  ;;  %v7912_v3 = vpack.c.bf16 %v2827_v5, %v2824_v62  ;;  %v2798_v59 = vld [vmem:[%s10531_s0 + $0xb0] sm:$0x3f]  ;;  %v3048_v62 = vld [vmem:[#allocation9 + $0x860] sm:$0xff] }
 0x251   :  { %v10104_v20 = vadd.f32 %v1569_v17, %v10071_v32  ;;  %v1571_v21 = vpop.f32.mrb[23].mxu1  ;;  %v2799_v32 = vld [vmem:[%s10531_s0 + $0xb8] sm:$0x3f]  ;;  %v7914_v6 = vpack.c.bf16 %v2834_v1, %v2831_v58  ;;  %v2841_v17 = vld [vmem:[#allocation9 + $0x778] sm:$0xff]  ;;  %v7969_v1 = vpack.c.bf16 %v2865_v54, %v2862_v52  ;;  %v3073_v52 = vld [vmem:[#allocation9 + $0x928] sm:$0xff] }
 0x252   :  { %7893 = vmatpush1.bf16.msra.mxu1 %v7892_v18  ;;  %v10119_v34 = vrot.slane %v2799_v32, 4  ;;  %v2833_v18 = vld [vmem:[#allocation9 + $0x738] sm:$0xff]  ;;  %v2846_v21 = vld [vmem:[#allocation9 + $0x7a0] sm:$0xff]  ;;  %v2847_v32 = vld [vmem:[#allocation9 + $0x7a8] sm:$0xff] }
 0x253   :  { %7860 = vmatpush1.bf16.msra.mxu0 %v7859_v10  ;;  %7938 = vmatprep.subr.bf16.mxu1 %v9608_v0  ;;  %v2837_v10 = vld [vmem:[#allocation9 + $0x758] sm:$0xff]  ;;  %v7916_v14 = vpack.c.bf16 %v2833_v18, %v2830_v9  ;;  %v7922_v19 = vpack.c.bf16 %v2846_v21, %v2843_v4  ;;  %v3049_v9 = vld [vmem:[#allocation9 + $0x868] sm:$0xff]  ;;  %v3044_v18 = vld [vmem:[#allocation9 + $0x840] sm:$0xff] }
 0x254   :  { %7895 = vmatprep.subr.bf16.mxu0 %v7894_v13  ;;  %v2875_v47 = vsel %vm295_vm0, %v2873_v37, %v10119_v34  ;;  %v7954_v13 = vpack.c.bf16 %v2835_v7, %v2832_v63  ;;  %v7918_v16 = vpack.c.bf16 %v2840_v12, %v2837_v10  ;;  %v2871_v63 = vrot.slane %v2798_v59, 4  ;;  %v3047_v10 = vld [vmem:[#allocation9 + $0x858] sm:$0xff]  ;;  %v3041_v4 = vld [vmem:[%s10531_s0 + $0x8] sm:$0xfc]  ;;  %v3043_v21 = vld [vmem:[%s10531_s0 + $0x18] sm:$0xf] }
 0x255   :  { %2780 = vmatmul.mubr.f32.vlgmr.msra.gmra.mrb[40].mxu1 %v2562_v23  ;;  %v7971_v7 = vpack.c.bf16 %v3048_v62, %v3045_v61  ;;  %v3118_v26 = vrot.slane %v3041_v4, 2  ;;  %v10160_v27 = vrot.slane %v3043_v21, 2  ;;  %v3068_v54 = vld [vmem:[#allocation9 + $0x900] sm:$0xff]  ;;  %v3079_v62 = vld [vmem:[#allocation9 + $0x958] sm:$0xff]  ;;  %v3086_v21 = vld [vmem:[#allocation9 + $0x990] sm:$0xff] }
 0x256   :  { %2703 = vmatmul.mubr.f32.vlgmr.msra.gmra.mrb[4].mxu0 %v2562_v23  ;;  %7940 = vmatpush1.bf16.msra.mxu1 %v7939_v22  ;;  %v2836_v23 = vld [vmem:[#allocation9 + $0x750] sm:$0xff]  ;;  %v7957_v22 = vpack.c.bf16 %v2841_v17, %v2838_v15  ;;  %v3091_v4 = vld [vmem:[#allocation9 + $0x9b8] sm:$0xff] }
 0x257   :  { %7897 = vmatpush1.bf16.msra.mxu0 %v7896_v24  ;;  %6877 = vmatprep.mubr.msk.f32.mxu1 %vm304_vm1, %v2565_v29  ;;  %v7920_v24 = vpack.c.bf16 %v2839_v11, %v2836_v23  ;;  %v7973_v23 = vpack.c.bf16 %v3047_v10, %v3044_v18  ;;  %v3052_v11 = vld [vmem:[#allocation9 + $0x880] sm:$0xff]  ;;  %v3085_v18 = vld [vmem:[#allocation9 + $0x988] sm:$0xff] }
 0x258   :  { %7941 = vmatprep.subr.bf16.mxu1 %v9608_v0  ;;  %7899 = vmatprep.subr.bf16.mxu0 %v7898_v30  ;;  %v7960_v30 = vpack.c.bf16 %v2847_v32, %v2844_v25  ;;  %v3060_v32 = vld [vmem:[#allocation9 + $0x8c0] sm:$0xff] }
 0x259   :  { %6875 = vmatprep.mubr.msk.f32.mxu0 %vm304_vm1, %v2565_v29  ;;  %2785 = vmatmul.mubr.f32.gmra.mrb[42].mxu1 %v2564_v35  ;;  %v2852_v29 = vld [vmem:[#allocation9 + $0x7d0] sm:$0xff]  ;;  %v3080_v10 = vld [vmem:[#allocation9 + $0x960] sm:$0xff] }
 0x25a   :  { %2709 = vmatmul.mubr.f32.gmra.mrb[6].mxu0 %v2564_v35  ;;  %7943 = vmatpush1.bf16.msra.mxu1 %v7942_v36  ;;  %v7926_v37 = vpack.c.bf16 %v2852_v29, %v2849_v28  ;;  %v2853_v35 = vld [vmem:[#allocation9 + $0x7d8] sm:$0xff]  ;;  %v2848_v36 = vld [vmem:[#allocation9 + $0x7b0] sm:$0xff] }
 0x25b   :  { %7901 = vmatpush1.bf16.msra.mxu0 %v7900_v38  ;;  %7944 = vmatprep.subr.bf16.mxu1 %v9608_v0  ;;  %v2851_v38 = vld [vmem:[#allocation9 + $0x7c8] sm:$0xff]  ;;  %v7963_v41 = vpack.c.bf16 %v2853_v35, %v2850_v33  ;;  %v3059_v35 = vld [vmem:[#allocation9 + $0x8b8] sm:$0xff] }
 0x25c   :  { %7903 = vmatprep.subr.bf16.mxu0 %v7902_v40  ;;  %6880 = vmatprep.mubr.msk.f32.mxu1 %vm304_vm1, %v2875_v47  ;;  %v2858_v40 = vld [vmem:[#allocation9 + $0x800] sm:$0xff]  ;;  %v7928_v42 = vpack.c.bf16 %v2851_v38, %v2848_v36  ;;  %v3061_v33 = vld [vmem:[#allocation9 + $0x8c8] sm:$0xff]  ;;  %v3063_v36 = vld [vmem:[#allocation9 + $0x8d8] sm:$0xff] }
 0x25d   :  { %6878 = vmatprep.mubr.msk.f32.mxu0 %vm304_vm1, %v2875_v47  ;;  %v7930_v43 = vpack.c.bf16 %v2858_v40, %v2855_v39  ;;  %v2854_v47 = vld [vmem:[#allocation9 + $0x7e0] sm:$0xff]  ;;  %v3066_v38 = vld [vmem:[#allocation9 + $0x8f0] sm:$0xff]  ;;  %v3120_v39 = vsel %vm3114_vm2, %v3118_v26, %v10160_v27 }
 0x25e   :  { %7946 = vmatpush1.bf16.msra.mxu1 %v7945_v48  ;;  %v2857_v48 = vld [vmem:[#allocation9 + $0x7f8] sm:$0xff]  ;;  %v3094_v26 = vld [vmem:[#allocation9 + $0x9d0] sm:$0xff] }
 0x25f   :  { %7905 = vmatpush1.bf16.msra.mxu0 %v7904_v49  ;;  %7947 = vmatprep.subr.bf16.mxu1 %v9608_v0  ;;  %v2861_v49 = vld [vmem:[#allocation9 + $0x818] sm:$0xff]  ;;  %v7932_v51 = vpack.c.bf16 %v2857_v48, %v2854_v47  ;;  %v3065_v47 = vld [vmem:[#allocation9 + $0x8e8] sm:$0xff] }
 0x260   :  { %7907 = vmatprep.subr.bf16.mxu0 %v7906_v50  ;;  %v7966_v50 = vpack.c.bf16 %v2859_v44, %v2856_v46  ;;  %v7934_v56 = vpack.c.bf16 %v2864_v45, %v2861_v49  ;;  %v7983_v46 = vpack.c.bf16 %v3066_v38, %v3063_v36  ;;  %v3062_v44 = vld [vmem:[#allocation9 + $0x8d0] sm:$0xff]  ;;  %v3069_v48 = vld [vmem:[#allocation9 + $0x908] sm:$0xff]  ;;  %v3072_v49 = vld [vmem:[#allocation9 + $0x920] sm:$0xff] }
 0x261   :  { %v7985_v45 = vpack.c.bf16 %v3065_v47, %v3062_v44  ;;  %v3098_v44 = vld [vmem:[#allocation9 + $0x9f0] sm:$0xff]  ;;  %v3101_v47 = vld [vmem:[#allocation9 + $0xa08] sm:$0xff] }
 0x262   :  { %7949 = vmatpush1.bf16.msra.mxu1 %v7948_v57  ;;  %v2863_v57 = vld [vmem:[#allocation9 + $0x828] sm:$0xff] }
 0x263   :  { %7909 = vmatpush1.bf16.msra.mxu0 %v7908_v53  ;;  %7950 = vmatprep.subr.bf16.mxu1 %v9608_v0  ;;  %v2796_v53 = vld [vmem:[%s10531_s0 + $0xa0] sm:$0xf0] }
 0x264   :  { %7911 = vmatprep.subr.bf16.mxu0 %v7910_v60 }
 0x266   :  { %7952 = vmatpush1.bf16.msra.mxu1 %v7951_v2  ;;  %v7936_v2 = vpack.c.bf16 %v2863_v57, %v2860_v55  ;;  %v3071_v55 = vld [vmem:[#allocation9 + $0x918] sm:$0xff]  ;;  %v3078_v57 = vld [vmem:[#allocation9 + $0x950] sm:$0xff] }
 0x267   :  { %7913 = vmatpush1.bf16.msra.mxu0 %v7912_v3  ;;  %7953 = vmatprep.subr.bf16.mxu1 %v9608_v0  ;;  %v2870_v3 = vrot.slane %v2796_v53, 4  ;;  %v7989_v59 = vpack.c.bf16 %v3071_v55, %v3068_v54  ;;  %v3109_v54 = vld [vmem:[#allocation9 + $0xa48] sm:$0xff]  ;;  %v3104_v55 = vld [vmem:[#allocation9 + $0xa20] sm:$0xff] }
 0x268   :  { %7915 = vmatprep.subr.bf16.mxu0 %v7914_v6  ;;  %v3046_v6 = vld [vmem:[#allocation9 + $0x850] sm:$0xff] }
 0x269   :  { %v8016_v17 = vpack.c.bf16 %v3049_v9, %v3046_v6 }
 0x26a   :  { %7955 = vmatpush1.bf16.msra.mxu1 %v7954_v13 }
 0x26b   :  { %7917 = vmatpush1.bf16.msra.mxu0 %v7916_v14  ;;  %7956 = vmatprep.subr.bf16.mxu1 %v9608_v0  ;;  %v3054_v14 = vld [vmem:[#allocation9 + $0x890] sm:$0xff] }
 0x26c   :  { %7919 = vmatprep.subr.bf16.mxu0 %v7918_v16  ;;  %v2872_v16 = vsel %vm295_vm0, %v2870_v3, %v2871_v63  ;;  %v3084_v3 = vld [vmem:[#allocation9 + $0x980] sm:$0xff] }
 0x26e   :  { %7958 = vmatpush1.bf16.msra.mxu1 %v7957_v22  ;;  %v3050_v22 = vld [vmem:[#allocation9 + $0x870] sm:$0xff] }
 0x26f   :  { %7921 = vmatpush1.bf16.msra.mxu0 %v7920_v24  ;;  %7959 = vmatprep.subr.bf16.mxu1 %v9608_v0  ;;  %v3053_v24 = vld [vmem:[#allocation9 + $0x888] sm:$0xff] }
 0x270   :  { %7923 = vmatprep.subr.bf16.mxu0 %v7922_v19  ;;  %v3057_v19 = vld [vmem:[#allocation9 + $0x8a8] sm:$0xff]  ;;  %v7977_v29 = vpack.c.bf16 %v3053_v24, %v3050_v22  ;;  %v3096_v24 = vld [vmem:[#allocation9 + $0x9e0] sm:$0xff] }
 0x271   :  { %v3093_v22 = vld [vmem:[#allocation9 + $0x9c8] sm:$0xff] }
 0x272   :  { %7961 = vmatpush1.bf16.msra.mxu1 %v7960_v30  ;;  %v3058_v30 = vld [vmem:[#allocation9 + $0x8b0] sm:$0xff] }
 0x273   :  { %7925 = vmatpush1.bf16.msra.mxu0 %v7924_v31  ;;  %7962 = vmatprep.subr.bf16.mxu1 %v9608_v0  ;;  %v7979_v31 = vpack.c.bf16 %v3060_v32, %v3057_v19  ;;  %v8022_v40 = vpack.c.bf16 %v3061_v33, %v3058_v30  ;;  %v3092_v30 = vld [vmem:[#allocation9 + $0x9c0] sm:$0xff]  ;;  %v3099_v33 = vld [vmem:[#allocation9 + $0x9f8] sm:$0xff] }
 0x274   :  { %7927 = vmatprep.subr.bf16.mxu0 %v7926_v37  ;;  %v3056_v37 = vld [vmem:[#allocation9 + $0x8a0] sm:$0xff] }
 0x276   :  { %7964 = vmatpush1.bf16.msra.mxu1 %v7963_v41  ;;  %v7981_v41 = vpack.c.bf16 %v3059_v35, %v3056_v37  ;;  %v3102_v37 = vld [vmem:[#allocation9 + $0xa10] sm:$0xff] }
 0x277   :  { %7929 = vmatpush1.bf16.msra.mxu0 %v7928_v42  ;;  %7965 = vmatprep.subr.bf16.mxu1 %v9608_v0  ;;  %v3064_v42 = vld [vmem:[#allocation9 + $0x8e0] sm:$0xff] }
 0x278   :  { %7931 = vmatprep.subr.bf16.mxu0 %v7930_v43  ;;  %v1799_v60 = vpop.f32.mrb[24].mxu1  ;;  %v3067_v43 = vld [vmem:[#allocation9 + $0x8f8] sm:$0xff] }
 0x279   :  { %v10146_v5 = vadd.f32 %v1799_v60, %v10100_v8  ;;  %v1801_v58 = vpop.f32.mrb[25].mxu1  ;;  %v3051_v8 = vld [vmem:[#allocation9 + $0x878] sm:$0xff]  ;;  %v3076_v60 = vld [vmem:[#allocation9 + $0x940] sm:$0xff] }
 0x27a   :  { %7967 = vmatpush1.bf16.msra.mxu1 %v7966_v50  ;;  %v7975_v25 = vpack.c.bf16 %v3054_v14, %v3051_v8  ;;  %v3070_v50 = vld [vmem:[#allocation9 + $0x910] sm:$0xff]  ;;  %v3087_v8 = vld [vmem:[#allocation9 + $0x998] sm:$0xff] }
 0x27b   :  { %7933 = vmatpush1.bf16.msra.mxu0 %v7932_v51  ;;  %7968 = vmatprep.subr.bf16.mxu1 %v9608_v0  ;;  %v7987_v51 = vpack.c.bf16 %v3072_v49, %v3069_v48  ;;  %v8028_v53 = vpack.c.bf16 %v3073_v52, %v3070_v50  ;;  %v3074_v58 = vld [vmem:[#allocation9 + $0x930] sm:$0xff]  ;;  %v3105_v48 = vld [vmem:[#allocation9 + $0xa28] sm:$0xff]  ;;  %v3108_v49 = vld [vmem:[#allocation9 + $0xa40] sm:$0xff] }
 0x27c   :  { %7935 = vmatprep.subr.bf16.mxu0 %v7934_v56  ;;  %v1804_v12 = vpop.f32.mrb[26].mxu1  ;;  %v3075_v56 = vld [vmem:[#allocation9 + $0x938] sm:$0xff]  ;;  %v3090_v14 = vld [vmem:[#allocation9 + $0x9b0] sm:$0xff] }
 0x27d   :  { %v10150_v13 = vadd.f32 %v1804_v12, %v10104_v20  ;;  %v1806_v15 = vpop.f32.mrb[27].mxu1  ;;  %v3055_v20 = vld [vmem:[#allocation9 + $0x898] sm:$0xff]  ;;  %v7991_v61 = vpack.c.bf16 %v3078_v57, %v3075_v56  ;;  %v3106_v52 = vld [vmem:[#allocation9 + $0xa30] sm:$0xff]  ;;  %v8011_v57 = vpack.c.bf16 %v3108_v49, %v3105_v48 }
 0x27e   :  { %7970 = vmatpush1.bf16.msra.mxu1 %v7969_v1  ;;  %v8019_v28 = vpack.c.bf16 %v3055_v20, %v3052_v11  ;;  %v3077_v1 = vld [vmem:[#allocation9 + $0x948] sm:$0xff]  ;;  %v3083_v12 = vld [vmem:[#allocation9 + $0x978] sm:$0xff]  ;;  %v2061_v15 = vlaneseq  ;;  %v7999_v11 = vpack.c.bf16 %v3090_v14, %v3087_v8  ;;  %v3291_v8 = vld [vmem:[#allocation9 + $0xa60] sm:$0xff] }
 0x27f   :  { %7937 = vmatpush1.bf16.msra.mxu0 %v7936_v2  ;;  %8015 = vmatprep.subr.bf16.mxu1 %v9608_v0  ;;  %v3081_v2 = vld [vmem:[#allocation9 + $0x968] sm:$0xff]  ;;  %v7993_v6 = vpack.c.bf16 %v3077_v1, %v3074_v58  ;;  %v3290_v58 = vld [vmem:[#allocation9 + $0xa58] sm:$0xff]  ;;  %v3293_v1 = vld [vmem:[#allocation9 + $0xa70] sm:$0xff] }
 0x280   :  { %7972 = vmatprep.subr.bf16.mxu0 %v7971_v7  ;;  %v3082_v7 = vld [vmem:[#allocation9 + $0x970] sm:$0xff]  ;;  %v7995_v9 = vpack.c.bf16 %v3084_v3, %v3081_v2  ;;  %v3089_v20 = vld [vmem:[#allocation9 + $0x9a8] sm:$0xff]  ;;  %v3294_v14 = vld [vmem:[#allocation9 + $0xa78] sm:$0xff] }
 0x281   :  { %3024 = vmatmul.mubr.f32.vlgmr.msra.gmra.mrb[44].mxu1 %v2872_v16  ;;  %v8001_v32 = vpack.c.bf16 %v3089_v20, %v3086_v21  ;;  %v3302_v49 = vld [vmem:[#allocation9 + $0xab8] sm:$0xff] }
 0x282   :  { %2947 = vmatmul.mubr.f32.vlgmr.msra.gmra.mrb[4].mxu0 %v2872_v16  ;;  %8017 = vmatpush1.bf16.msra.mxu1 %v8016_v17  ;;  %v8034_v16 = vpack.c.bf16 %v3085_v18, %v3082_v7  ;;  %v7997_v17 = vpack.c.bf16 %v3083_v12, %v3080_v10  ;;  %v8046_v7 = vpack.c.bf16 %v3109_v54, %v3106_v52 }
 0x283   :  { %7974 = vmatpush1.bf16.msra.mxu0 %v7973_v23  ;;  %6881 = vmatprep.mubr.msk.f32.mxu1 %vm304_vm1, %v10119_v34  ;;  %v3088_v23 = vld [vmem:[#allocation9 + $0x9a0] sm:$0xff] }
 0x284   :  { %8018 = vmatprep.subr.bf16.mxu1 %v9608_v0  ;;  %7976 = vmatprep.subr.bf16.mxu0 %v7975_v25  ;;  %v10177_v25 = vshrl.u32 %v2061_v15, 7  ;;  %v8037_v19 = vpack.c.bf16 %v3091_v4, %v3088_v23  ;;  %v8048_v23 = vpack.c.bf16 %v3293_v1, %v3290_v58 }
 0x285   :  { %6879 = vmatprep.mubr.msk.f32.mxu0 %vm304_vm1, %v10119_v34  ;;  %3029 = vmatmul.mubr.f32.gmra.mrb[46].mxu1 %v2871_v63  ;;  %v8025_v34 = vpack.c.bf16 %v3067_v43, %v3064_v42  ;;  %v3103_v43 = vld [vmem:[#allocation9 + $0xa18] sm:$0xff] }
 0x286   :  { %2953 = vmatmul.mubr.f32.gmra.mrb[6].mxu0 %v2871_v63  ;;  %8020 = vmatpush1.bf16.msra.mxu1 %v8019_v28  ;;  %v8031_v63 = vpack.c.bf16 %v3079_v62, %v3076_v60  ;;  %v8003_v28 = vpack.c.bf16 %v3096_v24, %v3093_v22  ;;  %v10181_v35 = vsub.s32 0, %v10177_v25  ;;  %v10188_v42 = vsub.s32 2, %v10177_v25  ;;  %v3042_v60 = vld [vmem:[%s10531_s0 + $0x10] sm:$0xf] }
 0x287   :  { %7978 = vmatpush1.bf16.msra.mxu0 %v7977_v29  ;;  %8021 = vmatprep.subr.bf16.mxu1 %v9608_v0  ;;  %v3097_v29 = vld [vmem:[#allocation9 + $0x9e8] sm:$0xff]  ;;  %v10201_v12 = vrot.slane %v3042_v60, 2 }
 0x288   :  { %7980 = vmatprep.subr.bf16.mxu0 %v7979_v31  ;;  %6884 = vmatprep.mubr.msk.f32.mxu1 %vm304_vm1, %v3120_v39  ;;  %v3095_v31 = vld [vmem:[#allocation9 + $0x9d8] sm:$0xff]  ;;  %v8040_v36 = vpack.c.bf16 %v3097_v29, %v3094_v26  ;;  %v8093_v26 = vpack.c.bf16 %v3294_v14, %v3291_v8  ;;  %v3299_v29 = vld [vmem:[#allocation9 + $0xaa0] sm:$0xff]  ;;  %v3308_v60 = vld [vmem:[#allocation9 + $0xae8] sm:$0xff] }
 0x289   :  { %6882 = vmatprep.mubr.msk.f32.mxu0 %vm304_vm1, %v3120_v39  ;;  %v8005_v38 = vpack.c.bf16 %v3095_v31, %v3092_v30  ;;  %v2059_v39 = vld [vmem:[#allocation12] sm:$0x7]  ;;  %v3318_v14 = vld [vmem:[#allocation9 + $0xb38] sm:$0xff] }
 0x28a   :  { %8023 = vmatpush1.bf16.msra.mxu1 %v8022_v40  ;;  %v10184_v40 = vsub.s32 1, %v10177_v25  ;;  %v2072_v56 = vrot.slane %v2059_v39, %v10188_v42 }
 0x28b   :  { %7982 = vmatpush1.bf16.msra.mxu0 %v7981_v41  ;;  %8024 = vmatprep.subr.bf16.mxu1 %v9608_v0  ;;  %v3100_v41 = vld [vmem:[#allocation9 + $0xa00] sm:$0xff] }
 0x28c   :  { %7984 = vmatprep.subr.bf16.mxu0 %v7983_v46  ;;  %v8007_v46 = vpack.c.bf16 %v3102_v37, %v3099_v33  ;;  %v8043_v50 = vpack.c.bf16 %v3103_v43, %v3100_v41  ;;  %v3295_v43 = vld [vmem:[#allocation9 + $0xa80] sm:$0xff] }
 0x28e   :  { %8026 = vmatpush1.bf16.msra.mxu1 %v8025_v34  ;;  %v2064_v34 = vrot.slane %v2059_v39, %v10181_v35 }
 0x28f   :  { %7986 = vmatpush1.bf16.msra.mxu0 %v7985_v45  ;;  %8027 = vmatprep.subr.bf16.mxu1 %v9608_v0  ;;  %v2068_v45 = vrot.slane %v2059_v39, %v10184_v40 }
 0x290   :  { %7988 = vmatprep.subr.bf16.mxu0 %v7987_v51  ;;  %v8009_v51 = vpack.c.bf16 %v3101_v47, %v3098_v44  ;;  %v3298_v44 = vld [vmem:[#allocation9 + $0xa98] sm:$0xff] }
 0x291   :  { %v8054_v54 = vpack.c.bf16 %v3298_v44, %v3295_v43  ;;  %v3336_v44 = vld [vmem:[#allocation9 + $0xbc8] sm:$0xff] }
 0x292   :  { %8029 = vmatpush1.bf16.msra.mxu1 %v8028_v53  ;;  %v3107_v53 = vld [vmem:[#allocation9 + $0xa38] sm:$0xff] }
 0x293   :  { %7990 = vmatpush1.bf16.msra.mxu0 %v7989_v59  ;;  %8030 = vmatprep.subr.bf16.mxu1 %v9608_v0  ;;  %v3040_v59 = vld [vmem:[%s10531_s0] sm:$0xfc]  ;;  %v8013_v18 = vpack.c.bf16 %v3107_v53, %v3104_v55  ;;  %v3303_v55 = vld [vmem:[#allocation9 + $0xac0] sm:$0xff]  ;;  %v3301_v53 = vld [vmem:[#allocation9 + $0xab0] sm:$0xff] }
 0x294   :  { %7992 = vmatprep.subr.bf16.mxu0 %v7991_v61  ;;  %v3115_v10 = vrot.slane %v3040_v59, 2  ;;  %v3304_v59 = vld [vmem:[#allocation9 + $0xac8] sm:$0xff] }
 0x295   :  { %v8058_v1 = vpack.c.bf16 %v3304_v59, %v3301_v53  ;;  %v3344_v53 = vld [vmem:[#allocation9 + $0xc08] sm:$0xff]  ;;  %v3347_v59 = vld [vmem:[#allocation9 + $0xc20] sm:$0xff] }
 0x296   :  { %8032 = vmatpush1.bf16.msra.mxu1 %v8031_v63  ;;  %v3117_v33 = vsel %vm3114_vm2, %v3115_v10, %v10201_v12 }
 0x297   :  { %7994 = vmatpush1.bf16.msra.mxu0 %v7993_v6  ;;  %8033 = vmatprep.subr.bf16.mxu1 %v9608_v0 }
 0x298   :  { %7996 = vmatprep.subr.bf16.mxu0 %v7995_v9 }
 0x29a   :  { %8035 = vmatpush1.bf16.msra.mxu1 %v8034_v16 }
 0x29b   :  { %7998 = vmatpush1.bf16.msra.mxu0 %v7997_v17  ;;  %8036 = vmatprep.subr.bf16.mxu1 %v9608_v0 }
 0x29c   :  { %8000 = vmatprep.subr.bf16.mxu0 %v7999_v11  ;;  %v3292_v11 = vld [vmem:[#allocation9 + $0xa68] sm:$0xff] }
 0x29e   :  { %8038 = vmatpush1.bf16.msra.mxu1 %v8037_v19 }
 0x29f   :  { %8002 = vmatpush1.bf16.msra.mxu0 %v8001_v32  ;;  %8039 = vmatprep.subr.bf16.mxu1 %v9608_v0 }
 0x2a0   :  { %8004 = vmatprep.subr.bf16.mxu0 %v8003_v28  ;;  %v3296_v28 = vld [vmem:[#allocation9 + $0xa88] sm:$0xff] }
 0x2a1   :  { %v8052_v48 = vpack.c.bf16 %v3299_v29, %v3296_v28 }
 0x2a2   :  { %8041 = vmatpush1.bf16.msra.mxu1 %v8040_v36  ;;  %v3297_v36 = vld [vmem:[#allocation9 + $0xa90] sm:$0xff] }
 0x2a3   :  { %8006 = vmatpush1.bf16.msra.mxu0 %v8005_v38  ;;  %8042 = vmatprep.subr.bf16.mxu1 %v9608_v0  ;;  %v3286_v38 = vld [vmem:[%s10531_s0 + $0x18] sm:$0xc0] }
 0x2a4   :  { %8008 = vmatprep.subr.bf16.mxu0 %v8007_v46  ;;  %v2044_v61 = vpop.f32.mrb[28].mxu1  ;;  %v3300_v46 = vld [vmem:[#allocation9 + $0xaa8] sm:$0xff] }
 0x2a5   :  { %v1967_v62 = vpop.f32.mrb[0].mxu0  ;;  %v2055_v2 = vadd.f32 %v2044_v61, %v10146_v5  ;;  %v2046_v63 = vpop.f32.mrb[29].mxu1  ;;  %v3289_v5 = vld [vmem:[#allocation9 + $0xa50] sm:$0xff]  ;;  %v8096_v52 = vpack.c.bf16 %v3300_v46, %v3297_v36  ;;  %v3311_v61 = vld [vmem:[#allocation9 + $0xb00] sm:$0xff]  ;;  %v3328_v36 = vld [vmem:[#allocation9 + $0xb88] sm:$0xff] }
 0x2a6   :  { %v2076_v3 = vadd.f32 %v2064_v34, %v1967_v62  ;;  %v1969_v6 = vpop.f32.mrb[1].mxu0  ;;  %8044 = vmatpush1.bf16.msra.mxu1 %v8043_v50  ;;  %v8050_v37 = vpack.c.bf16 %v3292_v11, %v3289_v5  ;;  %v3363_v50 = vrot.slane %v3286_v38, 6  ;;  %v3312_v63 = vld [vmem:[#allocation9 + $0xb08] sm:$0xff]  ;;  %v3323_v5 = vld [vmem:[#allocation9 + $0xb60] sm:$0xff]  ;;  %v3333_v46 = vld [vmem:[#allocation9 + $0xbb0] sm:$0xff] }
 0x2a7   :  { %v2077_v9 = vadd.f32 %v2068_v45, %v1969_v6  ;;  %8010 = vmatpush1.bf16.msra.mxu0 %v8009_v51  ;;  %v2078_v16 = vadd.f32 %v2072_v56, %v2055_v2  ;;  %8045 = vmatprep.subr.bf16.mxu1 %v9608_v0  ;;  %v3309_v2 = vld [vmem:[#allocation9 + $0xaf0] sm:$0xff]  ;;  %v3307_v6 = vld [vmem:[#allocation9 + $0xae0] sm:$0xff]  ;;  %v3332_v38 = vld [vmem:[#allocation9 + $0xba8] sm:$0xff] }
 0x2a8   :  { %v2082_v17 = vmax.f32 %v2076_v3, 0.0  ;;  %8012 = vmatprep.subr.bf16.mxu0 %v8011_v57  ;;  %v2049_v21 = vpop.f32.mrb[30].mxu1  ;;  %v3306_v57 = vld [vmem:[#allocation9 + $0xad8] sm:$0xff]  ;;  %v8060_v3 = vpack.c.bf16 %v3311_v61, %v3308_v60 }
 0x2a9   :  { %v2083_v4 = vmax.f32 %v2077_v9, 0.0  ;;  %v1973_v20 = vpop.f32.mrb[2].mxu0  ;;  %v2084_v22 = vmax.f32 %v2078_v16, 0.0  ;;  %v2058_v24 = vadd.f32 %v2049_v21, %v10150_v13  ;;  %v2051_v30 = vpop.f32.mrb[31].mxu1  ;;  %v3288_v13 = vld [vmem:[%s10531_s0 + $0x28] sm:$0xff]  ;;  %v8099_v58 = vpack.c.bf16 %v3306_v57, %v3303_v55  ;;  %v3342_v55 = vld [vmem:[#allocation9 + $0xbf8] sm:$0xff] }
 0x2aa   :  { %2088 = vst [vmem:[#allocation2] sm:$0xff] %v2082_v17  ;;  %v2079_v19 = vadd.f32 %v2064_v34, %v1973_v20  ;;  %v1975_v32 = vpop.f32.mrb[3].mxu0  ;;  %8047 = vmatpush1.bf16.msra.mxu1 %v8046_v7  ;;  %v3305_v34 = vld [vmem:[#allocation9 + $0xad0] sm:$0xff]  ;;  %v10215_v51 = vrot.slane %v3288_v13, 6  ;;  %v3310_v7 = vld [vmem:[#allocation9 + $0xaf8] sm:$0xff]  ;;  %v3316_v17 = vld [vmem:[#allocation9 + $0xb28] sm:$0xff] }
 0x2ab   :  { %2089 = vst [vmem:[#allocation2 + $0x8] sm:$0xff] %v2083_v4  ;;  %v2080_v31 = vadd.f32 %v2068_v45, %v1975_v32  ;;  %8014 = vmatpush1.bf16.msra.mxu0 %v8013_v18  ;;  %2091 = vst.msk [vmem:[#allocation2 + $0x10] sm:$0xff] %vm2090_vm3, %v2084_v22  ;;  %v2081_v39 = vadd.f32 %v2072_v56, %v2058_v24  ;;  %8092 = vmatprep.subr.bf16.mxu1 %v9608_v0  ;;  %v3317_v9 = vld [vmem:[#allocation9 + $0xb30] sm:$0xff]  ;;  %v3324_v22 = vld [vmem:[#allocation9 + $0xb68] sm:$0xff] }
 0x2ac   :  { %v2085_v41 = vmax.f32 %v2079_v19, 0.0  ;;  %8049 = vmatprep.subr.bf16.mxu0 %v8048_v23  ;;  %v8056_v56 = vpack.c.bf16 %v3305_v34, %v3302_v49  ;;  %v3365_v62 = vsel %vm3359_vm5, %v3363_v50, %v10215_v51  ;;  %v8102_v18 = vpack.c.bf16 %v3312_v63, %v3309_v2  ;;  %v3313_v16 = vld [vmem:[#allocation9 + $0xb10] sm:$0xff]  ;;  %v3320_v23 = vld [vmem:[#allocation9 + $0xb48] sm:$0xff]  ;;  %v3319_v24 = vld [vmem:[#allocation9 + $0xb40] sm:$0xff] }
 0x2ad   :  { %v2086_v47 = vmax.f32 %v2080_v31, 0.0  ;;  %v2087_v45 = vmax.f32 %v2081_v39, 0.0  ;;  %3269 = vmatmul.mubr.f32.vlgmr.msra.gmra.mrb[48].mxu1 %v3117_v33  ;;  %v8062_v10 = vpack.c.bf16 %v3310_v7, %v3307_v6  ;;  %v8066_v4 = vpack.c.bf16 %v3316_v17, %v3313_v16  ;;  %v3321_v21 = vld [vmem:[#allocation9 + $0xb50] sm:$0xff]  ;;  %v3322_v19 = vld [vmem:[#allocation9 + $0xb58] sm:$0xff]  ;;  %v3327_v30 = vld [vmem:[#allocation9 + $0xb80] sm:$0xff] }
 0x2ae   :  { %2092 = vst [vmem:[#allocation2 + $0x18] sm:$0x3] %v2085_v41  ;;  %3192 = vmatmul.mubr.f32.vlgmr.msra.gmra.mrb[4].mxu0 %v3117_v33  ;;  %8094 = vmatpush1.bf16.msra.mxu1 %v8093_v26  ;;  %v8068_v20 = vpack.c.bf16 %v3323_v5, %v3320_v23  ;;  %v3326_v32 = vld [vmem:[#allocation9 + $0xb78] sm:$0xff]  ;;  %v3329_v26 = vld [vmem:[#allocation9 + $0xb90] sm:$0xff]  ;;  %v8108_v28 = vpack.c.bf16 %v3324_v22, %v3321_v21  ;;  %v3335_v13 = vld [vmem:[#allocation9 + $0xbc0] sm:$0xff] }
 0x2af   :  { %2093 = vst [vmem:[#allocation2 + $0x20] sm:$0x3] %v2086_v47  ;;  %8051 = vmatpush1.bf16.msra.mxu0 %v8050_v37  ;;  %2095 = vst.msk [vmem:[#allocation2 + $0x28] sm:$0x3] %vm2094_vm4, %v2087_v45  ;;  %6885 = vmatprep.mubr.msk.f32.mxu1 %vm304_vm1, %v10160_v27  ;;  %v8070_v29 = vpack.c.bf16 %v3322_v19, %v3319_v24  ;;  %v8072_v31 = vpack.c.bf16 %v3329_v26, %v3326_v32  ;;  %v3330_v33 = vld [vmem:[#allocation9 + $0xb98] sm:$0xff]  ;;  %v3325_v37 = vld [vmem:[#allocation9 + $0xb70] sm:$0xff] }
 0x2b0   :  { %8095 = vmatprep.subr.bf16.mxu1 %v9608_v0  ;;  %8053 = vmatprep.subr.bf16.mxu0 %v8052_v48  ;;  %v8111_v39 = vpack.c.bf16 %v3330_v33, %v3327_v30  ;;  %v8074_v41 = vpack.c.bf16 %v3328_v36, %v3325_v37  ;;  %v8076_v43 = vpack.c.bf16 %v3335_v13, %v3332_v38  ;;  %v3331_v47 = vld [vmem:[#allocation9 + $0xba0] sm:$0xff]  ;;  %v3334_v48 = vld [vmem:[#allocation9 + $0xbb8] sm:$0xff]  ;;  %v3341_v34 = vld [vmem:[#allocation9 + $0xbf0] sm:$0xff] }
 0x2b1   :  { %6883 = vmatprep.mubr.msk.f32.mxu0 %vm304_vm1, %v10160_v27  ;;  %3274 = vmatmul.mubr.f32.gmra.mrb[50].mxu1 %v10201_v12  ;;  %v3314_v27 = vld [vmem:[#allocation9 + $0xb18] sm:$0xff]  ;;  %v8114_v45 = vpack.c.bf16 %v3336_v44, %v3333_v46  ;;  %v8078_v50 = vpack.c.bf16 %v3334_v48, %v3331_v47  ;;  %v3340_v57 = vld [vmem:[#allocation9 + $0xbe8] sm:$0xff]  ;;  %v3343_v2 = vld [vmem:[#allocation9 + $0xc00] sm:$0xff] }
 0x2b2   :  { %3198 = vmatmul.mubr.f32.gmra.mrb[6].mxu0 %v10201_v12  ;;  %8097 = vmatpush1.bf16.msra.mxu1 %v8096_v52  ;;  %v3315_v12 = vld [vmem:[#allocation9 + $0xb20] sm:$0xff]  ;;  %v8064_v8 = vpack.c.bf16 %v3317_v9, %v3314_v27  ;;  %v3338_v49 = vld [vmem:[#allocation9 + $0xbd8] sm:$0xff]  ;;  %v3353_v6 = vld [vmem:[#allocation9 + $0xc50] sm:$0xff] }
 0x2b3   :  { %8055 = vmatpush1.bf16.msra.mxu0 %v8054_v54  ;;  %8098 = vmatprep.subr.bf16.mxu1 %v9608_v0  ;;  %v8105_v11 = vpack.c.bf16 %v3318_v14, %v3315_v12  ;;  %v3339_v52 = vld [vmem:[#allocation9 + $0xbe0] sm:$0xff]  ;;  %v8080_v54 = vpack.c.bf16 %v3341_v34, %v3338_v49  ;;  %v3350_v63 = vld [vmem:[#allocation9 + $0xc38] sm:$0xff]  ;;  %v3287_v16 = vld [vmem:[%s10531_s0 + $0x20] sm:$0xff] }
 0x2b4   :  { %8057 = vmatprep.subr.bf16.mxu0 %v8056_v56  ;;  %6888 = vmatprep.mubr.msk.f32.mxu1 %vm304_vm1, %v3365_v62  ;;  %v3337_v56 = vld [vmem:[#allocation9 + $0xbd0] sm:$0xff]  ;;  %v8117_v60 = vpack.c.bf16 %v3342_v55, %v3339_v52  ;;  %v3351_v9 = vld [vmem:[#allocation9 + $0xc40] sm:$0xff]  ;;  %v8088_v12 = vpack.c.bf16 %v3353_v6, %v3350_v63  ;;  %v3285_v14 = vld [vmem:[%s10531_s0 + $0x10] sm:$0xc0]  ;;  %v3361_v22 = vrot.slane %v3287_v16, 6 }
 0x2b5   :  { %6886 = vmatprep.mubr.msk.f32.mxu0 %vm304_vm1, %v3365_v62  ;;  %v8082_v61 = vpack.c.bf16 %v3340_v57, %v3337_v56  ;;  %v3345_v62 = vld [vmem:[#allocation9 + $0xc10] sm:$0xff]  ;;  %v3535_v23 = vld [vmem:[#allocation9 + $0xc68] sm:$0xff]  ;;  %v3538_v5 = vld [vmem:[#allocation9 + $0xc80] sm:$0xff] }
 0x2b6   :  { %8100 = vmatpush1.bf16.msra.mxu1 %v8099_v58  ;;  %v8084_v58 = vpack.c.bf16 %v3347_v59, %v3344_v53  ;;  %v3536_v24 = vld [vmem:[#allocation9 + $0xc70] sm:$0xff]  ;;  %v8125_v19 = vpack.c.bf16 %v3538_v5, %v3535_v23  ;;  %v3539_v32 = vld [vmem:[#allocation9 + $0xc88] sm:$0xff]  ;;  %v3534_v26 = vld [vmem:[#allocation9 + $0xc60] sm:$0xff] }
 0x2b7   :  { %8059 = vmatpush1.bf16.msra.mxu0 %v8058_v1  ;;  %8101 = vmatprep.subr.bf16.mxu1 %v9608_v0  ;;  %v3348_v1 = vld [vmem:[#allocation9 + $0xc28] sm:$0xff]  ;;  %v3541_v30 = vld [vmem:[#allocation9 + $0xc98] sm:$0xff]  ;;  %v8170_v36 = vpack.c.bf16 %v3539_v32, %v3536_v24  ;;  %v3542_v13 = vld [vmem:[#allocation9 + $0xca0] sm:$0xff] }
 0x2b8   :  { %8061 = vmatprep.subr.bf16.mxu0 %v8060_v3  ;;  %v3346_v3 = vld [vmem:[#allocation9 + $0xc18] sm:$0xff]  ;;  %v8120_v7 = vpack.c.bf16 %v3348_v1, %v3345_v62  ;;  %v3543_v44 = vld [vmem:[#allocation9 + $0xca8] sm:$0xff]  ;;  %v3550_v49 = vld [vmem:[#allocation9 + $0xce0] sm:$0xff] }
 0x2b9   :  { %v8086_v27 = vpack.c.bf16 %v3346_v3, %v3343_v2  ;;  %v3545_v46 = vld [vmem:[#allocation9 + $0xcb8] sm:$0xff]  ;;  %v3547_v48 = vld [vmem:[#allocation9 + $0xcc8] sm:$0xff]  ;;  %v3546_v57 = vld [vmem:[#allocation9 + $0xcc0] sm:$0xff] }
 0x2ba   :  { %8103 = vmatpush1.bf16.msra.mxu1 %v8102_v18  ;;  %v3354_v18 = vld [vmem:[#allocation9 + $0xc58] sm:$0xff]  ;;  %v8133_v55 = vpack.c.bf16 %v3550_v49, %v3547_v48  ;;  %v3551_v56 = vld [vmem:[#allocation9 + $0xce8] sm:$0xff]  ;;  %v3554_v1 = vld [vmem:[#allocation9 + $0xd00] sm:$0xff] }
 0x2bb   :  { %8063 = vmatpush1.bf16.msra.mxu0 %v8062_v10  ;;  %8104 = vmatprep.subr.bf16.mxu1 %v9608_v0  ;;  %v3349_v10 = vld [vmem:[#allocation9 + $0xc30] sm:$0xff]  ;;  %v3549_v53 = vld [vmem:[#allocation9 + $0xcd8] sm:$0xff]  ;;  %v3555_v6 = vld [vmem:[#allocation9 + $0xd08] sm:$0xff] }
 0x2bc   :  { %8065 = vmatprep.subr.bf16.mxu0 %v8064_v8  ;;  %v3352_v8 = vld [vmem:[#allocation9 + $0xc48] sm:$0xff]  ;;  %v3553_v59 = vld [vmem:[#allocation9 + $0xcf8] sm:$0xff]  ;;  %v3552_v63 = vld [vmem:[#allocation9 + $0xcf0] sm:$0xff] }
 0x2bd   :  { %v8090_v21 = vpack.c.bf16 %v3352_v8, %v3349_v10  ;;  %v3557_v3 = vld [vmem:[#allocation9 + $0xd18] sm:$0xff]  ;;  %v3558_v8 = vld [vmem:[#allocation9 + $0xd20] sm:$0xff]  ;;  %v3568_v23 = vld [vmem:[#allocation9 + $0xd70] sm:$0xff] }
 0x2be   :  { %8106 = vmatpush1.bf16.msra.mxu1 %v8105_v11  ;;  %v3565_v16 = vld [vmem:[#allocation9 + $0xd58] sm:$0xff]  ;;  %v3567_v24 = vld [vmem:[#allocation9 + $0xd68] sm:$0xff]  ;;  %v3574_v32 = vld [vmem:[#allocation9 + $0xda0] sm:$0xff] }
 0x2bf   :  { %8067 = vmatpush1.bf16.msra.mxu0 %v8066_v4  ;;  %8107 = vmatprep.subr.bf16.mxu1 %v9608_v0  ;;  %v8123_v4 = vpack.c.bf16 %v3354_v18, %v3351_v9  ;;  %v8139_v9 = vpack.c.bf16 %v3555_v6, %v3552_v63  ;;  %v3560_v18 = vld [vmem:[#allocation9 + $0xd30] sm:$0xff]  ;;  %v3579_v48 = vld [vmem:[#allocation9 + $0xdc8] sm:$0xff] }
 0x2c0   :  { %8069 = vmatprep.subr.bf16.mxu0 %v8068_v20  ;;  %v3360_v20 = vrot.slane %v3285_v14, 6  ;;  %v3561_v14 = vld [vmem:[#allocation9 + $0xd38] sm:$0xff]  ;;  %v3583_v49 = vld [vmem:[#allocation9 + $0xde8] sm:$0xff] }
 0x2c1   :  { %v3591_v63 = vld [vmem:[#allocation9 + $0xe28] sm:$0xff] }
 0x2c2   :  { %8109 = vmatpush1.bf16.msra.mxu1 %v8108_v28  ;;  %v3537_v28 = vld [vmem:[#allocation9 + $0xc78] sm:$0xff]  ;;  %v3362_v37 = vsel %vm3359_vm5, %v3360_v20, %v3361_v22  ;;  %v3595_v6 = vld [vmem:[#allocation9 + $0xe48] sm:$0xff] }
 0x2c3   :  { %8071 = vmatpush1.bf16.msra.mxu0 %v8070_v29  ;;  %8110 = vmatprep.subr.bf16.mxu1 %v9608_v0  ;;  %v8127_v38 = vpack.c.bf16 %v3537_v28, %v3534_v26  ;;  %v3569_v20 = vld [vmem:[#allocation9 + $0xd78] sm:$0xff] }
 0x2c4   :  { %8073 = vmatprep.subr.bf16.mxu0 %v8072_v31  ;;  %v3544_v31 = vld [vmem:[#allocation9 + $0xcb0] sm:$0xff] }
 0x2c5   :  { %v8129_v47 = vpack.c.bf16 %v3544_v31, %v3541_v30  ;;  %v3572_v30 = vld [vmem:[#allocation9 + $0xd90] sm:$0xff] }
 0x2c6   :  { %8112 = vmatpush1.bf16.msra.mxu1 %v8111_v39  ;;  %v3531_v39 = vld [vmem:[%s10531_s0 + $0x38] sm:$0xfc] }
 0x2c7   :  { %8075 = vmatpush1.bf16.msra.mxu0 %v8074_v41  ;;  %8113 = vmatprep.subr.bf16.mxu1 %v9608_v0  ;;  %v3533_v41 = vld [vmem:[%s10531_s0 + $0x48] sm:$0xf]  ;;  %v3607_v34 = vrot.slane %v3531_v39, 2 }
 0x2c8   :  { %8077 = vmatprep.subr.bf16.mxu0 %v8076_v43  ;;  %v3540_v43 = vld [vmem:[#allocation9 + $0xc90] sm:$0xff] }
 0x2c9   :  { %v8131_v52 = vpack.c.bf16 %v3543_v44, %v3540_v43  ;;  %v3581_v44 = vld [vmem:[#allocation9 + $0xdd8] sm:$0xff] }
 0x2ca   :  { %8115 = vmatpush1.bf16.msra.mxu1 %v8114_v45  ;;  %v10256_v45 = vrot.slane %v3533_v41, 2 }
 0x2cb   :  { %8079 = vmatpush1.bf16.msra.mxu0 %v8078_v50  ;;  %8116 = vmatprep.subr.bf16.mxu1 %v9608_v0  ;;  %v8173_v50 = vpack.c.bf16 %v3545_v46, %v3542_v13  ;;  %v3580_v13 = vld [vmem:[#allocation9 + $0xdd0] sm:$0xff]  ;;  %v3578_v46 = vld [vmem:[#allocation9 + $0xdc0] sm:$0xff] }
 0x2cc   :  { %8081 = vmatprep.subr.bf16.mxu0 %v8080_v54  ;;  %v3548_v54 = vld [vmem:[#allocation9 + $0xcd0] sm:$0xff] }
 0x2cd   :  { %v8176_v62 = vpack.c.bf16 %v3551_v56, %v3548_v54  ;;  %v3584_v54 = vld [vmem:[#allocation9 + $0xdf0] sm:$0xff]  ;;  %v3587_v56 = vld [vmem:[#allocation9 + $0xe08] sm:$0xff] }
 0x2ce   :  { %8118 = vmatpush1.bf16.msra.mxu1 %v8117_v60  ;;  %v3556_v60 = vld [vmem:[#allocation9 + $0xd10] sm:$0xff] }
 0x2cf   :  { %8083 = vmatpush1.bf16.msra.mxu0 %v8082_v61  ;;  %8119 = vmatprep.subr.bf16.mxu1 %v9608_v0  ;;  %v3609_v61 = vsel %vm3114_vm2, %v3607_v34, %v10256_v45  ;;  %v8137_v2 = vpack.c.bf16 %v3556_v60, %v3553_v59  ;;  %v3586_v34 = vld [vmem:[#allocation9 + $0xe00] sm:$0xff]  ;;  %v3589_v59 = vld [vmem:[#allocation9 + $0xe18] sm:$0xff]  ;;  %v3592_v60 = vld [vmem:[#allocation9 + $0xe30] sm:$0xff] }
 0x2d0   :  { %8085 = vmatprep.subr.bf16.mxu0 %v8084_v58  ;;  %v10243_v17 = vpop.f32.mrb[32].mxu1  ;;  %v8135_v58 = vpack.c.bf16 %v3549_v53, %v3546_v57  ;;  %v3582_v57 = vld [vmem:[#allocation9 + $0xde0] sm:$0xff]  ;;  %v3585_v53 = vld [vmem:[#allocation9 + $0xdf8] sm:$0xff] }
 0x2d1   :  { %v2397_v11 = vpop.f32.mrb[33].mxu1 }
 0x2d2   :  { %8121 = vmatpush1.bf16.msra.mxu1 %v8120_v7  ;;  %v3559_v7 = vld [vmem:[#allocation9 + $0xd28] sm:$0xff]  ;;  %v8143_v11 = vpack.c.bf16 %v3561_v14, %v3558_v8  ;;  %v3597_v8 = vld [vmem:[#allocation9 + $0xe58] sm:$0xff] }
 0x2d3   :  { %8087 = vmatpush1.bf16.msra.mxu0 %v8086_v27  ;;  %8122 = vmatprep.subr.bf16.mxu1 %v9608_v0  ;;  %v3562_v27 = vld [vmem:[#allocation9 + $0xd40] sm:$0xff]  ;;  %v3530_v14 = vld [vmem:[%s10531_s0 + $0x30] sm:$0xfc] }
 0x2d4   :  { %8089 = vmatprep.subr.bf16.mxu0 %v8088_v12  ;;  %v10246_v29 = vpop.f32.mrb[34].mxu1  ;;  %v8141_v10 = vpack.c.bf16 %v3562_v27, %v3559_v7  ;;  %v3563_v12 = vld [vmem:[#allocation9 + $0xd48] sm:$0xff]  ;;  %v3598_v7 = vld [vmem:[#allocation9 + $0xe60] sm:$0xff] }
 0x2d5   :  { %v2402_v33 = vpop.f32.mrb[35].mxu1  ;;  %v8182_v5 = vpack.c.bf16 %v3563_v12, %v3560_v18  ;;  %v3599_v18 = vld [vmem:[#allocation9 + $0xe68] sm:$0xff]  ;;  %v8165_v12 = vpack.c.bf16 %v3598_v7, %v3595_v6 }
 0x2d6   :  { %8124 = vmatpush1.bf16.msra.mxu1 %v8123_v4  ;;  %v3566_v4 = vld [vmem:[#allocation9 + $0xd60] sm:$0xff]  ;;  %v3575_v33 = vld [vmem:[#allocation9 + $0xda8] sm:$0xff] }
 0x2d7   :  { %8091 = vmatpush1.bf16.msra.mxu0 %v8090_v21  ;;  %8169 = vmatprep.subr.bf16.mxu1 %v9608_v0  ;;  %v8145_v21 = vpack.c.bf16 %v3568_v23, %v3565_v16  ;;  %v8185_v26 = vpack.c.bf16 %v3569_v20, %v3566_v4  ;;  %v8188_v39 = vpack.c.bf16 %v3575_v33, %v3572_v30  ;;  %v3532_v16 = vld [vmem:[%s10531_s0 + $0x40] sm:$0xf]  ;;  %v3778_v30 = vld [vmem:[#allocation9 + $0xe70] sm:$0xff] }
 0x2d8   :  { %8126 = vmatprep.subr.bf16.mxu0 %v8125_v19  ;;  %v3571_v19 = vld [vmem:[#allocation9 + $0xd88] sm:$0xff] }
 0x2d9   :  { %3514 = vmatmul.mubr.f32.vlgmr.msra.gmra.mrb[52].mxu1 %v3362_v37  ;;  %v8149_v31 = vpack.c.bf16 %v3574_v32, %v3571_v19  ;;  %v3605_v19 = vrot.slane %v3532_v16, 2  ;;  %v3780_v32 = vld [vmem:[#allocation9 + $0xe80] sm:$0xff]  ;;  %v3801_v7 = vld [vmem:[#allocation9 + $0xf28] sm:$0xff]  ;;  %v3802_v16 = vld [vmem:[#allocation9 + $0xf30] sm:$0xff] }
 0x2da   :  { %3437 = vmatmul.mubr.f32.vlgmr.msra.gmra.mrb[4].mxu0 %v3362_v37  ;;  %8171 = vmatpush1.bf16.msra.mxu1 %v8170_v36  ;;  %v3570_v37 = vld [vmem:[#allocation9 + $0xd80] sm:$0xff]  ;;  %v3573_v36 = vld [vmem:[#allocation9 + $0xd98] sm:$0xff] }
 0x2db   :  { %8128 = vmatpush1.bf16.msra.mxu0 %v8127_v38  ;;  %6889 = vmatprep.mubr.msk.f32.mxu1 %vm304_vm1, %v10215_v51  ;;  %v3577_v38 = vld [vmem:[#allocation9 + $0xdb8] sm:$0xff]  ;;  %v8151_v41 = vpack.c.bf16 %v3573_v36, %v3570_v37  ;;  %v3788_v36 = vld [vmem:[#allocation9 + $0xec0] sm:$0xff] }
 0x2dc   :  { %8172 = vmatprep.subr.bf16.mxu1 %v9608_v0  ;;  %8130 = vmatprep.subr.bf16.mxu0 %v8129_v47  ;;  %v8153_v43 = vpack.c.bf16 %v3580_v13, %v3577_v38  ;;  %v3576_v47 = vld [vmem:[#allocation9 + $0xdb0] sm:$0xff] }
 0x2dd   :  { %6887 = vmatprep.mubr.msk.f32.mxu0 %vm304_vm1, %v10215_v51  ;;  %3519 = vmatmul.mubr.f32.gmra.mrb[54].mxu1 %v3361_v22  ;;  %v8179_v51 = vpack.c.bf16 %v3557_v3, %v3554_v1  ;;  %v8161_v1 = vpack.c.bf16 %v3592_v60, %v3589_v59  ;;  %v3588_v3 = vld [vmem:[#allocation9 + $0xe10] sm:$0xff]  ;;  %v3795_v59 = vld [vmem:[#allocation9 + $0xef8] sm:$0xff] }
 0x2de   :  { %3443 = vmatmul.mubr.f32.gmra.mrb[6].mxu0 %v3361_v22  ;;  %8174 = vmatpush1.bf16.msra.mxu1 %v8173_v50  ;;  %v3564_v22 = vld [vmem:[#allocation9 + $0xd50] sm:$0xff]  ;;  %v8191_v50 = vpack.c.bf16 %v3581_v44, %v3578_v46  ;;  %v3777_v44 = vld [vmem:[%s10531_s0 + $0x58] sm:$0xff] }
 0x2df   :  { %8132 = vmatpush1.bf16.msra.mxu0 %v8131_v52  ;;  %8175 = vmatprep.subr.bf16.mxu1 %v9608_v0  ;;  %v8147_v28 = vpack.c.bf16 %v3567_v24, %v3564_v22  ;;  %v8155_v52 = vpack.c.bf16 %v3579_v48, %v3576_v47  ;;  %v3604_v24 = vrot.slane %v3530_v14, 2  ;;  %v3786_v46 = vld [vmem:[#allocation9 + $0xeb0] sm:$0xff]  ;;  %v3784_v47 = vld [vmem:[#allocation9 + $0xea0] sm:$0xff]  ;;  %v3787_v48 = vld [vmem:[#allocation9 + $0xeb8] sm:$0xff] }
 0x2e0   :  { %8134 = vmatprep.subr.bf16.mxu0 %v8133_v55  ;;  %6892 = vmatprep.mubr.msk.f32.mxu1 %vm304_vm1, %v3609_v61  ;;  %v8157_v55 = vpack.c.bf16 %v3586_v34, %v3583_v49  ;;  %v3791_v34 = vld [vmem:[#allocation9 + $0xed8] sm:$0xff]  ;;  %v3790_v60 = vld [vmem:[#allocation9 + $0xed0] sm:$0xff] }
 0x2e1   :  { %6890 = vmatprep.mubr.msk.f32.mxu0 %vm304_vm1, %v3609_v61  ;;  %v8194_v61 = vpack.c.bf16 %v3587_v56, %v3584_v54  ;;  %v3606_v13 = vsel %vm3114_vm2, %v3604_v24, %v3605_v19  ;;  %v10296_v54 = vrot.slane %v3777_v44, 6  ;;  %v8208_v56 = vpack.c.bf16 %v3787_v48, %v3784_v47  ;;  %v3807_v14 = vld [vmem:[#allocation9 + $0xf58] sm:$0xff]  ;;  %v3825_v48 = vld [vmem:[#allocation9 + $0xfe8] sm:$0xff] }
 0x2e2   :  { %8177 = vmatpush1.bf16.msra.mxu1 %v8176_v62  ;;  %v8159_v62 = vpack.c.bf16 %v3585_v53, %v3582_v57  ;;  %v3792_v57 = vld [vmem:[#allocation9 + $0xee0] sm:$0xff] }
 0x2e3   :  { %8136 = vmatpush1.bf16.msra.mxu0 %v8135_v58  ;;  %8178 = vmatprep.subr.bf16.mxu1 %v9608_v0  ;;  %v3590_v58 = vld [vmem:[#allocation9 + $0xe20] sm:$0xff] }
 0x2e4   :  { %8138 = vmatprep.subr.bf16.mxu0 %v8137_v2  ;;  %v3593_v2 = vld [vmem:[#allocation9 + $0xe38] sm:$0xff] }
 0x2e5   :  { %v8197_v27 = vpack.c.bf16 %v3593_v2, %v3590_v58  ;;  %v3800_v58 = vld [vmem:[#allocation9 + $0xf20] sm:$0xff]  ;;  %v8253_v2 = vpack.c.bf16 %v3795_v59, %v3792_v57  ;;  %v3831_v59 = vld [vmem:[#allocation9 + $0x1018] sm:$0xff] }
 0x2e6   :  { %8180 = vmatpush1.bf16.msra.mxu1 %v8179_v51  ;;  %v8163_v51 = vpack.c.bf16 %v3591_v63, %v3588_v3  ;;  %v3798_v63 = vld [vmem:[#allocation9 + $0xf10] sm:$0xff]  ;;  %v3828_v57 = vld [vmem:[#allocation9 + $0x1000] sm:$0xff] }
 0x2e7   :  { %8140 = vmatpush1.bf16.msra.mxu0 %v8139_v9  ;;  %8181 = vmatprep.subr.bf16.mxu1 %v9608_v0  ;;  %v3596_v9 = vld [vmem:[#allocation9 + $0xe50] sm:$0xff] }
 0x2e8   :  { %8142 = vmatprep.subr.bf16.mxu0 %v8141_v10  ;;  %v3594_v10 = vld [vmem:[#allocation9 + $0xe40] sm:$0xff]  ;;  %v8200_v20 = vpack.c.bf16 %v3599_v18, %v3596_v9  ;;  %v3803_v9 = vld [vmem:[#allocation9 + $0xf38] sm:$0xff]  ;;  %v3806_v18 = vld [vmem:[#allocation9 + $0xf50] sm:$0xff] }
 0x2e9   :  { %v8167_v22 = vpack.c.bf16 %v3597_v8, %v3594_v10  ;;  %v8218_v8 = vpack.c.bf16 %v3806_v18, %v3803_v9  ;;  %v3842_v9 = vld [vmem:[#allocation9 + $0x1070] sm:$0xff] }
 0x2ea   :  { %8183 = vmatpush1.bf16.msra.mxu1 %v8182_v5  ;;  %v3779_v5 = vld [vmem:[#allocation9 + $0xe78] sm:$0xff] }
 0x2eb   :  { %8144 = vmatpush1.bf16.msra.mxu0 %v8143_v11  ;;  %8184 = vmatprep.subr.bf16.mxu1 %v9608_v0  ;;  %v3782_v11 = vld [vmem:[#allocation9 + $0xe90] sm:$0xff] }
 0x2ec   :  { %8146 = vmatprep.subr.bf16.mxu0 %v8145_v21 }
 0x2ee   :  { %8186 = vmatpush1.bf16.msra.mxu1 %v8185_v26  ;;  %v8202_v26 = vpack.c.bf16 %v3782_v11, %v3779_v5  ;;  %v3809_v5 = vld [vmem:[#allocation9 + $0xf68] sm:$0xff]  ;;  %v3812_v11 = vld [vmem:[#allocation9 + $0xf80] sm:$0xff] }
 0x2ef   :  { %8148 = vmatpush1.bf16.msra.mxu0 %v8147_v28  ;;  %8187 = vmatprep.subr.bf16.mxu1 %v9608_v0  ;;  %v3783_v28 = vld [vmem:[#allocation9 + $0xe98] sm:$0xff]  ;;  %v8222_v24 = vpack.c.bf16 %v3812_v11, %v3809_v5 }
 0x2f0   :  { %8150 = vmatprep.subr.bf16.mxu0 %v8149_v31  ;;  %v3781_v31 = vld [vmem:[#allocation9 + $0xe88] sm:$0xff]  ;;  %v3776_v5 = vld [vmem:[%s10531_s0 + $0x50] sm:$0xff] }
 0x2f2   :  { %8189 = vmatpush1.bf16.msra.mxu1 %v8188_v39  ;;  %v8247_v39 = vpack.c.bf16 %v3783_v28, %v3780_v32  ;;  %v3808_v32 = vld [vmem:[#allocation9 + $0xf60] sm:$0xff]  ;;  %v3815_v28 = vld [vmem:[#allocation9 + $0xf98] sm:$0xff] }
 0x2f3   :  { %8152 = vmatpush1.bf16.msra.mxu0 %v8151_v41  ;;  %8190 = vmatprep.subr.bf16.mxu1 %v9608_v0  ;;  %v8204_v41 = vpack.c.bf16 %v3781_v31, %v3778_v30  ;;  %v3818_v30 = vld [vmem:[#allocation9 + $0xfb0] sm:$0xff] }
 0x2f4   :  { %8154 = vmatprep.subr.bf16.mxu0 %v8153_v43  ;;  %v3775_v43 = vld [vmem:[%s10531_s0 + $0x48] sm:$0xc0] }
 0x2f6   :  { %8192 = vmatpush1.bf16.msra.mxu1 %v8191_v50  ;;  %v3794_v50 = vld [vmem:[#allocation9 + $0xef0] sm:$0xff] }
 0x2f7   :  { %8156 = vmatpush1.bf16.msra.mxu0 %v8155_v52  ;;  %8193 = vmatprep.subr.bf16.mxu1 %v9608_v0  ;;  %v3851_v52 = vrot.slane %v3775_v43, 6  ;;  %v8210_v53 = vpack.c.bf16 %v3794_v50, %v3791_v34  ;;  %v3823_v34 = vld [vmem:[#allocation9 + $0xfd8] sm:$0xff] }
 0x2f8   :  { %8158 = vmatprep.subr.bf16.mxu0 %v8157_v55  ;;  %v3827_v50 = vld [vmem:[#allocation9 + $0xff8] sm:$0xff] }
 0x2fa   :  { %8195 = vmatpush1.bf16.msra.mxu1 %v8194_v61  ;;  %v3793_v61 = vld [vmem:[#allocation9 + $0xee8] sm:$0xff] }
 0x2fb   :  { %8160 = vmatpush1.bf16.msra.mxu0 %v8159_v62  ;;  %8196 = vmatprep.subr.bf16.mxu1 %v9608_v0  ;;  %v3797_v62 = vld [vmem:[#allocation9 + $0xf08] sm:$0xff]  ;;  %v8212_v3 = vpack.c.bf16 %v3793_v61, %v3790_v60  ;;  %v3826_v60 = vld [vmem:[#allocation9 + $0xff0] sm:$0xff] }
 0x2fc   :  { %8162 = vmatprep.subr.bf16.mxu0 %v8161_v1  ;;  %v2553_v23 = vpop.f32.mrb[36].mxu1  ;;  %v3853_v1 = vsel %vm3359_vm5, %v3851_v52, %v10296_v54  ;;  %v8214_v6 = vpack.c.bf16 %v3800_v58, %v3797_v62  ;;  %v3830_v52 = vld [vmem:[#allocation9 + $0x1010] sm:$0xff]  ;;  %v3829_v61 = vld [vmem:[#allocation9 + $0x1008] sm:$0xff]  ;;  %v3836_v58 = vld [vmem:[#allocation9 + $0x1040] sm:$0xff] }
 0x2fd   :  { %v10282_v4 = vadd.f32 %v2553_v23, %v10243_v17  ;;  %v2555_v21 = vpop.f32.mrb[37].mxu1  ;;  %v3785_v17 = vld [vmem:[#allocation9 + $0xea8] sm:$0xff] }
 0x2fe   :  { %8198 = vmatpush1.bf16.msra.mxu1 %v8197_v27  ;;  %v8206_v49 = vpack.c.bf16 %v3788_v36, %v3785_v17  ;;  %v3796_v27 = vld [vmem:[#allocation9 + $0xf00] sm:$0xff]  ;;  %v3805_v23 = vld [vmem:[#allocation9 + $0xf48] sm:$0xff]  ;;  %v8226_v36 = vpack.c.bf16 %v3818_v30, %v3815_v28 }
 0x2ff   :  { %8164 = vmatpush1.bf16.msra.mxu0 %v8163_v51  ;;  %8199 = vmatprep.subr.bf16.mxu1 %v9608_v0  ;;  %v3799_v51 = vld [vmem:[#allocation9 + $0xf18] sm:$0xff]  ;;  %v3816_v17 = vld [vmem:[#allocation9 + $0xfa0] sm:$0xff]  ;;  %v3833_v62 = vld [vmem:[#allocation9 + $0x1028] sm:$0xff] }
 0x300   :  { %8166 = vmatprep.subr.bf16.mxu0 %v8165_v12  ;;  %v2558_v33 = vpop.f32.mrb[38].mxu1  ;;  %v8216_v10 = vpack.c.bf16 %v3799_v51, %v3796_v27  ;;  %v3804_v12 = vld [vmem:[#allocation9 + $0xf40] sm:$0xff]  ;;  %v3835_v27 = vld [vmem:[#allocation9 + $0x1038] sm:$0xff] }
 0x301   :  { %v10286_v37 = vadd.f32 %v2558_v33, %v10246_v29  ;;  %v2560_v38 = vpop.f32.mrb[39].mxu1  ;;  %v3789_v29 = vld [vmem:[#allocation9 + $0xec8] sm:$0xff]  ;;  %v8259_v21 = vpack.c.bf16 %v3807_v14, %v3804_v12  ;;  %v3839_v51 = vld [vmem:[#allocation9 + $0x1058] sm:$0xff] }
 0x302   :  { %8201 = vmatpush1.bf16.msra.mxu1 %v8200_v20  ;;  %v8250_v55 = vpack.c.bf16 %v3789_v29, %v3786_v46  ;;  %v8220_v20 = vpack.c.bf16 %v3805_v23, %v3802_v16  ;;  %v3819_v38 = vld [vmem:[#allocation9 + $0xfb8] sm:$0xff]  ;;  %v3824_v46 = vld [vmem:[#allocation9 + $0xfe0] sm:$0xff]  ;;  %v3822_v29 = vld [vmem:[#allocation9 + $0xfd0] sm:$0xff]  ;;  %v8242_v14 = vpack.c.bf16 %v3842_v9, %v3839_v51 }
 0x303   :  { %8168 = vmatpush1.bf16.msra.mxu0 %v8167_v22  ;;  %8246 = vmatprep.subr.bf16.mxu1 %v9608_v0  ;;  %v3810_v22 = vld [vmem:[#allocation9 + $0xf70] sm:$0xff]  ;;  %v8265_v43 = vpack.c.bf16 %v3819_v38, %v3816_v17  ;;  %v3843_v12 = vld [vmem:[#allocation9 + $0x1078] sm:$0xff]  ;;  %v3841_v16 = vld [vmem:[#allocation9 + $0x1068] sm:$0xff] }
 0x304   :  { %8203 = vmatprep.subr.bf16.mxu0 %v8202_v26  ;;  %v3811_v26 = vld [vmem:[#allocation9 + $0xf78] sm:$0xff]  ;;  %v3774_v23 = vld [vmem:[%s10531_s0 + $0x40] sm:$0xc0]  ;;  %s9609_s0 = smov [#allocation4]  }
 0x305   :  { %3758 = vmatmul.mubr.f32.vlgmr.msra.gmra.mrb[56].mxu1 %v3606_v13  ;;  %v8224_v33 = vpack.c.bf16 %v3811_v26, %v3808_v32  ;;  %v3849_v32 = vrot.slane %v3776_v5, 6  ;;  %s110_s30 = sshll.u32 %s9609_s0, 4  ;;  %s111_s30 = int_to_ptr.vmem [resolvable:$true] %s110_s30 }
 0x306   :  { %3681 = vmatmul.mubr.f32.vlgmr.msra.gmra.mrb[4].mxu0 %v3606_v13  ;;  %8248 = vmatpush1.bf16.msra.mxu1 %v8247_v39  ;;  %v3814_v13 = vld [vmem:[#allocation9 + $0xf90] sm:$0xff]  ;;  %v3817_v39 = vld [vmem:[#allocation9 + $0xfa8] sm:$0xff] }
 0x307   :  { %8205 = vmatpush1.bf16.msra.mxu0 %v8204_v41  ;;  %6893 = vmatprep.mubr.msk.f32.mxu1 %vm304_vm1, %v10256_v45  ;;  %v3821_v41 = vld [vmem:[#allocation9 + $0xfc8] sm:$0xff]  ;;  %v8228_v44 = vpack.c.bf16 %v3817_v39, %v3814_v13 }
 0x308   :  { %8249 = vmatprep.subr.bf16.mxu1 %v9608_v0  ;;  %8207 = vmatprep.subr.bf16.mxu0 %v8206_v49  ;;  %v8230_v47 = vpack.c.bf16 %v3824_v46, %v3821_v41  ;;  %v3820_v49 = vld [vmem:[#allocation9 + $0xfc0] sm:$0xff] }
 0x309   :  { %6891 = vmatprep.mubr.msk.f32.mxu0 %vm304_vm1, %v10256_v45  ;;  %3763 = vmatmul.mubr.f32.gmra.mrb[58].mxu1 %v3605_v19  ;;  %v8256_v45 = vpack.c.bf16 %v3801_v7, %v3798_v63  ;;  %v8238_v63 = vpack.c.bf16 %v3836_v58, %v3833_v62  ;;  %v3832_v7 = vld [vmem:[#allocation9 + $0x1020] sm:$0xff] }
 0x30a   :  { %3687 = vmatmul.mubr.f32.gmra.mrb[6].mxu0 %v3605_v19  ;;  %8251 = vmatpush1.bf16.msra.mxu1 %v8250_v55  ;;  %v3813_v19 = vld [vmem:[#allocation9 + $0xf88] sm:$0xff]  ;;  %v8268_v55 = vpack.c.bf16 %v3825_v48, %v3822_v29 }
 0x30b   :  { %8209 = vmatpush1.bf16.msra.mxu0 %v8208_v56  ;;  %8252 = vmatprep.subr.bf16.mxu1 %v9608_v0  ;;  %v8262_v31 = vpack.c.bf16 %v3813_v19, %v3810_v22  ;;  %v8232_v56 = vpack.c.bf16 %v3823_v34, %v3820_v49  ;;  %v3848_v19 = vrot.slane %v3774_v23, 6 }
 0x30c   :  { %8211 = vmatprep.subr.bf16.mxu0 %v8210_v53  ;;  %6896 = vmatprep.mubr.msk.f32.mxu1 %vm304_vm1, %v3853_v1  ;;  %v8234_v53 = vpack.c.bf16 %v3830_v52, %v3827_v50 }
 0x30d   :  { %6894 = vmatprep.mubr.msk.f32.mxu0 %vm304_vm1, %v3853_v1  ;;  %v8271_v1 = vpack.c.bf16 %v3831_v59, %v3828_v57 }
 0x30e   :  { %8254 = vmatpush1.bf16.msra.mxu1 %v8253_v2  ;;  %v8236_v2 = vpack.c.bf16 %v3829_v61, %v3826_v60 }
 0x30f   :  { %8213 = vmatpush1.bf16.msra.mxu0 %v8212_v3  ;;  %8255 = vmatprep.subr.bf16.mxu1 %v9608_v0  ;;  %v3834_v3 = vld [vmem:[#allocation9 + $0x1030] sm:$0xff] }
 0x310   :  { %8215 = vmatprep.subr.bf16.mxu0 %v8214_v6  ;;  %v3837_v6 = vld [vmem:[#allocation9 + $0x1048] sm:$0xff] }
 0x311   :  { %v8274_v18 = vpack.c.bf16 %v3837_v6, %v3834_v3 }
 0x312   :  { %8257 = vmatpush1.bf16.msra.mxu1 %v8256_v45  ;;  %v8240_v45 = vpack.c.bf16 %v3835_v27, %v3832_v7 }
 0x313   :  { %8217 = vmatpush1.bf16.msra.mxu0 %v8216_v10  ;;  %8258 = vmatprep.subr.bf16.mxu1 %v9608_v0  ;;  %v3840_v10 = vld [vmem:[#allocation9 + $0x1060] sm:$0xff] }
 0x314   :  { %8219 = vmatprep.subr.bf16.mxu0 %v8218_v8  ;;  %v3838_v8 = vld [vmem:[#allocation9 + $0x1050] sm:$0xff]  ;;  %v8277_v22 = vpack.c.bf16 %v3843_v12, %v3840_v10 }
 0x316   :  { %8260 = vmatpush1.bf16.msra.mxu1 %v8259_v21 }
 0x317   :  { %8221 = vmatpush1.bf16.msra.mxu0 %v8220_v20  ;;  %8261 = vmatprep.subr.bf16.mxu1 %v9608_v0 }
 0x318   :  { %8223 = vmatprep.subr.bf16.mxu0 %v8222_v24  ;;  %v8244_v24 = vpack.c.bf16 %v3841_v16, %v3838_v8 }
 0x31a   :  { %8263 = vmatpush1.bf16.msra.mxu1 %v8262_v31  ;;  %v3850_v31 = vsel %vm3359_vm5, %v3848_v19, %v3849_v32 }
 0x31b   :  { %8225 = vmatpush1.bf16.msra.mxu0 %v8224_v33  ;;  %8264 = vmatprep.subr.bf16.mxu1 %v9608_v0 }
 0x31c   :  { %8227 = vmatprep.subr.bf16.mxu0 %v8226_v36 }
 0x31e   :  { %8266 = vmatpush1.bf16.msra.mxu1 %v8265_v43 }
 0x31f   :  { %8229 = vmatpush1.bf16.msra.mxu0 %v8228_v44  ;;  %8267 = vmatprep.subr.bf16.mxu1 %v9608_v0 }
 0x320   :  { %8231 = vmatprep.subr.bf16.mxu0 %v8230_v47 }
 0x322   :  { %8269 = vmatpush1.bf16.msra.mxu1 %v8268_v55 }
 0x323   :  { %8233 = vmatpush1.bf16.msra.mxu0 %v8232_v56  ;;  %8270 = vmatprep.subr.bf16.mxu1 %v9608_v0 }
 0x324   :  { %8235 = vmatprep.subr.bf16.mxu0 %v8234_v53 }
 0x326   :  { %8272 = vmatpush1.bf16.msra.mxu1 %v8271_v1 }
 0x327   :  { %8237 = vmatpush1.bf16.msra.mxu0 %v8236_v2  ;;  %8273 = vmatprep.subr.bf16.mxu1 %v9608_v0 }
 0x328   :  { %8239 = vmatprep.subr.bf16.mxu0 %v8238_v63  ;;  %v2781_v11 = vpop.f32.mrb[40].mxu1 }
 0x329   :  { %v2792_v21 = vadd.f32 %v2781_v11, %v10282_v4  ;;  %v2783_v20 = vpop.f32.mrb[41].mxu1 }
 0x32a   :  { %8275 = vmatpush1.bf16.msra.mxu1 %v8274_v18 }
 0x32b   :  { %8241 = vmatpush1.bf16.msra.mxu0 %v8240_v45  ;;  %8276 = vmatprep.subr.bf16.mxu1 %v9608_v0 }
 0x32c   :  { %8243 = vmatprep.subr.bf16.mxu0 %v8242_v14  ;;  %v2786_v26 = vpop.f32.mrb[42].mxu1 }
 0x32d   :  { %v2795_v28 = vadd.f32 %v2786_v26, %v10286_v37  ;;  %v2788_v30 = vpop.f32.mrb[43].mxu1 }
 0x32e   :  { %8278 = vmatpush1.bf16.msra.mxu1 %v8277_v22 }
 0x32f   :  { %8245 = vmatpush1.bf16.msra.mxu0 %v8244_v24 }
 0x331   :  { %4002 = vmatmul.mubr.f32.vlgmr.msra.gmra.mrb[60].mxu1 %v3850_v31 }
 0x332   :  { %3925 = vmatmul.mubr.f32.vlgmr.msra.gmra.mrb[4].mxu0 %v3850_v31  ;;  %6897 = vmatprep.mubr.msk.f32.mxu1 %vm304_vm1, %v10296_v54 }
 0x333   :  { %6895 = vmatprep.mubr.msk.f32.mxu0 %vm304_vm1, %v10296_v54 }
 0x335   :  { %4007 = vmatmul.mubr.f32.gmra.mrb[62].mxu1 %v3849_v32 }
 0x336   :  { %3931 = vmatmul.mubr.f32.gmra.mrb[6].mxu0 %v3849_v32 }
 0x354   :  { %v3025_v0 = vpop.f32.mrb[44].mxu1 }
 0x355   :  { %v3036_v4 = vadd.f32 %v3025_v0, %v2792_v21  ;;  %v3027_v33 = vpop.f32.mrb[45].mxu1 }
 0x358   :  { %v3030_v17 = vpop.f32.mrb[46].mxu1 }
 0x359   :  { %v3039_v37 = vadd.f32 %v3030_v17, %v2795_v28  ;;  %v3032_v36 = vpop.f32.mrb[47].mxu1 }
 0x380   :  { %v3270_v38 = vpop.f32.mrb[48].mxu1 }
 0x381   :  { %v10329_v13 = vadd.f32 %v3270_v38, %v3036_v4  ;;  %v3272_v39 = vpop.f32.mrb[49].mxu1 }
 0x384   :  { %v3275_v41 = vpop.f32.mrb[50].mxu1 }
 0x385   :  { %v10331_v46 = vadd.f32 %v3275_v41, %v3039_v37  ;;  %v3277_v43 = vpop.f32.mrb[51].mxu1 }
 0x386   :  { %9481 = shalt.err (!%p9478_p8)  }
 0x387   :  { %s9482_s19 = scalar_lea.vmem %s111_s30, 40960  ;;  %p9487_p10 = scmp.lt.s32.totalorder %s111_s30, %s111_s30 }
 0x388   :  { %p9483_p9 = scmp.ne.s32.totalorder %s111_s30, %s9482_s19  ;;  %p9488_p11 = scmp.lt.s32.totalorder %s9482_s19, %s9482_s19 }
 0x38a   :  { %p9489_p12 = por %p9488_p11, %p9487_p10 }
 0x38c   :  { %p9490_p13 = pnand %p9489_p12, %p9483_p9 }
 0x38e   :  { %9493 = shalt.err (!%p9490_p13)  }
 0x38f   :  { %113 = dma.hbm_to_vmem [thread:$0]  %s10538_s7, 40960, %s111_s30, [#allocation8] }
 0x390   :  { %s9494_s25 = scalar_lea.hbm %s10539_s8, 32768 }
 0x391   :  { %p9495_p0 = scmp.ne.s32.totalorder %s10539_s8, %s9494_s25  ;;  %p9498_p1 = scmp.lt.u32.totalorder %s9494_s25, %s10539_s8 }
 0x393   :  { %p9500_p2 = pnand %p9498_p1, %p9495_p0 }
 0x395   :  { %9503 = shalt.err (!%p9500_p2)  }
 0x396   :  { %s9504_s21 = scalar_lea.vmem %s123_s13, 32768  ;;  %p9509_p4 = scmp.lt.s32.totalorder %s123_s13, %s123_s13 }
 0x397   :  { %p9505_p3 = scmp.ne.s32.totalorder %s123_s13, %s9504_s21  ;;  %p9510_p5 = scmp.lt.s32.totalorder %s9504_s21, %s9504_s21 }
 0x399   :  { %p9511_p6 = por %p9510_p5, %p9509_p4 }
 0x39b   :  { %p9512_p7 = pnand %p9511_p6, %p9505_p3 }
 0x39d   :  { %9515 = shalt.err (!%p9512_p7)  }
 0x39e   :  { %125 = dma.hbm_to_vmem [thread:$0]  %s10539_s8, 32768, %s123_s13, [#allocation8 + $0x1] }
 0x39f   :  { %s9611_s6 = smov [#allocation6]   ;;  %s9612_s29 = smov [#allocation7]  }
 0x3a0   :  { %s134_s28 = sshll.u32 %s9611_s6, 4  ;;  %s146_s0 = sshll.u32 %s9612_s29, 4  ;;  %s135_s28 = int_to_ptr.vmem [resolvable:$true] %s134_s28  ;;  %s147_s0 = int_to_ptr.vmem [resolvable:$true] %s146_s0 }
 0x3a1   :  { %s9516_s4 = scalar_lea.hbm %s10540_s9, 32768 }
 0x3a2   :  { %p9517_p8 = scmp.ne.s32.totalorder %s10540_s9, %s9516_s4  ;;  %p9520_p9 = scmp.lt.u32.totalorder %s9516_s4, %s10540_s9 }
 0x3a4   :  { %p9522_p10 = pnand %p9520_p9, %p9517_p8 }
 0x3a6   :  { %9525 = shalt.err (!%p9522_p10)  }
 0x3a7   :  { %s9526_s8 = scalar_lea.vmem %s135_s28, 32768  ;;  %p9531_p12 = scmp.lt.s32.totalorder %s135_s28, %s135_s28 }
 0x3a8   :  { %p9527_p11 = scmp.ne.s32.totalorder %s135_s28, %s9526_s8  ;;  %p9532_p13 = scmp.lt.s32.totalorder %s9526_s8, %s9526_s8 }
 0x3aa   :  { %p9533_p0 = por %p9532_p13, %p9531_p12 }
 0x3ac   :  { %p9534_p1 = pnand %p9533_p0, %p9527_p11 }
 0x3ae   :  { %9537 = shalt.err (!%p9534_p1)  }
 0x3af   :  { %137 = dma.hbm_to_vmem [thread:$0]  %s10540_s9, 32768, %s135_s28, [#allocation8 + $0x2] }
 0x3b0   :  { %s9538_s22 = scalar_lea.hbm %s10541_s10, 16384 }
 0x3b1   :  { %p9539_p2 = scmp.ne.s32.totalorder %s10541_s10, %s9538_s22  ;;  %p9542_p3 = scmp.lt.u32.totalorder %s9538_s22, %s10541_s10 }
 0x3b3   :  { %p9544_p4 = pnand %p9542_p3, %p9539_p2 }
 0x3b5   :  { %9547 = shalt.err (!%p9544_p4)  }
 0x3b6   :  { %s9548_s26 = scalar_lea.vmem %s147_s0, 16384  ;;  %p9553_p6 = scmp.lt.s32.totalorder %s147_s0, %s147_s0 }
 0x3b7   :  { %p9549_p5 = scmp.ne.s32.totalorder %s147_s0, %s9548_s26  ;;  %p9554_p7 = scmp.lt.s32.totalorder %s9548_s26, %s9548_s26 }
 0x3b9   :  { %p9555_p8 = por %p9554_p7, %p9553_p6 }
 0x3bb   :  { %p9556_p9 = pnand %p9555_p8, %p9549_p5 }
 0x3bd   :  { %9559 = shalt.err (!%p9556_p9)  }
 0x3be   :  { %149 = dma.hbm_to_vmem [thread:$0]  %s10541_s10, 16384, %s147_s0, [#allocation8 + $0x3]  ;;  %v3515_v54 = vpop.f32.mrb[52].mxu1  ;;  %v4018_v53 = vld [vmem:[#allocation12] sm:$0x7]  ;;  %vm4070_vm6 = vcmask 523266  }
 0x3bf   :  { %v3526_v44 = vadd.f32 %v3515_v54, %v10329_v13  ;;  %v3517_v29 = vpop.f32.mrb[53].mxu1  ;;  %v4023_v59 = vrot.slane %v4018_v53, %v10181_v35  ;;  %v4027_v60 = vrot.slane %v4018_v53, %v10184_v40  ;;  %v4031_v61 = vrot.slane %v4018_v53, %v10188_v42 }
 0x3c0   :  { %v3520_v47 = vpop.f32.mrb[54].mxu1  ;;  %vm4074_vm7 = vcmask 519168  }
 0x3c1   :  { %v3529_v48 = vadd.f32 %v3520_v47, %v10331_v46  ;;  %v3522_v49 = vpop.f32.mrb[55].mxu1 }
 0x3d8   :  { %v3759_v34 = vpop.f32.mrb[56].mxu1 }
 0x3d9   :  { %v3770_v50 = vadd.f32 %v3759_v34, %v3526_v44  ;;  %v3761_v52 = vpop.f32.mrb[57].mxu1 }
 0x3dc   :  { %v3764_v55 = vpop.f32.mrb[58].mxu1 }
 0x3dd   :  { %v3773_v56 = vadd.f32 %v3764_v55, %v3529_v48  ;;  %v3766_v57 = vpop.f32.mrb[59].mxu1 }
 0x404   :  { %v4003_v62 = vpop.f32.mrb[60].mxu1 }
 0x405   :  { %v3926_v58 = vpop.f32.mrb[4].mxu0  ;;  %v4014_v1 = vadd.f32 %v4003_v62, %v3770_v50  ;;  %v4005_v3 = vpop.f32.mrb[61].mxu1 }
 0x406   :  { %v4035_v2 = vadd.f32 %v4023_v59, %v3926_v58  ;;  %v3928_v63 = vpop.f32.mrb[5].mxu0 }
 0x407   :  { %v4036_v6 = vadd.f32 %v4027_v60, %v3928_v63  ;;  %v4037_v7 = vadd.f32 %v4031_v61, %v4014_v1 }
 0x408   :  { %v4041_v27 = vmax.f32 %v4035_v2, 0.0  ;;  %v4008_v9 = vpop.f32.mrb[62].mxu1 }
 0x409   :  { %v4042_v51 = vmax.f32 %v4036_v6, 0.0  ;;  %v3932_v18 = vpop.f32.mrb[6].mxu0  ;;  %v4043_v45 = vmax.f32 %v4037_v7, 0.0  ;;  %v4017_v12 = vadd.f32 %v4008_v9, %v3773_v56  ;;  %v4010_v14 = vpop.f32.mrb[63].mxu1 }
 0x40a   :  { %v4053_v10 = vrot.slane %v4041_v27, 6  ;;  %v4038_v8 = vadd.f32 %v4023_v59, %v3932_v18  ;;  %v3934_v16 = vpop.f32.mrb[7].mxu0 }
 0x40b   :  { %v4054_v23 = vrot.slane %v4042_v51, 6  ;;  %v4039_v5 = vadd.f32 %v4027_v60, %v3934_v16  ;;  %v4055_v11 = vrot.slane %v4043_v45, 6  ;;  %v4040_v21 = vadd.f32 %v4031_v61, %v4017_v12 }
 0x40c   :  { %4068 = vst [vmem:[#allocation2 + $0x18] sm:$0xfc] %v4053_v10  ;;  %v4044_v20 = vmax.f32 %v4038_v8, 0.0 }
 0x40d   :  { %4069 = vst [vmem:[#allocation2 + $0x20] sm:$0xfc] %v4054_v23  ;;  %v4045_v22 = vmax.f32 %v4039_v5, 0.0  ;;  %4071 = vst.msk [vmem:[#allocation2 + $0x28] sm:$0xfc] %vm4070_vm6, %v4055_v11  ;;  %v4046_v24 = vmax.f32 %v4040_v21, 0.0 }
 0x40e   :  { %v4056_v19 = vrot.slane %v4044_v20, 6 }
 0x40f   :  { %v4058_v32 = vrot.slane %v4045_v22, 6  ;;  %v4060_v26 = vrot.slane %v4046_v24, 6 }
 0x410   :  { %v4057_v28 = vsel %vm3359_vm5, %v4053_v10, %v4056_v19 }
 0x411   :  { %4072 = vst [vmem:[#allocation2 + $0x30] sm:$0xf] %v4057_v28  ;;  %v4059_v30 = vsel %vm3359_vm5, %v4054_v23, %v4058_v32  ;;  %v4061_v31 = vsel %vm3359_vm5, %v4055_v11, %v4060_v26 }
 0x412   :  { %4073 = vst [vmem:[#allocation2 + $0x38] sm:$0xf] %v4059_v30  ;;  %4075 = vst.msk [vmem:[#allocation2 + $0x40] sm:$0xf] %vm4074_vm7, %v4061_v31 }
 0x413   :  { %9590 = dma.done.wait [#allocation8], 40960 }
 0x414   :  { %9591 = vsyncadd [#allocation8], 4294926336  ;;  %v4172_v0 = vld [vmem:[#allocation4 + $0x288] sm:$0xff]  ;;  %v4174_v4 = vld [vmem:[#allocation4 + $0x298] sm:$0xff]  ;;  %vm10410_vm8 = vcmp.lt.s32.totalorder %v2061_v15, 256 }
 0x415   :  { %v4171_v33 = vld [vmem:[#allocation4 + $0x280] sm:$0xff]  ;;  %v8279_v17 = vpack.c.bf16 %v4174_v4, %v4172_v0  ;;  %v4173_v37 = vld [vmem:[#allocation4 + $0x290] sm:$0xff]  ;;  %v4176_v36 = vld [vmem:[#allocation4 + $0x2a8] sm:$0xff] }
 0x416   :  { %v4178_v38 = vld [vmem:[#allocation4 + $0x2b8] sm:$0xff]  ;;  %v8281_v13 = vpack.c.bf16 %v4173_v37, %v4171_v33  ;;  %v4175_v41 = vld [vmem:[#allocation4 + $0x2a0] sm:$0xff]  ;;  %v4177_v46 = vld [vmem:[#allocation4 + $0x2b0] sm:$0xff] }
 0x417   :  { %v8283_v39 = vpack.c.bf16 %v4178_v38, %v4176_v36  ;;  %v4180_v43 = vld [vmem:[#allocation4 + $0x2c8] sm:$0xff]  ;;  %8280 = vmatprep.subr.bf16.mxu0 %v8279_v17  ;;  %v4182_v54 = vld [vmem:[#allocation4 + $0x2d8] sm:$0xff]  ;;  %v8285_v44 = vpack.c.bf16 %v4177_v46, %v4175_v41  ;;  %v4179_v47 = vld [vmem:[#allocation4 + $0x2c0] sm:$0xff] }
 0x418   :  { %8282 = vmatpush1.bf16.msra.mxu0 %v8281_v13  ;;  %v8287_v29 = vpack.c.bf16 %v4182_v54, %v4180_v43  ;;  %v4181_v48 = vld [vmem:[#allocation4 + $0x2d0] sm:$0xff]  ;;  %v4184_v49 = vld [vmem:[#allocation4 + $0x2e8] sm:$0xff]  ;;  %v4186_v34 = vld [vmem:[#allocation4 + $0x2f8] sm:$0xff] }
 0x419   :  { %8284 = vmatprep.subr.bf16.mxu0 %v8283_v39  ;;  %v8289_v50 = vpack.c.bf16 %v4181_v48, %v4179_v47  ;;  %v8291_v52 = vpack.c.bf16 %v4186_v34, %v4184_v49  ;;  %v4183_v55 = vld [vmem:[#allocation4 + $0x2e0] sm:$0xff]  ;;  %v4185_v56 = vld [vmem:[#allocation4 + $0x2f0] sm:$0xff]  ;;  %v4188_v57 = vld [vmem:[#allocation4 + $0x308] sm:$0xff] }
 0x41a   :  { %v4190_v53 = vld [vmem:[#allocation4 + $0x318] sm:$0xff]  ;;  %v8293_v59 = vpack.c.bf16 %v4185_v56, %v4183_v55  ;;  %v4187_v61 = vld [vmem:[#allocation4 + $0x300] sm:$0xff]  ;;  %v4189_v62 = vld [vmem:[#allocation4 + $0x310] sm:$0xff] }
 0x41b   :  { %v8295_v60 = vpack.c.bf16 %v4190_v53, %v4188_v57  ;;  %v4192_v58 = vld [vmem:[#allocation4 + $0x328] sm:$0xff]  ;;  %v4194_v1 = vld [vmem:[#allocation4 + $0x338] sm:$0xff]  ;;  %v8297_v2 = vpack.c.bf16 %v4189_v62, %v4187_v61  ;;  %v4191_v63 = vld [vmem:[#allocation4 + $0x320] sm:$0xff] }
 0x41c   :  { %8286 = vmatpush1.bf16.msra.mxu0 %v8285_v44  ;;  %v8299_v3 = vpack.c.bf16 %v4194_v1, %v4192_v58  ;;  %v4193_v6 = vld [vmem:[#allocation4 + $0x330] sm:$0xff]  ;;  %v4196_v7 = vld [vmem:[#allocation4 + $0x348] sm:$0xff]  ;;  %v4198_v27 = vld [vmem:[#allocation4 + $0x358] sm:$0xff] }
 0x41d   :  { %8288 = vmatprep.subr.bf16.mxu0 %v8287_v29  ;;  %v8301_v51 = vpack.c.bf16 %v4193_v6, %v4191_v63  ;;  %v4195_v9 = vld [vmem:[#allocation4 + $0x340] sm:$0xff]  ;;  %v8303_v18 = vpack.c.bf16 %v4198_v27, %v4196_v7  ;;  %v4197_v45 = vld [vmem:[#allocation4 + $0x350] sm:$0xff]  ;;  %v4165_v10 = vld [vmem:[#allocation2 + $0x20] sm:$0xfc] }
 0x41e   :  { %v4168_v12 = vld [vmem:[#allocation2 + $0x38] sm:$0x3]  ;;  %v4200_v8 = vld [vmem:[#allocation4 + $0x368] sm:$0xff]  ;;  %v4202_v14 = vld [vmem:[#allocation4 + $0x378] sm:$0xff]  ;;  %v4260_v16 = vrot.slane %v4165_v10, 2  ;;  %v8305_v5 = vpack.c.bf16 %v4197_v45, %v4195_v9 }
 0x41f   :  { %v4261_v23 = vrot.slane %v4168_v12, 2  ;;  %v8307_v21 = vpack.c.bf16 %v4202_v14, %v4200_v8  ;;  %v4199_v20 = vld [vmem:[#allocation4 + $0x360] sm:$0xff]  ;;  %v4201_v22 = vld [vmem:[#allocation4 + $0x370] sm:$0xff]  ;;  %v4204_v24 = vld [vmem:[#allocation4 + $0x388] sm:$0xff] }
 0x420   :  { %8290 = vmatpush1.bf16.msra.mxu0 %v8289_v50  ;;  %v4206_v19 = vld [vmem:[#allocation4 + $0x398] sm:$0xff]  ;;  %v8309_v32 = vpack.c.bf16 %v4201_v22, %v4199_v20  ;;  %v4203_v28 = vld [vmem:[#allocation4 + $0x380] sm:$0xff]  ;;  %v4205_v30 = vld [vmem:[#allocation4 + $0x390] sm:$0xff] }
 0x421   :  { %8292 = vmatprep.subr.bf16.mxu0 %v8291_v52  ;;  %v4262_v11 = vsel %vm3114_vm2, %v4260_v16, %v4261_v23  ;;  %v8311_v26 = vpack.c.bf16 %v4206_v19, %v4204_v24  ;;  %v4208_v31 = vld [vmem:[#allocation4 + $0x3a8] sm:$0xff]  ;;  %v4210_v0 = vld [vmem:[#allocation4 + $0x3b8] sm:$0xff]  ;;  %v8313_v4 = vpack.c.bf16 %v4205_v30, %v4203_v28  ;;  %v4207_v17 = vld [vmem:[#allocation4 + $0x3a0] sm:$0xff] }
 0x422   :  { %4334 = vmatprep.mubr.f32.mxu0 %v4262_v11  ;;  %v8315_v33 = vpack.c.bf16 %v4210_v0, %v4208_v31  ;;  %v4209_v37 = vld [vmem:[#allocation4 + $0x3b0] sm:$0xff]  ;;  %v4212_v36 = vld [vmem:[#allocation4 + $0x3c8] sm:$0xff]  ;;  %v4214_v38 = vld [vmem:[#allocation4 + $0x3d8] sm:$0xff] }
 0x423   :  { %v8317_v13 = vpack.c.bf16 %v4209_v37, %v4207_v17  ;;  %v8319_v39 = vpack.c.bf16 %v4214_v38, %v4212_v36  ;;  %v4211_v41 = vld [vmem:[#allocation4 + $0x3c0] sm:$0xff]  ;;  %v4213_v46 = vld [vmem:[#allocation4 + $0x3d0] sm:$0xff]  ;;  %v4216_v43 = vld [vmem:[#allocation4 + $0x3e8] sm:$0xff] }
 0x424   :  { %8294 = vmatpush1.bf16.msra.mxu0 %v8293_v59  ;;  %v4218_v54 = vld [vmem:[#allocation4 + $0x3f8] sm:$0xff]  ;;  %v8321_v44 = vpack.c.bf16 %v4213_v46, %v4211_v41  ;;  %v4215_v47 = vld [vmem:[#allocation4 + $0x3e0] sm:$0xff]  ;;  %v4217_v48 = vld [vmem:[#allocation4 + $0x3f0] sm:$0xff] }
 0x425   :  { %8296 = vmatprep.subr.bf16.mxu0 %v8295_v60  ;;  %v8323_v29 = vpack.c.bf16 %v4218_v54, %v4216_v43  ;;  %v4220_v49 = vld [vmem:[#allocation4 + $0x408] sm:$0xff]  ;;  %v4222_v34 = vld [vmem:[#allocation4 + $0x418] sm:$0xff]  ;;  %v8325_v50 = vpack.c.bf16 %v4217_v48, %v4215_v47  ;;  %v4219_v55 = vld [vmem:[#allocation4 + $0x400] sm:$0xff] }
 0x426   :  { %v8327_v52 = vpack.c.bf16 %v4222_v34, %v4220_v49  ;;  %v4221_v56 = vld [vmem:[#allocation4 + $0x410] sm:$0xff]  ;;  %v4224_v57 = vld [vmem:[#allocation4 + $0x428] sm:$0xff]  ;;  %v4226_v53 = vld [vmem:[#allocation4 + $0x438] sm:$0xff] }
 0x427   :  { %v8329_v59 = vpack.c.bf16 %v4221_v56, %v4219_v55  ;;  %v8331_v60 = vpack.c.bf16 %v4226_v53, %v4224_v57  ;;  %v4223_v61 = vld [vmem:[#allocation4 + $0x420] sm:$0xff]  ;;  %v4225_v62 = vld [vmem:[#allocation4 + $0x430] sm:$0xff]  ;;  %v4228_v58 = vld [vmem:[#allocation4 + $0x448] sm:$0xff] }
 0x428   :  { %8298 = vmatpush1.bf16.msra.mxu0 %v8297_v2  ;;  %v4230_v1 = vld [vmem:[#allocation4 + $0x458] sm:$0xff]  ;;  %v8333_v2 = vpack.c.bf16 %v4225_v62, %v4223_v61  ;;  %v4227_v63 = vld [vmem:[#allocation4 + $0x440] sm:$0xff]  ;;  %v4229_v6 = vld [vmem:[#allocation4 + $0x450] sm:$0xff] }
 0x429   :  { %8300 = vmatprep.subr.bf16.mxu0 %v8299_v3  ;;  %v8335_v3 = vpack.c.bf16 %v4230_v1, %v4228_v58  ;;  %v4232_v7 = vld [vmem:[#allocation4 + $0x468] sm:$0xff]  ;;  %v4234_v27 = vld [vmem:[#allocation4 + $0x478] sm:$0xff]  ;;  %v4231_v9 = vld [vmem:[#allocation4 + $0x460] sm:$0xff] }
 0x42a   :  { %v4233_v45 = vld [vmem:[#allocation4 + $0x470] sm:$0xff]  ;;  %v4164_v10 = vld [vmem:[#allocation2 + $0x18] sm:$0xfc]  ;;  %v4167_v12 = vld [vmem:[#allocation2 + $0x30] sm:$0x3] }
 0x42b   :  { %v4236_v8 = vld [vmem:[#allocation4 + $0x488] sm:$0xff]  ;;  %v4238_v14 = vld [vmem:[#allocation4 + $0x498] sm:$0xff]  ;;  %v8341_v16 = vpack.c.bf16 %v4233_v45, %v4231_v9  ;;  %v4257_v23 = vrot.slane %v4164_v10, 2  ;;  %v4237_v20 = vld [vmem:[#allocation4 + $0x490] sm:$0xff] }
 0x42c   :  { %8302 = vmatpush1.bf16.msra.mxu0 %v8301_v51  ;;  %v8337_v51 = vpack.c.bf16 %v4229_v6, %v4227_v63  ;;  %v8343_v11 = vpack.c.bf16 %v4238_v14, %v4236_v8  ;;  %v4240_v22 = vld [vmem:[#allocation4 + $0x4a8] sm:$0xff]  ;;  %v4242_v24 = vld [vmem:[#allocation4 + $0x4b8] sm:$0xff]  ;;  %v4239_v28 = vld [vmem:[#allocation4 + $0x4a0] sm:$0xff] }
 0x42d   :  { %8304 = vmatprep.subr.bf16.mxu0 %v8303_v18  ;;  %v8339_v18 = vpack.c.bf16 %v4234_v27, %v4232_v7  ;;  %v4241_v30 = vld [vmem:[#allocation4 + $0x4b0] sm:$0xff]  ;;  %v4244_v31 = vld [vmem:[#allocation4 + $0x4c8] sm:$0xff]  ;;  %v4246_v0 = vld [vmem:[#allocation4 + $0x4d8] sm:$0xff] }
 0x42e   :  { %v8351_v17 = vpack.c.bf16 %v4246_v0, %v4244_v31  ;;  %v4243_v37 = vld [vmem:[#allocation4 + $0x4c0] sm:$0xff]  ;;  %v4245_v36 = vld [vmem:[#allocation4 + $0x4d0] sm:$0xff]  ;;  %v4248_v38 = vld [vmem:[#allocation4 + $0x4e8] sm:$0xff] }
 0x42f   :  { %v4247_v41 = vld [vmem:[#allocation4 + $0x4e0] sm:$0xff]  ;;  %v4249_v43 = vld [vmem:[#allocation4 + $0x4f0] sm:$0xff]  ;;  %v4087_v47 = vld [vmem:[#allocation4 + $0x18] sm:$0xff] }
 0x430   :  { %8306 = vmatpush1.bf16.msra.mxu0 %v8305_v5  ;;  %v4258_v5 = vrot.slane %v4167_v12, 2  ;;  %v4166_v54 = vld [vmem:[#allocation2 + $0x28] sm:$0xfc]  ;;  %v8357_v48 = vpack.c.bf16 %v4249_v43, %v4247_v41  ;;  %v4089_v56 = vld [vmem:[#allocation4 + $0x28] sm:$0xff]  ;;  %v4091_v57 = vld [vmem:[#allocation4 + $0x38] sm:$0xff] }
 0x431   :  { %8308 = vmatprep.subr.bf16.mxu0 %v8307_v21  ;;  %v4235_v21 = vld [vmem:[#allocation4 + $0x480] sm:$0xff]  ;;  %v4263_v49 = vrot.slane %v4166_v54, 2  ;;  %v4086_v55 = vld [vmem:[#allocation4 + $0x10] sm:$0xff]  ;;  %v4093_v1 = vld [vmem:[#allocation4 + $0x48] sm:$0xff] }
 0x432   :  { %v4259_v19 = vsel %vm3114_vm2, %v4257_v23, %v4258_v5  ;;  %v4088_v61 = vld [vmem:[#allocation4 + $0x20] sm:$0xff]  ;;  %v4090_v62 = vld [vmem:[#allocation4 + $0x30] sm:$0xff]  ;;  %v4097_v27 = vld [vmem:[#allocation4 + $0x68] sm:$0xff] }
 0x433   :  { %v4082_v58 = vld [vmem:[#allocation2 + $0x8] sm:$0xff]  ;;  %v4092_v6 = vld [vmem:[#allocation4 + $0x40] sm:$0xff]  ;;  %v4101_v12 = vld [vmem:[#allocation4 + $0x88] sm:$0xff] }
 0x434   :  { %8310 = vmatpush1.bf16.msra.mxu0 %v8309_v32  ;;  %v8345_v32 = vpack.c.bf16 %v4237_v20, %v4235_v21  ;;  %v4094_v7 = vld [vmem:[#allocation4 + $0x50] sm:$0xff]  ;;  %v4096_v45 = vld [vmem:[#allocation4 + $0x60] sm:$0xff]  ;;  %v4103_v8 = vld [vmem:[#allocation4 + $0x98] sm:$0xff] }
 0x435   :  { %8312 = vmatprep.subr.bf16.mxu0 %v8311_v26  ;;  %v8347_v26 = vpack.c.bf16 %v4242_v24, %v4240_v22  ;;  %v8369_v9 = vpack.c.bf16 %v4094_v7, %v4092_v6  ;;  %v4098_v10 = vld [vmem:[#allocation4 + $0x70] sm:$0xff]  ;;  %v4100_v23 = vld [vmem:[#allocation4 + $0x80] sm:$0xff]  ;;  %v4107_v21 = vld [vmem:[#allocation4 + $0xb8] sm:$0xff] }
 0x436   :  { %v8373_v14 = vpack.c.bf16 %v4098_v10, %v4096_v45  ;;  %v4102_v5 = vld [vmem:[#allocation4 + $0x90] sm:$0xff]  ;;  %v4104_v24 = vld [vmem:[#allocation4 + $0xa0] sm:$0xff]  ;;  %v4119_v41 = vld [vmem:[#allocation4 + $0x118] sm:$0xff] }
 0x437   :  { %v8377_v20 = vpack.c.bf16 %v4102_v5, %v4100_v23  ;;  %v4108_v31 = vld [vmem:[#allocation4 + $0xc0] sm:$0xff]  ;;  %v4110_v0 = vld [vmem:[#allocation4 + $0xd0] sm:$0xff] }
 0x438   :  { %8314 = vmatpush1.bf16.msra.mxu0 %v8313_v4  ;;  %v8349_v4 = vpack.c.bf16 %v4241_v30, %v4239_v28  ;;  %v4116_v54 = vld [vmem:[#allocation4 + $0x100] sm:$0xff] }
 0x439   :  { %8316 = vmatprep.subr.bf16.mxu0 %v8315_v33  ;;  %v9613_v33 = vmov 0.0  }
 0x43c   :  { %8318 = vmatpush1.bf16.msra.mxu0 %v8317_v13  ;;  %v4250_v13 = vld [vmem:[#allocation4 + $0x4f8] sm:$0xff] }
 0x43d   :  { %8320 = vmatprep.subr.bf16.mxu0 %v8319_v39  ;;  %v8353_v39 = vpack.c.bf16 %v4245_v36, %v4243_v37  ;;  %v8355_v46 = vpack.c.bf16 %v4250_v13, %v4248_v38  ;;  %v8385_v37 = vpack.c.bf16 %v4110_v0, %v4108_v31  ;;  %v4112_v38 = vld [vmem:[#allocation4 + $0xe0] sm:$0xff]  ;;  %v4114_v13 = vld [vmem:[#allocation4 + $0xf0] sm:$0xff] }
 0x440   :  { %8322 = vmatpush1.bf16.msra.mxu0 %v8321_v44  ;;  %v4169_v44 = vld [vmem:[#allocation2 + $0x40] sm:$0x3] }
 0x441   :  { %8324 = vmatprep.subr.bf16.mxu0 %v8323_v29  ;;  %v4085_v29 = vld [vmem:[#allocation4 + $0x8] sm:$0xff]  ;;  %v4264_v34 = vrot.slane %v4169_v44, 2  ;;  %v4118_v44 = vld [vmem:[#allocation4 + $0x110] sm:$0xff] }
 0x443   :  { %v4265_v53 = vsel %vm3114_vm2, %v4263_v49, %v4264_v34  ;;  %v4120_v34 = vld [vmem:[#allocation4 + $0x120] sm:$0xff] }
 0x444   :  { %8326 = vmatpush1.bf16.msra.mxu0 %v8325_v50  ;;  %v8359_v50 = vpack.c.bf16 %v4087_v47, %v4085_v29  ;;  %v4121_v29 = vld [vmem:[#allocation4 + $0x128] sm:$0xff]  ;;  %v4123_v47 = vld [vmem:[#allocation4 + $0x138] sm:$0xff] }
 0x445   :  { %8328 = vmatprep.subr.bf16.mxu0 %v8327_v52  ;;  %v4084_v52 = vld [vmem:[#allocation4] sm:$0xff]  ;;  %v8395_v49 = vpack.c.bf16 %v4123_v47, %v4121_v29 }
 0x446   :  { %v4156_v47 = vld [vmem:[#allocation4 + $0x240] sm:$0xff] }
 0x448   :  { %8330 = vmatpush1.bf16.msra.mxu0 %v8329_v59  ;;  %v8361_v59 = vpack.c.bf16 %v4086_v55, %v4084_v52  ;;  %v4125_v52 = vld [vmem:[#allocation4 + $0x148] sm:$0xff]  ;;  %v4127_v55 = vld [vmem:[#allocation4 + $0x158] sm:$0xff] }
 0x449   :  { %8332 = vmatprep.subr.bf16.mxu0 %v8331_v60  ;;  %v8363_v60 = vpack.c.bf16 %v4091_v57, %v4089_v56  ;;  %v8399_v57 = vpack.c.bf16 %v4127_v55, %v4125_v52  ;;  %v4160_v55 = vld [vmem:[#allocation4 + $0x260] sm:$0xff] }
 0x44c   :  { %8334 = vmatpush1.bf16.msra.mxu0 %v8333_v2  ;;  %v4095_v2 = vld [vmem:[#allocation4 + $0x58] sm:$0xff] }
 0x44d   :  { %8336 = vmatprep.subr.bf16.mxu0 %v8335_v3  ;;  %v8365_v3 = vpack.c.bf16 %v4090_v62, %v4088_v61  ;;  %v8367_v63 = vpack.c.bf16 %v4095_v2, %v4093_v1  ;;  %v4131_v61 = vld [vmem:[#allocation4 + $0x178] sm:$0xff]  ;;  %v4128_v1 = vld [vmem:[#allocation4 + $0x160] sm:$0xff]  ;;  %v4130_v2 = vld [vmem:[#allocation4 + $0x170] sm:$0xff] }
 0x44e   :  { %v8405_v6 = vpack.c.bf16 %v4130_v2, %v4128_v1  ;;  %v4566_v1 = vld [vmem:[#allocation4 + $0x510] sm:$0xff] }
 0x450   :  { %8338 = vmatpush1.bf16.msra.mxu0 %v8337_v51  ;;  %v4099_v51 = vld [vmem:[#allocation4 + $0x78] sm:$0xff] }
 0x451   :  { %8340 = vmatprep.subr.bf16.mxu0 %v8339_v18  ;;  %v8371_v18 = vpack.c.bf16 %v4099_v51, %v4097_v27  ;;  %v4132_v27 = vld [vmem:[#allocation4 + $0x180] sm:$0xff]  ;;  %v4134_v51 = vld [vmem:[#allocation4 + $0x190] sm:$0xff] }
 0x452   :  { %v8409_v45 = vpack.c.bf16 %v4134_v51, %v4132_v27 }
 0x454   :  { %8342 = vmatpush1.bf16.msra.mxu0 %v8341_v16  ;;  %v8375_v16 = vpack.c.bf16 %v4103_v8, %v4101_v12  ;;  %v4136_v12 = vld [vmem:[#allocation4 + $0x1a0] sm:$0xff]  ;;  %v4138_v8 = vld [vmem:[#allocation4 + $0x1b0] sm:$0xff] }
 0x455   :  { %8344 = vmatprep.subr.bf16.mxu0 %v8343_v11  ;;  %v4105_v11 = vld [vmem:[#allocation4 + $0xa8] sm:$0xff]  ;;  %v8413_v23 = vpack.c.bf16 %v4138_v8, %v4136_v12  ;;  %v4575_v12 = vld [vmem:[#allocation4 + $0x558] sm:$0xff] }
 0x456   :  { %v8379_v22 = vpack.c.bf16 %v4107_v21, %v4105_v11  ;;  %v4140_v11 = vld [vmem:[#allocation4 + $0x1c0] sm:$0xff]  ;;  %v4142_v21 = vld [vmem:[#allocation4 + $0x1d0] sm:$0xff] }
 0x457   :  { %4335 = vmatmul.mubr.f32.vlgmr.msra.gmra.mrb[8].mxu0 %v4259_v19  ;;  %v4106_v19 = vld [vmem:[#allocation4 + $0xb0] sm:$0xff] }
 0x458   :  { %8346 = vmatpush1.bf16.msra.mxu0 %v8345_v32  ;;  %4405 = vmatprep.mubr.f32.mxu0 %v9613_v33  ;;  %v4109_v32 = vld [vmem:[#allocation4 + $0xc8] sm:$0xff]  ;;  %v8381_v28 = vpack.c.bf16 %v4106_v19, %v4104_v24  ;;  %v8417_v24 = vpack.c.bf16 %v4142_v21, %v4140_v11  ;;  %v4579_v11 = vld [vmem:[#allocation4 + $0x578] sm:$0xff] }
 0x459   :  { %8348 = vmatprep.subr.bf16.mxu0 %v8347_v26  ;;  %v4111_v26 = vld [vmem:[#allocation4 + $0xd8] sm:$0xff] }
 0x45a   :  { %v8383_v30 = vpack.c.bf16 %v4111_v26, %v4109_v32  ;;  %v4144_v32 = vld [vmem:[#allocation4 + $0x1e0] sm:$0xff]  ;;  %v4146_v26 = vld [vmem:[#allocation4 + $0x1f0] sm:$0xff] }
 0x45b   :  { %v8421_v31 = vpack.c.bf16 %v4146_v26, %v4144_v32  ;;  %v4583_v32 = vld [vmem:[#allocation4 + $0x598] sm:$0xff] }
 0x45c   :  { %8350 = vmatpush1.bf16.msra.mxu0 %v8349_v4  ;;  %v4113_v4 = vld [vmem:[#allocation4 + $0xe8] sm:$0xff] }
 0x45d   :  { %8352 = vmatprep.subr.bf16.mxu0 %v8351_v17  ;;  %v4115_v17 = vld [vmem:[#allocation4 + $0xf8] sm:$0xff] }
 0x45e   :  { %v8387_v36 = vpack.c.bf16 %v4115_v17, %v4113_v4  ;;  %v4148_v4 = vld [vmem:[#allocation4 + $0x200] sm:$0xff]  ;;  %v4150_v17 = vld [vmem:[#allocation4 + $0x210] sm:$0xff] }
 0x460   :  { %8354 = vmatpush1.bf16.msra.mxu0 %v8353_v39  ;;  %v4117_v39 = vld [vmem:[#allocation4 + $0x108] sm:$0xff] }
 0x461   :  { %8356 = vmatprep.subr.bf16.mxu0 %v8355_v46  ;;  %v8389_v46 = vpack.c.bf16 %v4114_v13, %v4112_v38  ;;  %v8391_v43 = vpack.c.bf16 %v4119_v41, %v4117_v39  ;;  %v4081_v38 = vld [vmem:[#allocation2] sm:$0xff]  ;;  %v8425_v13 = vpack.c.bf16 %v4150_v17, %v4148_v4  ;;  %v4152_v41 = vld [vmem:[#allocation4 + $0x220] sm:$0xff]  ;;  %v4587_v4 = vld [vmem:[#allocation4 + $0x5b8] sm:$0xff] }
 0x464   :  { %8358 = vmatpush1.bf16.msra.mxu0 %v8357_v48  ;;  %v8393_v48 = vpack.c.bf16 %v4118_v44, %v4116_v54  ;;  %v4159_v54 = vld [vmem:[#allocation4 + $0x258] sm:$0xff] }
 0x465   :  { %8360 = vmatprep.subr.bf16.mxu0 %v8359_v50  ;;  %v4122_v50 = vld [vmem:[#allocation4 + $0x130] sm:$0xff] }
 0x466   :  { %v8397_v56 = vpack.c.bf16 %v4122_v50, %v4120_v34  ;;  %v4163_v34 = vld [vmem:[#allocation4 + $0x278] sm:$0xff] }
 0x467   :  { %6898 = vmatmul.mubr.msk.f32.vlgmr.msra.gmra.mrb[8].mxu0 %vm2090_vm3, %v4265_v53  ;;  %v4124_v53 = vld [vmem:[#allocation4 + $0x140] sm:$0xff] }
 0x468   :  { %8362 = vmatpush1.bf16.msra.mxu0 %v8361_v59  ;;  %4479 = vmatprep.mubr.f32.mxu0 %v4082_v58  ;;  %v4126_v59 = vld [vmem:[#allocation4 + $0x150] sm:$0xff] }
 0x469   :  { %8364 = vmatprep.subr.bf16.mxu0 %v8363_v60  ;;  %v4129_v60 = vld [vmem:[#allocation4 + $0x168] sm:$0xff]  ;;  %v8401_v62 = vpack.c.bf16 %v4126_v59, %v4124_v53  ;;  %v4567_v53 = vld [vmem:[#allocation4 + $0x518] sm:$0xff]  ;;  %v4558_v59 = vld [vmem:[#allocation2 + $0x8] sm:$0xfc] }
 0x46a   :  { %v8403_v58 = vpack.c.bf16 %v4131_v61, %v4129_v60  ;;  %v4561_v60 = vld [vmem:[#allocation2 + $0x20] sm:$0x3]  ;;  %v4653_v2 = vrot.slane %v4558_v59, 2 }
 0x46b   :  { %v4601_v59 = vld [vmem:[#allocation4 + $0x628] sm:$0xff] }
 0x46c   :  { %8366 = vmatpush1.bf16.msra.mxu0 %v8365_v3  ;;  %v4133_v3 = vld [vmem:[#allocation4 + $0x188] sm:$0xff] }
 0x46d   :  { %8368 = vmatprep.subr.bf16.mxu0 %v8367_v63  ;;  %v4135_v63 = vld [vmem:[#allocation4 + $0x198] sm:$0xff] }
 0x46e   :  { %v8407_v7 = vpack.c.bf16 %v4135_v63, %v4133_v3  ;;  %v4654_v3 = vrot.slane %v4561_v60, 2  ;;  %v4569_v63 = vld [vmem:[#allocation4 + $0x528] sm:$0xff]  ;;  %v4603_v60 = vld [vmem:[#allocation4 + $0x638] sm:$0xff] }
 0x470   :  { %8370 = vmatpush1.bf16.msra.mxu0 %v8369_v9  ;;  %v4137_v9 = vld [vmem:[#allocation4 + $0x1a8] sm:$0xff] }
 0x471   :  { %8372 = vmatprep.subr.bf16.mxu0 %v8371_v18  ;;  %v4139_v18 = vld [vmem:[#allocation4 + $0x1b8] sm:$0xff] }
 0x472   :  { %v8411_v10 = vpack.c.bf16 %v4139_v18, %v4137_v9  ;;  %v4568_v9 = vld [vmem:[#allocation4 + $0x520] sm:$0xff]  ;;  %v4570_v18 = vld [vmem:[#allocation4 + $0x530] sm:$0xff] }
 0x473   :  { %v8445_v8 = vpack.c.bf16 %v4570_v18, %v4568_v9  ;;  %v4611_v9 = vld [vmem:[#allocation4 + $0x678] sm:$0xff] }
 0x474   :  { %8374 = vmatpush1.bf16.msra.mxu0 %v8373_v14  ;;  %v4141_v14 = vld [vmem:[#allocation4 + $0x1c8] sm:$0xff] }
 0x475   :  { %8376 = vmatprep.subr.bf16.mxu0 %v8375_v16  ;;  %v4143_v16 = vld [vmem:[#allocation4 + $0x1d8] sm:$0xff] }
 0x476   :  { %v8415_v5 = vpack.c.bf16 %v4143_v16, %v4141_v14  ;;  %v4572_v16 = vld [vmem:[#allocation4 + $0x540] sm:$0xff] }
 0x478   :  { %8378 = vmatpush1.bf16.msra.mxu0 %v8377_v20  ;;  %v4145_v20 = vld [vmem:[#allocation4 + $0x1e8] sm:$0xff] }
 0x479   :  { %8380 = vmatprep.subr.bf16.mxu0 %v8379_v22  ;;  %v4147_v22 = vld [vmem:[#allocation4 + $0x1f8] sm:$0xff] }
 0x47a   :  { %v8419_v19 = vpack.c.bf16 %v4147_v22, %v4145_v20  ;;  %v4576_v22 = vld [vmem:[#allocation4 + $0x560] sm:$0xff] }
 0x47c   :  { %8382 = vmatpush1.bf16.msra.mxu0 %v8381_v28  ;;  %v4149_v28 = vld [vmem:[#allocation4 + $0x208] sm:$0xff] }
 0x47d   :  { %8384 = vmatprep.subr.bf16.mxu0 %v8383_v30  ;;  %v4151_v30 = vld [vmem:[#allocation4 + $0x218] sm:$0xff] }
 0x47e   :  { %v8423_v0 = vpack.c.bf16 %v4151_v30, %v4149_v28  ;;  %v4580_v30 = vld [vmem:[#allocation4 + $0x580] sm:$0xff] }
 0x480   :  { %8386 = vmatpush1.bf16.msra.mxu0 %v8385_v37  ;;  %v4153_v37 = vld [vmem:[#allocation4 + $0x228] sm:$0xff] }
 0x481   :  { %8388 = vmatprep.subr.bf16.mxu0 %v8387_v36  ;;  %v4155_v36 = vld [vmem:[#allocation4 + $0x238] sm:$0xff] }
 0x482   :  { %v8427_v39 = vpack.c.bf16 %v4155_v36, %v4153_v37  ;;  %v4584_v36 = vld [vmem:[#allocation4 + $0x5a0] sm:$0xff] }
 0x484   :  { %8390 = vmatpush1.bf16.msra.mxu0 %v8389_v46  ;;  %v4154_v46 = vld [vmem:[#allocation4 + $0x230] sm:$0xff] }
 0x485   :  { %8392 = vmatprep.subr.bf16.mxu0 %v8391_v43  ;;  %v4157_v43 = vld [vmem:[#allocation4 + $0x248] sm:$0xff]  ;;  %v8429_v44 = vpack.c.bf16 %v4154_v46, %v4152_v41 }
 0x486   :  { %v8431_v29 = vpack.c.bf16 %v4159_v54, %v4157_v43  ;;  %v4588_v43 = vld [vmem:[#allocation4 + $0x5c0] sm:$0xff]  ;;  %v4590_v54 = vld [vmem:[#allocation4 + $0x5d0] sm:$0xff] }
 0x488   :  { %8394 = vmatpush1.bf16.msra.mxu0 %v8393_v48  ;;  %v4158_v48 = vld [vmem:[#allocation4 + $0x250] sm:$0xff] }
 0x489   :  { %8396 = vmatprep.subr.bf16.mxu0 %v8395_v49  ;;  %v4161_v49 = vld [vmem:[#allocation4 + $0x268] sm:$0xff]  ;;  %v8433_v50 = vpack.c.bf16 %v4158_v48, %v4156_v47  ;;  %v8465_v47 = vpack.c.bf16 %v4590_v54, %v4588_v43  ;;  %v4631_v54 = vld [vmem:[#allocation4 + $0x718] sm:$0xff] }
 0x48a   :  { %v8435_v52 = vpack.c.bf16 %v4163_v34, %v4161_v49  ;;  %v4592_v49 = vld [vmem:[#allocation4 + $0x5e0] sm:$0xff]  ;;  %v4594_v34 = vld [vmem:[#allocation4 + $0x5f0] sm:$0xff]  ;;  %v4629_v43 = vld [vmem:[#allocation4 + $0x708] sm:$0xff] }
 0x48c   :  { %8398 = vmatpush1.bf16.msra.mxu0 %v8397_v56  ;;  %v4162_v56 = vld [vmem:[#allocation4 + $0x270] sm:$0xff] }
 0x48d   :  { %8400 = vmatprep.subr.bf16.mxu0 %v8399_v57  ;;  %v4565_v57 = vld [vmem:[#allocation4 + $0x508] sm:$0xff]  ;;  %v8437_v61 = vpack.c.bf16 %v4162_v56, %v4160_v55  ;;  %v8469_v55 = vpack.c.bf16 %v4594_v34, %v4592_v49  ;;  %v4628_v49 = vld [vmem:[#allocation4 + $0x700] sm:$0xff]  ;;  %v4630_v34 = vld [vmem:[#allocation4 + $0x710] sm:$0xff] }
 0x490   :  { %8402 = vmatpush1.bf16.msra.mxu0 %v8401_v62  ;;  %v8439_v62 = vpack.c.bf16 %v4567_v53, %v4565_v57  ;;  %v4596_v57 = vld [vmem:[#allocation4 + $0x600] sm:$0xff]  ;;  %v4598_v53 = vld [vmem:[#allocation4 + $0x610] sm:$0xff] }
 0x491   :  { %8404 = vmatprep.subr.bf16.mxu0 %v8403_v58  ;;  %v4564_v58 = vld [vmem:[#allocation4 + $0x500] sm:$0xff] }
 0x492   :  { %v8441_v27 = vpack.c.bf16 %v4566_v1, %v4564_v58  ;;  %v4600_v58 = vld [vmem:[#allocation4 + $0x620] sm:$0xff]  ;;  %v4602_v1 = vld [vmem:[#allocation4 + $0x630] sm:$0xff] }
 0x494   :  { %8406 = vmatpush1.bf16.msra.mxu0 %v8405_v6  ;;  %v4571_v6 = vld [vmem:[#allocation4 + $0x538] sm:$0xff] }
 0x495   :  { %8408 = vmatprep.subr.bf16.mxu0 %v8407_v7  ;;  %v4083_v7 = vld [vmem:[#allocation2 + $0x10] sm:$0xff]  ;;  %v8443_v51 = vpack.c.bf16 %v4571_v6, %v4569_v63  ;;  %v8477_v63 = vpack.c.bf16 %v4602_v1, %v4600_v58  ;;  %v4636_v1 = vld [vmem:[#allocation4 + $0x740] sm:$0xff] }
 0x498   :  { %8410 = vmatpush1.bf16.msra.mxu0 %v8409_v45  ;;  %v4655_v45 = vsel %vm3114_vm2, %v4653_v2, %v4654_v3  ;;  %v4605_v2 = vld [vmem:[#allocation4 + $0x648] sm:$0xff]  ;;  %v4607_v3 = vld [vmem:[#allocation4 + $0x658] sm:$0xff] }
 0x499   :  { %8412 = vmatprep.subr.bf16.mxu0 %v8411_v10  ;;  %v4573_v10 = vld [vmem:[#allocation4 + $0x548] sm:$0xff]  ;;  %v8479_v6 = vpack.c.bf16 %v4607_v3, %v4605_v2  ;;  %v4638_v2 = vld [vmem:[#allocation4 + $0x750] sm:$0xff] }
 0x49a   :  { %v8447_v14 = vpack.c.bf16 %v4575_v12, %v4573_v10  ;;  %v4608_v10 = vld [vmem:[#allocation4 + $0x660] sm:$0xff]  ;;  %v4610_v12 = vld [vmem:[#allocation4 + $0x670] sm:$0xff]  ;;  %v4641_v3 = vld [vmem:[#allocation4 + $0x768] sm:$0xff] }
 0x49c   :  { %8414 = vmatpush1.bf16.msra.mxu0 %v8413_v23  ;;  %v4574_v23 = vld [vmem:[#allocation4 + $0x550] sm:$0xff] }
 0x49d   :  { %8416 = vmatprep.subr.bf16.mxu0 %v8415_v5  ;;  %v4577_v5 = vld [vmem:[#allocation4 + $0x568] sm:$0xff]  ;;  %v8449_v21 = vpack.c.bf16 %v4574_v23, %v4572_v16  ;;  %v8485_v16 = vpack.c.bf16 %v4610_v12, %v4608_v10  ;;  %v4817_v10 = vld [vmem:[#allocation4 + $0x798] sm:$0xff] }
 0x49e   :  { %v8451_v20 = vpack.c.bf16 %v4579_v11, %v4577_v5  ;;  %v4612_v5 = vld [vmem:[#allocation4 + $0x680] sm:$0xff]  ;;  %v4614_v11 = vld [vmem:[#allocation4 + $0x690] sm:$0xff]  ;;  %v4808_v12 = vld [vmem:[#allocation2 + $0x20] sm:$0xf0] }
 0x4a0   :  { %8418 = vmatpush1.bf16.msra.mxu0 %v8417_v24  ;;  %v4578_v24 = vld [vmem:[#allocation4 + $0x570] sm:$0xff] }
 0x4a1   :  { %8420 = vmatprep.subr.bf16.mxu0 %v8419_v19  ;;  %v4581_v19 = vld [vmem:[#allocation4 + $0x588] sm:$0xff]  ;;  %v8453_v26 = vpack.c.bf16 %v4578_v24, %v4576_v22  ;;  %v8489_v22 = vpack.c.bf16 %v4614_v11, %v4612_v5  ;;  %v4814_v11 = vld [vmem:[#allocation4 + $0x780] sm:$0xff] }
 0x4a2   :  { %v8455_v28 = vpack.c.bf16 %v4583_v32, %v4581_v19  ;;  %v4616_v19 = vld [vmem:[#allocation4 + $0x6a0] sm:$0xff]  ;;  %v4618_v32 = vld [vmem:[#allocation4 + $0x6b0] sm:$0xff] }
 0x4a4   :  { %8422 = vmatpush1.bf16.msra.mxu0 %v8421_v31  ;;  %v4582_v31 = vld [vmem:[#allocation4 + $0x590] sm:$0xff] }
 0x4a5   :  { %8424 = vmatprep.subr.bf16.mxu0 %v8423_v0  ;;  %v4585_v0 = vld [vmem:[#allocation4 + $0x5a8] sm:$0xff]  ;;  %v8457_v17 = vpack.c.bf16 %v4582_v31, %v4580_v30  ;;  %v8493_v30 = vpack.c.bf16 %v4618_v32, %v4616_v19  ;;  %v4821_v19 = vld [vmem:[#allocation4 + $0x7b8] sm:$0xff] }
 0x4a6   :  { %v8459_v37 = vpack.c.bf16 %v4587_v4, %v4585_v0  ;;  %v4620_v0 = vld [vmem:[#allocation4 + $0x6c0] sm:$0xff]  ;;  %v4622_v4 = vld [vmem:[#allocation4 + $0x6d0] sm:$0xff] }
 0x4a7   :  { %4480 = vmatmul.mubr.f32.vlgmr.msra.gmra.mrb[8].mxu0 %v4081_v38  ;;  %v4586_v38 = vld [vmem:[#allocation4 + $0x5b0] sm:$0xff] }
 0x4a8   :  { %8426 = vmatpush1.bf16.msra.mxu0 %v8425_v13  ;;  %4550 = vmatprep.mubr.f32.mxu0 %v9613_v33  ;;  %v4589_v13 = vld [vmem:[#allocation4 + $0x5c8] sm:$0xff]  ;;  %v8461_v41 = vpack.c.bf16 %v4586_v38, %v4584_v36  ;;  %v8497_v36 = vpack.c.bf16 %v4622_v4, %v4620_v0  ;;  %v4624_v38 = vld [vmem:[#allocation4 + $0x6e0] sm:$0xff] }
 0x4a9   :  { %8428 = vmatprep.subr.bf16.mxu0 %v8427_v39  ;;  %v4591_v39 = vld [vmem:[#allocation4 + $0x5d8] sm:$0xff]  ;;  %v4823_v4 = vld [vmem:[#allocation4 + $0x7c8] sm:$0xff] }
 0x4aa   :  { %v8463_v46 = vpack.c.bf16 %v4591_v39, %v4589_v13  ;;  %v4626_v39 = vld [vmem:[#allocation4 + $0x6f0] sm:$0xff] }
 0x4ac   :  { %8430 = vmatpush1.bf16.msra.mxu0 %v8429_v44  ;;  %v4593_v44 = vld [vmem:[#allocation4 + $0x5e8] sm:$0xff] }
 0x4ad   :  { %8432 = vmatprep.subr.bf16.mxu0 %v8431_v29  ;;  %v4595_v29 = vld [vmem:[#allocation4 + $0x5f8] sm:$0xff] }
 0x4ae   :  { %v8467_v48 = vpack.c.bf16 %v4595_v29, %v4593_v44  ;;  %v8501_v44 = vpack.c.bf16 %v4626_v39, %v4624_v38  ;;  %v4822_v38 = vld [vmem:[#allocation4 + $0x7c0] sm:$0xff]  ;;  %v4827_v39 = vld [vmem:[#allocation4 + $0x7e8] sm:$0xff] }
 0x4b0   :  { %8434 = vmatpush1.bf16.msra.mxu0 %v8433_v50  ;;  %v4597_v50 = vld [vmem:[#allocation4 + $0x608] sm:$0xff] }
 0x4b1   :  { %8436 = vmatprep.subr.bf16.mxu0 %v8435_v52  ;;  %v4599_v52 = vld [vmem:[#allocation4 + $0x618] sm:$0xff] }
 0x4b2   :  { %v8471_v56 = vpack.c.bf16 %v4599_v52, %v4597_v50  ;;  %v4633_v50 = vld [vmem:[#allocation4 + $0x728] sm:$0xff]  ;;  %v4635_v52 = vld [vmem:[#allocation4 + $0x738] sm:$0xff] }
 0x4b4   :  { %8438 = vmatpush1.bf16.msra.mxu0 %v8437_v61  ;;  %v8473_v61 = vpack.c.bf16 %v4598_v53, %v4596_v57  ;;  %v8507_v57 = vpack.c.bf16 %v4635_v52, %v4633_v50  ;;  %v4632_v53 = vld [vmem:[#allocation4 + $0x720] sm:$0xff]  ;;  %v4832_v50 = vld [vmem:[#allocation4 + $0x810] sm:$0xff]  ;;  %v4835_v52 = vld [vmem:[#allocation4 + $0x828] sm:$0xff] }
 0x4b5   :  { %8440 = vmatprep.subr.bf16.mxu0 %v8439_v62  ;;  %v8475_v62 = vpack.c.bf16 %v4603_v60, %v4601_v59  ;;  %v4634_v59 = vld [vmem:[#allocation4 + $0x730] sm:$0xff]  ;;  %v4637_v60 = vld [vmem:[#allocation4 + $0x748] sm:$0xff] }
 0x4b7   :  { %6899 = vmatmul.mubr.msk.f32.vlgmr.msra.gmra.mrb[8].mxu0 %vm2090_vm3, %v4083_v7  ;;  %v4604_v7 = vld [vmem:[#allocation4 + $0x640] sm:$0xff] }
 0x4b8   :  { %8442 = vmatpush1.bf16.msra.mxu0 %v8441_v27  ;;  %4727 = vmatprep.mubr.f32.mxu0 %v4655_v45  ;;  %v4606_v27 = vld [vmem:[#allocation4 + $0x650] sm:$0xff] }
 0x4b9   :  { %8444 = vmatprep.subr.bf16.mxu0 %v8443_v51  ;;  %v4609_v51 = vld [vmem:[#allocation4 + $0x668] sm:$0xff]  ;;  %v8481_v18 = vpack.c.bf16 %v4606_v27, %v4604_v7  ;;  %v4640_v7 = vld [vmem:[#allocation4 + $0x760] sm:$0xff]  ;;  %v4642_v27 = vld [vmem:[#allocation4 + $0x770] sm:$0xff] }
 0x4ba   :  { %v8483_v45 = vpack.c.bf16 %v4611_v9, %v4609_v51  ;;  %v4815_v9 = vld [vmem:[#allocation4 + $0x788] sm:$0xff] }
 0x4bb   :  { %v8519_v5 = vpack.c.bf16 %v4817_v10, %v4815_v9  ;;  %v4847_v9 = vld [vmem:[#allocation4 + $0x888] sm:$0xff] }
 0x4bc   :  { %8446 = vmatpush1.bf16.msra.mxu0 %v8445_v8  ;;  %v4613_v8 = vld [vmem:[#allocation4 + $0x688] sm:$0xff] }
 0x4bd   :  { %8448 = vmatprep.subr.bf16.mxu0 %v8447_v14  ;;  %v4615_v14 = vld [vmem:[#allocation4 + $0x698] sm:$0xff] }
 0x4be   :  { %v8487_v23 = vpack.c.bf16 %v4615_v14, %v4613_v8  ;;  %v4811_v8 = vld [vmem:[#allocation2 + $0x38] sm:$0xf]  ;;  %v8517_v14 = vpack.c.bf16 %v4642_v27, %v4640_v7 }
 0x4bf   :  { %v4842_v27 = vld [vmem:[#allocation4 + $0x860] sm:$0xff] }
 0x4c0   :  { %8450 = vmatpush1.bf16.msra.mxu0 %v8449_v21  ;;  %v4617_v21 = vld [vmem:[#allocation4 + $0x6a8] sm:$0xff] }
 0x4c1   :  { %8452 = vmatprep.subr.bf16.mxu0 %v8451_v20  ;;  %v4619_v20 = vld [vmem:[#allocation4 + $0x6b8] sm:$0xff] }
 0x4c2   :  { %v8491_v24 = vpack.c.bf16 %v4619_v20, %v4617_v21  ;;  %v4816_v21 = vld [vmem:[#allocation4 + $0x790] sm:$0xff]  ;;  %v4903_v20 = vrot.slane %v4808_v12, 4  ;;  %v4846_v12 = vld [vmem:[#allocation4 + $0x880] sm:$0xff] }
 0x4c4   :  { %8454 = vmatpush1.bf16.msra.mxu0 %v8453_v26  ;;  %v4621_v26 = vld [vmem:[#allocation4 + $0x6c8] sm:$0xff] }
 0x4c5   :  { %8456 = vmatprep.subr.bf16.mxu0 %v8455_v28  ;;  %v4623_v28 = vld [vmem:[#allocation4 + $0x6d8] sm:$0xff] }
 0x4c6   :  { %v8495_v31 = vpack.c.bf16 %v4623_v28, %v4621_v26  ;;  %v8521_v26 = vpack.c.bf16 %v4816_v21, %v4814_v11  ;;  %v4850_v11 = vld [vmem:[#allocation4 + $0x8a0] sm:$0xff]  ;;  %v4852_v21 = vld [vmem:[#allocation4 + $0x8b0] sm:$0xff] }
 0x4c8   :  { %8458 = vmatpush1.bf16.msra.mxu0 %v8457_v17  ;;  %v4625_v17 = vld [vmem:[#allocation4 + $0x6e8] sm:$0xff] }
 0x4c9   :  { %8460 = vmatprep.subr.bf16.mxu0 %v8459_v37  ;;  %v4627_v37 = vld [vmem:[#allocation4 + $0x6f8] sm:$0xff] }
 0x4ca   :  { %v8499_v13 = vpack.c.bf16 %v4627_v37, %v4625_v17  ;;  %v4825_v17 = vld [vmem:[#allocation4 + $0x7d8] sm:$0xff] }
 0x4cc   :  { %8462 = vmatpush1.bf16.msra.mxu0 %v8461_v41  ;;  %v4557_v41 = vld [vmem:[#allocation2] sm:$0xfc] }
 0x4cd   :  { %8464 = vmatprep.subr.bf16.mxu0 %v8463_v46  ;;  %v4560_v46 = vld [vmem:[#allocation2 + $0x18] sm:$0x3]  ;;  %v4650_v29 = vrot.slane %v4557_v41, 2  ;;  %v4829_v41 = vld [vmem:[#allocation4 + $0x7f8] sm:$0xff] }
 0x4d0   :  { %8466 = vmatpush1.bf16.msra.mxu0 %v8465_v47  ;;  %v4651_v47 = vrot.slane %v4560_v46, 2 }
 0x4d1   :  { %8468 = vmatprep.subr.bf16.mxu0 %v8467_v48  ;;  %v8503_v48 = vpack.c.bf16 %v4631_v54, %v4629_v43  ;;  %v8531_v43 = vpack.c.bf16 %v4829_v41, %v4827_v39  ;;  %v4826_v54 = vld [vmem:[#allocation4 + $0x7e0] sm:$0xff]  ;;  %v4864_v41 = vld [vmem:[#allocation4 + $0x910] sm:$0xff] }
 0x4d2   :  { %v4862_v39 = vld [vmem:[#allocation4 + $0x900] sm:$0xff] }
 0x4d4   :  { %8470 = vmatpush1.bf16.msra.mxu0 %v8469_v55  ;;  %v4652_v55 = vsel %vm3114_vm2, %v4650_v29, %v4651_v47  ;;  %v4831_v29 = vld [vmem:[#allocation4 + $0x808] sm:$0xff]  ;;  %v4833_v47 = vld [vmem:[#allocation4 + $0x818] sm:$0xff] }
 0x4d5   :  { %8472 = vmatprep.subr.bf16.mxu0 %v8471_v56  ;;  %v8505_v56 = vpack.c.bf16 %v4630_v34, %v4628_v49  ;;  %v8535_v49 = vpack.c.bf16 %v4833_v47, %v4831_v29  ;;  %v4830_v34 = vld [vmem:[#allocation4 + $0x800] sm:$0xff]  ;;  %v4868_v47 = vld [vmem:[#allocation4 + $0x930] sm:$0xff] }
 0x4d6   :  { %v4866_v29 = vld [vmem:[#allocation4 + $0x920] sm:$0xff] }
 0x4d8   :  { %8474 = vmatpush1.bf16.msra.mxu0 %v8473_v61  ;;  %v4639_v61 = vld [vmem:[#allocation4 + $0x758] sm:$0xff] }
 0x4d9   :  { %8476 = vmatprep.subr.bf16.mxu0 %v8475_v62  ;;  %v8509_v62 = vpack.c.bf16 %v4634_v59, %v4632_v53  ;;  %v8511_v58 = vpack.c.bf16 %v4639_v61, %v4637_v60  ;;  %v4834_v53 = vld [vmem:[#allocation4 + $0x820] sm:$0xff]  ;;  %v4836_v59 = vld [vmem:[#allocation4 + $0x830] sm:$0xff]  ;;  %v4839_v60 = vld [vmem:[#allocation4 + $0x848] sm:$0xff] }
 0x4da   :  { %v4841_v61 = vld [vmem:[#allocation4 + $0x858] sm:$0xff] }
 0x4dc   :  { %8478 = vmatpush1.bf16.msra.mxu0 %v8477_v63  ;;  %v4643_v63 = vld [vmem:[#allocation4 + $0x778] sm:$0xff] }
 0x4dd   :  { %8480 = vmatprep.subr.bf16.mxu0 %v8479_v6  ;;  %v8513_v6 = vpack.c.bf16 %v4638_v2, %v4636_v1  ;;  %v8515_v51 = vpack.c.bf16 %v4643_v63, %v4641_v3  ;;  %v4838_v1 = vld [vmem:[#allocation4 + $0x840] sm:$0xff]  ;;  %v4840_v2 = vld [vmem:[#allocation4 + $0x850] sm:$0xff]  ;;  %v4843_v3 = vld [vmem:[#allocation4 + $0x868] sm:$0xff] }
 0x4de   :  { %v4845_v63 = vld [vmem:[#allocation4 + $0x878] sm:$0xff] }
 0x4df   :  { %v8547_v7 = vpack.c.bf16 %v4845_v63, %v4843_v3 }
 0x4e0   :  { %8482 = vmatpush1.bf16.msra.mxu0 %v8481_v18  ;;  %v4559_v18 = vld [vmem:[#allocation2 + $0x10] sm:$0xfc] }
 0x4e1   :  { %8484 = vmatprep.subr.bf16.mxu0 %v8483_v45  ;;  %v4562_v45 = vld [vmem:[#allocation2 + $0x28] sm:$0x3] }
 0x4e4   :  { %8486 = vmatpush1.bf16.msra.mxu0 %v8485_v16  ;;  %v4656_v16 = vrot.slane %v4559_v18, 2  ;;  %v4849_v18 = vld [vmem:[#allocation4 + $0x898] sm:$0xff] }
 0x4e5   :  { %8488 = vmatprep.subr.bf16.mxu0 %v8487_v23  ;;  %v4657_v23 = vrot.slane %v4562_v45, 2  ;;  %v8551_v10 = vpack.c.bf16 %v4849_v18, %v4847_v9  ;;  %v4883_v9 = vld [vmem:[#allocation4 + $0x9a8] sm:$0xff]  ;;  %v4885_v18 = vld [vmem:[#allocation4 + $0x9b8] sm:$0xff] }
 0x4e7   :  { %v4658_v32 = vsel %vm3114_vm2, %v4656_v16, %v4657_v23  ;;  %v4853_v16 = vld [vmem:[#allocation4 + $0x8b8] sm:$0xff] }
 0x4e8   :  { %8490 = vmatpush1.bf16.msra.mxu0 %v8489_v22  ;;  %v4904_v22 = vrot.slane %v4811_v8, 4  ;;  %v4848_v8 = vld [vmem:[#allocation4 + $0x890] sm:$0xff] }
 0x4e9   :  { %8492 = vmatprep.subr.bf16.mxu0 %v8491_v24  ;;  %v4819_v24 = vld [vmem:[#allocation4 + $0x7a8] sm:$0xff]  ;;  %v8553_v23 = vpack.c.bf16 %v4848_v8, %v4846_v12  ;;  %v8587_v12 = vpack.c.bf16 %v4885_v18, %v4883_v9  ;;  %v4882_v8 = vld [vmem:[#allocation4 + $0x9a0] sm:$0xff] }
 0x4ea   :  { %v8523_v28 = vpack.c.bf16 %v4821_v19, %v4819_v24  ;;  %v4905_v0 = vsel %vm295_vm0, %v4903_v20, %v4904_v22  ;;  %v4855_v20 = vld [vmem:[#allocation4 + $0x8c8] sm:$0xff]  ;;  %v4857_v22 = vld [vmem:[#allocation4 + $0x8d8] sm:$0xff]  ;;  %v8557_v24 = vpack.c.bf16 %v4852_v21, %v4850_v11  ;;  %v4886_v21 = vld [vmem:[#allocation4 + $0x9c0] sm:$0xff] }
 0x4eb   :  { %v8559_v19 = vpack.c.bf16 %v4857_v22, %v4855_v20  ;;  %v4888_v20 = vld [vmem:[#allocation4 + $0x9d0] sm:$0xff]  ;;  %v4891_v22 = vld [vmem:[#allocation4 + $0x9e8] sm:$0xff] }
 0x4ec   :  { %8494 = vmatpush1.bf16.msra.mxu0 %v8493_v30  ;;  %v4818_v30 = vld [vmem:[#allocation4 + $0x7a0] sm:$0xff] }
 0x4ed   :  { %8496 = vmatprep.subr.bf16.mxu0 %v8495_v31  ;;  %v4820_v31 = vld [vmem:[#allocation4 + $0x7b0] sm:$0xff] }
 0x4ee   :  { %v8525_v37 = vpack.c.bf16 %v4820_v31, %v4818_v30  ;;  %v4861_v30 = vld [vmem:[#allocation4 + $0x8f8] sm:$0xff] }
 0x4f0   :  { %8498 = vmatpush1.bf16.msra.mxu0 %v8497_v36  ;;  %v8527_v36 = vpack.c.bf16 %v4825_v17, %v4823_v4  ;;  %v4858_v4 = vld [vmem:[#allocation4 + $0x8e0] sm:$0xff]  ;;  %v4860_v17 = vld [vmem:[#allocation4 + $0x8f0] sm:$0xff] }
 0x4f1   :  { %8500 = vmatprep.subr.bf16.mxu0 %v8499_v13  ;;  %v4824_v13 = vld [vmem:[#allocation4 + $0x7d0] sm:$0xff] }
 0x4f2   :  { %v8529_v46 = vpack.c.bf16 %v4824_v13, %v4822_v38  ;;  %v8565_v38 = vpack.c.bf16 %v4860_v17, %v4858_v4 }
 0x4f4   :  { %8502 = vmatpush1.bf16.msra.mxu0 %v8501_v44  ;;  %v4828_v44 = vld [vmem:[#allocation4 + $0x7f0] sm:$0xff] }
 0x4f5   :  { %8504 = vmatprep.subr.bf16.mxu0 %v8503_v48  ;;  %v8533_v48 = vpack.c.bf16 %v4828_v44, %v4826_v54  ;;  %v8569_v54 = vpack.c.bf16 %v4864_v41, %v4862_v39 }
 0x4f7   :  { %4728 = vmatmul.mubr.f32.vlgmr.msra.gmra.mrb[8].mxu0 %v4652_v55  ;;  %v4837_v55 = vld [vmem:[#allocation4 + $0x838] sm:$0xff] }
 0x4f8   :  { %8506 = vmatpush1.bf16.msra.mxu0 %v8505_v56  ;;  %4798 = vmatprep.mubr.f32.mxu0 %v9613_v33  ;;  %v8537_v56 = vpack.c.bf16 %v4832_v50, %v4830_v34  ;;  %v8573_v34 = vpack.c.bf16 %v4868_v47, %v4866_v29 }
 0x4f9   :  { %8508 = vmatprep.subr.bf16.mxu0 %v8507_v57  ;;  %v8539_v57 = vpack.c.bf16 %v4837_v55, %v4835_v52  ;;  %v4870_v52 = vld [vmem:[#allocation4 + $0x940] sm:$0xff]  ;;  %v4872_v55 = vld [vmem:[#allocation4 + $0x950] sm:$0xff] }
 0x4fc   :  { %8510 = vmatpush1.bf16.msra.mxu0 %v8509_v62  ;;  %v8541_v62 = vpack.c.bf16 %v4836_v59, %v4834_v53  ;;  %v8577_v53 = vpack.c.bf16 %v4872_v55, %v4870_v52  ;;  %v4874_v59 = vld [vmem:[#allocation4 + $0x960] sm:$0xff] }
 0x4fd   :  { %8512 = vmatprep.subr.bf16.mxu0 %v8511_v58  ;;  %v8543_v58 = vpack.c.bf16 %v4841_v61, %v4839_v60  ;;  %v4876_v61 = vld [vmem:[#allocation4 + $0x970] sm:$0xff] }
 0x4fe   :  { %v8581_v3 = vpack.c.bf16 %v4876_v61, %v4874_v59 }
 0x500   :  { %8514 = vmatpush1.bf16.msra.mxu0 %v8513_v6  ;;  %v8545_v6 = vpack.c.bf16 %v4840_v2, %v4838_v1  ;;  %v4879_v1 = vld [vmem:[#allocation4 + $0x988] sm:$0xff]  ;;  %v4881_v2 = vld [vmem:[#allocation4 + $0x998] sm:$0xff] }
 0x501   :  { %8516 = vmatprep.subr.bf16.mxu0 %v8515_v51  ;;  %v4844_v51 = vld [vmem:[#allocation4 + $0x870] sm:$0xff] }
 0x502   :  { %v8549_v45 = vpack.c.bf16 %v4844_v51, %v4842_v27  ;;  %v4878_v27 = vld [vmem:[#allocation4 + $0x980] sm:$0xff]  ;;  %v4880_v51 = vld [vmem:[#allocation4 + $0x990] sm:$0xff] }
 0x504   :  { %8518 = vmatpush1.bf16.msra.mxu0 %v8517_v14  ;;  %v4851_v14 = vld [vmem:[#allocation4 + $0x8a8] sm:$0xff] }
 0x505   :  { %8520 = vmatprep.subr.bf16.mxu0 %v8519_v5  ;;  %v8555_v5 = vpack.c.bf16 %v4853_v16, %v4851_v14  ;;  %v4884_v14 = vld [vmem:[#allocation4 + $0x9b0] sm:$0xff]  ;;  %v4887_v16 = vld [vmem:[#allocation4 + $0x9c8] sm:$0xff] }
 0x507   :  { %6900 = vmatmul.mubr.msk.f32.vlgmr.msra.gmra.mrb[8].mxu0 %vm2090_vm3, %v4658_v32  ;;  %v4854_v32 = vld [vmem:[#allocation4 + $0x8c0] sm:$0xff] }
 0x508   :  { %8522 = vmatpush1.bf16.msra.mxu0 %v8521_v26  ;;  %4977 = vmatprep.mubr.f32.mxu0 %v4905_v0  ;;  %v4856_v26 = vld [vmem:[#allocation4 + $0x8d0] sm:$0xff] }
 0x509   :  { %8524 = vmatprep.subr.bf16.mxu0 %v8523_v28  ;;  %v4859_v28 = vld [vmem:[#allocation4 + $0x8e8] sm:$0xff]  ;;  %v8561_v31 = vpack.c.bf16 %v4856_v26, %v4854_v32  ;;  %v4890_v32 = vld [vmem:[#allocation4 + $0x9e0] sm:$0xff] }
 0x50a   :  { %v8563_v0 = vpack.c.bf16 %v4861_v30, %v4859_v28  ;;  %v4892_v28 = vld [vmem:[#allocation4 + $0x9f0] sm:$0xff] }
 0x50b   :  { %v4809_v30 = vld [vmem:[#allocation2 + $0x28] sm:$0xf0] }
 0x50c   :  { %8526 = vmatpush1.bf16.msra.mxu0 %v8525_v37  ;;  %v4863_v37 = vld [vmem:[#allocation4 + $0x908] sm:$0xff]  ;;  %v4906_v4 = vrot.slane %v4809_v30, 4 }
 0x50d   :  { %8528 = vmatprep.subr.bf16.mxu0 %v8527_v36  ;;  %v4865_v36 = vld [vmem:[#allocation4 + $0x918] sm:$0xff] }
 0x50e   :  { %v8567_v13 = vpack.c.bf16 %v4865_v36, %v4863_v37  ;;  %v5057_v37 = vld [vmem:[#allocation14] sm:$0x3]  ;;  %v9614_v36 = vmov 1966171168  }
 0x50f   :  { %v5066_v39 = vrot.slane %v5057_v37, %v10184_v40 }
 0x510   :  { %8530 = vmatpush1.bf16.msra.mxu0 %v8529_v46  ;;  %v4867_v46 = vld [vmem:[#allocation4 + $0x928] sm:$0xff] }
 0x511   :  { %8532 = vmatprep.subr.bf16.mxu0 %v8531_v43  ;;  %v4869_v43 = vld [vmem:[#allocation4 + $0x938] sm:$0xff] }
 0x512   :  { %v8571_v44 = vpack.c.bf16 %v4869_v43, %v4867_v46 }
 0x514   :  { %8534 = vmatpush1.bf16.msra.mxu0 %v8533_v48  ;;  %v4871_v48 = vld [vmem:[#allocation4 + $0x948] sm:$0xff] }
 0x515   :  { %8536 = vmatprep.subr.bf16.mxu0 %v8535_v49  ;;  %v4873_v49 = vld [vmem:[#allocation4 + $0x958] sm:$0xff] }
 0x516   :  { %v8575_v50 = vpack.c.bf16 %v4873_v49, %v4871_v48 }
 0x518   :  { %8538 = vmatpush1.bf16.msra.mxu0 %v8537_v56  ;;  %v4875_v56 = vld [vmem:[#allocation4 + $0x968] sm:$0xff] }
 0x519   :  { %8540 = vmatprep.subr.bf16.mxu0 %v8539_v57  ;;  %v4877_v57 = vld [vmem:[#allocation4 + $0x978] sm:$0xff] }
 0x51a   :  { %v8579_v60 = vpack.c.bf16 %v4877_v57, %v4875_v56 }
 0x51c   :  { %8542 = vmatpush1.bf16.msra.mxu0 %v8541_v62  ;;  %v4807_v62 = vld [vmem:[#allocation2 + $0x18] sm:$0xf0] }
 0x51d   :  { %8544 = vmatprep.subr.bf16.mxu0 %v8543_v58  ;;  %v4810_v58 = vld [vmem:[#allocation2 + $0x30] sm:$0xf]  ;;  %v4900_v63 = vrot.slane %v4807_v62, 4 }
 0x520   :  { %8546 = vmatpush1.bf16.msra.mxu0 %v8545_v6  ;;  %v4901_v6 = vrot.slane %v4810_v58, 4 }
 0x521   :  { %8548 = vmatprep.subr.bf16.mxu0 %v8547_v7  ;;  %v8583_v7 = vpack.c.bf16 %v4881_v2, %v4879_v1 }
 0x524   :  { %8550 = vmatpush1.bf16.msra.mxu0 %v8549_v45  ;;  %v4902_v45 = vsel %vm295_vm0, %v4900_v63, %v4901_v6 }
 0x525   :  { %8552 = vmatprep.subr.bf16.mxu0 %v8551_v10  ;;  %v8585_v10 = vpack.c.bf16 %v4880_v51, %v4878_v27 }
 0x528   :  { %8554 = vmatpush1.bf16.msra.mxu0 %v8553_v23  ;;  %v4889_v23 = vld [vmem:[#allocation4 + $0x9d8] sm:$0xff] }
 0x529   :  { %8556 = vmatprep.subr.bf16.mxu0 %v8555_v5  ;;  %v8589_v5 = vpack.c.bf16 %v4884_v14, %v4882_v8  ;;  %v8591_v11 = vpack.c.bf16 %v4889_v23, %v4887_v16 }
 0x52c   :  { %8558 = vmatpush1.bf16.msra.mxu0 %v8557_v24  ;;  %v4893_v24 = vld [vmem:[#allocation4 + $0x9f8] sm:$0xff] }
 0x52d   :  { %8560 = vmatprep.subr.bf16.mxu0 %v8559_v19  ;;  %v8593_v19 = vpack.c.bf16 %v4888_v20, %v4886_v21  ;;  %v8595_v26 = vpack.c.bf16 %v4893_v24, %v4891_v22 }
 0x530   :  { %8562 = vmatpush1.bf16.msra.mxu0 %v8561_v31  ;;  %v4812_v31 = vld [vmem:[#allocation2 + $0x40] sm:$0xf] }
 0x531   :  { %8564 = vmatprep.subr.bf16.mxu0 %v8563_v0  ;;  %v8597_v0 = vpack.c.bf16 %v4892_v28, %v4890_v32  ;;  %v4907_v17 = vrot.slane %v4812_v31, 4 }
 0x534   :  { %8566 = vmatpush1.bf16.msra.mxu0 %v8565_v38  ;;  %v5077_v38 = vunpack.c.l.s4 %v9614_v36 }
 0x535   :  { %8568 = vmatprep.subr.bf16.mxu0 %v8567_v13  ;;  %v5062_v13 = vrot.slane %v5057_v37, %v10181_v35 }
 0x536   :  { %v5078_v46 = vunpack.c.0.s8 %v5077_v38 }
 0x538   :  { %8570 = vmatpush1.bf16.msra.mxu0 %v8569_v54  ;;  %v5081_v48 = vsub.s32 %v5078_v46, %v10177_v25 }
 0x539   :  { %8572 = vmatprep.subr.bf16.mxu0 %v8571_v44 }
 0x53c   :  { %8574 = vmatpush1.bf16.msra.mxu0 %v8573_v34 }
 0x53d   :  { %8576 = vmatprep.subr.bf16.mxu0 %v8575_v50 }
 0x540   :  { %8578 = vmatpush1.bf16.msra.mxu0 %v8577_v53 }
 0x541   :  { %8580 = vmatprep.subr.bf16.mxu0 %v8579_v60 }
 0x544   :  { %8582 = vmatpush1.bf16.msra.mxu0 %v8581_v3 }
 0x545   :  { %8584 = vmatprep.subr.bf16.mxu0 %v8583_v7 }
 0x547   :  { %4978 = vmatmul.mubr.f32.vlgmr.msra.gmra.mrb[8].mxu0 %v4902_v45 }
 0x548   :  { %8586 = vmatpush1.bf16.msra.mxu0 %v8585_v10  ;;  %5048 = vmatprep.mubr.f32.mxu0 %v9613_v33  ;;  %v4908_v33 = vsel %vm295_vm0, %v4906_v4, %v4907_v17 }
 0x549   :  { %8588 = vmatprep.subr.bf16.mxu0 %v8587_v12 }
 0x54c   :  { %8590 = vmatpush1.bf16.msra.mxu0 %v8589_v5 }
 0x54d   :  { %8592 = vmatprep.subr.bf16.mxu0 %v8591_v11 }
 0x550   :  { %8594 = vmatpush1.bf16.msra.mxu0 %v8593_v19 }
 0x551   :  { %8596 = vmatprep.subr.bf16.mxu0 %v8595_v26 }
 0x554   :  { %8598 = vmatpush1.bf16.msra.mxu0 %v8597_v0 }
 0x557   :  { %6901 = vmatmul.mubr.msk.f32.vlgmr.msra.gmra.mrb[8].mxu0 %vm2090_vm3, %v4908_v33 }
 0x62a   :  { %v5050_v41 = vpop.f32.mrb[8].mxu0 }
 0x62b   :  { %v5069_v43 = vadd.f32 %v5062_v13, %v5050_v41  ;;  %v5052_v54 = vpop.f32.mrb[9].mxu0 }
 0x62c   :  { %v5070_v44 = vadd.f32 %v5066_v39, %v5052_v54 }
 0x62d   :  { %v5071_v29 = vmax.f32 %v5069_v43, 0.0 }
 0x62e   :  { %v5072_v47 = vmax.f32 %v5070_v44, 0.0 }
 0x630   :  { %v5075_v49 = vcombine.low %v5071_v29, %v5072_v47  ;;  %v5115_v34 = vcombine.high %v5071_v29, %v5072_v47 }
 0x632   :  { %v5082_v50 = vrot.slane %v5075_v49, %v5081_v48  ;;  %v5122_v52 = vrot.slane %v5115_v34, %v5081_v48 }
 0x634   :  { %v5089_v56 = vrot.slane %v5082_v50, %v5081_v48  ;;  %v5096_v57 = vcombine.high %v5082_v50, %v5082_v50  ;;  %v5129_v53 = vrot.slane %v5122_v52, %v5081_v48  ;;  %v5133_v59 = vcombine.high %v5122_v52, %v5122_v52 }
 0x636   :  { %5095 = vst.msk [vmem:[#allocation3] ss:$2 sm:$0x3] %vm10410_vm8, %v5089_v56  ;;  %v5103_v60 = vrot.slane %v5096_v57, %v5081_v48  ;;  %v5107_v61 = vcombine.high %v5089_v56, %v5089_v56  ;;  %5132 = vst.msk [vmem:[#allocation3 + $0x8] ss:$2 sm:$0x3] %vm10410_vm8, %v5129_v53  ;;  %v5140_v62 = vrot.slane %v5133_v59, %v5081_v48 }
 0x637   :  { %v5144_v58 = vcombine.high %v5129_v53, %v5129_v53 }
 0x638   :  { %5106 = vst.msk [vmem:[#allocation3 + $0x1] ss:$2 sm:$0x3] %vm10410_vm8, %v5103_v60  ;;  %5110 = vst.msk [vmem:[#allocation3 + $0x4] ss:$2 sm:$0x3] %vm10410_vm8, %v5107_v61  ;;  %v5111_v15 = vcombine.high %v5103_v60, %v5103_v60  ;;  %v5148_v1 = vcombine.high %v5140_v62, %v5140_v62 }
 0x639   :  { %5143 = vst.msk [vmem:[#allocation3 + $0x9] ss:$2 sm:$0x3] %vm10410_vm8, %v5140_v62  ;;  %5147 = vst.msk [vmem:[#allocation3 + $0xc] ss:$2 sm:$0x3] %vm10410_vm8, %v5144_v58 }
 0x63a   :  { %5114 = vst.msk [vmem:[#allocation3 + $0x5] ss:$2 sm:$0x3] %vm10410_vm8, %v5111_v15  ;;  %5151 = vst.msk [vmem:[#allocation3 + $0xd] ss:$2 sm:$0x3] %vm10410_vm8, %v5148_v1 }
 0x63b   :  { %9592 = dma.done.wait [#allocation8 + $0x1], 32768 }
 0x63c   :  { %9593 = vsyncadd [#allocation8 + $0x1], 4294934528  ;;  %v5159_v2 = vld [vmem:[#allocation5 + $0x8] sm:$0xff]  ;;  %v5161_v3 = vld [vmem:[#allocation5 + $0x18] sm:$0xff]  ;;  %v9615_v28 = vmov 1983009808  }
 0x63d   :  { %v5158_v63 = vld [vmem:[#allocation5] sm:$0xff]  ;;  %v8599_v6 = vpack.c.bf16 %v5161_v3, %v5159_v2  ;;  %v5160_v7 = vld [vmem:[#allocation5 + $0x10] sm:$0xff]  ;;  %v5163_v27 = vld [vmem:[#allocation5 + $0x28] sm:$0xff]  ;;  %v5430_v30 = vunpack.c.l.s4 %v9615_v28 }
 0x63e   :  { %v5165_v51 = vld [vmem:[#allocation5 + $0x38] sm:$0xff]  ;;  %v8601_v9 = vpack.c.bf16 %v5160_v7, %v5158_v63  ;;  %v5162_v45 = vld [vmem:[#allocation5 + $0x20] sm:$0xff]  ;;  %v5164_v10 = vld [vmem:[#allocation5 + $0x30] sm:$0xff] }
 0x63f   :  { %v8603_v18 = vpack.c.bf16 %v5165_v51, %v5163_v27  ;;  %v5167_v12 = vld [vmem:[#allocation5 + $0x48] sm:$0xff]  ;;  %8600 = vmatprep.subr.bf16.mxu1 %v8599_v6  ;;  %v5169_v8 = vld [vmem:[#allocation5 + $0x58] sm:$0xff]  ;;  %v8605_v14 = vpack.c.bf16 %v5164_v10, %v5162_v45  ;;  %v5166_v23 = vld [vmem:[#allocation5 + $0x40] sm:$0xff]  ;;  %v5431_v36 = vunpack.c.0.s8 %v5430_v30 }
 0x640   :  { %8602 = vmatpush1.bf16.msra.mxu1 %v8601_v9  ;;  %v8607_v16 = vpack.c.bf16 %v5169_v8, %v5167_v12  ;;  %v5168_v5 = vld [vmem:[#allocation5 + $0x50] sm:$0xff]  ;;  %v5171_v11 = vld [vmem:[#allocation5 + $0x68] sm:$0xff]  ;;  %v5173_v21 = vld [vmem:[#allocation5 + $0x78] sm:$0xff] }
 0x641   :  { %8604 = vmatprep.subr.bf16.mxu1 %v8603_v18  ;;  %v8609_v20 = vpack.c.bf16 %v5168_v5, %v5166_v23  ;;  %v8611_v22 = vpack.c.bf16 %v5173_v21, %v5171_v11  ;;  %v5170_v24 = vld [vmem:[#allocation5 + $0x60] sm:$0xff]  ;;  %v5172_v19 = vld [vmem:[#allocation5 + $0x70] sm:$0xff]  ;;  %v5175_v32 = vld [vmem:[#allocation5 + $0x88] sm:$0xff]  ;;  %v10431_v54 = vsub.s32 %v5431_v36, %v10177_v25 }
 0x642   :  { %v5177_v26 = vld [vmem:[#allocation5 + $0x98] sm:$0xff]  ;;  %v8613_v31 = vpack.c.bf16 %v5172_v19, %v5170_v24  ;;  %v5174_v4 = vld [vmem:[#allocation5 + $0x80] sm:$0xff]  ;;  %v5176_v17 = vld [vmem:[#allocation5 + $0x90] sm:$0xff] }
 0x643   :  { %v8615_v0 = vpack.c.bf16 %v5177_v26, %v5175_v32  ;;  %v5179_v33 = vld [vmem:[#allocation5 + $0xa8] sm:$0xff]  ;;  %v5181_v37 = vld [vmem:[#allocation5 + $0xb8] sm:$0xff]  ;;  %v8617_v38 = vpack.c.bf16 %v5176_v17, %v5174_v4  ;;  %v5178_v39 = vld [vmem:[#allocation5 + $0xa0] sm:$0xff] }
 0x644   :  { %8606 = vmatpush1.bf16.msra.mxu1 %v8605_v14  ;;  %v8619_v13 = vpack.c.bf16 %v5181_v37, %v5179_v33  ;;  %v5180_v41 = vld [vmem:[#allocation5 + $0xb0] sm:$0xff]  ;;  %v5183_v46 = vld [vmem:[#allocation5 + $0xc8] sm:$0xff]  ;;  %v5185_v43 = vld [vmem:[#allocation5 + $0xd8] sm:$0xff] }
 0x645   :  { %8608 = vmatprep.subr.bf16.mxu1 %v8607_v16  ;;  %v8621_v44 = vpack.c.bf16 %v5180_v41, %v5178_v39  ;;  %v8623_v29 = vpack.c.bf16 %v5185_v43, %v5183_v46  ;;  %v5182_v47 = vld [vmem:[#allocation5 + $0xc0] sm:$0xff]  ;;  %v5184_v48 = vld [vmem:[#allocation5 + $0xd0] sm:$0xff]  ;;  %v5187_v34 = vld [vmem:[#allocation5 + $0xe8] sm:$0xff] }
 0x646   :  { %v10433_v49 = vld [vmem:[#allocation3] sm:$0xff]  ;;  %v5189_v50 = vld [vmem:[#allocation5 + $0xf8] sm:$0xff]  ;;  %v8625_v55 = vpack.c.bf16 %v5184_v48, %v5182_v47  ;;  %v5186_v53 = vld [vmem:[#allocation5 + $0xe0] sm:$0xff] }
 0x647   :  { %v10437_v52 = vrot.slane %v10433_v49, %v10431_v54  ;;  %v8627_v57 = vpack.c.bf16 %v5189_v50, %v5187_v34  ;;  %v5188_v59 = vld [vmem:[#allocation5 + $0xf0] sm:$0xff]  ;;  %v5191_v60 = vld [vmem:[#allocation5 + $0x108] sm:$0xff]  ;;  %v5193_v61 = vld [vmem:[#allocation5 + $0x118] sm:$0xff]  ;;  %v5428_v43 = vcombine.high %v10433_v49, %v10433_v49 }
 0x648   :  { %8610 = vmatpush1.bf16.msra.mxu1 %v8609_v20  ;;  %v8629_v62 = vpack.c.bf16 %v5188_v59, %v5186_v53  ;;  %v8631_v58 = vpack.c.bf16 %v5193_v61, %v5191_v60  ;;  %v5190_v15 = vld [vmem:[#allocation5 + $0x100] sm:$0xff]  ;;  %v5192_v1 = vld [vmem:[#allocation5 + $0x110] sm:$0xff]  ;;  %v5195_v2 = vld [vmem:[#allocation5 + $0x128] sm:$0xff] }
 0x649   :  { %8612 = vmatprep.subr.bf16.mxu1 %v8611_v22  ;;  %v5443_v56 = vcombine.high %v10437_v52, %v10437_v52  ;;  %v5197_v3 = vld [vmem:[#allocation5 + $0x138] sm:$0xff]  ;;  %v8633_v63 = vpack.c.bf16 %v5192_v1, %v5190_v15  ;;  %v5194_v7 = vld [vmem:[#allocation5 + $0x120] sm:$0xff]  ;;  %v5196_v27 = vld [vmem:[#allocation5 + $0x130] sm:$0xff] }
 0x64a   :  { %v8635_v6 = vpack.c.bf16 %v5197_v3, %v5195_v2  ;;  %v5199_v51 = vld [vmem:[#allocation5 + $0x148] sm:$0xff]  ;;  %v5201_v9 = vld [vmem:[#allocation5 + $0x158] sm:$0xff]  ;;  %v8637_v18 = vpack.c.bf16 %v5196_v27, %v5194_v7  ;;  %v5198_v10 = vld [vmem:[#allocation5 + $0x140] sm:$0xff] }
 0x64b   :  { %5534 = vmatprep.mubr.f32.mxu1 %v5443_v56  ;;  %v8639_v45 = vpack.c.bf16 %v5201_v9, %v5199_v51  ;;  %v5200_v12 = vld [vmem:[#allocation5 + $0x150] sm:$0xff]  ;;  %v5203_v8 = vld [vmem:[#allocation5 + $0x168] sm:$0xff]  ;;  %v5205_v14 = vld [vmem:[#allocation5 + $0x178] sm:$0xff] }
 0x64c   :  { %8614 = vmatpush1.bf16.msra.mxu1 %v8613_v31  ;;  %v8641_v16 = vpack.c.bf16 %v5200_v12, %v5198_v10  ;;  %v8643_v23 = vpack.c.bf16 %v5205_v14, %v5203_v8  ;;  %v5202_v5 = vld [vmem:[#allocation5 + $0x160] sm:$0xff]  ;;  %v5204_v11 = vld [vmem:[#allocation5 + $0x170] sm:$0xff]  ;;  %v5207_v21 = vld [vmem:[#allocation5 + $0x188] sm:$0xff] }
 0x64d   :  { %8616 = vmatprep.subr.bf16.mxu1 %v8615_v0  ;;  %v5209_v20 = vld [vmem:[#allocation5 + $0x198] sm:$0xff]  ;;  %v8645_v22 = vpack.c.bf16 %v5204_v11, %v5202_v5  ;;  %v5206_v19 = vld [vmem:[#allocation5 + $0x180] sm:$0xff]  ;;  %v5208_v32 = vld [vmem:[#allocation5 + $0x190] sm:$0xff] }
 0x64e   :  { %v8647_v24 = vpack.c.bf16 %v5209_v20, %v5207_v21  ;;  %v5211_v26 = vld [vmem:[#allocation5 + $0x1a8] sm:$0xff]  ;;  %v5213_v28 = vld [vmem:[#allocation5 + $0x1b8] sm:$0xff]  ;;  %v8649_v30 = vpack.c.bf16 %v5208_v32, %v5206_v19  ;;  %v5210_v0 = vld [vmem:[#allocation5 + $0x1a0] sm:$0xff] }
 0x64f   :  { %v8651_v31 = vpack.c.bf16 %v5213_v28, %v5211_v26  ;;  %v5212_v4 = vld [vmem:[#allocation5 + $0x1b0] sm:$0xff]  ;;  %v5215_v17 = vld [vmem:[#allocation5 + $0x1c8] sm:$0xff]  ;;  %v5217_v33 = vld [vmem:[#allocation5 + $0x1d8] sm:$0xff] }
 0x650   :  { %8618 = vmatpush1.bf16.msra.mxu1 %v8617_v38  ;;  %v8653_v37 = vpack.c.bf16 %v5212_v4, %v5210_v0  ;;  %v8655_v36 = vpack.c.bf16 %v5217_v33, %v5215_v17  ;;  %v5214_v38 = vld [vmem:[#allocation5 + $0x1c0] sm:$0xff]  ;;  %v5219_v39 = vld [vmem:[#allocation5 + $0x1e8] sm:$0xff]  ;;  %v5221_v41 = vld [vmem:[#allocation5 + $0x1f8] sm:$0xff] }
 0x651   :  { %8620 = vmatprep.subr.bf16.mxu1 %v8619_v13  ;;  %v5216_v13 = vld [vmem:[#allocation5 + $0x1d0] sm:$0xff]  ;;  %v5223_v48 = vld [vmem:[#allocation5 + $0x208] sm:$0xff]  ;;  %v5225_v34 = vld [vmem:[#allocation5 + $0x218] sm:$0xff] }
 0x652   :  { %v8657_v46 = vpack.c.bf16 %v5216_v13, %v5214_v38  ;;  %v5220_v47 = vld [vmem:[#allocation5 + $0x1f0] sm:$0xff]  ;;  %v8663_v56 = vpack.c.bf16 %v5225_v34, %v5223_v48  ;;  %v5227_v59 = vld [vmem:[#allocation5 + $0x228] sm:$0xff]  ;;  %v5229_v60 = vld [vmem:[#allocation5 + $0x238] sm:$0xff] }
 0x653   :  { %v5224_v53 = vld [vmem:[#allocation5 + $0x210] sm:$0xff]  ;;  %v5231_v1 = vld [vmem:[#allocation5 + $0x248] sm:$0xff]  ;;  %v5233_v2 = vld [vmem:[#allocation5 + $0x258] sm:$0xff] }
 0x654   :  { %8622 = vmatpush1.bf16.msra.mxu1 %v8621_v44  ;;  %v8659_v44 = vpack.c.bf16 %v5221_v41, %v5219_v39  ;;  %v5228_v15 = vld [vmem:[#allocation5 + $0x230] sm:$0xff]  ;;  %v5235_v27 = vld [vmem:[#allocation5 + $0x268] sm:$0xff]  ;;  %v5237_v51 = vld [vmem:[#allocation5 + $0x278] sm:$0xff] }
 0x655   :  { %8624 = vmatprep.subr.bf16.mxu1 %v8623_v29  ;;  %v5218_v29 = vld [vmem:[#allocation5 + $0x1e0] sm:$0xff]  ;;  %v5232_v7 = vld [vmem:[#allocation5 + $0x250] sm:$0xff]  ;;  %v5239_v12 = vld [vmem:[#allocation5 + $0x288] sm:$0xff] }
 0x656   :  { %v8661_v50 = vpack.c.bf16 %v5220_v47, %v5218_v29  ;;  %v5236_v10 = vld [vmem:[#allocation5 + $0x270] sm:$0xff]  ;;  %v5241_v8 = vld [vmem:[#allocation5 + $0x298] sm:$0xff]  ;;  %v5243_v5 = vld [vmem:[#allocation5 + $0x2a8] sm:$0xff] }
 0x657   :  { %v5245_v11 = vld [vmem:[#allocation5 + $0x2b8] sm:$0xff]  ;;  %v5247_v19 = vld [vmem:[#allocation5 + $0x2c8] sm:$0xff]  ;;  %v5258_v34 = vld [vmem:[#allocation5 + $0x320] sm:$0xff] }
 0x658   :  { %8626 = vmatpush1.bf16.msra.mxu1 %v8625_v55  ;;  %v10444_v55 = vrot.slane %v5428_v43, %v10431_v54  ;;  %v8683_v20 = vpack.c.bf16 %v5245_v11, %v5243_v5  ;;  %v5249_v32 = vld [vmem:[#allocation5 + $0x2d8] sm:$0xff]  ;;  %v5251_v0 = vld [vmem:[#allocation5 + $0x2e8] sm:$0xff]  ;;  %v5256_v43 = vld [vmem:[#allocation5 + $0x310] sm:$0xff] }
 0x659   :  { %8628 = vmatprep.subr.bf16.mxu1 %v8627_v57  ;;  %v5222_v57 = vld [vmem:[#allocation5 + $0x200] sm:$0xff]  ;;  %v8687_v28 = vpack.c.bf16 %v5249_v32, %v5247_v19  ;;  %v5253_v4 = vld [vmem:[#allocation5 + $0x2f8] sm:$0xff]  ;;  %v5255_v38 = vld [vmem:[#allocation5 + $0x308] sm:$0xff] }
 0x65a   :  { %v8665_v61 = vpack.c.bf16 %v5224_v53, %v5222_v57  ;;  %v5444_v49 = vcombine.high %v10444_v55, %v10444_v55  ;;  %v8691_v33 = vpack.c.bf16 %v5253_v4, %v5251_v0  ;;  %v5257_v13 = vld [vmem:[#allocation5 + $0x318] sm:$0xff]  ;;  %v5278_v5 = vld [vmem:[#allocation5 + $0x3c0] sm:$0xff]  ;;  %v5280_v11 = vld [vmem:[#allocation5 + $0x3d0] sm:$0xff] }
 0x65b   :  { %v8695_v41 = vpack.c.bf16 %v5257_v13, %v5255_v38  ;;  %v5261_v29 = vld [vmem:[#allocation5 + $0x338] sm:$0xff]  ;;  %v5282_v19 = vld [vmem:[#allocation5 + $0x3e0] sm:$0xff]  ;;  %v5284_v32 = vld [vmem:[#allocation5 + $0x3f0] sm:$0xff] }
 0x65c   :  { %8630 = vmatpush1.bf16.msra.mxu1 %v8629_v62  ;;  %v8667_v62 = vpack.c.bf16 %v5229_v60, %v5227_v59  ;;  %v5265_v57 = vld [vmem:[#allocation5 + $0x358] sm:$0xff]  ;;  %v5262_v60 = vld [vmem:[#allocation5 + $0x340] sm:$0xff] }
 0x65d   :  { %8632 = vmatprep.subr.bf16.mxu1 %v8631_v58  ;;  %v5226_v58 = vld [vmem:[#allocation5 + $0x220] sm:$0xff] }
 0x65e   :  { %v8669_v3 = vpack.c.bf16 %v5228_v15, %v5226_v58 }
 0x660   :  { %8634 = vmatpush1.bf16.msra.mxu1 %v8633_v63  ;;  %v8671_v63 = vpack.c.bf16 %v5233_v2, %v5231_v1  ;;  %v5266_v1 = vld [vmem:[#allocation5 + $0x360] sm:$0xff]  ;;  %v5268_v2 = vld [vmem:[#allocation5 + $0x370] sm:$0xff] }
 0x661   :  { %8636 = vmatprep.subr.bf16.mxu1 %v8635_v6  ;;  %v5230_v6 = vld [vmem:[#allocation5 + $0x240] sm:$0xff] }
 0x662   :  { %v8673_v9 = vpack.c.bf16 %v5232_v7, %v5230_v6  ;;  %v8709_v6 = vpack.c.bf16 %v5268_v2, %v5266_v1  ;;  %v5307_v1 = vld [vmem:[#allocation5 + $0x4a8] sm:$0xff]  ;;  %v5309_v2 = vld [vmem:[#allocation5 + $0x4b8] sm:$0xff] }
 0x664   :  { %8638 = vmatpush1.bf16.msra.mxu1 %v8637_v18  ;;  %v8675_v18 = vpack.c.bf16 %v5237_v51, %v5235_v27  ;;  %v5270_v27 = vld [vmem:[#allocation5 + $0x380] sm:$0xff]  ;;  %v5272_v51 = vld [vmem:[#allocation5 + $0x390] sm:$0xff] }
 0x665   :  { %8640 = vmatprep.subr.bf16.mxu1 %v8639_v45  ;;  %v5234_v45 = vld [vmem:[#allocation5 + $0x260] sm:$0xff] }
 0x666   :  { %v8677_v14 = vpack.c.bf16 %v5236_v10, %v5234_v45  ;;  %v8713_v45 = vpack.c.bf16 %v5272_v51, %v5270_v27  ;;  %v5311_v27 = vld [vmem:[#allocation5 + $0x4c8] sm:$0xff]  ;;  %v5313_v51 = vld [vmem:[#allocation5 + $0x4d8] sm:$0xff] }
 0x668   :  { %8642 = vmatpush1.bf16.msra.mxu1 %v8641_v16  ;;  %v5238_v16 = vld [vmem:[#allocation5 + $0x280] sm:$0xff] }
 0x669   :  { %8644 = vmatprep.subr.bf16.mxu1 %v8643_v23  ;;  %v5240_v23 = vld [vmem:[#allocation5 + $0x290] sm:$0xff] }
 0x66a   :  { %v8681_v21 = vpack.c.bf16 %v5240_v23, %v5238_v16 }
 0x66c   :  { %8646 = vmatpush1.bf16.msra.mxu1 %v8645_v22  ;;  %v5242_v22 = vld [vmem:[#allocation5 + $0x2a0] sm:$0xff] }
 0x66d   :  { %8648 = vmatprep.subr.bf16.mxu1 %v8647_v24  ;;  %v5244_v24 = vld [vmem:[#allocation5 + $0x2b0] sm:$0xff] }
 0x66e   :  { %v8685_v26 = vpack.c.bf16 %v5244_v24, %v5242_v22  ;;  %v8721_v22 = vpack.c.bf16 %v5280_v11, %v5278_v5  ;;  %v5319_v5 = vld [vmem:[#allocation5 + $0x508] sm:$0xff]  ;;  %v5321_v11 = vld [vmem:[#allocation5 + $0x518] sm:$0xff] }
 0x670   :  { %8650 = vmatpush1.bf16.msra.mxu1 %v8649_v30  ;;  %v5246_v30 = vld [vmem:[#allocation5 + $0x2c0] sm:$0xff] }
 0x671   :  { %8652 = vmatprep.subr.bf16.mxu1 %v8651_v31  ;;  %v5248_v31 = vld [vmem:[#allocation5 + $0x2d0] sm:$0xff] }
 0x672   :  { %v8689_v17 = vpack.c.bf16 %v5248_v31, %v5246_v30  ;;  %v5289_v30 = vld [vmem:[#allocation5 + $0x418] sm:$0xff]  ;;  %v8725_v31 = vpack.c.bf16 %v5284_v32, %v5282_v19  ;;  %v5323_v19 = vld [vmem:[#allocation5 + $0x528] sm:$0xff] }
 0x673   :  { %v5325_v32 = vld [vmem:[#allocation5 + $0x538] sm:$0xff] }
 0x674   :  { %8654 = vmatpush1.bf16.msra.mxu1 %v8653_v37  ;;  %v5250_v37 = vld [vmem:[#allocation5 + $0x2e0] sm:$0xff] }
 0x675   :  { %8656 = vmatprep.subr.bf16.mxu1 %v8655_v36  ;;  %v5252_v36 = vld [vmem:[#allocation5 + $0x2f0] sm:$0xff] }
 0x676   :  { %v8693_v39 = vpack.c.bf16 %v5252_v36, %v5250_v37  ;;  %v5291_v37 = vld [vmem:[#allocation5 + $0x428] sm:$0xff]  ;;  %v5293_v36 = vld [vmem:[#allocation5 + $0x438] sm:$0xff] }
 0x678   :  { %8658 = vmatpush1.bf16.msra.mxu1 %v8657_v46  ;;  %v5254_v46 = vld [vmem:[#allocation5 + $0x300] sm:$0xff] }
 0x679   :  { %8660 = vmatprep.subr.bf16.mxu1 %v8659_v44  ;;  %v5259_v44 = vld [vmem:[#allocation5 + $0x328] sm:$0xff]  ;;  %v8697_v47 = vpack.c.bf16 %v5256_v43, %v5254_v46  ;;  %v5292_v46 = vld [vmem:[#allocation5 + $0x430] sm:$0xff] }
 0x67a   :  { %v8699_v48 = vpack.c.bf16 %v5261_v29, %v5259_v44  ;;  %v5295_v43 = vld [vmem:[#allocation5 + $0x448] sm:$0xff]  ;;  %v5297_v44 = vld [vmem:[#allocation5 + $0x458] sm:$0xff] }
 0x67c   :  { %8662 = vmatpush1.bf16.msra.mxu1 %v8661_v50  ;;  %v5260_v50 = vld [vmem:[#allocation5 + $0x330] sm:$0xff] }
 0x67d   :  { %8664 = vmatprep.subr.bf16.mxu1 %v8663_v56  ;;  %v5263_v56 = vld [vmem:[#allocation5 + $0x348] sm:$0xff]  ;;  %v8701_v53 = vpack.c.bf16 %v5260_v50, %v5258_v34  ;;  %v5296_v34 = vld [vmem:[#allocation5 + $0x450] sm:$0xff] }
 0x67e   :  { %v8703_v59 = vpack.c.bf16 %v5265_v57, %v5263_v56  ;;  %v5299_v50 = vld [vmem:[#allocation5 + $0x468] sm:$0xff]  ;;  %v5301_v56 = vld [vmem:[#allocation5 + $0x478] sm:$0xff] }
 0x67f   :  { %5535 = vmatmul.mubr.f32.vlgmr.msra.gmra.mrb[64].mxu1 %v10437_v52  ;;  %v8679_v52 = vpack.c.bf16 %v5241_v8, %v5239_v12  ;;  %v5274_v12 = vld [vmem:[#allocation5 + $0x3a0] sm:$0xff]  ;;  %v5276_v8 = vld [vmem:[#allocation5 + $0x3b0] sm:$0xff] }
 0x680   :  { %8666 = vmatpush1.bf16.msra.mxu1 %v8665_v61  ;;  %5605 = vmatprep.mubr.f32.mxu1 %v5444_v49  ;;  %v5264_v61 = vld [vmem:[#allocation5 + $0x350] sm:$0xff]  ;;  %v5267_v49 = vld [vmem:[#allocation5 + $0x368] sm:$0xff]  ;;  %v8717_v16 = vpack.c.bf16 %v5276_v8, %v5274_v12  ;;  %v5317_v8 = vld [vmem:[#allocation5 + $0x4f8] sm:$0xff] }
 0x681   :  { %8668 = vmatprep.subr.bf16.mxu1 %v8667_v62  ;;  %v5269_v62 = vld [vmem:[#allocation5 + $0x378] sm:$0xff]  ;;  %v8705_v58 = vpack.c.bf16 %v5264_v61, %v5262_v60  ;;  %v5300_v60 = vld [vmem:[#allocation5 + $0x470] sm:$0xff]  ;;  %v5303_v61 = vld [vmem:[#allocation5 + $0x488] sm:$0xff] }
 0x682   :  { %v8707_v15 = vpack.c.bf16 %v5269_v62, %v5267_v49  ;;  %v5305_v49 = vld [vmem:[#allocation5 + $0x498] sm:$0xff]  ;;  %v5315_v12 = vld [vmem:[#allocation5 + $0x4e8] sm:$0xff] }
 0x684   :  { %8670 = vmatpush1.bf16.msra.mxu1 %v8669_v3  ;;  %v5271_v3 = vld [vmem:[#allocation5 + $0x388] sm:$0xff] }
 0x685   :  { %8672 = vmatprep.subr.bf16.mxu1 %v8671_v63  ;;  %v5273_v63 = vld [vmem:[#allocation5 + $0x398] sm:$0xff] }
 0x686   :  { %v8711_v7 = vpack.c.bf16 %v5273_v63, %v5271_v3  ;;  %v8747_v63 = vpack.c.bf16 %v5309_v2, %v5307_v1  ;;  %v5342_v2 = vld [vmem:[#allocation5 + $0x5c0] sm:$0xff] }
 0x688   :  { %8674 = vmatpush1.bf16.msra.mxu1 %v8673_v9  ;;  %v5275_v9 = vld [vmem:[#allocation5 + $0x3a8] sm:$0xff] }
 0x689   :  { %8676 = vmatprep.subr.bf16.mxu1 %v8675_v18  ;;  %v5277_v18 = vld [vmem:[#allocation5 + $0x3b8] sm:$0xff] }
 0x68a   :  { %v8715_v10 = vpack.c.bf16 %v5277_v18, %v5275_v9  ;;  %v8751_v18 = vpack.c.bf16 %v5313_v51, %v5311_v27 }
 0x68c   :  { %8678 = vmatpush1.bf16.msra.mxu1 %v8677_v14  ;;  %v5279_v14 = vld [vmem:[#allocation5 + $0x3c8] sm:$0xff] }
 0x68d   :  { %8680 = vmatprep.subr.bf16.mxu1 %v8679_v52  ;;  %v5281_v52 = vld [vmem:[#allocation5 + $0x3d8] sm:$0xff] }
 0x68e   :  { %v8719_v23 = vpack.c.bf16 %v5281_v52, %v5279_v14  ;;  %v8755_v52 = vpack.c.bf16 %v5317_v8, %v5315_v12 }
 0x690   :  { %8682 = vmatpush1.bf16.msra.mxu1 %v8681_v21  ;;  %v5283_v21 = vld [vmem:[#allocation5 + $0x3e8] sm:$0xff] }
 0x691   :  { %8684 = vmatprep.subr.bf16.mxu1 %v8683_v20  ;;  %v5285_v20 = vld [vmem:[#allocation5 + $0x3f8] sm:$0xff] }
 0x692   :  { %v8723_v24 = vpack.c.bf16 %v5285_v20, %v5283_v21  ;;  %v8759_v20 = vpack.c.bf16 %v5321_v11, %v5319_v5  ;;  %v5357_v5 = vld [vmem:[#allocation5 + $0x638] sm:$0xff] }
 0x694   :  { %8686 = vmatpush1.bf16.msra.mxu1 %v8685_v26  ;;  %v10449_v26 = vld [vmem:[#allocation3 + $0x8] sm:$0xff] }
 0x695   :  { %8688 = vmatprep.subr.bf16.mxu1 %v8687_v28  ;;  %v5287_v28 = vld [vmem:[#allocation5 + $0x408] sm:$0xff]  ;;  %v10453_v0 = vrot.slane %v10449_v26, %v10431_v54  ;;  %v5445_v27 = vcombine.high %v10449_v26, %v10449_v26 }
 0x696   :  { %v8727_v4 = vpack.c.bf16 %v5289_v30, %v5287_v28  ;;  %v8763_v30 = vpack.c.bf16 %v5325_v32, %v5323_v19  ;;  %v5361_v19 = vld [vmem:[#allocation5 + $0x658] sm:$0xff] }
 0x697   :  { %v5460_v13 = vcombine.high %v10453_v0, %v10453_v0  ;;  %v10461_v8 = vrot.slane %v5445_v27, %v10431_v54  ;;  %v5387_v27 = vld [vmem:[#allocation5 + $0x728] sm:$0xff] }
 0x698   :  { %8690 = vmatpush1.bf16.msra.mxu1 %v8689_v17  ;;  %v5286_v17 = vld [vmem:[#allocation5 + $0x400] sm:$0xff] }
 0x699   :  { %8692 = vmatprep.subr.bf16.mxu1 %v8691_v33  ;;  %v5288_v33 = vld [vmem:[#allocation5 + $0x410] sm:$0xff]  ;;  %v5461_v26 = vcombine.high %v10461_v8, %v10461_v8 }
 0x69a   :  { %v8729_v38 = vpack.c.bf16 %v5288_v33, %v5286_v17  ;;  %v5327_v17 = vld [vmem:[#allocation5 + $0x548] sm:$0xff]  ;;  %v5329_v33 = vld [vmem:[#allocation5 + $0x558] sm:$0xff] }
 0x69c   :  { %8694 = vmatpush1.bf16.msra.mxu1 %v8693_v39  ;;  %v8731_v39 = vpack.c.bf16 %v5293_v36, %v5291_v37  ;;  %v8767_v36 = vpack.c.bf16 %v5329_v33, %v5327_v17 }
 0x69d   :  { %8696 = vmatprep.subr.bf16.mxu1 %v8695_v41  ;;  %v5290_v41 = vld [vmem:[#allocation5 + $0x420] sm:$0xff] }
 0x69e   :  { %v8733_v29 = vpack.c.bf16 %v5292_v46, %v5290_v41  ;;  %v5333_v41 = vld [vmem:[#allocation5 + $0x578] sm:$0xff] }
 0x6a0   :  { %8698 = vmatpush1.bf16.msra.mxu1 %v8697_v47  ;;  %v8735_v47 = vpack.c.bf16 %v5297_v44, %v5295_v43  ;;  %v5330_v44 = vld [vmem:[#allocation5 + $0x560] sm:$0xff] }
 0x6a1   :  { %8700 = vmatprep.subr.bf16.mxu1 %v8699_v48  ;;  %v5294_v48 = vld [vmem:[#allocation5 + $0x440] sm:$0xff] }
 0x6a2   :  { %v8737_v57 = vpack.c.bf16 %v5296_v34, %v5294_v48  ;;  %v5337_v48 = vld [vmem:[#allocation5 + $0x598] sm:$0xff] }
 0x6a4   :  { %8702 = vmatpush1.bf16.msra.mxu1 %v8701_v53  ;;  %v8739_v53 = vpack.c.bf16 %v5301_v56, %v5299_v50  ;;  %v5334_v56 = vld [vmem:[#allocation5 + $0x580] sm:$0xff] }
 0x6a5   :  { %8704 = vmatprep.subr.bf16.mxu1 %v8703_v59  ;;  %v5298_v59 = vld [vmem:[#allocation5 + $0x460] sm:$0xff] }
 0x6a6   :  { %v8741_v62 = vpack.c.bf16 %v5300_v60, %v5298_v59  ;;  %v5341_v59 = vld [vmem:[#allocation5 + $0x5b8] sm:$0xff] }
 0x6a8   :  { %8706 = vmatpush1.bf16.msra.mxu1 %v8705_v58  ;;  %v5302_v58 = vld [vmem:[#allocation5 + $0x480] sm:$0xff] }
 0x6a9   :  { %8708 = vmatprep.subr.bf16.mxu1 %v8707_v15  ;;  %v5304_v15 = vld [vmem:[#allocation5 + $0x490] sm:$0xff] }
 0x6aa   :  { %v8745_v3 = vpack.c.bf16 %v5304_v15, %v5302_v58  ;;  %v5345_v58 = vld [vmem:[#allocation5 + $0x5d8] sm:$0xff] }
 0x6ac   :  { %8710 = vmatpush1.bf16.msra.mxu1 %v8709_v6  ;;  %v5306_v6 = vld [vmem:[#allocation5 + $0x4a0] sm:$0xff] }
 0x6ad   :  { %8712 = vmatprep.subr.bf16.mxu1 %v8711_v7  ;;  %v5308_v7 = vld [vmem:[#allocation5 + $0x4b0] sm:$0xff] }
 0x6ae   :  { %v8749_v9 = vpack.c.bf16 %v5308_v7, %v5306_v6  ;;  %v5349_v6 = vld [vmem:[#allocation5 + $0x5f8] sm:$0xff] }
 0x6b0   :  { %8714 = vmatpush1.bf16.msra.mxu1 %v8713_v45  ;;  %v5310_v45 = vld [vmem:[#allocation5 + $0x4c0] sm:$0xff] }
 0x6b1   :  { %8716 = vmatprep.subr.bf16.mxu1 %v8715_v10  ;;  %v5312_v10 = vld [vmem:[#allocation5 + $0x4d0] sm:$0xff] }
 0x6b2   :  { %v8753_v14 = vpack.c.bf16 %v5312_v10, %v5310_v45  ;;  %v5351_v45 = vld [vmem:[#allocation5 + $0x608] sm:$0xff]  ;;  %v5353_v10 = vld [vmem:[#allocation5 + $0x618] sm:$0xff] }
 0x6b4   :  { %8718 = vmatpush1.bf16.msra.mxu1 %v8717_v16  ;;  %v5314_v16 = vld [vmem:[#allocation5 + $0x4e0] sm:$0xff] }
 0x6b5   :  { %8720 = vmatprep.subr.bf16.mxu1 %v8719_v23  ;;  %v5316_v23 = vld [vmem:[#allocation5 + $0x4f0] sm:$0xff] }
 0x6b6   :  { %v8757_v21 = vpack.c.bf16 %v5316_v23, %v5314_v16  ;;  %v5352_v16 = vld [vmem:[#allocation5 + $0x610] sm:$0xff]  ;;  %v5355_v23 = vld [vmem:[#allocation5 + $0x628] sm:$0xff] }
 0x6b8   :  { %8722 = vmatpush1.bf16.msra.mxu1 %v8721_v22  ;;  %v5318_v22 = vld [vmem:[#allocation5 + $0x500] sm:$0xff] }
 0x6b9   :  { %8724 = vmatprep.subr.bf16.mxu1 %v8723_v24  ;;  %v5320_v24 = vld [vmem:[#allocation5 + $0x510] sm:$0xff] }
 0x6ba   :  { %v8761_v28 = vpack.c.bf16 %v5320_v24, %v5318_v22  ;;  %v5356_v22 = vld [vmem:[#allocation5 + $0x630] sm:$0xff]  ;;  %v5359_v24 = vld [vmem:[#allocation5 + $0x648] sm:$0xff] }
 0x6bb   :  { %v8799_v32 = vpack.c.bf16 %v5361_v19, %v5359_v24  ;;  %v5396_v24 = vld [vmem:[#allocation5 + $0x770] sm:$0xff]  ;;  %v5399_v19 = vld [vmem:[#allocation5 + $0x788] sm:$0xff] }
 0x6bc   :  { %8726 = vmatpush1.bf16.msra.mxu1 %v8725_v31  ;;  %v5322_v31 = vld [vmem:[#allocation5 + $0x520] sm:$0xff] }
 0x6bd   :  { %8728 = vmatprep.subr.bf16.mxu1 %v8727_v4  ;;  %v5324_v4 = vld [vmem:[#allocation5 + $0x530] sm:$0xff] }
 0x6be   :  { %v8765_v37 = vpack.c.bf16 %v5324_v4, %v5322_v31  ;;  %v5363_v31 = vld [vmem:[#allocation5 + $0x668] sm:$0xff]  ;;  %v5365_v4 = vld [vmem:[#allocation5 + $0x678] sm:$0xff] }
 0x6bf   :  { %5606 = vmatmul.mubr.f32.vlgmr.msra.gmra.mrb[64].mxu1 %v10444_v55  ;;  %v8743_v55 = vpack.c.bf16 %v5305_v49, %v5303_v61  ;;  %v5338_v49 = vld [vmem:[#allocation5 + $0x5a0] sm:$0xff]  ;;  %v8803_v33 = vpack.c.bf16 %v5365_v4, %v5363_v31  ;;  %v5400_v31 = vld [vmem:[#allocation5 + $0x790] sm:$0xff]  ;;  %v5403_v4 = vld [vmem:[#allocation5 + $0x7a8] sm:$0xff] }
 0x6c0   :  { %8730 = vmatpush1.bf16.msra.mxu1 %v8729_v38  ;;  %5676 = vmatprep.mubr.f32.mxu1 %v5460_v13  ;;  %v5326_v38 = vld [vmem:[#allocation5 + $0x540] sm:$0xff]  ;;  %v5328_v13 = vld [vmem:[#allocation5 + $0x550] sm:$0xff] }
 0x6c1   :  { %8732 = vmatprep.subr.bf16.mxu1 %v8731_v39  ;;  %v5331_v39 = vld [vmem:[#allocation5 + $0x568] sm:$0xff]  ;;  %v8769_v46 = vpack.c.bf16 %v5328_v13, %v5326_v38  ;;  %v5369_v13 = vld [vmem:[#allocation5 + $0x698] sm:$0xff] }
 0x6c2   :  { %v8771_v43 = vpack.c.bf16 %v5333_v41, %v5331_v39  ;;  %v5367_v38 = vld [vmem:[#allocation5 + $0x688] sm:$0xff]  ;;  %v5366_v41 = vld [vmem:[#allocation5 + $0x680] sm:$0xff] }
 0x6c4   :  { %8734 = vmatpush1.bf16.msra.mxu1 %v8733_v29  ;;  %v5332_v29 = vld [vmem:[#allocation5 + $0x570] sm:$0xff] }
 0x6c5   :  { %8736 = vmatprep.subr.bf16.mxu1 %v8735_v47  ;;  %v5335_v47 = vld [vmem:[#allocation5 + $0x588] sm:$0xff]  ;;  %v8773_v34 = vpack.c.bf16 %v5332_v29, %v5330_v44  ;;  %v5373_v44 = vld [vmem:[#allocation5 + $0x6b8] sm:$0xff] }
 0x6c6   :  { %v8775_v50 = vpack.c.bf16 %v5337_v48, %v5335_v47  ;;  %v5370_v48 = vld [vmem:[#allocation5 + $0x6a0] sm:$0xff] }
 0x6c8   :  { %8738 = vmatpush1.bf16.msra.mxu1 %v8737_v57  ;;  %v5336_v57 = vld [vmem:[#allocation5 + $0x590] sm:$0xff] }
 0x6c9   :  { %8740 = vmatprep.subr.bf16.mxu1 %v8739_v53  ;;  %v5339_v53 = vld [vmem:[#allocation5 + $0x5a8] sm:$0xff]  ;;  %v8777_v60 = vpack.c.bf16 %v5336_v57, %v5334_v56  ;;  %v5377_v56 = vld [vmem:[#allocation5 + $0x6d8] sm:$0xff] }
 0x6ca   :  { %v8779_v61 = vpack.c.bf16 %v5341_v59, %v5339_v53  ;;  %v5374_v59 = vld [vmem:[#allocation5 + $0x6c0] sm:$0xff] }
 0x6cc   :  { %8742 = vmatpush1.bf16.msra.mxu1 %v8741_v62  ;;  %v5340_v62 = vld [vmem:[#allocation5 + $0x5b0] sm:$0xff] }
 0x6cd   :  { %8744 = vmatprep.subr.bf16.mxu1 %v8743_v55  ;;  %v5343_v55 = vld [vmem:[#allocation5 + $0x5c8] sm:$0xff]  ;;  %v8781_v15 = vpack.c.bf16 %v5340_v62, %v5338_v49  ;;  %v5381_v49 = vld [vmem:[#allocation5 + $0x6f8] sm:$0xff] }
 0x6ce   :  { %v8783_v1 = vpack.c.bf16 %v5345_v58, %v5343_v55  ;;  %v5378_v58 = vld [vmem:[#allocation5 + $0x6e0] sm:$0xff] }
 0x6d0   :  { %8746 = vmatpush1.bf16.msra.mxu1 %v8745_v3  ;;  %v5344_v3 = vld [vmem:[#allocation5 + $0x5d0] sm:$0xff] }
 0x6d1   :  { %8748 = vmatprep.subr.bf16.mxu1 %v8747_v63  ;;  %v5347_v63 = vld [vmem:[#allocation5 + $0x5e8] sm:$0xff]  ;;  %v8785_v7 = vpack.c.bf16 %v5344_v3, %v5342_v2  ;;  %v5385_v2 = vld [vmem:[#allocation5 + $0x718] sm:$0xff] }
 0x6d2   :  { %v8787_v51 = vpack.c.bf16 %v5349_v6, %v5347_v63  ;;  %v5382_v6 = vld [vmem:[#allocation5 + $0x700] sm:$0xff] }
 0x6d4   :  { %8750 = vmatpush1.bf16.msra.mxu1 %v8749_v9  ;;  %v5346_v9 = vld [vmem:[#allocation5 + $0x5e0] sm:$0xff] }
 0x6d5   :  { %8752 = vmatprep.subr.bf16.mxu1 %v8751_v18  ;;  %v5348_v18 = vld [vmem:[#allocation5 + $0x5f0] sm:$0xff] }
 0x6d6   :  { %v8789_v12 = vpack.c.bf16 %v5348_v18, %v5346_v9 }
 0x6d8   :  { %8754 = vmatpush1.bf16.msra.mxu1 %v8753_v14  ;;  %v8791_v14 = vpack.c.bf16 %v5353_v10, %v5351_v45  ;;  %v5386_v45 = vld [vmem:[#allocation5 + $0x720] sm:$0xff]  ;;  %v5388_v10 = vld [vmem:[#allocation5 + $0x730] sm:$0xff] }
 0x6d9   :  { %8756 = vmatprep.subr.bf16.mxu1 %v8755_v52  ;;  %v5350_v52 = vld [vmem:[#allocation5 + $0x600] sm:$0xff] }
 0x6da   :  { %v8793_v11 = vpack.c.bf16 %v5352_v16, %v5350_v52  ;;  %v8829_v52 = vpack.c.bf16 %v5388_v10, %v5386_v45 }
 0x6dc   :  { %8758 = vmatpush1.bf16.msra.mxu1 %v8757_v21  ;;  %v8795_v21 = vpack.c.bf16 %v5357_v5, %v5355_v23  ;;  %v5390_v23 = vld [vmem:[#allocation5 + $0x740] sm:$0xff]  ;;  %v5392_v5 = vld [vmem:[#allocation5 + $0x750] sm:$0xff] }
 0x6dd   :  { %8760 = vmatprep.subr.bf16.mxu1 %v8759_v20  ;;  %v5354_v20 = vld [vmem:[#allocation5 + $0x620] sm:$0xff] }
 0x6de   :  { %v8797_v54 = vpack.c.bf16 %v5356_v22, %v5354_v20  ;;  %v5394_v22 = vld [vmem:[#allocation5 + $0x760] sm:$0xff] }
 0x6e0   :  { %8762 = vmatpush1.bf16.msra.mxu1 %v8761_v28  ;;  %v5358_v28 = vld [vmem:[#allocation5 + $0x640] sm:$0xff] }
 0x6e1   :  { %8764 = vmatprep.subr.bf16.mxu1 %v8763_v30  ;;  %v5360_v30 = vld [vmem:[#allocation5 + $0x650] sm:$0xff] }
 0x6e2   :  { %v8801_v17 = vpack.c.bf16 %v5360_v30, %v5358_v28  ;;  %v5398_v30 = vld [vmem:[#allocation5 + $0x780] sm:$0xff] }
 0x6e4   :  { %8766 = vmatpush1.bf16.msra.mxu1 %v8765_v37  ;;  %v5362_v37 = vld [vmem:[#allocation5 + $0x660] sm:$0xff] }
 0x6e5   :  { %8768 = vmatprep.subr.bf16.mxu1 %v8767_v36  ;;  %v5364_v36 = vld [vmem:[#allocation5 + $0x670] sm:$0xff] }
 0x6e6   :  { %v8805_v39 = vpack.c.bf16 %v5364_v36, %v5362_v37  ;;  %v5402_v36 = vld [vmem:[#allocation5 + $0x7a0] sm:$0xff] }
 0x6e8   :  { %8770 = vmatpush1.bf16.msra.mxu1 %v8769_v46  ;;  %v5368_v46 = vld [vmem:[#allocation5 + $0x690] sm:$0xff] }
 0x6e9   :  { %8772 = vmatprep.subr.bf16.mxu1 %v8771_v43  ;;  %v5371_v43 = vld [vmem:[#allocation5 + $0x6a8] sm:$0xff]  ;;  %v8809_v29 = vpack.c.bf16 %v5368_v46, %v5366_v41  ;;  %v5406_v46 = vld [vmem:[#allocation5 + $0x7c0] sm:$0xff] }
 0x6ea   :  { %v8811_v47 = vpack.c.bf16 %v5373_v44, %v5371_v43  ;;  %v5408_v43 = vld [vmem:[#allocation5 + $0x7d0] sm:$0xff]  ;;  %v5411_v44 = vld [vmem:[#allocation5 + $0x7e8] sm:$0xff] }
 0x6ec   :  { %8774 = vmatpush1.bf16.msra.mxu1 %v8773_v34  ;;  %v5372_v34 = vld [vmem:[#allocation5 + $0x6b0] sm:$0xff] }
 0x6ed   :  { %8776 = vmatprep.subr.bf16.mxu1 %v8775_v50  ;;  %v5375_v50 = vld [vmem:[#allocation5 + $0x6c8] sm:$0xff]  ;;  %v8813_v57 = vpack.c.bf16 %v5372_v34, %v5370_v48  ;;  %v5410_v34 = vld [vmem:[#allocation5 + $0x7e0] sm:$0xff] }
 0x6ee   :  { %v8815_v53 = vpack.c.bf16 %v5377_v56, %v5375_v50  ;;  %v5412_v50 = vld [vmem:[#allocation5 + $0x7f0] sm:$0xff] }
 0x6ef   :  { %v8853_v56 = vpack.c.bf16 %v5412_v50, %v5410_v34 }
 0x6f0   :  { %8778 = vmatpush1.bf16.msra.mxu1 %v8777_v60  ;;  %v5376_v60 = vld [vmem:[#allocation5 + $0x6d0] sm:$0xff] }
 0x6f1   :  { %8780 = vmatprep.subr.bf16.mxu1 %v8779_v61  ;;  %v5379_v61 = vld [vmem:[#allocation5 + $0x6e8] sm:$0xff]  ;;  %v8817_v62 = vpack.c.bf16 %v5376_v60, %v5374_v59 }
 0x6f2   :  { %v8819_v55 = vpack.c.bf16 %v5381_v49, %v5379_v61 }
 0x6f4   :  { %8782 = vmatpush1.bf16.msra.mxu1 %v8781_v15  ;;  %v5380_v15 = vld [vmem:[#allocation5 + $0x6f0] sm:$0xff] }
 0x6f5   :  { %8784 = vmatprep.subr.bf16.mxu1 %v8783_v1  ;;  %v5383_v1 = vld [vmem:[#allocation5 + $0x708] sm:$0xff]  ;;  %v8821_v3 = vpack.c.bf16 %v5380_v15, %v5378_v58 }
 0x6f6   :  { %v8823_v63 = vpack.c.bf16 %v5385_v2, %v5383_v1 }
 0x6f8   :  { %8786 = vmatpush1.bf16.msra.mxu1 %v8785_v7  ;;  %v5384_v7 = vld [vmem:[#allocation5 + $0x710] sm:$0xff] }
 0x6f9   :  { %8788 = vmatprep.subr.bf16.mxu1 %v8787_v51  ;;  %v5389_v51 = vld [vmem:[#allocation5 + $0x738] sm:$0xff]  ;;  %v8825_v9 = vpack.c.bf16 %v5384_v7, %v5382_v6 }
 0x6fa   :  { %v8827_v18 = vpack.c.bf16 %v5389_v51, %v5387_v27 }
 0x6fc   :  { %8790 = vmatpush1.bf16.msra.mxu1 %v8789_v12  ;;  %v5391_v12 = vld [vmem:[#allocation5 + $0x748] sm:$0xff] }
 0x6fd   :  { %8792 = vmatprep.subr.bf16.mxu1 %v8791_v14  ;;  %v5393_v14 = vld [vmem:[#allocation5 + $0x758] sm:$0xff] }
 0x6fe   :  { %v8831_v16 = vpack.c.bf16 %v5393_v14, %v5391_v12 }
 0x6ff   :  { %5677 = vmatmul.mubr.f32.vlgmr.msra.gmra.mrb[64].mxu1 %v10453_v0  ;;  %v8807_v0 = vpack.c.bf16 %v5369_v13, %v5367_v38  ;;  %v5404_v38 = vld [vmem:[#allocation5 + $0x7b0] sm:$0xff]  ;;  %v5407_v13 = vld [vmem:[#allocation5 + $0x7c8] sm:$0xff] }
 0x700   :  { %8794 = vmatpush1.bf16.msra.mxu1 %v8793_v11  ;;  %5747 = vmatprep.mubr.f32.mxu1 %v5461_v26  ;;  %v5395_v11 = vld [vmem:[#allocation5 + $0x768] sm:$0xff]  ;;  %v5397_v26 = vld [vmem:[#allocation5 + $0x778] sm:$0xff] }
 0x701   :  { %8796 = vmatprep.subr.bf16.mxu1 %v8795_v21  ;;  %v8833_v21 = vpack.c.bf16 %v5392_v5, %v5390_v23  ;;  %v8835_v20 = vpack.c.bf16 %v5397_v26, %v5395_v11 }
 0x704   :  { %8798 = vmatpush1.bf16.msra.mxu1 %v8797_v54  ;;  %v5401_v54 = vld [vmem:[#allocation5 + $0x798] sm:$0xff] }
 0x705   :  { %8800 = vmatprep.subr.bf16.mxu1 %v8799_v32  ;;  %v8837_v32 = vpack.c.bf16 %v5396_v24, %v5394_v22  ;;  %v8839_v28 = vpack.c.bf16 %v5401_v54, %v5399_v19 }
 0x708   :  { %8802 = vmatpush1.bf16.msra.mxu1 %v8801_v17  ;;  %v5405_v17 = vld [vmem:[#allocation5 + $0x7b8] sm:$0xff] }
 0x709   :  { %8804 = vmatprep.subr.bf16.mxu1 %v8803_v33  ;;  %v8841_v33 = vpack.c.bf16 %v5400_v31, %v5398_v30  ;;  %v8843_v37 = vpack.c.bf16 %v5405_v17, %v5403_v4 }
 0x70c   :  { %8806 = vmatpush1.bf16.msra.mxu1 %v8805_v39  ;;  %v5409_v39 = vld [vmem:[#allocation5 + $0x7d8] sm:$0xff] }
 0x70d   :  { %8808 = vmatprep.subr.bf16.mxu1 %v8807_v0  ;;  %v8845_v0 = vpack.c.bf16 %v5404_v38, %v5402_v36  ;;  %v8847_v41 = vpack.c.bf16 %v5409_v39, %v5407_v13 }
 0x710   :  { %8810 = vmatpush1.bf16.msra.mxu1 %v8809_v29  ;;  %v5413_v29 = vld [vmem:[#allocation5 + $0x7f8] sm:$0xff] }
 0x711   :  { %8812 = vmatprep.subr.bf16.mxu1 %v8811_v47  ;;  %v8849_v47 = vpack.c.bf16 %v5408_v43, %v5406_v46  ;;  %v8851_v48 = vpack.c.bf16 %v5413_v29, %v5411_v44 }
 0x714   :  { %8814 = vmatpush1.bf16.msra.mxu1 %v8813_v57  ;;  %v5414_v57 = vld [vmem:[#allocation15] sm:$0x3] }
 0x715   :  { %8816 = vmatprep.subr.bf16.mxu1 %v8815_v53  ;;  %v5419_v53 = vrot.slane %v5414_v57, %v10181_v35  ;;  %v5423_v59 = vrot.slane %v5414_v57, %v10184_v40 }
 0x718   :  { %8818 = vmatpush1.bf16.msra.mxu1 %v8817_v62 }
 0x719   :  { %8820 = vmatprep.subr.bf16.mxu1 %v8819_v55 }
 0x71c   :  { %8822 = vmatpush1.bf16.msra.mxu1 %v8821_v3 }
 0x71d   :  { %8824 = vmatprep.subr.bf16.mxu1 %v8823_v63 }
 0x720   :  { %8826 = vmatpush1.bf16.msra.mxu1 %v8825_v9 }
 0x721   :  { %8828 = vmatprep.subr.bf16.mxu1 %v8827_v18 }
 0x724   :  { %8830 = vmatpush1.bf16.msra.mxu1 %v8829_v52 }
 0x725   :  { %8832 = vmatprep.subr.bf16.mxu1 %v8831_v16 }
 0x728   :  { %8834 = vmatpush1.bf16.msra.mxu1 %v8833_v21 }
 0x729   :  { %8836 = vmatprep.subr.bf16.mxu1 %v8835_v20 }
 0x72c   :  { %8838 = vmatpush1.bf16.msra.mxu1 %v8837_v32 }
 0x72d   :  { %8840 = vmatprep.subr.bf16.mxu1 %v8839_v28 }
 0x730   :  { %8842 = vmatpush1.bf16.msra.mxu1 %v8841_v33 }
 0x731   :  { %8844 = vmatprep.subr.bf16.mxu1 %v8843_v37 }
 0x734   :  { %8846 = vmatpush1.bf16.msra.mxu1 %v8845_v0 }
 0x735   :  { %8848 = vmatprep.subr.bf16.mxu1 %v8847_v41 }
 0x738   :  { %8850 = vmatpush1.bf16.msra.mxu1 %v8849_v47 }
 0x739   :  { %8852 = vmatprep.subr.bf16.mxu1 %v8851_v48 }
 0x73c   :  { %8854 = vmatpush1.bf16.msra.mxu1 %v8853_v56 }
 0x73f   :  { %5748 = vmatmul.mubr.f32.vlgmr.msra.gmra.mrb[64].mxu1 %v10461_v8 }
 0x812   :  { %v5749_v60 = vpop.f32.mrb[64].mxu1 }
 0x813   :  { %v9239_v61 = vadd.f32 %v5749_v60, %v5419_v53  ;;  %v5751_v49 = vpop.f32.mrb[65].mxu1 }
 0x814   :  { %v9240_v62 = vadd.f32 %v5751_v49, %v5423_v59 }
 0x815   :  { %v10469_v55 = vmax.f32 %v9239_v61, 0.0 }
 0x816   :  { %v10471_v58 = vmax.f32 %v9240_v62, 0.0 }
 0x817   :  { %9594 = dma.done.wait [#allocation8 + $0x2], 32768 }
 0x818   :  { %9595 = vsyncadd [#allocation8 + $0x2], 4294934528  ;;  %6122 = vmatprep.mubr.f32.mxu1 %v10471_v58  ;;  %6193 = vmatprep.mubr.f32.mxu0 %v10471_v58  ;;  %v5761_v8 = vld [vmem:[#allocation6 + $0x8] sm:$0xff]  ;;  %v5763_v1 = vld [vmem:[#allocation6 + $0x18] sm:$0xff] }
 0x819   :  { %v5769_v15 = vld [vmem:[#allocation6 + $0x48] sm:$0xff]  ;;  %v5771_v3 = vld [vmem:[#allocation6 + $0x58] sm:$0xff]  ;;  %v5760_v63 = vld [vmem:[#allocation6] sm:$0xff] }
 0x81a   :  { %v8855_v2 = vpack.c.bf16 %v5769_v15, %v5761_v8  ;;  %v5768_v6 = vld [vmem:[#allocation6 + $0x40] sm:$0xff]  ;;  %v8919_v7 = vpack.c.bf16 %v5771_v3, %v5763_v1  ;;  %v5762_v51 = vld [vmem:[#allocation6 + $0x10] sm:$0xff]  ;;  %v5777_v18 = vld [vmem:[#allocation6 + $0x88] sm:$0xff] }
 0x81b   :  { %v8857_v27 = vpack.c.bf16 %v5768_v6, %v5760_v63  ;;  %v5770_v9 = vld [vmem:[#allocation6 + $0x50] sm:$0xff]  ;;  %v5785_v10 = vld [vmem:[#allocation6 + $0xc8] sm:$0xff]  ;;  %v5779_v12 = vld [vmem:[#allocation6 + $0x98] sm:$0xff] }
 0x81c   :  { %8856 = vmatprep.subr.bf16.mxu1 %v8855_v2  ;;  %v8921_v45 = vpack.c.bf16 %v5770_v9, %v5762_v51  ;;  %v5787_v14 = vld [vmem:[#allocation6 + $0xd8] sm:$0xff]  ;;  %8920 = vmatprep.subr.bf16.mxu0 %v8919_v7  ;;  %v8859_v52 = vpack.c.bf16 %v5785_v10, %v5777_v18  ;;  %v5776_v23 = vld [vmem:[#allocation6 + $0x80] sm:$0xff]  ;;  %v5778_v11 = vld [vmem:[#allocation6 + $0x90] sm:$0xff] }
 0x81d   :  { %8858 = vmatpush1.bf16.msra.mxu1 %v8857_v27  ;;  %v8923_v16 = vpack.c.bf16 %v5787_v14, %v5779_v12  ;;  %v5784_v5 = vld [vmem:[#allocation6 + $0xc0] sm:$0xff]  ;;  %v5786_v21 = vld [vmem:[#allocation6 + $0xd0] sm:$0xff]  ;;  %v5793_v20 = vld [vmem:[#allocation6 + $0x108] sm:$0xff] }
 0x81e   :  { %8922 = vmatpush1.bf16.msra.mxu0 %v8921_v45  ;;  %v8861_v26 = vpack.c.bf16 %v5784_v5, %v5776_v23  ;;  %v5801_v22 = vld [vmem:[#allocation6 + $0x148] sm:$0xff]  ;;  %8860 = vmatprep.subr.bf16.mxu1 %v8859_v52  ;;  %v8925_v24 = vpack.c.bf16 %v5786_v21, %v5778_v11  ;;  %v5795_v54 = vld [vmem:[#allocation6 + $0x118] sm:$0xff]  ;;  %v5792_v28 = vld [vmem:[#allocation6 + $0x100] sm:$0xff] }
 0x81f   :  { %8924 = vmatprep.subr.bf16.mxu0 %v8923_v16  ;;  %v8863_v19 = vpack.c.bf16 %v5801_v22, %v5793_v20  ;;  %v5803_v32 = vld [vmem:[#allocation6 + $0x158] sm:$0xff]  ;;  %v5800_v31 = vld [vmem:[#allocation6 + $0x140] sm:$0xff]  ;;  %v5794_v4 = vld [vmem:[#allocation6 + $0x110] sm:$0xff] }
 0x820   :  { %v8927_v30 = vpack.c.bf16 %v5803_v32, %v5795_v54  ;;  %v5802_v17 = vld [vmem:[#allocation6 + $0x150] sm:$0xff]  ;;  %v8865_v33 = vpack.c.bf16 %v5800_v31, %v5792_v28  ;;  %v5809_v37 = vld [vmem:[#allocation6 + $0x188] sm:$0xff]  ;;  %v5811_v38 = vld [vmem:[#allocation6 + $0x198] sm:$0xff] }
 0x821   :  { %8862 = vmatpush1.bf16.msra.mxu1 %v8861_v26  ;;  %v5817_v36 = vld [vmem:[#allocation6 + $0x1c8] sm:$0xff]  ;;  %v8929_v13 = vpack.c.bf16 %v5802_v17, %v5794_v4  ;;  %v5819_v0 = vld [vmem:[#allocation6 + $0x1d8] sm:$0xff]  ;;  %v5808_v41 = vld [vmem:[#allocation6 + $0x180] sm:$0xff] }
 0x822   :  { %8926 = vmatpush1.bf16.msra.mxu0 %v8925_v24  ;;  %8864 = vmatprep.subr.bf16.mxu1 %v8863_v19  ;;  %v8867_v39 = vpack.c.bf16 %v5817_v36, %v5809_v37  ;;  %v5816_v46 = vld [vmem:[#allocation6 + $0x1c0] sm:$0xff]  ;;  %v8931_v43 = vpack.c.bf16 %v5819_v0, %v5811_v38  ;;  %v5810_v44 = vld [vmem:[#allocation6 + $0x190] sm:$0xff]  ;;  %v5825_v47 = vld [vmem:[#allocation6 + $0x208] sm:$0xff] }
 0x823   :  { %8928 = vmatprep.subr.bf16.mxu0 %v8927_v30  ;;  %v5818_v29 = vld [vmem:[#allocation6 + $0x1d0] sm:$0xff]  ;;  %v5833_v48 = vld [vmem:[#allocation6 + $0x248] sm:$0xff]  ;;  %v5827_v34 = vld [vmem:[#allocation6 + $0x218] sm:$0xff]  ;;  %v8869_v56 = vpack.c.bf16 %v5816_v46, %v5808_v41 }
 0x824   :  { %v5835_v50 = vld [vmem:[#allocation6 + $0x258] sm:$0xff]  ;;  %v8933_v57 = vpack.c.bf16 %v5818_v29, %v5810_v44  ;;  %v8871_v53 = vpack.c.bf16 %v5833_v48, %v5825_v47  ;;  %v5824_v59 = vld [vmem:[#allocation6 + $0x200] sm:$0xff]  ;;  %v5826_v61 = vld [vmem:[#allocation6 + $0x210] sm:$0xff] }
 0x825   :  { %8866 = vmatpush1.bf16.msra.mxu1 %v8865_v33  ;;  %v5832_v60 = vld [vmem:[#allocation6 + $0x240] sm:$0xff]  ;;  %v8935_v49 = vpack.c.bf16 %v5835_v50, %v5827_v34  ;;  %v5834_v62 = vld [vmem:[#allocation6 + $0x250] sm:$0xff]  ;;  %v5841_v8 = vld [vmem:[#allocation6 + $0x288] sm:$0xff] }
 0x826   :  { %8930 = vmatpush1.bf16.msra.mxu0 %v8929_v13  ;;  %8868 = vmatprep.subr.bf16.mxu1 %v8867_v39  ;;  %v5849_v15 = vld [vmem:[#allocation6 + $0x2c8] sm:$0xff]  ;;  %v5843_v1 = vld [vmem:[#allocation6 + $0x298] sm:$0xff]  ;;  %v8873_v3 = vpack.c.bf16 %v5832_v60, %v5824_v59  ;;  %v8937_v63 = vpack.c.bf16 %v5834_v62, %v5826_v61  ;;  %v5840_v7 = vld [vmem:[#allocation6 + $0x280] sm:$0xff] }
 0x827   :  { %8932 = vmatprep.subr.bf16.mxu0 %v8931_v43  ;;  %v5851_v2 = vld [vmem:[#allocation6 + $0x2d8] sm:$0xff]  ;;  %v8875_v6 = vpack.c.bf16 %v5849_v15, %v5841_v8  ;;  %v5848_v27 = vld [vmem:[#allocation6 + $0x2c0] sm:$0xff]  ;;  %v5842_v51 = vld [vmem:[#allocation6 + $0x290] sm:$0xff] }
 0x828   :  { %v8939_v9 = vpack.c.bf16 %v5851_v2, %v5843_v1  ;;  %v5850_v18 = vld [vmem:[#allocation6 + $0x2d0] sm:$0xff]  ;;  %v5857_v45 = vld [vmem:[#allocation6 + $0x308] sm:$0xff]  ;;  %v5859_v12 = vld [vmem:[#allocation6 + $0x318] sm:$0xff]  ;;  %v8877_v52 = vpack.c.bf16 %v5848_v27, %v5840_v7 }
 0x829   :  { %8870 = vmatpush1.bf16.msra.mxu1 %v8869_v56  ;;  %v5865_v10 = vld [vmem:[#allocation6 + $0x348] sm:$0xff]  ;;  %v5867_v14 = vld [vmem:[#allocation6 + $0x358] sm:$0xff]  ;;  %v8941_v16 = vpack.c.bf16 %v5850_v18, %v5842_v51  ;;  %v5856_v5 = vld [vmem:[#allocation6 + $0x300] sm:$0xff] }
 0x82a   :  { %8934 = vmatpush1.bf16.msra.mxu0 %v8933_v57  ;;  %8872 = vmatprep.subr.bf16.mxu1 %v8871_v53  ;;  %v8879_v23 = vpack.c.bf16 %v5865_v10, %v5857_v45  ;;  %v5864_v11 = vld [vmem:[#allocation6 + $0x340] sm:$0xff]  ;;  %v5858_v26 = vld [vmem:[#allocation6 + $0x310] sm:$0xff]  ;;  %v8943_v21 = vpack.c.bf16 %v5867_v14, %v5859_v12  ;;  %v5873_v22 = vld [vmem:[#allocation6 + $0x388] sm:$0xff] }
 0x82b   :  { %8936 = vmatprep.subr.bf16.mxu0 %v8935_v49  ;;  %v5866_v20 = vld [vmem:[#allocation6 + $0x350] sm:$0xff]  ;;  %v5881_v24 = vld [vmem:[#allocation6 + $0x3c8] sm:$0xff]  ;;  %v5875_v19 = vld [vmem:[#allocation6 + $0x398] sm:$0xff]  ;;  %v8881_v32 = vpack.c.bf16 %v5864_v11, %v5856_v5 }
 0x82c   :  { %v5883_v54 = vld [vmem:[#allocation6 + $0x3d8] sm:$0xff]  ;;  %v8945_v28 = vpack.c.bf16 %v5866_v20, %v5858_v26  ;;  %v8883_v30 = vpack.c.bf16 %v5881_v24, %v5873_v22  ;;  %v5872_v31 = vld [vmem:[#allocation6 + $0x380] sm:$0xff]  ;;  %v5874_v17 = vld [vmem:[#allocation6 + $0x390] sm:$0xff] }
 0x82d   :  { %8874 = vmatpush1.bf16.msra.mxu1 %v8873_v3  ;;  %v5880_v4 = vld [vmem:[#allocation6 + $0x3c0] sm:$0xff]  ;;  %v8947_v33 = vpack.c.bf16 %v5883_v54, %v5875_v19  ;;  %v5882_v37 = vld [vmem:[#allocation6 + $0x3d0] sm:$0xff]  ;;  %v5889_v36 = vld [vmem:[#allocation6 + $0x408] sm:$0xff] }
 0x82e   :  { %8938 = vmatpush1.bf16.msra.mxu0 %v8937_v63  ;;  %8876 = vmatprep.subr.bf16.mxu1 %v8875_v6  ;;  %v5897_v38 = vld [vmem:[#allocation6 + $0x448] sm:$0xff]  ;;  %v5891_v13 = vld [vmem:[#allocation6 + $0x418] sm:$0xff]  ;;  %v8885_v0 = vpack.c.bf16 %v5880_v4, %v5872_v31  ;;  %v8949_v41 = vpack.c.bf16 %v5882_v37, %v5874_v17  ;;  %v5888_v43 = vld [vmem:[#allocation6 + $0x400] sm:$0xff] }
 0x82f   :  { %8940 = vmatprep.subr.bf16.mxu0 %v8939_v9  ;;  %v5899_v39 = vld [vmem:[#allocation6 + $0x458] sm:$0xff]  ;;  %v8887_v46 = vpack.c.bf16 %v5897_v38, %v5889_v36  ;;  %v5896_v44 = vld [vmem:[#allocation6 + $0x440] sm:$0xff]  ;;  %v5890_v29 = vld [vmem:[#allocation6 + $0x410] sm:$0xff] }
 0x830   :  { %v8951_v47 = vpack.c.bf16 %v5899_v39, %v5891_v13  ;;  %v5898_v48 = vld [vmem:[#allocation6 + $0x450] sm:$0xff]  ;;  %v5905_v34 = vld [vmem:[#allocation6 + $0x488] sm:$0xff]  ;;  %v5907_v56 = vld [vmem:[#allocation6 + $0x498] sm:$0xff]  ;;  %v8889_v53 = vpack.c.bf16 %v5896_v44, %v5888_v43 }
 0x831   :  { %8878 = vmatpush1.bf16.msra.mxu1 %v8877_v52  ;;  %v5913_v50 = vld [vmem:[#allocation6 + $0x4c8] sm:$0xff]  ;;  %v5915_v57 = vld [vmem:[#allocation6 + $0x4d8] sm:$0xff]  ;;  %v8953_v59 = vpack.c.bf16 %v5898_v48, %v5890_v29  ;;  %v5904_v61 = vld [vmem:[#allocation6 + $0x480] sm:$0xff] }
 0x832   :  { %8942 = vmatpush1.bf16.msra.mxu0 %v8941_v16  ;;  %8880 = vmatprep.subr.bf16.mxu1 %v8879_v23  ;;  %v8891_v60 = vpack.c.bf16 %v5913_v50, %v5905_v34  ;;  %v5912_v49 = vld [vmem:[#allocation6 + $0x4c0] sm:$0xff]  ;;  %v5906_v62 = vld [vmem:[#allocation6 + $0x490] sm:$0xff]  ;;  %v8955_v8 = vpack.c.bf16 %v5915_v57, %v5907_v56  ;;  %v5921_v1 = vld [vmem:[#allocation6 + $0x508] sm:$0xff] }
 0x833   :  { %8944 = vmatprep.subr.bf16.mxu0 %v8943_v21  ;;  %v5914_v15 = vld [vmem:[#allocation6 + $0x4d0] sm:$0xff]  ;;  %v5929_v2 = vld [vmem:[#allocation6 + $0x548] sm:$0xff]  ;;  %v5923_v3 = vld [vmem:[#allocation6 + $0x518] sm:$0xff]  ;;  %v8893_v6 = vpack.c.bf16 %v5912_v49, %v5904_v61 }
 0x834   :  { %v5931_v63 = vld [vmem:[#allocation6 + $0x558] sm:$0xff]  ;;  %v8957_v7 = vpack.c.bf16 %v5914_v15, %v5906_v62  ;;  %v8895_v27 = vpack.c.bf16 %v5929_v2, %v5921_v1  ;;  %v5920_v51 = vld [vmem:[#allocation6 + $0x500] sm:$0xff]  ;;  %v5922_v18 = vld [vmem:[#allocation6 + $0x510] sm:$0xff] }
 0x835   :  { %8882 = vmatpush1.bf16.msra.mxu1 %v8881_v32  ;;  %v5928_v9 = vld [vmem:[#allocation6 + $0x540] sm:$0xff]  ;;  %v8959_v45 = vpack.c.bf16 %v5931_v63, %v5923_v3  ;;  %v5930_v10 = vld [vmem:[#allocation6 + $0x550] sm:$0xff]  ;;  %v5937_v12 = vld [vmem:[#allocation6 + $0x588] sm:$0xff] }
 0x836   :  { %8946 = vmatpush1.bf16.msra.mxu0 %v8945_v28  ;;  %8884 = vmatprep.subr.bf16.mxu1 %v8883_v30  ;;  %v5945_v14 = vld [vmem:[#allocation6 + $0x5c8] sm:$0xff]  ;;  %v5939_v52 = vld [vmem:[#allocation6 + $0x598] sm:$0xff]  ;;  %v8897_v23 = vpack.c.bf16 %v5928_v9, %v5920_v51  ;;  %v8961_v5 = vpack.c.bf16 %v5930_v10, %v5922_v18  ;;  %v5936_v26 = vld [vmem:[#allocation6 + $0x580] sm:$0xff] }
 0x837   :  { %8948 = vmatprep.subr.bf16.mxu0 %v8947_v33  ;;  %v5947_v16 = vld [vmem:[#allocation6 + $0x5d8] sm:$0xff]  ;;  %v8899_v11 = vpack.c.bf16 %v5945_v14, %v5937_v12  ;;  %v5944_v21 = vld [vmem:[#allocation6 + $0x5c0] sm:$0xff]  ;;  %v5938_v20 = vld [vmem:[#allocation6 + $0x590] sm:$0xff] }
 0x838   :  { %v8963_v22 = vpack.c.bf16 %v5947_v16, %v5939_v52  ;;  %v5946_v24 = vld [vmem:[#allocation6 + $0x5d0] sm:$0xff]  ;;  %v5953_v19 = vld [vmem:[#allocation6 + $0x608] sm:$0xff]  ;;  %v5955_v32 = vld [vmem:[#allocation6 + $0x618] sm:$0xff]  ;;  %v8901_v30 = vpack.c.bf16 %v5944_v21, %v5936_v26 }
 0x839   :  { %8886 = vmatpush1.bf16.msra.mxu1 %v8885_v0  ;;  %v5961_v54 = vld [vmem:[#allocation6 + $0x648] sm:$0xff]  ;;  %v5963_v28 = vld [vmem:[#allocation6 + $0x658] sm:$0xff]  ;;  %v8965_v31 = vpack.c.bf16 %v5946_v24, %v5938_v20  ;;  %v5952_v17 = vld [vmem:[#allocation6 + $0x600] sm:$0xff] }
 0x83a   :  { %8950 = vmatpush1.bf16.msra.mxu0 %v8949_v41  ;;  %8888 = vmatprep.subr.bf16.mxu1 %v8887_v46  ;;  %v8903_v4 = vpack.c.bf16 %v5961_v54, %v5953_v19  ;;  %v5960_v33 = vld [vmem:[#allocation6 + $0x640] sm:$0xff]  ;;  %v5954_v37 = vld [vmem:[#allocation6 + $0x610] sm:$0xff]  ;;  %v8967_v36 = vpack.c.bf16 %v5963_v28, %v5955_v32  ;;  %v5969_v13 = vld [vmem:[#allocation6 + $0x688] sm:$0xff] }
 0x83b   :  { %8952 = vmatprep.subr.bf16.mxu0 %v8951_v47  ;;  %v5962_v38 = vld [vmem:[#allocation6 + $0x650] sm:$0xff]  ;;  %v5977_v39 = vld [vmem:[#allocation6 + $0x6c8] sm:$0xff]  ;;  %v5971_v0 = vld [vmem:[#allocation6 + $0x698] sm:$0xff]  ;;  %v8905_v46 = vpack.c.bf16 %v5960_v33, %v5952_v17 }
 0x83c   :  { %v5979_v41 = vld [vmem:[#allocation6 + $0x6d8] sm:$0xff]  ;;  %v8969_v43 = vpack.c.bf16 %v5962_v38, %v5954_v37  ;;  %v8907_v44 = vpack.c.bf16 %v5977_v39, %v5969_v13  ;;  %v5968_v29 = vld [vmem:[#allocation6 + $0x680] sm:$0xff]  ;;  %v5970_v48 = vld [vmem:[#allocation6 + $0x690] sm:$0xff] }
 0x83d   :  { %8890 = vmatpush1.bf16.msra.mxu1 %v8889_v53  ;;  %v5976_v47 = vld [vmem:[#allocation6 + $0x6c0] sm:$0xff]  ;;  %v8971_v34 = vpack.c.bf16 %v5979_v41, %v5971_v0  ;;  %v5978_v50 = vld [vmem:[#allocation6 + $0x6d0] sm:$0xff]  ;;  %v5985_v56 = vld [vmem:[#allocation6 + $0x708] sm:$0xff] }
 0x83e   :  { %8954 = vmatpush1.bf16.msra.mxu0 %v8953_v59  ;;  %8892 = vmatprep.subr.bf16.mxu1 %v8891_v60  ;;  %v5993_v57 = vld [vmem:[#allocation6 + $0x748] sm:$0xff]  ;;  %v5987_v53 = vld [vmem:[#allocation6 + $0x718] sm:$0xff]  ;;  %v8909_v60 = vpack.c.bf16 %v5976_v47, %v5968_v29  ;;  %v8973_v61 = vpack.c.bf16 %v5978_v50, %v5970_v48  ;;  %v5984_v62 = vld [vmem:[#allocation6 + $0x700] sm:$0xff] }
 0x83f   :  { %8956 = vmatprep.subr.bf16.mxu0 %v8955_v8  ;;  %v5995_v59 = vld [vmem:[#allocation6 + $0x758] sm:$0xff]  ;;  %v8911_v49 = vpack.c.bf16 %v5993_v57, %v5985_v56  ;;  %v5992_v8 = vld [vmem:[#allocation6 + $0x740] sm:$0xff]  ;;  %v5986_v15 = vld [vmem:[#allocation6 + $0x710] sm:$0xff] }
 0x840   :  { %v8975_v1 = vpack.c.bf16 %v5995_v59, %v5987_v53  ;;  %v5994_v2 = vld [vmem:[#allocation6 + $0x750] sm:$0xff]  ;;  %v6001_v3 = vld [vmem:[#allocation6 + $0x788] sm:$0xff]  ;;  %v6000_v18 = vld [vmem:[#allocation6 + $0x780] sm:$0xff] }
 0x841   :  { %8894 = vmatpush1.bf16.msra.mxu1 %v8893_v6  ;;  %v6009_v63 = vld [vmem:[#allocation6 + $0x7c8] sm:$0xff]  ;;  %v6003_v6 = vld [vmem:[#allocation6 + $0x798] sm:$0xff]  ;;  %v8977_v51 = vpack.c.bf16 %v5994_v2, %v5986_v15  ;;  %v6002_v10 = vld [vmem:[#allocation6 + $0x790] sm:$0xff] }
 0x842   :  { %8958 = vmatpush1.bf16.msra.mxu0 %v8957_v7  ;;  %8896 = vmatprep.subr.bf16.mxu1 %v8895_v27  ;;  %v6011_v7 = vld [vmem:[#allocation6 + $0x7d8] sm:$0xff]  ;;  %v8913_v27 = vpack.c.bf16 %v5992_v8, %v5984_v62  ;;  %v8915_v9 = vpack.c.bf16 %v6009_v63, %v6001_v3  ;;  %v6010_v14 = vld [vmem:[#allocation6 + $0x7d0] sm:$0xff]  ;;  %v5765_v52 = vld [vmem:[#allocation6 + $0x28] sm:$0xff] }
 0x843   :  { %8960 = vmatprep.subr.bf16.mxu0 %v8959_v45  ;;  %v6008_v45 = vld [vmem:[#allocation6 + $0x7c0] sm:$0xff]  ;;  %v8979_v12 = vpack.c.bf16 %v6011_v7, %v6003_v6  ;;  %v5773_v16 = vld [vmem:[#allocation6 + $0x68] sm:$0xff]  ;;  %v8981_v26 = vpack.c.bf16 %v6010_v14, %v6002_v10  ;;  %v5766_v24 = vld [vmem:[#allocation6 + $0x30] sm:$0xff] }
 0x844   :  { %v8983_v21 = vpack.c.bf16 %v5773_v16, %v5765_v52  ;;  %v5764_v20 = vld [vmem:[#allocation6 + $0x20] sm:$0xff]  ;;  %v5774_v54 = vld [vmem:[#allocation6 + $0x70] sm:$0xff]  ;;  %v5781_v32 = vld [vmem:[#allocation6 + $0xa8] sm:$0xff] }
 0x845   :  { %8898 = vmatpush1.bf16.msra.mxu1 %v8897_v23  ;;  %v5767_v23 = vld [vmem:[#allocation6 + $0x38] sm:$0xff]  ;;  %v5789_v28 = vld [vmem:[#allocation6 + $0xe8] sm:$0xff]  ;;  %v9049_v17 = vpack.c.bf16 %v5774_v54, %v5766_v24  ;;  %v5780_v37 = vld [vmem:[#allocation6 + $0xa0] sm:$0xff] }
 0x846   :  { %8962 = vmatpush1.bf16.msra.mxu0 %v8961_v5  ;;  %8900 = vmatprep.subr.bf16.mxu1 %v8899_v11  ;;  %v5775_v5 = vld [vmem:[#allocation6 + $0x78] sm:$0xff]  ;;  %v8917_v11 = vpack.c.bf16 %v6008_v45, %v6000_v18  ;;  %v8987_v33 = vpack.c.bf16 %v5789_v28, %v5781_v32  ;;  %v5782_v38 = vld [vmem:[#allocation6 + $0xb0] sm:$0xff]  ;;  %v5797_v0 = vld [vmem:[#allocation6 + $0x128] sm:$0xff] }
 0x847   :  { %8964 = vmatprep.subr.bf16.mxu0 %v8963_v22  ;;  %v5772_v22 = vld [vmem:[#allocation6 + $0x60] sm:$0xff]  ;;  %v9047_v19 = vpack.c.bf16 %v5775_v5, %v5767_v23  ;;  %v5790_v39 = vld [vmem:[#allocation6 + $0xf0] sm:$0xff]  ;;  %v5805_v41 = vld [vmem:[#allocation6 + $0x168] sm:$0xff] }
 0x848   :  { %v9053_v29 = vpack.c.bf16 %v5790_v39, %v5782_v38  ;;  %v8991_v47 = vpack.c.bf16 %v5805_v41, %v5797_v0  ;;  %v5796_v48 = vld [vmem:[#allocation6 + $0x120] sm:$0xff]  ;;  %v5798_v50 = vld [vmem:[#allocation6 + $0x130] sm:$0xff]  ;;  %v5813_v53 = vld [vmem:[#allocation6 + $0x1a8] sm:$0xff] }
 0x849   :  { %8902 = vmatpush1.bf16.msra.mxu1 %v8901_v30  ;;  %v5783_v30 = vld [vmem:[#allocation6 + $0xb8] sm:$0xff]  ;;  %v5806_v57 = vld [vmem:[#allocation6 + $0x170] sm:$0xff]  ;;  %v5821_v59 = vld [vmem:[#allocation6 + $0x1e8] sm:$0xff] }
 0x84a   :  { %8966 = vmatpush1.bf16.msra.mxu0 %v8965_v31  ;;  %8904 = vmatprep.subr.bf16.mxu1 %v8903_v4  ;;  %v5791_v31 = vld [vmem:[#allocation6 + $0xf8] sm:$0xff]  ;;  %v8985_v4 = vpack.c.bf16 %v5772_v22, %v5764_v20  ;;  %v9057_v62 = vpack.c.bf16 %v5806_v57, %v5798_v50  ;;  %v8995_v8 = vpack.c.bf16 %v5821_v59, %v5813_v53  ;;  %v5812_v15 = vld [vmem:[#allocation6 + $0x1a0] sm:$0xff]  ;;  %v5814_v2 = vld [vmem:[#allocation6 + $0x1b0] sm:$0xff] }
 0x84b   :  { %8968 = vmatprep.subr.bf16.mxu0 %v8967_v36  ;;  %v5788_v36 = vld [vmem:[#allocation6 + $0xe0] sm:$0xff]  ;;  %v9051_v13 = vpack.c.bf16 %v5791_v31, %v5783_v30  ;;  %v5822_v63 = vld [vmem:[#allocation6 + $0x1f0] sm:$0xff]  ;;  %v5829_v6 = vld [vmem:[#allocation6 + $0x228] sm:$0xff] }
 0x84c   :  { %v5837_v7 = vld [vmem:[#allocation6 + $0x268] sm:$0xff]  ;;  %v5828_v45 = vld [vmem:[#allocation6 + $0x220] sm:$0xff]  ;;  %v5838_v52 = vld [vmem:[#allocation6 + $0x270] sm:$0xff] }
 0x84d   :  { %8906 = vmatpush1.bf16.msra.mxu1 %v8905_v46  ;;  %v5799_v46 = vld [vmem:[#allocation6 + $0x138] sm:$0xff]  ;;  %v8999_v18 = vpack.c.bf16 %v5837_v7, %v5829_v6  ;;  %v5836_v10 = vld [vmem:[#allocation6 + $0x260] sm:$0xff]  ;;  %v5845_v16 = vld [vmem:[#allocation6 + $0x2a8] sm:$0xff] }
 0x84e   :  { %8970 = vmatpush1.bf16.msra.mxu0 %v8969_v43  ;;  %8908 = vmatprep.subr.bf16.mxu1 %v8907_v44  ;;  %v5807_v43 = vld [vmem:[#allocation6 + $0x178] sm:$0xff]  ;;  %v8989_v44 = vpack.c.bf16 %v5788_v36, %v5780_v37  ;;  %v5853_v23 = vld [vmem:[#allocation6 + $0x2e8] sm:$0xff]  ;;  %v5844_v22 = vld [vmem:[#allocation6 + $0x2a0] sm:$0xff] }
 0x84f   :  { %8972 = vmatprep.subr.bf16.mxu0 %v8971_v34  ;;  %v5804_v34 = vld [vmem:[#allocation6 + $0x160] sm:$0xff]  ;;  %v9055_v56 = vpack.c.bf16 %v5807_v43, %v5799_v46  ;;  %v5847_v5 = vld [vmem:[#allocation6 + $0x2b8] sm:$0xff]  ;;  %v9003_v20 = vpack.c.bf16 %v5853_v23, %v5845_v16  ;;  %v5854_v32 = vld [vmem:[#allocation6 + $0x2f0] sm:$0xff] }
 0x850   :  { %v5852_v24 = vld [vmem:[#allocation6 + $0x2e0] sm:$0xff]  ;;  %v5861_v28 = vld [vmem:[#allocation6 + $0x328] sm:$0xff]  ;;  %v5863_v31 = vld [vmem:[#allocation6 + $0x338] sm:$0xff] }
 0x851   :  { %8910 = vmatpush1.bf16.msra.mxu1 %v8909_v60  ;;  %v5815_v60 = vld [vmem:[#allocation6 + $0x1b8] sm:$0xff]  ;;  %v5869_v30 = vld [vmem:[#allocation6 + $0x368] sm:$0xff]  ;;  %v5860_v36 = vld [vmem:[#allocation6 + $0x320] sm:$0xff] }
 0x852   :  { %8974 = vmatpush1.bf16.msra.mxu0 %v8973_v61  ;;  %8912 = vmatprep.subr.bf16.mxu1 %v8911_v49  ;;  %v5823_v61 = vld [vmem:[#allocation6 + $0x1f8] sm:$0xff]  ;;  %v8993_v49 = vpack.c.bf16 %v5804_v34, %v5796_v48  ;;  %v9007_v37 = vpack.c.bf16 %v5869_v30, %v5861_v28  ;;  %v5868_v38 = vld [vmem:[#allocation6 + $0x360] sm:$0xff]  ;;  %v5870_v0 = vld [vmem:[#allocation6 + $0x370] sm:$0xff] }
 0x853   :  { %8976 = vmatprep.subr.bf16.mxu0 %v8975_v1  ;;  %v5820_v1 = vld [vmem:[#allocation6 + $0x1e0] sm:$0xff]  ;;  %v9059_v3 = vpack.c.bf16 %v5823_v61, %v5815_v60  ;;  %v5877_v41 = vld [vmem:[#allocation6 + $0x3a8] sm:$0xff]  ;;  %v5879_v43 = vld [vmem:[#allocation6 + $0x3b8] sm:$0xff] }
 0x854   :  { %v5885_v46 = vld [vmem:[#allocation6 + $0x3e8] sm:$0xff]  ;;  %v5876_v34 = vld [vmem:[#allocation6 + $0x3a0] sm:$0xff]  ;;  %v5886_v53 = vld [vmem:[#allocation6 + $0x3f0] sm:$0xff] }
 0x855   :  { %8914 = vmatpush1.bf16.msra.mxu1 %v8913_v27  ;;  %v5831_v27 = vld [vmem:[#allocation6 + $0x238] sm:$0xff]  ;;  %v9011_v48 = vpack.c.bf16 %v5885_v46, %v5877_v41  ;;  %v5884_v50 = vld [vmem:[#allocation6 + $0x3e0] sm:$0xff]  ;;  %v5893_v59 = vld [vmem:[#allocation6 + $0x428] sm:$0xff] }
 0x856   :  { %8978 = vmatpush1.bf16.msra.mxu0 %v8977_v51  ;;  %8916 = vmatprep.subr.bf16.mxu1 %v8915_v9  ;;  %v5839_v51 = vld [vmem:[#allocation6 + $0x278] sm:$0xff]  ;;  %v8997_v9 = vpack.c.bf16 %v5820_v1, %v5812_v15  ;;  %v5901_v60 = vld [vmem:[#allocation6 + $0x468] sm:$0xff]  ;;  %v5892_v1 = vld [vmem:[#allocation6 + $0x420] sm:$0xff] }
 0x857   :  { %8980 = vmatprep.subr.bf16.mxu0 %v8979_v12  ;;  %v5830_v12 = vld [vmem:[#allocation6 + $0x230] sm:$0xff]  ;;  %v9063_v14 = vpack.c.bf16 %v5839_v51, %v5831_v27  ;;  %v5895_v61 = vld [vmem:[#allocation6 + $0x438] sm:$0xff]  ;;  %v9015_v15 = vpack.c.bf16 %v5901_v60, %v5893_v59  ;;  %v5909_v7 = vld [vmem:[#allocation6 + $0x4a8] sm:$0xff] }
 0x858   :  { %v5902_v6 = vld [vmem:[#allocation6 + $0x470] sm:$0xff]  ;;  %v5917_v27 = vld [vmem:[#allocation6 + $0x4e8] sm:$0xff]  ;;  %v5911_v51 = vld [vmem:[#allocation6 + $0x4b8] sm:$0xff] }
 0x859   :  { %8918 = vmatpush1.bf16.msra.mxu1 %v8917_v11  ;;  %v5855_v11 = vld [vmem:[#allocation6 + $0x2f8] sm:$0xff]  ;;  %v5918_v16 = vld [vmem:[#allocation6 + $0x4f0] sm:$0xff]  ;;  %v5925_v23 = vld [vmem:[#allocation6 + $0x528] sm:$0xff] }
 0x85a   :  { %8982 = vmatpush1.bf16.msra.mxu0 %v8981_v26  ;;  %8984 = vmatprep.subr.bf16.mxu1 %v8983_v21  ;;  %v9001_v26 = vpack.c.bf16 %v5836_v10, %v5828_v45  ;;  %v9065_v21 = vpack.c.bf16 %v5838_v52, %v5830_v12  ;;  %v9067_v54 = vpack.c.bf16 %v5855_v11, %v5847_v5  ;;  %v5908_v10 = vld [vmem:[#allocation6 + $0x4a0] sm:$0xff]  ;;  %v5933_v5 = vld [vmem:[#allocation6 + $0x568] sm:$0xff]  ;;  %v5927_v11 = vld [vmem:[#allocation6 + $0x538] sm:$0xff] }
 0x85b   :  { %9048 = vmatprep.subr.bf16.mxu0 %v9047_v19  ;;  %v5846_v19 = vld [vmem:[#allocation6 + $0x2b0] sm:$0xff]  ;;  %v9019_v45 = vpack.c.bf16 %v5917_v27, %v5909_v7  ;;  %v5916_v12 = vld [vmem:[#allocation6 + $0x4e0] sm:$0xff]  ;;  %v5941_v30 = vld [vmem:[#allocation6 + $0x5a8] sm:$0xff] }
 0x85c   :  { %6123 = vmatmul.mubr.f32.vlgmr.msra.gmra.mrb[66].mxu1 %v10469_v55  ;;  %v5934_v28 = vld [vmem:[#allocation6 + $0x570] sm:$0xff]  ;;  %v5957_v46 = vld [vmem:[#allocation6 + $0x628] sm:$0xff] }
 0x85d   :  { %6194 = vmatmul.mubr.f32.vlgmr.msra.gmra.mrb[10].mxu0 %v10469_v55  ;;  %8986 = vmatpush1.bf16.msra.mxu1 %v8985_v4  ;;  %v5871_v4 = vld [vmem:[#allocation6 + $0x378] sm:$0xff]  ;;  %v5950_v41 = vld [vmem:[#allocation6 + $0x5f0] sm:$0xff]  ;;  %v5973_v60 = vld [vmem:[#allocation6 + $0x6a8] sm:$0xff] }
 0x85e   :  { %9050 = vmatpush1.bf16.msra.mxu0 %v9049_v17  ;;  %8988 = vmatprep.subr.bf16.mxu1 %v8987_v33  ;;  %v9005_v17 = vpack.c.bf16 %v5852_v24, %v5844_v22  ;;  %v9069_v33 = vpack.c.bf16 %v5854_v32, %v5846_v19  ;;  %v9071_v39 = vpack.c.bf16 %v5871_v4, %v5863_v31  ;;  %v5924_v24 = vld [vmem:[#allocation6 + $0x520] sm:$0xff]  ;;  %v5949_v31 = vld [vmem:[#allocation6 + $0x5e8] sm:$0xff]  ;;  %v5943_v4 = vld [vmem:[#allocation6 + $0x5b8] sm:$0xff] }
 0x85f   :  { %9052 = vmatprep.subr.bf16.mxu0 %v9051_v13  ;;  %6264 = vmatprep.mubr.f32.mxu1 %v10471_v58  ;;  %v5862_v13 = vld [vmem:[#allocation6 + $0x330] sm:$0xff]  ;;  %v9023_v22 = vpack.c.bf16 %v5933_v5, %v5925_v23  ;;  %v5932_v19 = vld [vmem:[#allocation6 + $0x560] sm:$0xff]  ;;  %v5989_v27 = vld [vmem:[#allocation6 + $0x728] sm:$0xff] }
 0x860   :  { %6335 = vmatprep.mubr.f32.mxu0 %v10471_v58  ;;  %v9061_v58 = vpack.c.bf16 %v5822_v63, %v5814_v2  ;;  %v5900_v2 = vld [vmem:[#allocation6 + $0x460] sm:$0xff]  ;;  %v5966_v59 = vld [vmem:[#allocation6 + $0x670] sm:$0xff]  ;;  %v6005_v5 = vld [vmem:[#allocation6 + $0x7a8] sm:$0xff] }
 0x861   :  { %8990 = vmatpush1.bf16.msra.mxu1 %v8989_v44  ;;  %v5887_v44 = vld [vmem:[#allocation6 + $0x3f8] sm:$0xff]  ;;  %v5982_v7 = vld [vmem:[#allocation6 + $0x6f0] sm:$0xff] }
 0x862   :  { %9054 = vmatpush1.bf16.msra.mxu0 %v9053_v29  ;;  %8992 = vmatprep.subr.bf16.mxu1 %v8991_v47  ;;  %v9009_v29 = vpack.c.bf16 %v5868_v38, %v5860_v36  ;;  %v9073_v47 = vpack.c.bf16 %v5870_v0, %v5862_v13  ;;  %v9075_v57 = vpack.c.bf16 %v5887_v44, %v5879_v43  ;;  %v5940_v38 = vld [vmem:[#allocation6 + $0x5a0] sm:$0xff]  ;;  %v5965_v43 = vld [vmem:[#allocation6 + $0x668] sm:$0xff]  ;;  %v5959_v44 = vld [vmem:[#allocation6 + $0x638] sm:$0xff] }
 0x863   :  { %9056 = vmatprep.subr.bf16.mxu0 %v9055_v56  ;;  %v5878_v56 = vld [vmem:[#allocation6 + $0x3b0] sm:$0xff]  ;;  %v9027_v36 = vpack.c.bf16 %v5949_v31, %v5941_v30  ;;  %v5948_v13 = vld [vmem:[#allocation6 + $0x5e0] sm:$0xff] }
 0x864   :  { %v5998_v23 = vld [vmem:[#allocation6 + $0x770] sm:$0xff] }
 0x865   :  { %8994 = vmatpush1.bf16.msra.mxu1 %v8993_v49  ;;  %v5903_v49 = vld [vmem:[#allocation6 + $0x478] sm:$0xff]  ;;  %v6014_v30 = vld [vmem:[#allocation6 + $0x7f0] sm:$0xff] }
 0x866   :  { %9058 = vmatpush1.bf16.msra.mxu0 %v9057_v62  ;;  %8996 = vmatprep.subr.bf16.mxu1 %v8995_v8  ;;  %v9013_v62 = vpack.c.bf16 %v5884_v50, %v5876_v34  ;;  %v9077_v8 = vpack.c.bf16 %v5886_v53, %v5878_v56  ;;  %v9079_v63 = vpack.c.bf16 %v5903_v49, %v5895_v61  ;;  %v5956_v50 = vld [vmem:[#allocation6 + $0x620] sm:$0xff]  ;;  %v5981_v61 = vld [vmem:[#allocation6 + $0x6e8] sm:$0xff]  ;;  %v5975_v49 = vld [vmem:[#allocation6 + $0x6b8] sm:$0xff] }
 0x867   :  { %9060 = vmatprep.subr.bf16.mxu0 %v9059_v3  ;;  %v5894_v3 = vld [vmem:[#allocation6 + $0x430] sm:$0xff]  ;;  %v9031_v34 = vpack.c.bf16 %v5965_v43, %v5957_v46  ;;  %v5964_v56 = vld [vmem:[#allocation6 + $0x660] sm:$0xff] }
 0x869   :  { %8998 = vmatpush1.bf16.msra.mxu1 %v8997_v9  ;;  %v5919_v9 = vld [vmem:[#allocation6 + $0x4f8] sm:$0xff] }
 0x86a   :  { %9062 = vmatpush1.bf16.msra.mxu0 %v9061_v58  ;;  %9000 = vmatprep.subr.bf16.mxu1 %v8999_v18  ;;  %v9017_v58 = vpack.c.bf16 %v5900_v2, %v5892_v1  ;;  %v9081_v18 = vpack.c.bf16 %v5902_v6, %v5894_v3  ;;  %v9083_v52 = vpack.c.bf16 %v5919_v9, %v5911_v51  ;;  %v5972_v2 = vld [vmem:[#allocation6 + $0x6a0] sm:$0xff]  ;;  %v5997_v51 = vld [vmem:[#allocation6 + $0x768] sm:$0xff]  ;;  %v5991_v9 = vld [vmem:[#allocation6 + $0x738] sm:$0xff] }
 0x86b   :  { %9064 = vmatprep.subr.bf16.mxu0 %v9063_v14  ;;  %v5910_v14 = vld [vmem:[#allocation6 + $0x4b0] sm:$0xff]  ;;  %v9035_v1 = vpack.c.bf16 %v5981_v61, %v5973_v60  ;;  %v5980_v3 = vld [vmem:[#allocation6 + $0x6e0] sm:$0xff] }
 0x86d   :  { %9002 = vmatpush1.bf16.msra.mxu1 %v9001_v26  ;;  %v5935_v26 = vld [vmem:[#allocation6 + $0x578] sm:$0xff] }
 0x86e   :  { %9066 = vmatpush1.bf16.msra.mxu0 %v9065_v21  ;;  %9004 = vmatprep.subr.bf16.mxu1 %v9003_v20  ;;  %v9021_v21 = vpack.c.bf16 %v5916_v12, %v5908_v10  ;;  %v9085_v20 = vpack.c.bf16 %v5918_v16, %v5910_v14  ;;  %v9087_v32 = vpack.c.bf16 %v5935_v26, %v5927_v11  ;;  %v5988_v12 = vld [vmem:[#allocation6 + $0x720] sm:$0xff]  ;;  %v6013_v11 = vld [vmem:[#allocation6 + $0x7e8] sm:$0xff]  ;;  %v6007_v26 = vld [vmem:[#allocation6 + $0x7b8] sm:$0xff] }
 0x86f   :  { %9068 = vmatprep.subr.bf16.mxu0 %v9067_v54  ;;  %v5926_v54 = vld [vmem:[#allocation6 + $0x530] sm:$0xff]  ;;  %v9039_v10 = vpack.c.bf16 %v5997_v51, %v5989_v27  ;;  %v5996_v14 = vld [vmem:[#allocation6 + $0x760] sm:$0xff] }
 0x871   :  { %9006 = vmatpush1.bf16.msra.mxu1 %v9005_v17  ;;  %v5951_v17 = vld [vmem:[#allocation6 + $0x5f8] sm:$0xff] }
 0x872   :  { %9070 = vmatpush1.bf16.msra.mxu0 %v9069_v33  ;;  %9008 = vmatprep.subr.bf16.mxu1 %v9007_v37  ;;  %v9025_v33 = vpack.c.bf16 %v5932_v19, %v5924_v24  ;;  %v9089_v37 = vpack.c.bf16 %v5934_v28, %v5926_v54  ;;  %v9091_v0 = vpack.c.bf16 %v5951_v17, %v5943_v4  ;;  %v6004_v19 = vld [vmem:[#allocation6 + $0x7a0] sm:$0xff]  ;;  %v6006_v28 = vld [vmem:[#allocation6 + $0x7b0] sm:$0xff]  ;;  %v6016_v17 = vld [vmem:[#allocation17] sm:$0xff] }
 0x873   :  { %9072 = vmatprep.subr.bf16.mxu0 %v9071_v39  ;;  %v5942_v39 = vld [vmem:[#allocation6 + $0x5b0] sm:$0xff]  ;;  %v9043_v24 = vpack.c.bf16 %v6013_v11, %v6005_v5  ;;  %v6012_v54 = vld [vmem:[#allocation6 + $0x7e0] sm:$0xff]  ;;  %v9109_v4 = vpack.c.bf16 %v6014_v30, %v6006_v28 }
 0x874   :  { %v9045_v31 = vpack.c.bf16 %v6012_v54, %v6004_v19 }
 0x875   :  { %9010 = vmatpush1.bf16.msra.mxu1 %v9009_v29  ;;  %v5967_v29 = vld [vmem:[#allocation6 + $0x678] sm:$0xff] }
 0x876   :  { %9074 = vmatpush1.bf16.msra.mxu0 %v9073_v47  ;;  %9012 = vmatprep.subr.bf16.mxu1 %v9011_v48  ;;  %v9029_v47 = vpack.c.bf16 %v5948_v13, %v5940_v38  ;;  %v9093_v48 = vpack.c.bf16 %v5950_v41, %v5942_v39  ;;  %v9095_v53 = vpack.c.bf16 %v5967_v29, %v5959_v44 }
 0x877   :  { %9076 = vmatprep.subr.bf16.mxu0 %v9075_v57  ;;  %v5958_v57 = vld [vmem:[#allocation6 + $0x630] sm:$0xff]  ;;  %v6025_v38 = vrot.slane %v6016_v17, %v10184_v40  ;;  %v6036_v40 = vsub.s32 4, %v10177_v25 }
 0x879   :  { %9014 = vmatpush1.bf16.msra.mxu1 %v9013_v62  ;;  %v5983_v62 = vld [vmem:[#allocation6 + $0x6f8] sm:$0xff] }
 0x87a   :  { %9078 = vmatpush1.bf16.msra.mxu0 %v9077_v8  ;;  %9016 = vmatprep.subr.bf16.mxu1 %v9015_v15  ;;  %v9033_v8 = vpack.c.bf16 %v5964_v56, %v5956_v50  ;;  %v9097_v15 = vpack.c.bf16 %v5966_v59, %v5958_v57  ;;  %v9099_v6 = vpack.c.bf16 %v5983_v62, %v5975_v49  ;;  %v6040_v50 = vsub.s32 5, %v10177_v25 }
 0x87b   :  { %9080 = vmatprep.subr.bf16.mxu0 %v9079_v63  ;;  %v5974_v63 = vld [vmem:[#allocation6 + $0x6b0] sm:$0xff]  ;;  %v6048_v56 = vsub.s32 7, %v10177_v25  ;;  %v6037_v57 = vrot.slane %v6016_v17, %v6036_v40 }
 0x87c   :  { %v6041_v59 = vrot.slane %v6016_v17, %v6040_v50 }
 0x87d   :  { %9018 = vmatpush1.bf16.msra.mxu1 %v9017_v58  ;;  %v5999_v58 = vld [vmem:[#allocation6 + $0x778] sm:$0xff]  ;;  %v6049_v60 = vrot.slane %v6016_v17, %v6048_v56 }
 0x87e   :  { %9082 = vmatpush1.bf16.msra.mxu0 %v9081_v18  ;;  %9020 = vmatprep.subr.bf16.mxu1 %v9019_v45  ;;  %v9037_v18 = vpack.c.bf16 %v5980_v3, %v5972_v2  ;;  %v9101_v45 = vpack.c.bf16 %v5982_v7, %v5974_v63  ;;  %v9103_v16 = vpack.c.bf16 %v5999_v58, %v5991_v9 }
 0x87f   :  { %9084 = vmatprep.subr.bf16.mxu0 %v9083_v52  ;;  %v5990_v52 = vld [vmem:[#allocation6 + $0x730] sm:$0xff] }
 0x881   :  { %9022 = vmatpush1.bf16.msra.mxu1 %v9021_v21  ;;  %v6015_v21 = vld [vmem:[#allocation6 + $0x7f8] sm:$0xff] }
 0x882   :  { %9086 = vmatpush1.bf16.msra.mxu0 %v9085_v20  ;;  %9024 = vmatprep.subr.bf16.mxu1 %v9023_v22  ;;  %v9041_v20 = vpack.c.bf16 %v5996_v14, %v5988_v12  ;;  %v9105_v22 = vpack.c.bf16 %v5998_v23, %v5990_v52 }
 0x883   :  { %9088 = vmatprep.subr.bf16.mxu0 %v9087_v32  ;;  %v9107_v32 = vpack.c.bf16 %v6015_v21, %v6007_v26 }
 0x885   :  { %9026 = vmatpush1.bf16.msra.mxu1 %v9025_v33  ;;  %v6032_v33 = vsub.s32 3, %v10177_v25 }
 0x886   :  { %9090 = vmatpush1.bf16.msra.mxu0 %v9089_v37  ;;  %9028 = vmatprep.subr.bf16.mxu1 %v9027_v36  ;;  %v6021_v37 = vrot.slane %v6016_v17, %v10181_v35  ;;  %v6029_v36 = vrot.slane %v6016_v17, %v10188_v42 }
 0x887   :  { %9092 = vmatprep.subr.bf16.mxu0 %v9091_v0  ;;  %v6033_v13 = vrot.slane %v6016_v17, %v6032_v33 }
 0x889   :  { %9030 = vmatpush1.bf16.msra.mxu1 %v9029_v47 }
 0x88a   :  { %9094 = vmatpush1.bf16.msra.mxu0 %v9093_v48  ;;  %9032 = vmatprep.subr.bf16.mxu1 %v9031_v34  ;;  %v6044_v34 = vsub.s32 6, %v10177_v25 }
 0x88b   :  { %9096 = vmatprep.subr.bf16.mxu0 %v9095_v53 }
 0x88c   :  { %v6045_v53 = vrot.slane %v6016_v17, %v6044_v34 }
 0x88d   :  { %9034 = vmatpush1.bf16.msra.mxu1 %v9033_v8 }
 0x88e   :  { %9098 = vmatpush1.bf16.msra.mxu0 %v9097_v15  ;;  %9036 = vmatprep.subr.bf16.mxu1 %v9035_v1 }
 0x88f   :  { %9100 = vmatprep.subr.bf16.mxu0 %v9099_v6 }
 0x891   :  { %9038 = vmatpush1.bf16.msra.mxu1 %v9037_v18 }
 0x892   :  { %9102 = vmatpush1.bf16.msra.mxu0 %v9101_v45  ;;  %9040 = vmatprep.subr.bf16.mxu1 %v9039_v10 }
 0x893   :  { %9104 = vmatprep.subr.bf16.mxu0 %v9103_v16 }
 0x895   :  { %9042 = vmatpush1.bf16.msra.mxu1 %v9041_v20 }
 0x896   :  { %9106 = vmatpush1.bf16.msra.mxu0 %v9105_v22  ;;  %9044 = vmatprep.subr.bf16.mxu1 %v9043_v24 }
 0x897   :  { %9108 = vmatprep.subr.bf16.mxu0 %v9107_v32 }
 0x899   :  { %9046 = vmatpush1.bf16.msra.mxu1 %v9045_v31 }
 0x89a   :  { %9110 = vmatpush1.bf16.msra.mxu0 %v9109_v4 }
 0x89c   :  { %6265 = vmatmul.mubr.f32.vlgmr.msra.gmra.mrb[68].mxu1 %v10469_v55 }
 0x89d   :  { %6336 = vmatmul.mubr.f32.vlgmr.msra.gmra.mrb[12].mxu0 %v10469_v55 }
 0x92f   :  { %v6124_v39 = vpop.f32.mrb[66].mxu1 }
 0x930   :  { %v10485_v0 = vadd.f32 %v6124_v39, %v6021_v37  ;;  %v6195_v41 = vpop.f32.mrb[10].mxu0  ;;  %v6126_v46 = vpop.f32.mrb[67].mxu1 }
 0x931   :  { %v10487_v43 = vadd.f32 %v6195_v41, %v6029_v36  ;;  %v6127_v44 = vadd.f32 %v6126_v46, %v6025_v38  ;;  %v6197_v29 = vpop.f32.mrb[11].mxu0 }
 0x932   :  { %v6342_v55 = vmax.f32 %v10485_v0, 0.0  ;;  %v10490_v47 = vadd.f32 %v6197_v29, %v6033_v13 }
 0x933   :  { %v6344_v35 = vmax.f32 %v10487_v43, 0.0  ;;  %v6343_v48 = vmax.f32 %v6127_v44, 0.0 }
 0x934   :  { %v6345_v42 = vmax.f32 %v10490_v47, 0.0 }
 0x96f   :  { %v6266_v61 = vpop.f32.mrb[68].mxu1 }
 0x970   :  { %v10498_v49 = vadd.f32 %v6266_v61, %v6037_v57  ;;  %v6337_v62 = vpop.f32.mrb[12].mxu0  ;;  %v6268_v8 = vpop.f32.mrb[69].mxu1 }
 0x971   :  { %v10500_v15 = vadd.f32 %v6337_v62, %v6045_v53  ;;  %v6269_v1 = vadd.f32 %v6268_v8, %v6041_v59  ;;  %v6339_v2 = vpop.f32.mrb[13].mxu0 }
 0x972   :  { %v6346_v3 = vmax.f32 %v10498_v49, 0.0  ;;  %v10503_v63 = vadd.f32 %v6339_v2, %v6049_v60 }
 0x973   :  { %v6348_v6 = vmax.f32 %v10500_v15, 0.0  ;;  %v6347_v25 = vmax.f32 %v6269_v1, 0.0 }
 0x974   :  { %v6349_v7 = vmax.f32 %v10503_v63, 0.0 }
 0x975   :  { %9596 = dma.done.wait [#allocation8 + $0x3], 16384 }
 0x976   :  { %9597 = vsyncadd [#allocation8 + $0x3], 4294950912  ;;  %6552 = vmatprep.mubr.f32.mxu1 %v6343_v48  ;;  %6692 = vmatprep.mubr.f32.mxu0 %v6347_v25  ;;  %v6369_v27 = vld [vmem:[#allocation7 + $0x80] sm:$0xff]  ;;  %v6370_v51 = vld [vmem:[#allocation7 + $0x88] sm:$0xff]  ;;  %s9617_s10 = smov 127   ;;  %vm6777_vm9 = vcmask 41984  }
 0x977   :  { %v6353_v9 = vld [vmem:[#allocation7] sm:$0xff]  ;;  %v9111_v58 = vpack.c.bf16 %v6370_v51, %v6369_v27  ;;  %v6354_v18 = vld [vmem:[#allocation7 + $0x8] sm:$0xff]  ;;  %v6371_v45 = vld [vmem:[#allocation7 + $0x90] sm:$0xff]  ;;  %s9618_s1 = smov [#allocation20]  }
 0x978   :  { %v6372_v10 = vld [vmem:[#allocation7 + $0x98] sm:$0xff]  ;;  %v9113_v12 = vpack.c.bf16 %v6354_v18, %v6353_v9  ;;  %v6355_v52 = vld [vmem:[#allocation7 + $0x10] sm:$0xff]  ;;  %v6373_v23 = vld [vmem:[#allocation7 + $0xa0] sm:$0xff]  ;;  %s6795_s5 = sshll.u32 %s9618_s1, 4  ;;  %s6796_s5 = int_to_ptr.vmem [resolvable:$true] %s6795_s5 }
 0x979   :  { %v9115_v14 = vpack.c.bf16 %v6372_v10, %v6371_v45  ;;  %v6356_v16 = vld [vmem:[#allocation7 + $0x18] sm:$0xff]  ;;  %9112 = vmatprep.subr.bf16.mxu1 %v9111_v58  ;;  %v6374_v5 = vld [vmem:[#allocation7 + $0xa8] sm:$0xff]  ;;  %v6357_v21 = vld [vmem:[#allocation7 + $0x20] sm:$0xff]  ;;  %s9560_s21 = scalar_lea.vmem %s6796_s5, 32  ;;  %p9565_p11 = scmp.lt.s32.totalorder %s6796_s5, %s6796_s5 }
 0x97a   :  { %9114 = vmatpush3.bf16.msra.mxu1 %v9113_v12  ;;  %v9117_v11 = vpack.c.bf16 %v6356_v16, %v6355_v52  ;;  %v9119_v26 = vpack.c.bf16 %v6374_v5, %v6373_v23  ;;  %v6358_v20 = vld [vmem:[#allocation7 + $0x28] sm:$0xff]  ;;  %v6375_v22 = vld [vmem:[#allocation7 + $0xb0] sm:$0xff]  ;;  %v6376_v24 = vld [vmem:[#allocation7 + $0xb8] sm:$0xff]  ;;  %p9561_p10 = scmp.ne.s32.totalorder %s6796_s5, %s9560_s21  ;;  %p9566_p12 = scmp.lt.s32.totalorder %s9560_s21, %s9560_s21 }
 0x97b   :  { %9116 = vmatprep.subr.bf16.mxu1 %v9115_v14  ;;  %v9121_v19 = vpack.c.bf16 %v6358_v20, %v6357_v21  ;;  %v9123_v54 = vpack.c.bf16 %v6376_v24, %v6375_v22  ;;  %v6359_v32 = vld [vmem:[#allocation7 + $0x30] sm:$0xff]  ;;  %v6360_v28 = vld [vmem:[#allocation7 + $0x38] sm:$0xff]  ;;  %v6377_v30 = vld [vmem:[#allocation7 + $0xc0] sm:$0xff] }
 0x97c   :  { %v6378_v31 = vld [vmem:[#allocation7 + $0xc8] sm:$0xff]  ;;  %v9125_v4 = vpack.c.bf16 %v6360_v28, %v6359_v32  ;;  %v6433_v17 = vld [vmem:[#allocation7 + $0x280] sm:$0xff]  ;;  %v6379_v46 = vld [vmem:[#allocation7 + $0xd0] sm:$0xff]  ;;  %p9567_p13 = por %p9566_p12, %p9565_p11 }
 0x97d   :  { %v6434_v33 = vld [vmem:[#allocation7 + $0x288] sm:$0xff]  ;;  %v6417_v37 = vld [vmem:[#allocation7 + $0x200] sm:$0xff]  ;;  %v9127_v36 = vpack.c.bf16 %v6378_v31, %v6377_v30  ;;  %v6380_v44 = vld [vmem:[#allocation7 + $0xd8] sm:$0xff] }
 0x97e   :  { %9118 = vmatpush3.bf16.msra.mxu1 %v9117_v11  ;;  %v6361_v38 = vld [vmem:[#allocation7 + $0x40] sm:$0xff]  ;;  %v6362_v13 = vld [vmem:[#allocation7 + $0x48] sm:$0xff]  ;;  %v9175_v39 = vpack.c.bf16 %v6434_v33, %v6433_v17  ;;  %v6435_v48 = vld [vmem:[#allocation7 + $0x290] sm:$0xff]  ;;  %v9131_v61 = vpack.c.bf16 %v6380_v44, %v6379_v46  ;;  %p9568_p0 = pnand %p9567_p13, %p9561_p10 }
 0x97f   :  { %9120 = vmatprep.subr.bf16.mxu1 %v9119_v26  ;;  %v6418_v41 = vld [vmem:[#allocation7 + $0x208] sm:$0xff]  ;;  %v6436_v40 = vld [vmem:[#allocation7 + $0x298] sm:$0xff]  ;;  %v6419_v34 = vld [vmem:[#allocation7 + $0x210] sm:$0xff]  ;;  %v9129_v56 = vpack.c.bf16 %v6362_v13, %v6361_v38 }
 0x980   :  { %v9177_v29 = vpack.c.bf16 %v6418_v41, %v6417_v37  ;;  %9176 = vmatprep.subr.bf16.mxu0 %v9175_v39  ;;  %v6420_v50 = vld [vmem:[#allocation7 + $0x218] sm:$0xff]  ;;  %v6363_v57 = vld [vmem:[#allocation7 + $0x50] sm:$0xff]  ;;  %v9179_v59 = vpack.c.bf16 %v6436_v40, %v6435_v48  ;;  %v6381_v62 = vld [vmem:[#allocation7 + $0xe0] sm:$0xff] }
 0x981   :  { %v6364_v53 = vld [vmem:[#allocation7 + $0x58] sm:$0xff]  ;;  %v9181_v60 = vpack.c.bf16 %v6420_v50, %v6419_v34  ;;  %v6437_v8 = vld [vmem:[#allocation7 + $0x2a0] sm:$0xff]  ;;  %v6438_v1 = vld [vmem:[#allocation7 + $0x2a8] sm:$0xff] }
 0x982   :  { %9122 = vmatpush3.bf16.msra.mxu1 %v9121_v19  ;;  %9178 = vmatpush3.bf16.msra.mxu0 %v9177_v29  ;;  %v6382_v2 = vld [vmem:[#allocation7 + $0xe8] sm:$0xff]  ;;  %v9183_v25 = vpack.c.bf16 %v6438_v1, %v6437_v8  ;;  %v6421_v27 = vld [vmem:[#allocation7 + $0x220] sm:$0xff]  ;;  %v9133_v9 = vpack.c.bf16 %v6364_v53, %v6363_v57  ;;  %v6439_v45 = vld [vmem:[#allocation7 + $0x2b0] sm:$0xff] }
 0x983   :  { %9124 = vmatprep.subr.bf16.mxu1 %v9123_v54  ;;  %9180 = vmatprep.subr.bf16.mxu0 %v9179_v59  ;;  %v6422_v51 = vld [vmem:[#allocation7 + $0x228] sm:$0xff]  ;;  %v6365_v58 = vld [vmem:[#allocation7 + $0x60] sm:$0xff]  ;;  %v6440_v10 = vld [vmem:[#allocation7 + $0x2b8] sm:$0xff]  ;;  %v9135_v12 = vpack.c.bf16 %v6382_v2, %v6381_v62 }
 0x984   :  { %v9185_v18 = vpack.c.bf16 %v6422_v51, %v6421_v27  ;;  %v6366_v14 = vld [vmem:[#allocation7 + $0x68] sm:$0xff]  ;;  %v9187_v52 = vpack.c.bf16 %v6440_v10, %v6439_v45  ;;  %v6423_v16 = vld [vmem:[#allocation7 + $0x230] sm:$0xff]  ;;  %v6424_v23 = vld [vmem:[#allocation7 + $0x238] sm:$0xff] }
 0x985   :  { %v6383_v5 = vld [vmem:[#allocation7 + $0xf0] sm:$0xff]  ;;  %v6384_v11 = vld [vmem:[#allocation7 + $0xf8] sm:$0xff]  ;;  %v6441_v26 = vld [vmem:[#allocation7 + $0x2c0] sm:$0xff]  ;;  %v9137_v20 = vpack.c.bf16 %v6366_v14, %v6365_v58  ;;  %v9189_v19 = vpack.c.bf16 %v6424_v23, %v6423_v16 }
 0x986   :  { %9126 = vmatpush3.bf16.msra.mxu1 %v9125_v4  ;;  %9182 = vmatpush3.bf16.msra.mxu0 %v9181_v60  ;;  %v6442_v21 = vld [vmem:[#allocation7 + $0x2c8] sm:$0xff]  ;;  %v6367_v22 = vld [vmem:[#allocation7 + $0x70] sm:$0xff]  ;;  %v6368_v24 = vld [vmem:[#allocation7 + $0x78] sm:$0xff]  ;;  %v9139_v54 = vpack.c.bf16 %v6384_v11, %v6383_v5 }
 0x987   :  { %9128 = vmatprep.subr.bf16.mxu1 %v9127_v36  ;;  %9184 = vmatprep.subr.bf16.mxu0 %v9183_v25  ;;  %v6401_v32 = vld [vmem:[#allocation7 + $0x180] sm:$0xff]  ;;  %v9191_v28 = vpack.c.bf16 %v6442_v21, %v6441_v26  ;;  %v6426_v31 = vld [vmem:[#allocation7 + $0x248] sm:$0xff]  ;;  %v6443_v17 = vld [vmem:[#allocation7 + $0x2d0] sm:$0xff]  ;;  %v9141_v37 = vpack.c.bf16 %v6368_v24, %v6367_v22 }
 0x988   :  { %v6425_v30 = vld [vmem:[#allocation7 + $0x240] sm:$0xff]  ;;  %v6402_v4 = vld [vmem:[#allocation7 + $0x188] sm:$0xff]  ;;  %v6444_v33 = vld [vmem:[#allocation7 + $0x2d8] sm:$0xff] }
 0x989   :  { %v6385_v36 = vld [vmem:[#allocation7 + $0x100] sm:$0xff]  ;;  %v6386_v38 = vld [vmem:[#allocation7 + $0x108] sm:$0xff]  ;;  %v9193_v13 = vpack.c.bf16 %v6426_v31, %v6425_v30  ;;  %v9143_v39 = vpack.c.bf16 %v6402_v4, %v6401_v32  ;;  %v6403_v41 = vld [vmem:[#allocation7 + $0x190] sm:$0xff]  ;;  %v9195_v46 = vpack.c.bf16 %v6444_v33, %v6443_v17 }
 0x98a   :  { %9130 = vmatpush3.bf16.msra.mxu1 %v9129_v56  ;;  %9186 = vmatpush3.bf16.msra.mxu0 %v9185_v18  ;;  %v6427_v44 = vld [vmem:[#allocation7 + $0x250] sm:$0xff]  ;;  %v6428_v29 = vld [vmem:[#allocation7 + $0x258] sm:$0xff]  ;;  %v6445_v40 = vld [vmem:[#allocation7 + $0x2e0] sm:$0xff]  ;;  %v9145_v50 = vpack.c.bf16 %v6386_v38, %v6385_v36 }
 0x98b   :  { %9132 = vmatprep.subr.bf16.mxu1 %v9131_v61  ;;  %9188 = vmatprep.subr.bf16.mxu0 %v9187_v52  ;;  %v6404_v48 = vld [vmem:[#allocation7 + $0x198] sm:$0xff]  ;;  %v6446_v34 = vld [vmem:[#allocation7 + $0x2e8] sm:$0xff]  ;;  %v6387_v56 = vld [vmem:[#allocation7 + $0x110] sm:$0xff]  ;;  %v9197_v53 = vpack.c.bf16 %v6428_v29, %v6427_v44 }
 0x98c   :  { %v6388_v57 = vld [vmem:[#allocation7 + $0x118] sm:$0xff]  ;;  %v9147_v59 = vpack.c.bf16 %v6404_v48, %v6403_v41  ;;  %v6405_v60 = vld [vmem:[#allocation7 + $0x1a0] sm:$0xff]  ;;  %v9199_v61 = vpack.c.bf16 %v6446_v34, %v6445_v40  ;;  %v6430_v8 = vld [vmem:[#allocation7 + $0x268] sm:$0xff] }
 0x98d   :  { %v6429_v62 = vld [vmem:[#allocation7 + $0x260] sm:$0xff]  ;;  %v6406_v1 = vld [vmem:[#allocation7 + $0x1a8] sm:$0xff]  ;;  %v6447_v2 = vld [vmem:[#allocation7 + $0x2f0] sm:$0xff]  ;;  %v9149_v27 = vpack.c.bf16 %v6388_v57, %v6387_v56 }
 0x98e   :  { %9134 = vmatpush3.bf16.msra.mxu1 %v9133_v9  ;;  %9190 = vmatpush3.bf16.msra.mxu0 %v9189_v19  ;;  %v6448_v25 = vld [vmem:[#allocation7 + $0x2f8] sm:$0xff]  ;;  %v6389_v51 = vld [vmem:[#allocation7 + $0x120] sm:$0xff]  ;;  %v9201_v9 = vpack.c.bf16 %v6430_v8, %v6429_v62  ;;  %v9151_v58 = vpack.c.bf16 %v6406_v1, %v6405_v60  ;;  %v6390_v18 = vld [vmem:[#allocation7 + $0x128] sm:$0xff] }
 0x98f   :  { %9136 = vmatprep.subr.bf16.mxu1 %v9135_v12  ;;  %9192 = vmatprep.subr.bf16.mxu0 %v9191_v28  ;;  %v9203_v45 = vpack.c.bf16 %v6448_v25, %v6447_v2  ;;  %v6431_v10 = vld [vmem:[#allocation7 + $0x270] sm:$0xff]  ;;  %v6432_v12 = vld [vmem:[#allocation7 + $0x278] sm:$0xff]  ;;  %v9153_v0 = vpack.c.bf16 %v6390_v18, %v6389_v51  ;;  %v6409_v11 = vld [vmem:[#allocation7 + $0x1c0] sm:$0xff] }
 0x990   :  { %v6407_v14 = vld [vmem:[#allocation7 + $0x1b0] sm:$0xff]  ;;  %v6408_v52 = vld [vmem:[#allocation7 + $0x1b8] sm:$0xff]  ;;  %v6410_v26 = vld [vmem:[#allocation7 + $0x1c8] sm:$0xff] }
 0x991   :  { %v9155_v16 = vpack.c.bf16 %v6408_v52, %v6407_v14  ;;  %v6391_v23 = vld [vmem:[#allocation7 + $0x130] sm:$0xff]  ;;  %v6392_v5 = vld [vmem:[#allocation7 + $0x138] sm:$0xff]  ;;  %v6393_v22 = vld [vmem:[#allocation7 + $0x140] sm:$0xff] }
 0x992   :  { %9138 = vmatpush3.bf16.msra.mxu1 %v9137_v20  ;;  %9194 = vmatpush3.bf16.msra.mxu0 %v9193_v13  ;;  %v9157_v21 = vpack.c.bf16 %v6392_v5, %v6391_v23  ;;  %v9159_v20 = vpack.c.bf16 %v6410_v26, %v6409_v11  ;;  %v6394_v24 = vld [vmem:[#allocation7 + $0x148] sm:$0xff]  ;;  %v6411_v47 = vld [vmem:[#allocation7 + $0x1d0] sm:$0xff]  ;;  %v6396_v28 = vld [vmem:[#allocation7 + $0x158] sm:$0xff] }
 0x993   :  { %9140 = vmatprep.subr.bf16.mxu1 %v9139_v54  ;;  %9196 = vmatprep.subr.bf16.mxu0 %v9195_v46  ;;  %v9161_v19 = vpack.c.bf16 %v6394_v24, %v6393_v22  ;;  %v6395_v32 = vld [vmem:[#allocation7 + $0x150] sm:$0xff]  ;;  %v6413_v30 = vld [vmem:[#allocation7 + $0x1e0] sm:$0xff]  ;;  %v6414_v31 = vld [vmem:[#allocation7 + $0x1e8] sm:$0xff] }
 0x994   :  { %v9165_v4 = vpack.c.bf16 %v6396_v28, %v6395_v32  ;;  %v9167_v17 = vpack.c.bf16 %v6414_v31, %v6413_v30  ;;  %v6397_v33 = vld [vmem:[#allocation7 + $0x160] sm:$0xff]  ;;  %v6415_v36 = vld [vmem:[#allocation7 + $0x1f0] sm:$0xff]  ;;  %v6416_v38 = vld [vmem:[#allocation7 + $0x1f8] sm:$0xff]  ;;  %v9616_v28 = vmov 0  }
 0x995   :  { %v9171_v49 = vpack.c.bf16 %v6416_v38, %v6415_v36  ;;  %v6465_v41 = vld [vmem:[#allocation7 + $0x380] sm:$0xff]  ;;  %v6466_v46 = vld [vmem:[#allocation7 + $0x388] sm:$0xff]  ;;  %v6467_v34 = vld [vmem:[#allocation7 + $0x390] sm:$0xff]  ;;  %9338 = vset.pattern.permute.xlu1 %v9616_v28  ;;  %9339 = vset.pattern.permute.xlu0 %v9616_v28 }
 0x996   :  { %9142 = vmatpush3.bf16.msra.mxu1 %v9141_v37  ;;  %9198 = vmatpush3.bf16.msra.mxu0 %v9197_v53  ;;  %v6398_v37 = vld [vmem:[#allocation7 + $0x168] sm:$0xff]  ;;  %v9207_v29 = vpack.c.bf16 %v6466_v46, %v6465_v41  ;;  %v6449_v48 = vld [vmem:[#allocation7 + $0x300] sm:$0xff]  ;;  %v6451_v53 = vld [vmem:[#allocation7 + $0x310] sm:$0xff] }
 0x997   :  { %9144 = vmatprep.subr.bf16.mxu1 %v9143_v39  ;;  %9200 = vmatprep.subr.bf16.mxu0 %v9199_v61  ;;  %v9169_v13 = vpack.c.bf16 %v6398_v37, %v6397_v33  ;;  %v6400_v39 = vld [vmem:[#allocation7 + $0x178] sm:$0xff]  ;;  %v6450_v40 = vld [vmem:[#allocation7 + $0x308] sm:$0xff]  ;;  %v6469_v60 = vld [vmem:[#allocation7 + $0x3a0] sm:$0xff] }
 0x998   :  { %v9209_v56 = vpack.c.bf16 %v6450_v40, %v6449_v48  ;;  %v6470_v61 = vld [vmem:[#allocation7 + $0x3a8] sm:$0xff]  ;;  %v6453_v1 = vld [vmem:[#allocation7 + $0x320] sm:$0xff]  ;;  %v6471_v25 = vld [vmem:[#allocation7 + $0x3b0] sm:$0xff] }
 0x999   :  { %6553 = vmatmul.mubr.f32.vlgmr.msra.gmra.mrb[70].mxu1 %v6342_v55  ;;  %v9205_v55 = vpack.c.bf16 %v6432_v12, %v6431_v10  ;;  %v9215_v8 = vpack.c.bf16 %v6470_v61, %v6469_v60  ;;  %v6454_v2 = vld [vmem:[#allocation7 + $0x328] sm:$0xff]  ;;  %v6456_v18 = vld [vmem:[#allocation7 + $0x338] sm:$0xff]  ;;  %v6457_v63 = vld [vmem:[#allocation7 + $0x340] sm:$0xff] }
 0x99a   :  { %9146 = vmatpush3.bf16.msra.mxu1 %v9145_v50  ;;  %6622 = vmatprep.mubr.f32.mxu1 %v6345_v42  ;;  %v6412_v42 = vld [vmem:[#allocation7 + $0x1d8] sm:$0xff]  ;;  %v9217_v51 = vpack.c.bf16 %v6454_v2, %v6453_v1  ;;  %v6474_v43 = vld [vmem:[#allocation7 + $0x3c8] sm:$0xff]  ;;  %v6475_v12 = vld [vmem:[#allocation7 + $0x3d0] sm:$0xff] }
 0x99b   :  { %9148 = vmatprep.subr.bf16.mxu1 %v9147_v59  ;;  %9202 = vmatpush3.bf16.msra.mxu0 %v9201_v9  ;;  %v9163_v54 = vpack.c.bf16 %v6412_v42, %v6411_v47  ;;  %v6468_v50 = vld [vmem:[#allocation7 + $0x398] sm:$0xff]  ;;  %v6477_v23 = vld [vmem:[#allocation7 + $0x3e0] sm:$0xff]  ;;  %v6478_v5 = vld [vmem:[#allocation7 + $0x3e8] sm:$0xff] }
 0x99c   :  { %9204 = vmatprep.subr.bf16.mxu0 %v9203_v45  ;;  %v9211_v57 = vpack.c.bf16 %v6468_v50, %v6467_v34  ;;  %v6452_v59 = vld [vmem:[#allocation7 + $0x318] sm:$0xff]  ;;  %v6473_v45 = vld [vmem:[#allocation7 + $0x3c0] sm:$0xff]  ;;  %v9231_v26 = vpack.c.bf16 %v6478_v5, %v6477_v23  ;;  %v6479_v22 = vld [vmem:[#allocation7 + $0x3f0] sm:$0xff] }
 0x99d   :  { %v9213_v62 = vpack.c.bf16 %v6452_v59, %v6451_v53  ;;  %v9223_v10 = vpack.c.bf16 %v6474_v43, %v6473_v45  ;;  %v6476_v14 = vld [vmem:[#allocation7 + $0x3d8] sm:$0xff]  ;;  %v6902_v36 = vld [vmem:[#allocation18] ss:$0 sm:$0xff] }
 0x99e   :  { %9150 = vmatpush3.bf16.msra.mxu1 %v9149_v27  ;;  %v6472_v27 = vld [vmem:[#allocation7 + $0x3b8] sm:$0xff] }
 0x99f   :  { %9152 = vmatprep.subr.bf16.mxu1 %v9151_v58  ;;  %9206 = vmatpush3.bf16.msra.mxu0 %v9205_v55  ;;  %v9219_v9 = vpack.c.bf16 %v6472_v27, %v6471_v25  ;;  %v6455_v58 = vld [vmem:[#allocation7 + $0x330] sm:$0xff]  ;;  %v6480_v24 = vld [vmem:[#allocation7 + $0x3f8] sm:$0xff] }
 0x9a0   :  { %v6459_v55 = vld [vmem:[#allocation7 + $0x350] sm:$0xff]  ;;  %v9235_v42 = vpack.c.bf16 %v6480_v24, %v6479_v22 }
 0x9a2   :  { %9154 = vmatpush3.bf16.msra.mxu1 %v9153_v0  ;;  %6693 = vmatmul.mubr.f32.vlgmr.msra.gmra.mrb[14].mxu0 %v6346_v3  ;;  %v6399_v3 = vld [vmem:[#allocation7 + $0x170] sm:$0xff]  ;;  %v9227_v0 = vpack.c.bf16 %v6476_v14, %v6475_v12 }
 0x9a3   :  { %9156 = vmatprep.subr.bf16.mxu1 %v9155_v16  ;;  %v9173_v44 = vpack.c.bf16 %v6400_v39, %v6399_v3  ;;  %v6460_v16 = vld [vmem:[#allocation7 + $0x358] sm:$0xff] }
 0x9a4   :  { %v9229_v11 = vpack.c.bf16 %v6460_v16, %v6459_v55 }
 0x9a6   :  { %9158 = vmatpush3.bf16.msra.mxu1 %v9157_v21  ;;  %v6461_v21 = vld [vmem:[#allocation7 + $0x360] sm:$0xff] }
 0x9a7   :  { %9160 = vmatprep.subr.bf16.mxu1 %v9159_v20  ;;  %v6462_v20 = vld [vmem:[#allocation7 + $0x368] sm:$0xff] }
 0x9a8   :  { %v9233_v47 = vpack.c.bf16 %v6462_v20, %v6461_v21 }
 0x9aa   :  { %9162 = vmatpush3.bf16.msra.mxu1 %v9161_v19  ;;  %v6463_v19 = vld [vmem:[#allocation7 + $0x370] sm:$0xff] }
 0x9ab   :  { %9164 = vmatprep.subr.bf16.mxu1 %v9163_v54  ;;  %v6464_v54 = vld [vmem:[#allocation7 + $0x378] sm:$0xff] }
 0x9ac   :  { %v9237_v32 = vpack.c.bf16 %v6464_v54, %v6463_v19 }
 0x9ae   :  { %9166 = vmatpush3.bf16.msra.mxu1 %v9165_v4 }
 0x9af   :  { %9168 = vmatprep.subr.bf16.mxu1 %v9167_v17 }
 0x9b2   :  { %9170 = vmatpush3.bf16.msra.mxu1 %v9169_v13 }
 0x9b3   :  { %9172 = vmatprep.subr.bf16.mxu1 %v9171_v49 }
 0x9b6   :  { %9174 = vmatpush3.bf16.msra.mxu1 %v9173_v44 }
 0x9b7   :  { %9208 = vmatprep.subr.bf16.mxu1 %v9207_v29 }
 0x9b9   :  { %6623 = vmatmul.mubr.f32.vlgmr.msra.gmra.mrb[72].mxu1 %v6344_v35  ;;  %v9221_v35 = vpack.c.bf16 %v6456_v18, %v6455_v58 }
 0x9ba   :  { %9210 = vmatpush3.bf16.msra.mxu1 %v9209_v56  ;;  %6762 = vmatprep.mubr.f32.mxu1 %v6349_v7  ;;  %v6458_v7 = vld [vmem:[#allocation7 + $0x348] sm:$0xff] }
 0x9bb   :  { %9212 = vmatprep.subr.bf16.mxu1 %v9211_v57  ;;  %v9225_v52 = vpack.c.bf16 %v6458_v7, %v6457_v63 }
 0x9be   :  { %9214 = vmatpush3.bf16.msra.mxu1 %v9213_v62 }
 0x9bf   :  { %9216 = vmatprep.subr.bf16.mxu1 %v9215_v8 }
 0x9c2   :  { %9218 = vmatpush3.bf16.msra.mxu1 %v9217_v51 }
 0x9c3   :  { %9220 = vmatprep.subr.bf16.mxu1 %v9219_v9 }
 0x9c6   :  { %9222 = vmatpush3.bf16.msra.mxu1 %v9221_v35 }
 0x9c7   :  { %9224 = vmatprep.subr.bf16.mxu1 %v9223_v10 }
 0x9ca   :  { %9226 = vmatpush3.bf16.msra.mxu1 %v9225_v52 }
 0x9cb   :  { %9228 = vmatprep.subr.bf16.mxu1 %v9227_v0 }
 0x9ce   :  { %9230 = vmatpush3.bf16.msra.mxu1 %v9229_v11 }
 0x9cf   :  { %9232 = vmatprep.subr.bf16.mxu1 %v9231_v26 }
 0x9d2   :  { %9234 = vmatpush3.bf16.msra.mxu1 %v9233_v47 }
 0x9d3   :  { %9236 = vmatprep.subr.bf16.mxu1 %v9235_v42 }
 0x9d6   :  { %9238 = vmatpush3.bf16.msra.mxu1 %v9237_v32 }
 0x9d9   :  { %6763 = vmatmul.mubr.f32.vlgmr.msra.gmra.mrb[74].mxu1 %v6348_v6 }
 0xa6c   :  { %v6939_v30 = vpop.f32.mrb[70].mxu1 }
 0xa6d   :  { %v6940_v31 = vpop.f32.mrb[71].mxu1 }
 0xa6e   :  { %v6941_v4 = vadd.f32 %v6940_v31, %v6939_v30 }
 0xa70   :  { %v6555_v49 = vadd.f32 %v6941_v4, %v6902_v36 }
 0xa75   :  { %v7009_v17 = vpop.f32.mrb[14].mxu0 }
 0xa76   :  { %v7010_v33 = vpop.f32.mrb[15].mxu0 }
 0xa77   :  { %v7011_v37 = vadd.f32 %v7010_v33, %v7009_v17 }
 0xa8c   :  { %v6974_v38 = vpop.f32.mrb[72].mxu1 }
 0xa8d   :  { %v6975_v13 = vpop.f32.mrb[73].mxu1 }
 0xa8e   :  { %v6976_v3 = vadd.f32 %v6975_v13, %v6974_v38 }
 0xa90   :  { %v6625_v39 = vadd.f32 %v6976_v3, %v6555_v49 }
 0xa92   :  { %v6695_v41 = vadd.f32 %v7011_v37, %v6625_v39 }
 0xaac   :  { %v7044_v46 = vpop.f32.mrb[74].mxu1 }
 0xaad   :  { %v7045_v44 = vpop.f32.mrb[75].mxu1 }
 0xaae   :  { %v7046_v15 = vadd.f32 %v7045_v44, %v7044_v46 }
 0xab0   :  { %v6765_v6 = vadd.f32 %v7046_v15, %v6695_v41 }
 0xab2   :  { %6770 = vperm.xlu1 %9338, %v6765_v6   ;;  %6774 = vrot.lane.b32.xlu0 %v6765_v6, %s9617_s10 }
 0xb24   :  { %v6775_v29 = vpop.permute.xlu0 %6774 }
 0xb25   :  { %v6778_v48 = vsel %vm6777_vm9, %v6775_v29, 0.0 }
 0xb26   :  { %6779 = vadd.xlane.f32.xlu0 %v6778_v48 }
 0xb31   :  { %v6771_v40 = vpop.permute.xlu1 %6770 }
 0xb32   :  { %v6773_v50 = vadd.f32 %v6771_v40, %v6765_v6 }
 0xbb3   :  { %v6780_v34 = vpop.xlane.xlu0 %6779 }
 0xbb4   :  { %v6782_v56 = vmul.f32 0.16666667, %v6780_v34 }
 0xbb6   :  { %v6783_v57 = vsub.f32 %v6773_v50, %v6782_v56 }
 0xbb8   :  { %6785 = vrot.lane.b32.xlu1 %v6783_v57, %s9617_s10 }
 0xc2a   :  { %v6786_v53 = vpop.permute.xlu1 %6785 }
 0xc2b   :  { %6788 = vst.msk [vmem:[#allocation20] sm:$0x3] %vm6777_vm9, %v6786_v53 }
 0xc2c   :  { %9571 = shalt.err (!%p9568_p0)
}
 0xc2d   :  { %s9572_s6 = scalar_lea.hbm %s10542_s11, 32 }
 0xc2e   :  { %p9573_p1 = scmp.ne.s32.totalorder %s10542_s11, %s9572_s6  ;;  %p9576_p2 = scmp.lt.u32.totalorder %s9572_s6, %s10542_s11 }
 0xc30   :  { %p9578_p3 = pnand %p9576_p2, %p9573_p1 }
 0xc32   :  { %9581 = shalt.err (!%p9578_p3)
}
 0xc33   :  { %6798 = dma.vmem_to_hbm [thread:$0]  %s6796_s5, 32, %s10542_s11, [#allocation11]  }
 0xc34   :  { %9598 = dma.done.wait [#allocation11], 32  }
 0xc35   :  { %9599 = vsyncadd [#allocation11], 4294967264 }
 0xc36   :  { %6802 = vsyncpa [#allocation10], 1 }
 0xc37   :  { %6803 = vsyncpa [#allocation13], 1 }
 0xc38   :  { %6804 = vsyncpa [#allocation16], 1 }
 0xc39   :  { %6805 = vsyncpa [#allocation19], 1 }
 0xc3a   :  { %6806 = vsyncpa [#allocation11], 1 }
 0xc3b   :  { %6807 = vsyncmov [#allocation8] }
 0xc3e   :  { %s6808_s20 = vpop.sfrf %6807 }
 0xc3f   :  { %p6903_p4 = scmp.ne.s32.totalorder %s6808_s20, 0 }
 0xc41   :  { %6812 = shalt.err (%p6903_p4)  }
 0xc42   :  { %6814 = vsyncmov [#allocation8 + $0x1] }
 0xc45   :  { %s6815_s14 = vpop.sfrf %6814 }
 0xc46   :  { %p6904_p5 = scmp.ne.s32.totalorder %s6815_s14, 0 }
 0xc48   :  { %6819 = shalt.err (%p6904_p5)  }
 0xc49   :  { %6821 = vsyncmov [#allocation8 + $0x2] }
 0xc4c   :  { %s6822_s15 = vpop.sfrf %6821 }
 0xc4d   :  { %p6905_p6 = scmp.ne.s32.totalorder %s6822_s15, 0 }
 0xc4f   :  { %6826 = shalt.err (%p6905_p6)  }
 0xc50   :  { %6828 = vsyncmov [#allocation8 + $0x3] }
 0xc53   :  { %s6829_s11 = vpop.sfrf %6828 }
 0xc54   :  { %p6906_p7 = scmp.ne.s32.totalorder %s6829_s11, 0 }
 0xc56   :  { %6833 = shalt.err (%p6906_p7)  }

</bundles_post_ra>
